<compile_context>
chip_gen: v6e
topology: v6e:2x2x1
jax: 0.10.0
libtpu: 0.0.40
codegen_flags: <defaults>
</compile_context>

<pallas_src>
import jax
import jax.numpy as jnp
from jax import lax
from jax.experimental import pallas as pl
from jax.experimental.pallas import tpu as pltpu


def _single_branch_kernel(x_ref, w1_ref, b1_ref, w2_ref, b2_ref, w3_ref, b3_ref,
                          out_ref):
    # x_ref:   (TB, 2, W)    f32  input block (C_in = 1 squeezed away in wrapper)
    # w1_ref:  (3, 256)      f32  conv1 taps (kw, C_out)
    # w2_ref:  (768, 256)    bf16 conv2 im2col weights, K index = kw*256 + C_in
    # w3_ref:  (1536, 128)   bf16 conv3 im2col weights, K index = (kh*3+kw)*256 + C_in,
    #                             C_out zero-padded 80 -> 128
    # b1/b2:   (1, 256)  b3: (1, 128)   f32
    # out_ref: (TB, W-6, 128) f32
    x = x_ref[...]
    TB, W = x.shape[0], x.shape[2]
    W1, W2, W3 = W - 2, W - 4, W - 6

    w1 = w1_ref[...]
    b1 = b1_ref[...]
    w2 = w2_ref[...]
    b2 = b2_ref[...]
    w3 = w3_ref[...]
    b3 = b3_ref[...]

    # ---- conv1: Conv2d(1, 256, (1,3)) + ReLU.  C_in = 1 -> VPU broadcast multiply. ----
    h1 = []
    for h in range(2):
        xh = x[:, h, :]                                          # (TB, W)
        acc = xh[:, 0:W1, None] * w1[0][None, None, :]           # init from first tap
        for k in range(1, 3):
            acc = acc + xh[:, k:k + W1, None] * w1[k][None, None, :]
        h1.append(jnp.maximum(acc + b1[None], 0.0).astype(jnp.bfloat16))   # (TB, W1, 256)

    # ---- conv2: Conv2d(256, 256, (1,3)) + ReLU.  im2col taps -> one MXU matmul per row. ----
    h2 = []
    for h in range(2):
        cols = jnp.concatenate([h1[h][:, k:k + W2, :] for k in range(3)],
                               axis=-1)                           # (TB, W2, 768) bf16
        acc = jnp.dot(cols.reshape(TB * W2, 3 * 256), w2,
                      preferred_element_type=jnp.float32).reshape(TB, W2, 256)
        h2.append(jnp.maximum(acc + b2[None], 0.0).astype(jnp.bfloat16))   # (TB, W2, 256)

    # ---- conv3: Conv2d(256, 80->128, (2,3)) + ReLU.  Collapses H; single fused matmul. ----
    cols3 = jnp.concatenate(
        [h2[kh][:, kw:kw + W3, :] for kh in range(2) for kw in range(3)],
        axis=-1)                                                  # (TB, W3, 1536) bf16
    acc = jnp.dot(cols3.reshape(TB * W3, 6 * 256), w3,
                  preferred_element_type=jnp.float32).reshape(TB, W3, 128)
    out_ref[...] = jnp.maximum(acc + b3[None], 0.0)


def _choose_block_b(B, W):
    """Batch block so the fused matmul M dim (~TB*(W-4)) is a few hundred rows,
    while keeping >= 2 grid steps when B allows (v7x has 2 TensorCores)."""
    W2 = max(W - 4, 1)
    tb = max(1, -(-512 // W2))            # target ~512 rows (multiples of 128-row MXU tiles)
    if B >= 2:
        tb = min(tb, max(1, B // 2))      # keep both v7x TensorCores busy
    return max(1, min(tb, B))


def single_branch_forward(x, params, *, block_b=None):
    """x: (B, 1, 2, W) float32 (NCHW).  Returns (B, 80*(W-6)) matching torch eval-mode."""
    B, Cin, H, W = x.shape
    assert Cin == 1 and H == 2 and W >= 7
    W3 = W - 6

    # --- Repack weights into channel-last, im2col-fused matmul form.
    w1_k = jnp.transpose(params["w1"].reshape(256, 3), (1, 0))              # (3, 256)
    w2_k = jnp.transpose(params["w2"][:, :, 0, :], (2, 1, 0))               # (3, 256, 256)
    w2_f = w2_k.reshape(3 * 256, 256).astype(jnp.bfloat16)                  # (768, 256)
    w3_k = jnp.transpose(params["w3"], (2, 3, 1, 0)).reshape(6, 256, 80)    # (6, 256, 80)
    w3_f = jnp.pad(w3_k.reshape(6 * 256, 80),
                   ((0, 0), (0, 48))).astype(jnp.bfloat16)                  # (1536, 128)
    b1_k = params["b1"].reshape(1, 256).astype(jnp.float32)
    b2_k = params["b2"].reshape(1, 256).astype(jnp.float32)
    b3_k = jnp.pad(params["b3"], (0, 48)).reshape(1, 128).astype(jnp.float32)

    x_k = x[:, 0, :, :].astype(jnp.float32)                                 # (B, 2, W)

    # --- Batch blocking: flatten TB samples into the matmul M dimension.
    if block_b is None:
        block_b = _choose_block_b(B, W)
    n_blocks = pl.cdiv(B, block_b)
    Bp = n_blocks * block_b
    if Bp != B:
        x_k = jnp.pad(x_k, ((0, Bp - B), (0, 0), (0, 0)))

    # --- Explicit VMEM budget with headroom, capped under v7x's 64 MiB physical VMEM.
    io_bytes = 2 * (block_b * 2 * W * 4 + block_b * W3 * 128 * 4)           # double-buffered x/out
    weight_bytes = 2 * ((3 * 256 + 256 + 256 + 128) * 4
                        + (768 * 256 + 1536 * 128) * 2)
    interm_bytes = block_b * W * 256 * 4 * 8                                # h1/h2/im2col live values
    vmem_limit = int(min(max(4 * (io_bytes + weight_bytes + interm_bytes),
                             32 << 20), 48 << 20))

    flops = 2 * Bp * (2 * (W - 2) * 3 * 256 + 2 * (W - 4) * 768 * 256
                      + W3 * 1536 * 128)
    bytes_accessed = int(x_k.size * 4 + w1_k.size * 4 + w2_f.size * 2 + w3_f.size * 2
                         + (b1_k.size + b2_k.size + b3_k.size) * 4
                         + Bp * W3 * 128 * 4)

    out = pl.pallas_call(
        _single_branch_kernel,
        out_shape=jax.ShapeDtypeStruct((Bp, W3, 128), jnp.float32),
        grid_spec=pltpu.PrefetchScalarGridSpec(
            num_scalar_prefetch=0,
            grid=(n_blocks,),
            in_specs=[
                pl.BlockSpec((block_b, 2, W), lambda b: (b, 0, 0)),
                pl.BlockSpec((3, 256), lambda b: (0, 0)),
                pl.BlockSpec((1, 256), lambda b: (0, 0)),
                pl.BlockSpec((768, 256), lambda b: (0, 0)),
                pl.BlockSpec((1, 256), lambda b: (0, 0)),
                pl.BlockSpec((1536, 128), lambda b: (0, 0)),
                pl.BlockSpec((1, 128), lambda b: (0, 0)),
            ],
            out_specs=pl.BlockSpec((block_b, W3, 128), lambda b: (b, 0, 0)),
        ),
        compiler_params=pltpu.CompilerParams(
            dimension_semantics=("parallel",),
            vmem_limit_bytes=vmem_limit),
        cost_estimate=pl.CostEstimate(flops=flops, transcendentals=0,
                                      bytes_accessed=bytes_accessed),
    )(x_k, w1_k, b1_k, w2_f, b2_k, w3_f, b3_k)

    out = out[:B, :, :80]                       # drop batch pad + channel pad (128 -> 80)
    # Match torch x.reshape(B, -1) on (B, 80, 1, W3): channel-major flatten.
    return jnp.transpose(out, (0, 2, 1)).reshape(B, -1)


def _reference_forward(x, params):
    """Pure-JAX NCHW reference using lax.conv_general_dilated (eval-mode, f32)."""
    dn = ("NCHW", "OIHW", "NCHW")
    h = lax.conv_general_dilated(x, params["w1"], (1, 1), "VALID",
                                 dimension_numbers=dn)
    h = jnp.maximum(h + params["b1"][None, :, None, None], 0.0)
    h = lax.conv_general_dilated(h, params["w2"], (1, 1), "VALID",
                                 dimension_numbers=dn)
    h = jnp.maximum(h + params["b2"][None, :, None, None], 0.0)
    h = lax.conv_general_dilated(h, params["w3"], (1, 1), "VALID",
                                 dimension_numbers=dn)
    h = jnp.maximum(h + params["b3"][None, :, None, None], 0.0)
    return h.reshape(h.shape[0], -1)


def _init_params(key):
    ks = jax.random.split(key, 6)
    scale = 0.05
    return {
        "w1": scale * jax.random.normal(ks[0], (256, 1, 1, 3), jnp.float32),
        "b1": scale * jax.random.normal(ks[1], (256,), jnp.float32),
        "w2": scale * jax.random.normal(ks[2], (256, 256, 1, 3), jnp.float32),
        "b2": scale * jax.random.normal(ks[3], (256,), jnp.float32),
        "w3": scale * jax.random.normal(ks[4], (80, 256, 2, 3), jnp.float32),
        "b3": scale * jax.random.normal(ks[5], (80,), jnp.float32),
    }


if __name__ == "__main__":
    key = jax.random.PRNGKey(0)
    kx, kp = jax.random.split(key)

    # Input: (B, 1, 2, W) I/Q-style signal.  W chosen so W-6 is sublane-aligned (24).
    B, W = 8, 30
    x = jax.random.normal(kx, (B, 1, 2, W), jnp.float32)
    params = _init_params(kp)

    out = single_branch_forward(x, params)
    out = jax.block_until_ready(out)

    ref = _reference_forward(x, params)
    assert out.shape == ref.shape == (B, 80 * (W - 6))
    err = jnp.max(jnp.abs(out - ref))
    # bf16 MXU operands (f32 accumulation) -> loosened tolerance vs the f32 reference.
    assert jnp.allclose(out, ref, atol=2e-2, rtol=2e-2), f"max abs err {err}"

    print("KERNEL_OK")
</pallas_src>

<mosaic_0001>
module attributes {stable_mosaic.version = 11 : i64} {
  func.func @_single_branch_kernel(%arg0: i32, %arg1: memref<4x2x30xf32, #tpu.memory_space<vmem>>, %arg2: memref<3x256xf32, #tpu.memory_space<vmem>>, %arg3: memref<1x256xf32, #tpu.memory_space<vmem>>, %arg4: memref<768x256xbf16, #tpu.memory_space<vmem>>, %arg5: memref<1x256xf32, #tpu.memory_space<vmem>>, %arg6: memref<1536x128xbf16, #tpu.memory_space<vmem>>, %arg7: memref<1x128xf32, #tpu.memory_space<vmem>>, %arg8: memref<4x24x128xf32, #tpu.memory_space<vmem>>) attributes {dimension_semantics = [#tpu.dimension_semantics<parallel>], iteration_bounds = array<i64: 2>, scalar_prefetch = 0 : i64, scratch_operands = 0 : i64, tpu.core_type = #tpu.core_type<tc>, window_params = [{transform_indices = @transform_0, window_bounds = array<i64: 4, 2, 30>}, {pipeline_mode = #tpu.pipeline_mode<synchronous>, transform_indices = @transform_1, window_bounds = array<i64: 3, 256>}, {pipeline_mode = #tpu.pipeline_mode<synchronous>, transform_indices = @transform_2, window_bounds = array<i64: 1, 256>}, {pipeline_mode = #tpu.pipeline_mode<synchronous>, transform_indices = @transform_3, window_bounds = array<i64: 768, 256>}, {pipeline_mode = #tpu.pipeline_mode<synchronous>, transform_indices = @transform_4, window_bounds = array<i64: 1, 256>}, {pipeline_mode = #tpu.pipeline_mode<synchronous>, transform_indices = @transform_5, window_bounds = array<i64: 1536, 128>}, {pipeline_mode = #tpu.pipeline_mode<synchronous>, transform_indices = @transform_6, window_bounds = array<i64: 1, 128>}, {transform_indices = @transform_7, window_bounds = array<i64: 4, 24, 128>}]} {
    %c0 = arith.constant 0 : index
    %c0_0 = arith.constant 0 : index
    %c0_1 = arith.constant 0 : index
    %0 = vector.load %arg1[%c0, %c0_0, %c0_1] : memref<4x2x30xf32, #tpu.memory_space<vmem>>, vector<4x2x30xf32>
    %c0_2 = arith.constant 0 : index
    %c0_3 = arith.constant 0 : index
    %1 = vector.load %arg2[%c0_2, %c0_3] : memref<3x256xf32, #tpu.memory_space<vmem>>, vector<3x256xf32>
    %c0_4 = arith.constant 0 : index
    %c0_5 = arith.constant 0 : index
    %2 = vector.load %arg3[%c0_4, %c0_5] : memref<1x256xf32, #tpu.memory_space<vmem>>, vector<1x256xf32>
    %c0_6 = arith.constant 0 : index
    %c0_7 = arith.constant 0 : index
    %3 = vector.load %arg4[%c0_6, %c0_7] : memref<768x256xbf16, #tpu.memory_space<vmem>>, vector<768x256xbf16>
    %c0_8 = arith.constant 0 : index
    %c0_9 = arith.constant 0 : index
    %4 = vector.load %arg5[%c0_8, %c0_9] : memref<1x256xf32, #tpu.memory_space<vmem>>, vector<1x256xf32>
    %c0_10 = arith.constant 0 : index
    %c0_11 = arith.constant 0 : index
    %5 = vector.load %arg6[%c0_10, %c0_11] : memref<1536x128xbf16, #tpu.memory_space<vmem>>, vector<1536x128xbf16>
    %c0_12 = arith.constant 0 : index
    %c0_13 = arith.constant 0 : index
    %6 = vector.load %arg7[%c0_12, %c0_13] : memref<1x128xf32, #tpu.memory_space<vmem>>, vector<1x128xf32>
    %7 = vector.extract_strided_slice %0 {offsets = [0, 0, 0], sizes = [4, 1, 30], strides = [1, 1, 1]} : vector<4x2x30xf32> to vector<4x1x30xf32>
    %8 = vector.shape_cast %7 : vector<4x1x30xf32> to vector<4x30xf32>
    %9 = vector.extract_strided_slice %8 {offsets = [0, 0], sizes = [4, 28], strides = [1, 1]} : vector<4x30xf32> to vector<4x28xf32>
    %10 = vector.shape_cast %9 : vector<4x28xf32> to vector<4x28x1xf32>
    %11 = vector.extract_strided_slice %1 {offsets = [0, 0], sizes = [1, 256], strides = [1, 1]} : vector<3x256xf32> to vector<1x256xf32>
    %12 = vector.shape_cast %11 : vector<1x256xf32> to vector<256xf32>
    %13 = vector.shape_cast %12 : vector<256xf32> to vector<1x1x256xf32>
    %14 = vector.broadcast %10 : vector<4x28x1xf32> to vector<4x28x256xf32>
    %15 = vector.broadcast %13 : vector<1x1x256xf32> to vector<4x28x256xf32>
    %16 = arith.mulf %14, %15 : vector<4x28x256xf32>
    %17 = vector.extract_strided_slice %8 {offsets = [0, 1], sizes = [4, 28], strides = [1, 1]} : vector<4x30xf32> to vector<4x28xf32>
    %18 = vector.shape_cast %17 : vector<4x28xf32> to vector<4x28x1xf32>
    %19 = vector.extract_strided_slice %1 {offsets = [1, 0], sizes = [1, 256], strides = [1, 1]} : vector<3x256xf32> to vector<1x256xf32>
    %20 = vector.shape_cast %19 : vector<1x256xf32> to vector<256xf32>
    %21 = vector.shape_cast %20 : vector<256xf32> to vector<1x1x256xf32>
    %22 = vector.broadcast %18 : vector<4x28x1xf32> to vector<4x28x256xf32>
    %23 = vector.broadcast %21 : vector<1x1x256xf32> to vector<4x28x256xf32>
    %24 = arith.mulf %22, %23 : vector<4x28x256xf32>
    %25 = arith.addf %16, %24 : vector<4x28x256xf32>
    %26 = vector.extract_strided_slice %8 {offsets = [0, 2], sizes = [4, 28], strides = [1, 1]} : vector<4x30xf32> to vector<4x28xf32>
    %27 = vector.shape_cast %26 : vector<4x28xf32> to vector<4x28x1xf32>
    %28 = vector.extract_strided_slice %1 {offsets = [2, 0], sizes = [1, 256], strides = [1, 1]} : vector<3x256xf32> to vector<1x256xf32>
    %29 = vector.shape_cast %28 : vector<1x256xf32> to vector<256xf32>
    %30 = vector.shape_cast %29 : vector<256xf32> to vector<1x1x256xf32>
    %31 = vector.broadcast %27 : vector<4x28x1xf32> to vector<4x28x256xf32>
    %32 = vector.broadcast %30 : vector<1x1x256xf32> to vector<4x28x256xf32>
    %33 = arith.mulf %31, %32 : vector<4x28x256xf32>
    %34 = arith.addf %25, %33 : vector<4x28x256xf32>
    %35 = vector.shape_cast %2 : vector<1x256xf32> to vector<1x1x256xf32>
    %36 = vector.broadcast %35 : vector<1x1x256xf32> to vector<4x28x256xf32>
    %37 = arith.addf %34, %36 : vector<4x28x256xf32>
    %cst = arith.constant 0.000000e+00 : f32
    %38 = vector.broadcast %cst : f32 to vector<4x28x256xf32>
    %39 = arith.maximumf %37, %38 : vector<4x28x256xf32>
    %40 = arith.truncf %39 : vector<4x28x256xf32> to vector<4x28x256xbf16>
    %41 = vector.extract_strided_slice %0 {offsets = [0, 1, 0], sizes = [4, 1, 30], strides = [1, 1, 1]} : vector<4x2x30xf32> to vector<4x1x30xf32>
    %42 = vector.shape_cast %41 : vector<4x1x30xf32> to vector<4x30xf32>
    %43 = vector.extract_strided_slice %42 {offsets = [0, 0], sizes = [4, 28], strides = [1, 1]} : vector<4x30xf32> to vector<4x28xf32>
    %44 = vector.shape_cast %43 : vector<4x28xf32> to vector<4x28x1xf32>
    %45 = vector.extract_strided_slice %1 {offsets = [0, 0], sizes = [1, 256], strides = [1, 1]} : vector<3x256xf32> to vector<1x256xf32>
    %46 = vector.shape_cast %45 : vector<1x256xf32> to vector<256xf32>
    %47 = vector.shape_cast %46 : vector<256xf32> to vector<1x1x256xf32>
    %48 = vector.broadcast %44 : vector<4x28x1xf32> to vector<4x28x256xf32>
    %49 = vector.broadcast %47 : vector<1x1x256xf32> to vector<4x28x256xf32>
    %50 = arith.mulf %48, %49 : vector<4x28x256xf32>
    %51 = vector.extract_strided_slice %42 {offsets = [0, 1], sizes = [4, 28], strides = [1, 1]} : vector<4x30xf32> to vector<4x28xf32>
    %52 = vector.shape_cast %51 : vector<4x28xf32> to vector<4x28x1xf32>
    %53 = vector.extract_strided_slice %1 {offsets = [1, 0], sizes = [1, 256], strides = [1, 1]} : vector<3x256xf32> to vector<1x256xf32>
    %54 = vector.shape_cast %53 : vector<1x256xf32> to vector<256xf32>
    %55 = vector.shape_cast %54 : vector<256xf32> to vector<1x1x256xf32>
    %56 = vector.broadcast %52 : vector<4x28x1xf32> to vector<4x28x256xf32>
    %57 = vector.broadcast %55 : vector<1x1x256xf32> to vector<4x28x256xf32>
    %58 = arith.mulf %56, %57 : vector<4x28x256xf32>
    %59 = arith.addf %50, %58 : vector<4x28x256xf32>
    %60 = vector.extract_strided_slice %42 {offsets = [0, 2], sizes = [4, 28], strides = [1, 1]} : vector<4x30xf32> to vector<4x28xf32>
    %61 = vector.shape_cast %60 : vector<4x28xf32> to vector<4x28x1xf32>
    %62 = vector.extract_strided_slice %1 {offsets = [2, 0], sizes = [1, 256], strides = [1, 1]} : vector<3x256xf32> to vector<1x256xf32>
    %63 = vector.shape_cast %62 : vector<1x256xf32> to vector<256xf32>
    %64 = vector.shape_cast %63 : vector<256xf32> to vector<1x1x256xf32>
    %65 = vector.broadcast %61 : vector<4x28x1xf32> to vector<4x28x256xf32>
    %66 = vector.broadcast %64 : vector<1x1x256xf32> to vector<4x28x256xf32>
    %67 = arith.mulf %65, %66 : vector<4x28x256xf32>
    %68 = arith.addf %59, %67 : vector<4x28x256xf32>
    %69 = vector.shape_cast %2 : vector<1x256xf32> to vector<1x1x256xf32>
    %70 = vector.broadcast %69 : vector<1x1x256xf32> to vector<4x28x256xf32>
    %71 = arith.addf %68, %70 : vector<4x28x256xf32>
    %cst_14 = arith.constant 0.000000e+00 : f32
    %72 = vector.broadcast %cst_14 : f32 to vector<4x28x256xf32>
    %73 = arith.maximumf %71, %72 : vector<4x28x256xf32>
    %74 = arith.truncf %73 : vector<4x28x256xf32> to vector<4x28x256xbf16>
    %75 = vector.extract_strided_slice %40 {offsets = [0, 0, 0], sizes = [4, 26, 256], strides = [1, 1, 1]} : vector<4x28x256xbf16> to vector<4x26x256xbf16>
    %76 = vector.extract_strided_slice %40 {offsets = [0, 1, 0], sizes = [4, 26, 256], strides = [1, 1, 1]} : vector<4x28x256xbf16> to vector<4x26x256xbf16>
    %77 = vector.extract_strided_slice %40 {offsets = [0, 2, 0], sizes = [4, 26, 256], strides = [1, 1, 1]} : vector<4x28x256xbf16> to vector<4x26x256xbf16>
    %78 = tpu.concatenate %75, %76, %77 in 2 : vector<4x26x256xbf16>, vector<4x26x256xbf16>, vector<4x26x256xbf16> -> vector<4x26x768xbf16>
    %79 = vector.shape_cast %78 : vector<4x26x768xbf16> to vector<104x768xbf16>
    %cst_15 = arith.constant dense<0.000000e+00> : vector<104x256xf32>
    %80 = tpu.matmul %79, %3, %cst_15 {dimension_numbers = #tpu.dot_dimension_numbers<[1], [0], [0], [1], [0, 0, 1, 1], [], []>} : vector<104x768xbf16>, vector<768x256xbf16>, vector<104x256xf32> -> vector<104x256xf32>
    %81 = vector.shape_cast %80 : vector<104x256xf32> to vector<4x26x256xf32>
    %82 = vector.shape_cast %4 : vector<1x256xf32> to vector<1x1x256xf32>
    %83 = vector.broadcast %82 : vector<1x1x256xf32> to vector<4x26x256xf32>
    %84 = arith.addf %81, %83 : vector<4x26x256xf32>
    %cst_16 = arith.constant 0.000000e+00 : f32
    %85 = vector.broadcast %cst_16 : f32 to vector<4x26x256xf32>
    %86 = arith.maximumf %84, %85 : vector<4x26x256xf32>
    %87 = arith.truncf %86 : vector<4x26x256xf32> to vector<4x26x256xbf16>
    %88 = vector.extract_strided_slice %74 {offsets = [0, 0, 0], sizes = [4, 26, 256], strides = [1, 1, 1]} : vector<4x28x256xbf16> to vector<4x26x256xbf16>
    %89 = vector.extract_strided_slice %74 {offsets = [0, 1, 0], sizes = [4, 26, 256], strides = [1, 1, 1]} : vector<4x28x256xbf16> to vector<4x26x256xbf16>
    %90 = vector.extract_strided_slice %74 {offsets = [0, 2, 0], sizes = [4, 26, 256], strides = [1, 1, 1]} : vector<4x28x256xbf16> to vector<4x26x256xbf16>
    %91 = tpu.concatenate %88, %89, %90 in 2 : vector<4x26x256xbf16>, vector<4x26x256xbf16>, vector<4x26x256xbf16> -> vector<4x26x768xbf16>
    %92 = vector.shape_cast %91 : vector<4x26x768xbf16> to vector<104x768xbf16>
    %cst_17 = arith.constant dense<0.000000e+00> : vector<104x256xf32>
    %93 = tpu.matmul %92, %3, %cst_17 {dimension_numbers = #tpu.dot_dimension_numbers<[1], [0], [0], [1], [0, 0, 1, 1], [], []>} : vector<104x768xbf16>, vector<768x256xbf16>, vector<104x256xf32> -> vector<104x256xf32>
    %94 = vector.shape_cast %93 : vector<104x256xf32> to vector<4x26x256xf32>
    %95 = vector.shape_cast %4 : vector<1x256xf32> to vector<1x1x256xf32>
    %96 = vector.broadcast %95 : vector<1x1x256xf32> to vector<4x26x256xf32>
    %97 = arith.addf %94, %96 : vector<4x26x256xf32>
    %cst_18 = arith.constant 0.000000e+00 : f32
    %98 = vector.broadcast %cst_18 : f32 to vector<4x26x256xf32>
    %99 = arith.maximumf %97, %98 : vector<4x26x256xf32>
    %100 = arith.truncf %99 : vector<4x26x256xf32> to vector<4x26x256xbf16>
    %101 = vector.extract_strided_slice %87 {offsets = [0, 0, 0], sizes = [4, 24, 256], strides = [1, 1, 1]} : vector<4x26x256xbf16> to vector<4x24x256xbf16>
    %102 = vector.extract_strided_slice %87 {offsets = [0, 1, 0], sizes = [4, 24, 256], strides = [1, 1, 1]} : vector<4x26x256xbf16> to vector<4x24x256xbf16>
    %103 = vector.extract_strided_slice %87 {offsets = [0, 2, 0], sizes = [4, 24, 256], strides = [1, 1, 1]} : vector<4x26x256xbf16> to vector<4x24x256xbf16>
    %104 = vector.extract_strided_slice %100 {offsets = [0, 0, 0], sizes = [4, 24, 256], strides = [1, 1, 1]} : vector<4x26x256xbf16> to vector<4x24x256xbf16>
    %105 = vector.extract_strided_slice %100 {offsets = [0, 1, 0], sizes = [4, 24, 256], strides = [1, 1, 1]} : vector<4x26x256xbf16> to vector<4x24x256xbf16>
    %106 = vector.extract_strided_slice %100 {offsets = [0, 2, 0], sizes = [4, 24, 256], strides = [1, 1, 1]} : vector<4x26x256xbf16> to vector<4x24x256xbf16>
    %107 = tpu.concatenate %101, %102, %103, %104, %105, %106 in 2 : vector<4x24x256xbf16>, vector<4x24x256xbf16>, vector<4x24x256xbf16>, vector<4x24x256xbf16>, vector<4x24x256xbf16>, vector<4x24x256xbf16> -> vector<4x24x1536xbf16>
    %108 = vector.shape_cast %107 : vector<4x24x1536xbf16> to vector<96x1536xbf16>
    %cst_19 = arith.constant dense<0.000000e+00> : vector<96x128xf32>
    %109 = tpu.matmul %108, %5, %cst_19 {dimension_numbers = #tpu.dot_dimension_numbers<[1], [0], [0], [1], [0, 0, 1, 1], [], []>} : vector<96x1536xbf16>, vector<1536x128xbf16>, vector<96x128xf32> -> vector<96x128xf32>
    %110 = vector.shape_cast %109 : vector<96x128xf32> to vector<4x24x128xf32>
    %111 = vector.shape_cast %6 : vector<1x128xf32> to vector<1x1x128xf32>
    %112 = vector.broadcast %111 : vector<1x1x128xf32> to vector<4x24x128xf32>
    %113 = arith.addf %110, %112 : vector<4x24x128xf32>
    %cst_20 = arith.constant 0.000000e+00 : f32
    %114 = vector.broadcast %cst_20 : f32 to vector<4x24x128xf32>
    %115 = arith.maximumf %113, %114 : vector<4x24x128xf32>
    %c0_21 = arith.constant 0 : index
    %c0_22 = arith.constant 0 : index
    %c0_23 = arith.constant 0 : index
    %116 = vector.load %arg8[%c0_21, %c0_22, %c0_23] : memref<4x24x128xf32, #tpu.memory_space<vmem>>, vector<4x24x128xf32>
    tpu.vector_store %arg8[%c0_21, %c0_22, %c0_23], %115 {strides = array<i32>} : memref<4x24x128xf32, #tpu.memory_space<vmem>>, vector<4x24x128xf32>,
    return
  }
  func.func @transform_0(%arg0: i32) -> (i32, i32, i32) {
    %c0_i32 = arith.constant 0 : i32
    %c0_i32_0 = arith.constant 0 : i32
    %c0_i32_1 = arith.constant 0 : i32
    return %arg0, %c0_i32, %c0_i32_0 : i32, i32, i32
  }
  func.func @transform_1(%arg0: i32) -> (i32, i32) {
    %c0_i32 = arith.constant 0 : i32
    %c0_i32_0 = arith.constant 0 : i32
    %c0_i32_1 = arith.constant 0 : i32
    return %c0_i32, %c0_i32_0 : i32, i32
  }
  func.func @transform_2(%arg0: i32) -> (i32, i32) {
    %c0_i32 = arith.constant 0 : i32
    %c0_i32_0 = arith.constant 0 : i32
    %c0_i32_1 = arith.constant 0 : i32
    return %c0_i32, %c0_i32_0 : i32, i32
  }
  func.func @transform_3(%arg0: i32) -> (i32, i32) {
    %c0_i32 = arith.constant 0 : i32
    %c0_i32_0 = arith.constant 0 : i32
    %c0_i32_1 = arith.constant 0 : i32
    return %c0_i32, %c0_i32_0 : i32, i32
  }
  func.func @transform_4(%arg0: i32) -> (i32, i32) {
    %c0_i32 = arith.constant 0 : i32
    %c0_i32_0 = arith.constant 0 : i32
    %c0_i32_1 = arith.constant 0 : i32
    return %c0_i32, %c0_i32_0 : i32, i32
  }
  func.func @transform_5(%arg0: i32) -> (i32, i32) {
    %c0_i32 = arith.constant 0 : i32
    %c0_i32_0 = arith.constant 0 : i32
    %c0_i32_1 = arith.constant 0 : i32
    return %c0_i32, %c0_i32_0 : i32, i32
  }
  func.func @transform_6(%arg0: i32) -> (i32, i32) {
    %c0_i32 = arith.constant 0 : i32
    %c0_i32_0 = arith.constant 0 : i32
    %c0_i32_1 = arith.constant 0 : i32
    return %c0_i32, %c0_i32_0 : i32, i32
  }
  func.func @transform_7(%arg0: i32) -> (i32, i32, i32) {
    %c0_i32 = arith.constant 0 : i32
    %c0_i32_0 = arith.constant 0 : i32
    %c0_i32_1 = arith.constant 0 : i32
    return %arg0, %c0_i32, %c0_i32_0 : i32, i32, i32
  }
}

</mosaic_0001>

<bundles_post_ra>
// kernel: tpu_custom_call.1
= control target key start
LH: loop header
LB: loop body
LE: loop exit
PB: predicated region body
PF: predicated region fallthrough
CT: control target
= control target key end

     0   :  { %s15005_s0 = inlined_call_operand.hbm [shape: f32[8,2,30], index: 0, kind: input, shape index: {}]   ;;  %s15006_s1 = inlined_call_operand.hbm [shape: f32[3,256], index: 1, kind: input, shape index: {}]   ;;  %s15007_s2 = inlined_call_operand.vmem [shape: f32[1,256], index: 2, kind: input, shape index: {}]   ;;  %s15008_s3 = inlined_call_operand.hbm [shape: bf16[768,256], index: 3, kind: input, shape index: {}]   ;;  %s15009_s4 = inlined_call_operand.vmem [shape: f32[1,256], index: 4, kind: input, shape index: {}]   ;;  %s15010_s5 = inlined_call_operand.hbm [shape: bf16[1536,128], index: 5, kind: input, shape index: {}]   ;;  %s15011_s6 = inlined_call_operand.vmem [shape: f32[1,128], index: 6, kind: input, shape index: {}]   ;;  %s15012_s7 = inlined_call_operand.hbm [shape: f32[8,24,128], index: 7, kind: output, shape index: {}]  }
   0x1   :  { %15105 = sst [smem:[#allocation55_spill]] %s15006_s1 }
   0x2   :  { %12 = vsyncpa [#allocation3], 0 }
   0x3   :  { %14 = vsyncpa [#allocation3 + $0x1], 0 }
   0x4   :  { %15 = vsyncpa [#allocation6], 0 }
   0x5   :  { %16 = vsyncpa [#allocation9], 0 }
   0x6   :  { %17 = vsyncpa [#allocation4], 0 }
   0x7   :  { %19 = vsyncpa [#allocation4 + $0x1], 0  ;;  %s11300_s24 = smov 0   ;;  %s11302_s25 = smov 0  }
   0x8   :  { %s11304_s26 = smov 0   ;;  %s11306_s27 = smov 0  }
   0x9 LB: > { %s11321_s28 = sadd.s32 4294967295, %s11243_s27   ;;  %s9948_s29 = sadd.s32 4294967294, %s11243_s27   ;;  %s11243_s27 = sphi %s11306_s27, %s15400_s27   ;;  %s11239_s26 = sphi %s11304_s26, %s15399_s26   ;;  %s11235_s25 = sphi %s11302_s25, %s15398_s25   ;;  %s11231_s24 = sphi %s11300_s24, %s15397_s24  }
   0xa   : > { %p45_p0 = scmp.ne.s32.totalorder %s11235_s25, %s11231_s24  ;;  %p15013_p1 = scmp.eq.s32.totalorder %s11321_s28, 0 }
   0xb   : > { %p201_p3 = scmp.eq.s32.totalorder %s9948_s29, 1  ;;  %p9949_p5 = scmp.ge.s32.totalorder %s11243_s27, 1 }
   0xc   : > { %p11330_p4 = por %p15013_p1, %p45_p0  ;;  %p208_p7 = scmp.lt.s32.totalorder %s11243_s27, 3 }
   0xd   : > { %p11335_p6 = por %p201_p3, %p45_p0  ;;  %s11245_s10 = smov [#allocation5]  }
   0xe   : > { %s15106_s30 = scalar_select %p11330_p4, 1, 0 }
   0xf   : > { %s15107_s8 = scalar_select %p11335_p6, 1, 0 }
  0x10   : > { %p11340_p8 = pnand %p9949_p5, %p208_p7  ;;  %s221_s11 = sshll.u32 %s11245_s10, 4  ;;  %s222_s11 = int_to_ptr.vmem [resolvable:$true] %s221_s11 }
  0x11   : > { %s11246_s12 = smov [#allocation7]   ;;  %s11247_s15 = smov [#allocation8]  }
  0x12   : > { %s15108_s9 = scalar_select %p11340_p8, 1, 0 }
  0x13   : > { %p10659_p10 = pneg %p11340_p8  ;;  %s234_s13 = sshll.u32 %s11246_s12, 4  ;;  %s235_s13 = int_to_ptr.vmem [resolvable:$true] %s234_s13 }
  0x14   : > { %s250_s16 = sshll.u32 %s11247_s15, 4  ;;  %s11076_s17 = scalar_lea.vmem %s222_s11, 128  ;;  %s251_s16 = int_to_ptr.vmem [resolvable:$true] %s250_s16 }
  0x15   : > { %p11349_p11 = pnand %p10659_p10, %p15013_p1  ;;  %p11077_p13 = scmp.ne.s32.totalorder %s222_s11, %s11076_s17 }
  0x16   : > { %p11084_p5 = scmp.lt.s32.totalorder %s222_s11, %s222_s11  ;;  %p11085_p7 = scmp.lt.s32.totalorder %s11076_s17, %s11076_s17 }
  0x17   : > { %p11067_p12 = pneg %p11349_p11 }
  0x18   : > { %p11086_p9 = por %p11085_p7, %p11084_p5 }
  0x19   : > { %p11079_p0 = pnand %p11077_p13, %p11067_p12 }
  0x1b   : > { %p11080_p3 = pneg %p11079_p0 }
  0x1d   : > { %p11087_p10 = pnand %p11086_p9, %p11080_p3 }
  0x1f   : > { %11090 = shalt.err (!%p11087_p10)
}
  0x20   : > { %s15110_s1 = sld [smem:[#allocation55_spill]]  ;;  %s11102_s20 = scalar_lea.vmem %s235_s13, 12288 }
  0x21   : > { %p11103_p1 = scmp.ne.s32.totalorder %s235_s13, %s11102_s20  ;;  %p11110_p13 = scmp.lt.s32.totalorder %s235_s13, %s235_s13 }
  0x22   : > { %p11111_p0 = scmp.lt.s32.totalorder %s11102_s20, %s11102_s20 }
  0x23   : > { %p11105_p2 = pnand %p11103_p1, %p11067_p12 }
  0x24   : > { %p11112_p4 = por %p11111_p0, %p11110_p13 }
  0x25   : > { %p11106_p6 = pneg %p11105_p2 }
  0x26   : > { %10662 = dma.hbm_to_vmem [thread:$0]  (!%p11349_p11), %s15110_s1, 128, %s222_s11, [#allocation6]  }
  0x27   : > { %p11113_p8 = pnand %p11112_p4, %p11106_p6 }
  0x29   : > { %11116 = shalt.err (!%p11113_p8)
}
  0x2a   : > { %s11248_s21 = smov 128   ;;  %s11249_s22 = smov 8  }
  0x2b   : > { %10665 = dma.hbm_to_vmem [thread:$0]  (!%p11349_p11), %s15008_s3, 12288, %s235_s13, [#allocation6], %s11248_s21, %s11248_s21, %s11249_s22  }
  0x2c   : > { %s11128_s10 = scalar_lea.vmem %s251_s16, 12288  ;;  %p11136_p3 = scmp.lt.s32.totalorder %s251_s16, %s251_s16 }
  0x2d   : > { %p11129_p9 = scmp.ne.s32.totalorder %s251_s16, %s11128_s10  ;;  %p11137_p5 = scmp.lt.s32.totalorder %s11128_s10, %s11128_s10 }
  0x2f   : > { %p11131_p1 = pnand %p11129_p9, %p11067_p12  ;;  %p11138_p4 = por %p11137_p5, %p11136_p3 }
  0x31   : > { %p11132_p2 = pneg %p11131_p1 }
  0x33   : > { %p11139_p6 = pnand %p11138_p4, %p11132_p2 }
  0x35   : > { %11142 = shalt.err (!%p11139_p6)
}
  0x36   : > { %s11250_s11 = smov 64   ;;  %s11251_s12 = smov 4  }
  0x37   : > { %10668 = dma.hbm_to_vmem [thread:$0]  (!%p11349_p11), %s15010_s5, 12288, %s251_s16, [#allocation9], %s11250_s11, %s11250_s11, %s11251_s12  }
  0x38   : > { %s11380_s17 = sadd.s32 1, %s11243_s27   ;;  %s32_s19 = sadd.s32 1, %s11239_s26 }
  0x39   : > { %s29_s18 = ssub.s32 %s11243_s27, %s11380_s17  ;;  %p39_p12 = scmp.ne.s32.totalorder %s11239_s26, %s11235_s25 }
  0x3a   : > { %p30_p8 = scmp.eq.s32.totalorder %s29_s18, 0  ;;  %p40_p7 = scmp.eq.s32.totalorder %s11243_s27, 0 }
  0x3b   : > { %p10680_p10 = scmp.lt.s32.totalorder %s11243_s27, 2  ;;  %p15111_p0 = scmp.eq.s32.totalorder %s11321_s28, 1 }
  0x3c   : > { %s11390_s20 = scalar_select %p30_p8, %s11239_s26, %s32_s19  }
  0x3d   : > { %p41_p13 = por %p40_p7, %p39_p12  ;;  %p11394_p9 = por %p15111_p0, %p39_p12 }
  0x3e   : > { %s267_s14 = sand.u32 1, %s11239_s26   ;;  %s10320_s22 = sshll.u32 %s11243_s27, 7 }
  0x3f   : > { %s15112_s21 = scalar_select %p11394_p9, 1, 0 }
  0x40   : > { %s9954_s16 = sshll.u32 %s267_s14, 3  ;;  %s11403_s10 = scalar_lea.hbm %s15005_s0, %s10320_s22 }
  0x41   : > { %s271_s11 = scalar_lea.vmem [#allocation2], %s9954_s16  ;;  %p11405_p11 = pnand %p10680_p10, %p41_p13 }
  0x42   : > { %s278_s12 = sshll.u32 %s271_s11, 4  ;;  %s11411_s15 = scalar_lea.sflag [#allocation3], %s267_s14  ;;  %s11409_s12 = int_to_ptr.vmem [resolvable:$true] %s278_s12 }
  0x43   : > { %s11143_s18 = scalar_lea.hbm %s11403_s10, 128  ;;  %p11145_p2 = pneg %p11405_p11 }
  0x44   : > { %p11144_p1 = scmp.ne.s32.totalorder %s11403_s10, %s11143_s18  ;;  %s11148_s16 = scalar_lea.hbm %s15005_s0, 256 }
  0x45   : > { %p11149_p4 = scmp.lt.s32.totalorder %s11403_s10, %s15005_s0  ;;  %p11150_p6 = scmp.lt.s32.totalorder %s11148_s16, %s11143_s18 }
  0x46   : > { %p11146_p3 = pnand %p11145_p2, %p11144_p1 }
  0x47   : > { %p11151_p8 = por %p11150_p6, %p11149_p4 }
  0x48   : > { %p11147_p5 = pneg %p11146_p3 }
  0x4a   : > { %p11152_p12 = pnand %p11151_p8, %p11147_p5 }
  0x4c   : > { %11155 = shalt.err (!%p11152_p12)
}
  0x4d   : > { %s11156_s14 = scalar_lea.vmem %s11409_s12, 128  ;;  %s11252_s11 = smov [#allocation2]  }
  0x4e   : > { %p11157_p7 = scmp.ne.s32.totalorder %s11409_s12, %s11156_s14  ;;  %s11161_s1 = sshll.u32 %s11252_s11, 4  ;;  %s11162_s1 = int_to_ptr.vmem [resolvable:$false] %s11161_s1 }
  0x4f   : > { %s11163_s19 = scalar_lea.vmem %s11162_s1, 256  ;;  %p11164_p0 = scmp.lt.s32.totalorder %s11409_s12, %s11162_s1 }
  0x50   : > { %p11159_p10 = pnand %p11157_p7, %p11145_p2  ;;  %p11165_p1 = scmp.lt.s32.totalorder %s11163_s19, %s11156_s14 }
  0x52   : > { %p11160_p13 = pneg %p11159_p10  ;;  %p11166_p3 = por %p11165_p1, %p11164_p0 }
  0x54   : > { %p11167_p9 = pnand %p11166_p3, %p11160_p13 }
  0x56   : > { %11170 = shalt.err (!%p11167_p9)
}
  0x57   : > { %s11253_s18 = smov 32   ;;  %s11254_s22 = smov 2  }
  0x58   : > { %10672 = dma.hbm_to_vmem [thread:$0]  (!%p11405_p11), %s11403_s10, 128, %s11409_s12, %s11411_s15, %s11253_s18, %s11253_s18, %s11254_s22  }
  0x59   : > { %p15114_p2 = scmp.ne.s32.totalorder %s15108_s9, 0 }
  0x5b   : > { %290 = sbr.rel (%p15114_p2) target bundleno = 1196 (0x4ac), region = 48 }
  0x60   : > { %s11435_s16 = sand.u32 1, %s11235_s25   ;;  %p15115_p9 = scmp.ne.s32.totalorder %s15106_s30, 0 }
  0x61   : > { %s9958_s1 = sshll.u32 %s11435_s16, 3  ;;  %s293_s23 = scalar_lea.sflag [#allocation3], %s11435_s16 }
  0x62   : > { %s11439_s29 = scalar_lea.vmem [#allocation2], %s9958_s1 }
  0x63   : > { %11214 = dma.done.wait (%p15115_p9), %s293_s23, 128  }
  0x64   : > { %11216 = vsyncadd (%p15115_p9), %s293_s23, 4294967168  ;;  %p15116_p11 = scmp.eq.s32.totalorder %s11321_s28, 0 }
  0x66   : > { %11218 = dma.done.wait (%p15116_p11), [#allocation6], 12416   ;;  %p15117_p5 = pmov %p15116_p11 }
  0x68   : > { %11220 = vsyncadd (%p15117_p5), [#allocation6], 4294954880  ;;  %p15118_p4 = pmov %p15117_p5 }
  0x6a   : > { %11222 = dma.done.wait (%p15118_p4), [#allocation9], 12288   ;;  %p15119_p6 = pmov %p15118_p4 }
  0x6b   : > { %v638_v0 = vlaneseq  ;;  %v342_v5 = vld [vmem:[%s11439_s29] sm:$0x3]  ;;  %v11461_v6 = vld [vmem:[#allocation5] sm:$0x77]  ;;  %v343_v13 = vld [vmem:[%s11439_s29 + $0x2] sm:$0x3] }
  0x6c   : > { %11224 = vsyncadd (%p15119_p6), [#allocation9], 4294955008  ;;  %v444_v7 = vld [vmem:[%s15009_s4] sm:$0x3]  ;;  %v11480_v14 = vld [vmem:[#allocation7 + $0x74] ss:$8 sps:$4 sm:$0xff]  }
  0x6d   : > { %v11453_v1 = vshrl.u32 %v638_v0, 7  ;;  %v10732_v16 = vld [vmem:[#allocation7 + $0x174] ss:$8 sps:$4 sm:$0xff]   ;;  %v10734_v17 = vld [vmem:[#allocation7 + $0x70] ss:$8 sps:$4 sm:$0xff]   ;;  %4014 = vmatprep.subr.bf16.mxu0 %v11480_v14  ;;  %vm1729_vm0 = vcmask 1046528  }
  0x6e   : > { %v10735_v18 = vld [vmem:[#allocation7 + $0x170] ss:$8 sps:$4 sm:$0xff]   ;;  %v10736_v21 = vld [vmem:[#allocation7 + $0x64] ss:$8 sps:$4 sm:$0xff]   ;;  %4115 = vmatprep.subr.bf16.mxu1 %v10732_v16  ;;  %4015 = vmatpush1.bf16.msra.mxu0 %v10734_v17  ;;  %v10740_v25 = vld [vmem:[#allocation7 + $0x60] ss:$8 sps:$4 sm:$0xff]  }
  0x6f   : > { %15120 = vst [vmem:[#allocation15_spill] sm:$0xff] %v11453_v1  ;;  %v11456_v2 = vsub.s32 0, %v11453_v1  ;;  %v721_v3 = vsub.s32 4, %v11453_v1  ;;  %v835_v4 = vsub.s32 5, %v11453_v1  ;;  %v11472_v11 = vsub.s32 1, %v11453_v1  ;;  %4116 = vmatpush1.bf16.msra.mxu1 %v10735_v18  ;;  %4016 = vmatprep.subr.bf16.mxu0 %v10736_v21  ;;  %s10641_s13 = smul.u32 96, %s11435_s16 }
  0x70   : > { %v10738_v23 = vld [vmem:[#allocation7 + $0x164] ss:$8 sps:$4 sm:$0xff]   ;;  %v10741_v26 = vld [vmem:[#allocation7 + $0x160] ss:$8 sps:$4 sm:$0xff]   ;;  %v10742_v29 = vld [vmem:[#allocation7 + $0x54] ss:$8 sps:$4 sm:$0xff]  }
  0x71   : > { %v11467_v8 = vrot.slane %v342_v5, %v11456_v2  ;;  %v722_v9 = vrot.slane %v11461_v6, %v721_v3  ;;  %v836_v10 = vrot.slane %v11461_v6, %v835_v4  ;;  %v11483_v15 = vrot.slane %v444_v7, %v11456_v2  ;;  %4117 = vmatprep.subr.bf16.mxu1 %v10738_v23  ;;  %v10744_v30 = vld [vmem:[#allocation7 + $0x154] ss:$8 sps:$4 sm:$0xff]   ;;  %v10746_v31 = vld [vmem:[#allocation7 + $0x50] ss:$8 sps:$4 sm:$0xff]   ;;  %v10748_v33 = vld [vmem:[#allocation7 + $0x44] ss:$8 sps:$4 sm:$0xff]  }
  0x72   : > { %v11489_v20 = vrot.slane %v342_v5, %v11472_v11  ;;  %v11493_v22 = vrot.slane %v444_v7, %v11472_v11  ;;  %v11496_v24 = vrot.slane %v343_v13, %v11472_v11  ;;  %4017 = vmatpush1.bf16.msra.mxu0 %v10740_v25  ;;  %v10747_v32 = vld [vmem:[#allocation7 + $0x150] ss:$8 sps:$4 sm:$0xff]   ;;  %v10750_v34 = vld [vmem:[#allocation7 + $0x144] ss:$8 sps:$4 sm:$0xff]   ;;  %v10752_v35 = vld [vmem:[#allocation7 + $0x40] ss:$8 sps:$4 sm:$0xff]   ;;  %v660_v44 = vrot.slane %v343_v13, %v11456_v2 }
  0x73   : > { %v11475_v12 = vrot.slane %v722_v9, %v11456_v2  ;;  %767 = vbcast.lane.b32.xlu1 %v11467_v8, 257  ;;  %643 = vbcast.lane.b32.xlu0 %v11467_v8, 256  ;;  %15121 = vst [vmem:[#allocation16_spill] sm:$0xff] %v11483_v15  ;;  %v11486_v19 = vrot.slane %v836_v10, %v11472_v11  ;;  %v10753_v36 = vld [vmem:[#allocation7 + $0x140] ss:$8 sps:$4 sm:$0xff]   ;;  %s14882_s11 = scalar_lea.vmem [#allocation10], %s10641_s13 }
  0x74   : > { %15122 = vst [vmem:[#allocation17_spill] sm:$0xff] %v11493_v22  ;;  %4118 = vmatpush1.bf16.msra.mxu1 %v10741_v26  ;;  %4018 = vmatprep.subr.bf16.mxu0 %v10742_v29  ;;  %v10754_v37 = vld [vmem:[#allocation7 + $0x34] ss:$8 sps:$4 sm:$0xff]   ;;  %v10758_v39 = vld [vmem:[#allocation7 + $0x30] ss:$8 sps:$4 sm:$0xff]   ;;  %s10642_s19 = smul.u32 1536, %s11321_s28 }
  0x75   : > { %4119 = vmatprep.subr.bf16.mxu1 %v10744_v30  ;;  %v10756_v38 = vld [vmem:[#allocation7 + $0x134] ss:$8 sps:$4 sm:$0xff]   ;;  %v10759_v40 = vld [vmem:[#allocation7 + $0x130] ss:$8 sps:$4 sm:$0xff]   ;;  %v10760_v41 = vld [vmem:[#allocation7 + $0x24] ss:$8 sps:$4 sm:$0xff]  }
  0x76   : > { %4019 = vmatpush1.bf16.msra.mxu0 %v10746_v31  ;;  %v10762_v42 = vld [vmem:[#allocation7 + $0x124] ss:$8 sps:$4 sm:$0xff]   ;;  %v10764_v43 = vld [vmem:[#allocation7 + $0x20] ss:$8 sps:$4 sm:$0xff]   ;;  %v10766_v47 = vld [vmem:[#allocation7 + $0x14] ss:$8 sps:$4 sm:$0xff]   ;;  %s14959_s23 = scalar_lea.hbm %s15012_s7, %s10642_s19 }
  0x77   : > { %771 = vbcast.lane.b32.xlu1 %v11467_v8, 265  ;;  %647 = vbcast.lane.b32.xlu0 %v11467_v8, 264  ;;  %v344_v45 = vld [vmem:[%s11439_s29 + $0x4] sm:$0x3]  ;;  %v10765_v46 = vld [vmem:[#allocation7 + $0x120] ss:$8 sps:$4 sm:$0xff]  }
  0x78   : > { %4120 = vmatpush1.bf16.msra.mxu1 %v10747_v32  ;;  %4020 = vmatprep.subr.bf16.mxu0 %v10748_v33  ;;  %v10768_v48 = vld [vmem:[#allocation7 + $0x114] ss:$8 sps:$4 sm:$0xff]   ;;  %v10770_v49 = vld [vmem:[#allocation7 + $0x10] ss:$8 sps:$4 sm:$0xff]   ;;  %v11515_v50 = vrot.slane %v344_v45, %v11472_v11  ;;  %v10772_v52 = vld [vmem:[#allocation7 + $0x4] ss:$8 sps:$4 sm:$0xff]   ;;  %v679_v10 = vrot.slane %v344_v45, %v11456_v2 }
  0x79   : > { %4121 = vmatprep.subr.bf16.mxu1 %v10750_v34  ;;  %v10771_v51 = vld [vmem:[#allocation7 + $0x110] ss:$8 sps:$4 sm:$0xff]   ;;  %v10774_v53 = vld [vmem:[#allocation7 + $0x104] ss:$8 sps:$4 sm:$0xff]   ;;  %v10776_v54 = vld [vmem:[#allocation7] ss:$8 sps:$4 sm:$0xff]  }
  0x7a   : > { %4021 = vmatpush1.bf16.msra.mxu0 %v10752_v35  ;;  %v10777_v55 = vld [vmem:[#allocation7 + $0x100] ss:$8 sps:$4 sm:$0xff]   ;;  %v10778_v56 = vld [vmem:[#allocation7 + $0xf4] ss:$8 sps:$4 sm:$0xff]   ;;  %v10782_v58 = vld [vmem:[#allocation7 + $0xf0] ss:$8 sps:$4 sm:$0xff]  }
  0x7b   : > { %655 = vbcast.lane.b32.xlu1 %v11467_v8, 280  ;;  %651 = vbcast.lane.b32.xlu0 %v11467_v8, 272  ;;  %v10780_v57 = vld [vmem:[#allocation7 + $0x1f4] ss:$8 sps:$4 sm:$0xff]   ;;  %v10783_v59 = vld [vmem:[#allocation7 + $0x1f0] ss:$8 sps:$4 sm:$0xff]  }
  0x7c   : > { %4122 = vmatpush1.bf16.msra.mxu1 %v10753_v36  ;;  %4022 = vmatprep.subr.bf16.mxu0 %v10754_v37  ;;  %v10784_v60 = vld [vmem:[#allocation7 + $0xe4] ss:$8 sps:$4 sm:$0xff]   ;;  %v10788_v62 = vld [vmem:[#allocation7 + $0xe0] ss:$8 sps:$4 sm:$0xff]   ;;  %v10790_v0 = vld [vmem:[#allocation7 + $0xd4] ss:$8 sps:$4 sm:$0xff]  }
  0x7d   : > { %4123 = vmatprep.subr.bf16.mxu1 %v10756_v38  ;;  %v10786_v61 = vld [vmem:[#allocation7 + $0x1e4] ss:$8 sps:$4 sm:$0xff]   ;;  %v10789_v63 = vld [vmem:[#allocation7 + $0x1e0] ss:$8 sps:$4 sm:$0xff]   ;;  %v10792_v3 = vld [vmem:[#allocation7 + $0x1d4] ss:$8 sps:$4 sm:$0xff]  }
  0x7e   : > { %4023 = vmatpush1.bf16.msra.mxu0 %v10758_v39  ;;  %v10794_v4 = vld [vmem:[#allocation7 + $0xd0] ss:$8 sps:$4 sm:$0xff]   ;;  %v10796_v7 = vld [vmem:[#allocation7 + $0xc4] ss:$8 sps:$4 sm:$0xff]   ;;  %v10800_v9 = vld [vmem:[#allocation7 + $0xc0] ss:$8 sps:$4 sm:$0xff]  }
  0x7f   : > { %779 = vbcast.lane.b32.xlu1 %v11467_v8, 281  ;;  %775 = vbcast.lane.b32.xlu0 %v11467_v8, 273  ;;  %v10795_v5 = vld [vmem:[#allocation7 + $0x1d0] ss:$8 sps:$4 sm:$0xff]   ;;  %v10801_v13 = vld [vmem:[#allocation7 + $0x1c0] ss:$8 sps:$4 sm:$0xff]  }
  0x80   : > { %4124 = vmatpush1.bf16.msra.mxu1 %v10759_v40  ;;  %4024 = vmatprep.subr.bf16.mxu0 %v10760_v41  ;;  %v10802_v16 = vld [vmem:[#allocation7 + $0xb4] ss:$8 sps:$4 sm:$0xff]   ;;  %v10806_v18 = vld [vmem:[#allocation7 + $0xb0] ss:$8 sps:$4 sm:$0xff]   ;;  %v10808_v25 = vld [vmem:[#allocation7 + $0xa4] ss:$8 sps:$4 sm:$0xff]  }
  0x81   : > { %4125 = vmatprep.subr.bf16.mxu1 %v10762_v42  ;;  %v10804_v17 = vld [vmem:[#allocation7 + $0x1b4] ss:$8 sps:$4 sm:$0xff]   ;;  %v10807_v23 = vld [vmem:[#allocation7 + $0x1b0] ss:$8 sps:$4 sm:$0xff]   ;;  %v10810_v26 = vld [vmem:[#allocation7 + $0x1a4] ss:$8 sps:$4 sm:$0xff]  }
  0x82   : > { %4025 = vmatpush1.bf16.msra.mxu0 %v10764_v43  ;;  %v345_v21 = vld [vmem:[%s11439_s29 + $0x6] sm:$0x3]  ;;  %v10812_v29 = vld [vmem:[#allocation7 + $0xa0] ss:$8 sps:$4 sm:$0xff]   ;;  %v10818_v34 = vld [vmem:[#allocation7 + $0x90] ss:$8 sps:$4 sm:$0xff]   ;;  %v832_v43 = vrot.slane %v11461_v6, %v11472_v11 }
  0x83   : > { %917 = vbcast.lane.b32.xlu1 %v11467_v8, 266  ;;  %913 = vbcast.lane.b32.xlu0 %v11467_v8, 258  ;;  %v11520_v30 = vrot.slane %v345_v21, %v11472_v11  ;;  %v10813_v31 = vld [vmem:[#allocation7 + $0x1a0] ss:$8 sps:$4 sm:$0xff]   ;;  %v10814_v32 = vld [vmem:[#allocation7 + $0x94] ss:$8 sps:$4 sm:$0xff]   ;;  %v698_v40 = vrot.slane %v345_v21, %v11456_v2 }
  0x84   : > { %4126 = vmatpush1.bf16.msra.mxu1 %v10765_v46  ;;  %4026 = vmatprep.subr.bf16.mxu0 %v10766_v47  ;;  %v10816_v33 = vld [vmem:[#allocation7 + $0x194] ss:$8 sps:$4 sm:$0xff]   ;;  %v10819_v35 = vld [vmem:[#allocation7 + $0x190] ss:$8 sps:$4 sm:$0xff]   ;;  %v10820_v36 = vld [vmem:[#allocation7 + $0x84] ss:$8 sps:$4 sm:$0xff]  }
  0x85   : > { %4127 = vmatprep.subr.bf16.mxu1 %v10768_v48  ;;  %v10822_v37 = vld [vmem:[#allocation7 + $0x184] ss:$8 sps:$4 sm:$0xff]   ;;  %v10824_v38 = vld [vmem:[#allocation7 + $0x80] ss:$8 sps:$4 sm:$0xff]   ;;  %v977_v47 = vsub.s32 2, %v11453_v1  ;;  %v981_v48 = vsub.s32 6, %v11453_v1 }
  0x86   : > { %4027 = vmatpush1.bf16.msra.mxu0 %v10770_v49  ;;  %v10825_v39 = vld [vmem:[#allocation7 + $0x180] ss:$8 sps:$4 sm:$0xff]   ;;  %v11543_v49 = vrot.slane %v832_v43, %v11472_v11  ;;  %vm1592_vm1 = vsmask.f32 7424  ;;  %s9846_s18 = sshll.u32 %s14882_s11, 4  ;;  %s9832_s29 = scalar_lea.sflag [#allocation4], %s11435_s16  ;;  %s14961_s18 = int_to_ptr.vmem [resolvable:$true] %s9846_s18 }
  0x87   : > { %925 = vbcast.lane.b32.xlu1 %v11467_v8, 282  ;;  %921 = vbcast.lane.b32.xlu0 %v11467_v8, 274  ;;  %v10798_v8 = vld [vmem:[#allocation7 + $0x1c4] ss:$8 sps:$4 sm:$0xff]   ;;  %s11171_s28 = scalar_lea.vmem %s14961_s18, 1536  ;;  %p15394_p12 = scmp.ne.s32.totalorder %s15112_s21, 0 }
  0x88   : > { %4128 = vmatpush1.bf16.msra.mxu1 %v10771_v51  ;;  %4028 = vmatprep.subr.bf16.mxu0 %v10772_v52  ;;  %p11172_p8 = scmp.ne.s32.totalorder %s14961_s18, %s11171_s28  ;;  %s11257_s30 = smov [#allocation10]  }
  0x89   : > { %4129 = vmatprep.subr.bf16.mxu1 %v10774_v53  ;;  %s11175_s9 = sshll.u32 %s11257_s30, 4  ;;  %s11176_s9 = int_to_ptr.vmem [resolvable:$false] %s11175_s9 }
  0x8a   : > { %4029 = vmatpush1.bf16.msra.mxu0 %v10776_v54  ;;  %v982_v54 = vrot.slane %v11461_v6, %v981_v48  ;;  %p11173_p7 = pnand %p11172_p8, %p15394_p12  ;;  %s11177_s10 = scalar_lea.vmem %s11176_s9, 3072 }
  0x8b   : > { %666 = vbcast.lane.b32.xlu1 %v660_v44, 264  ;;  %662 = vbcast.lane.b32.xlu0 %v660_v44, 256  ;;  %p11178_p13 = scmp.lt.s32.totalorder %s14961_s18, %s11176_s9  ;;  %p11179_p0 = scmp.lt.s32.totalorder %s11177_s10, %s11171_s28 }
  0x8c   : > { %4130 = vmatpush1.bf16.msra.mxu1 %v10777_v55  ;;  %4030 = vmatprep.subr.bf16.mxu0 %v10778_v56  ;;  %p11174_p10 = pneg %p11173_p7 }
  0x8d   : > { %4131 = vmatprep.subr.bf16.mxu1 %v10780_v57  ;;  %p11180_p1 = por %p11179_p0, %p11178_p13 }
  0x8e   : > { %4031 = vmatpush2.bf16.msra.mxu0 %v10782_v58 }
  0x8f   : > { %787 = vbcast.lane.b32.xlu1 %v660_v44, 265  ;;  %783 = vbcast.lane.b32.xlu0 %v660_v44, 257  ;;  %p11181_p3 = pnand %p11180_p1, %p11174_p10 }
  0x90   : > { %4132 = vmatpush2.bf16.msra.mxu1 %v10783_v59  ;;  %4032 = vmatprep.subr.bf16.mxu0 %v10784_v60  ;;  %v347_v59 = vld [vmem:[%s15007_s2] sm:$0x3] }
  0x91   : > { %4133 = vmatprep.subr.bf16.mxu1 %v10786_v61 }
  0x92   : > { %4033 = vmatpush2.bf16.msra.mxu0 %v10788_v62 }
  0x93   : > { %674 = vbcast.lane.b32.xlu1 %v660_v44, 280  ;;  %670 = vbcast.lane.b32.xlu0 %v660_v44, 272 }
  0x94   : > { %4134 = vmatpush2.bf16.msra.mxu1 %v10789_v63  ;;  %4034 = vmatprep.subr.bf16.mxu0 %v10790_v0 }
  0x95   : > { %4135 = vmatprep.subr.bf16.mxu1 %v10792_v3 }
  0x96   : > { %4035 = vmatpush2.bf16.msra.mxu0 %v10794_v4  ;;  %v11567_v4 = vrot.slane %v982_v54, %v977_v47 }
  0x97   : > { %795 = vbcast.lane.b32.xlu1 %v660_v44, 281  ;;  %791 = vbcast.lane.b32.xlu0 %v660_v44, 273 }
  0x98   : > { %4136 = vmatpush2.bf16.msra.mxu1 %v10795_v5  ;;  %4036 = vmatprep.subr.bf16.mxu0 %v10796_v7  ;;  %v11570_v5 = vrot.slane %v347_v59, %v11456_v2  ;;  %v11255_v7 = vmov 1966171168  }
  0x99   : > { %4137 = vmatprep.subr.bf16.mxu1 %v10798_v8  ;;  %v1761_v8 = vunpack.c.l.s4 %v11255_v7 }
  0x9a   : > { %4037 = vmatpush2.bf16.msra.mxu0 %v10800_v9  ;;  %v11573_v9 = vrot.slane %v347_v59, %v11472_v11 }
  0x9b   : > { %933 = vbcast.lane.b32.xlu1 %v660_v44, 266  ;;  %929 = vbcast.lane.b32.xlu0 %v660_v44, 258 }
  0x9c   : > { %4138 = vmatpush2.bf16.msra.mxu1 %v10801_v13  ;;  %4038 = vmatprep.subr.bf16.mxu0 %v10802_v16 }
  0x9d   : > { %4139 = vmatprep.subr.bf16.mxu1 %v10804_v17 }
  0x9e   : > { %4039 = vmatpush2.bf16.msra.mxu0 %v10806_v18 }
  0x9f   : > { %941 = vbcast.lane.b32.xlu1 %v660_v44, 282  ;;  %937 = vbcast.lane.b32.xlu0 %v660_v44, 274  ;;  %v718_v44 = vrot.slane %v11461_v6, %v11456_v2 }
  0xa0   : > { %4140 = vmatpush2.bf16.msra.mxu1 %v10807_v23  ;;  %4040 = vmatprep.subr.bf16.mxu0 %v10808_v25 }
  0xa1   : > { %4141 = vmatprep.subr.bf16.mxu1 %v10810_v26  ;;  %v11546_v51 = vrot.slane %v718_v44, %v11456_v2 }
  0xa2   : > { %4041 = vmatpush2.bf16.msra.mxu0 %v10812_v29 }
  0xa3   : > { %685 = vbcast.lane.b32.xlu1 %v679_v10, 264  ;;  %681 = vbcast.lane.b32.xlu0 %v679_v10, 256 }
  0xa4   : > { %4142 = vmatpush2.bf16.msra.mxu1 %v10813_v31  ;;  %4042 = vmatprep.subr.bf16.mxu0 %v10814_v32 }
  0xa5   : > { %4143 = vmatprep.subr.bf16.mxu1 %v10816_v33 }
  0xa6   : > { %4043 = vmatpush2.bf16.msra.mxu0 %v10818_v34  ;;  %v1762_v34 = vunpack.c.0.s8 %v1761_v8 }
  0xa7   : > { %803 = vbcast.lane.b32.xlu1 %v679_v10, 265  ;;  %799 = vbcast.lane.b32.xlu0 %v679_v10, 257 }
  0xa8   : > { %4144 = vmatpush2.bf16.msra.mxu1 %v10819_v35  ;;  %4044 = vmatprep.subr.bf16.mxu0 %v10820_v36  ;;  %v11602_v8 = vsub.s32 %v1762_v34, %v11453_v1 }
  0xa9   : > { %4145 = vmatprep.subr.bf16.mxu1 %v10822_v37 }
  0xaa   : > { %4045 = vmatpush2.bf16.msra.mxu0 %v10824_v38 }
  0xab   : > { %693 = vbcast.lane.b32.xlu1 %v679_v10, 280  ;;  %689 = vbcast.lane.b32.xlu0 %v679_v10, 272 }
  0xac   : > { %4146 = vmatpush2.bf16.msra.mxu1 %v10825_v39 }
  0xad   : > { %7052 = vmatprep.subr.bf16.mxu1 %v11480_v14  ;;  %v10828_v14 = vld [vmem:[#allocation7 + $0x274] ss:$8 sps:$4 sm:$0xff]  }
  0xae   : > { %4216 = vmatprep.subr.bf16.mxu0 %v10828_v14 }
  0xaf   : > { %811 = vbcast.lane.b32.xlu1 %v679_v10, 281  ;;  %807 = vbcast.lane.b32.xlu0 %v679_v10, 273 }
  0xb3   : > { %949 = vbcast.lane.b32.xlu1 %v679_v10, 266  ;;  %945 = vbcast.lane.b32.xlu0 %v679_v10, 258 }
  0xb7   : > { %957 = vbcast.lane.b32.xlu1 %v679_v10, 282  ;;  %953 = vbcast.lane.b32.xlu0 %v679_v10, 274 }
  0xbb   : > { %704 = vbcast.lane.b32.xlu1 %v698_v40, 264  ;;  %700 = vbcast.lane.b32.xlu0 %v698_v40, 256 }
  0xbf   : > { %819 = vbcast.lane.b32.xlu1 %v698_v40, 265  ;;  %815 = vbcast.lane.b32.xlu0 %v698_v40, 257 }
  0xc3   : > { %712 = vbcast.lane.b32.xlu1 %v698_v40, 280  ;;  %708 = vbcast.lane.b32.xlu0 %v698_v40, 272 }
  0xc7   : > { %827 = vbcast.lane.b32.xlu1 %v698_v40, 281  ;;  %823 = vbcast.lane.b32.xlu0 %v698_v40, 273 }
  0xcb   : > { %965 = vbcast.lane.b32.xlu1 %v698_v40, 266  ;;  %961 = vbcast.lane.b32.xlu0 %v698_v40, 258 }
  0xcf   : > { %973 = vbcast.lane.b32.xlu1 %v698_v40, 282  ;;  %969 = vbcast.lane.b32.xlu0 %v698_v40, 274 }
  0xd3   : > { %1157 = vbcast.lane.b32.xlu1 %v11489_v20, 264  ;;  %1153 = vbcast.lane.b32.xlu0 %v11489_v20, 256 }
  0xd7   : > { %1262 = vbcast.lane.b32.xlu1 %v11489_v20, 265  ;;  %1258 = vbcast.lane.b32.xlu0 %v11489_v20, 257 }
  0xdb   : > { %1165 = vbcast.lane.b32.xlu1 %v11489_v20, 280  ;;  %1161 = vbcast.lane.b32.xlu0 %v11489_v20, 272 }
  0xdf   : > { %1270 = vbcast.lane.b32.xlu1 %v11489_v20, 281  ;;  %1266 = vbcast.lane.b32.xlu0 %v11489_v20, 273 }
  0xe3   : > { %1390 = vbcast.lane.b32.xlu1 %v11489_v20, 266  ;;  %1386 = vbcast.lane.b32.xlu0 %v11489_v20, 258 }
  0xe5   : > { %v768_v41 = vpop.permute.xlu1 %767  ;;  %v644_v42 = vpop.permute.xlu0 %643 }
  0xe6   : > { %v847_v55 = vmul.f32 %v11543_v49, %v768_v41  ;;  %v848_v56 = vmul.f32 %v11486_v19, %v768_v41  ;;  %v733_v57 = vmul.f32 %v11546_v51, %v644_v42  ;;  %v734_v58 = vmul.f32 %v11475_v12, %v644_v42 }
  0xe7   : > { %1398 = vbcast.lane.b32.xlu1 %v11489_v20, 282  ;;  %1394 = vbcast.lane.b32.xlu0 %v11489_v20, 274  ;;  %v978_v20 = vrot.slane %v11461_v6, %v977_v47 }
  0xe8   : > { %v879_v10 = vadd.f32 %v847_v55, %v733_v57  ;;  %v880_v13 = vadd.f32 %v848_v56, %v734_v58 }
  0xe9   : > { %v772_v45 = vpop.permute.xlu1 %771  ;;  %v648_v46 = vpop.permute.xlu0 %647  ;;  %v11565_v3 = vrot.slane %v978_v20, %v977_v47 }
  0xea   : > { %v849_v60 = vmul.f32 %v11543_v49, %v772_v45  ;;  %v850_v6 = vmul.f32 %v11486_v19, %v772_v45  ;;  %v735_v61 = vmul.f32 %v11546_v51, %v648_v46  ;;  %v736_v62 = vmul.f32 %v11475_v12, %v648_v46 }
  0xeb   : > { %1176 = vbcast.lane.b32.xlu1 %v11496_v24, 264  ;;  %1172 = vbcast.lane.b32.xlu0 %v11496_v24, 256 }
  0xec   : > { %v881_v16 = vadd.f32 %v849_v60, %v735_v61  ;;  %v882_v17 = vadd.f32 %v850_v6, %v736_v62 }
  0xed   : > { %v656_v52 = vpop.permute.xlu1 %655  ;;  %v652_v53 = vpop.permute.xlu0 %651 }
  0xee   : > { %v739_v18 = vmul.f32 %v11546_v51, %v656_v52  ;;  %v740_v35 = vmul.f32 %v11475_v12, %v656_v52  ;;  %v737_v36 = vmul.f32 %v11546_v51, %v652_v53  ;;  %v738_v37 = vmul.f32 %v11475_v12, %v652_v53 }
  0xef   : > { %1278 = vbcast.lane.b32.xlu1 %v11496_v24, 265  ;;  %1274 = vbcast.lane.b32.xlu0 %v11496_v24, 257 }
  0xf1   : > { %v780_v63 = vpop.permute.xlu1 %779  ;;  %v776_v0 = vpop.permute.xlu0 %775 }
  0xf2   : > { %v853_v21 = vmul.f32 %v11543_v49, %v780_v63  ;;  %v854_v2 = vmul.f32 %v11486_v19, %v780_v63  ;;  %v851_v23 = vmul.f32 %v11543_v49, %v776_v0  ;;  %v852_v25 = vmul.f32 %v11486_v19, %v776_v0 }
  0xf3   : > { %1184 = vbcast.lane.b32.xlu1 %v11496_v24, 280  ;;  %1180 = vbcast.lane.b32.xlu0 %v11496_v24, 272 }
  0xf4   : > { %v885_v41 = vadd.f32 %v853_v21, %v739_v18  ;;  %v886_v42 = vadd.f32 %v854_v2, %v740_v35  ;;  %v883_v43 = vadd.f32 %v851_v23, %v737_v36  ;;  %v884_v44 = vadd.f32 %v852_v25, %v738_v37 }
  0xf5   : > { %v918_v11 = vpop.permute.xlu1 %917  ;;  %v914_v26 = vpop.permute.xlu0 %913 }
  0xf6   : > { %v995_v29 = vmul.f32 %v11565_v3, %v918_v11  ;;  %v996_v31 = vmul.f32 %v11567_v4, %v918_v11  ;;  %v993_v32 = vmul.f32 %v11565_v3, %v914_v26  ;;  %v994_v33 = vmul.f32 %v11567_v4, %v914_v26 }
  0xf7   : > { %1286 = vbcast.lane.b32.xlu1 %v11496_v24, 281  ;;  %1282 = vbcast.lane.b32.xlu0 %v11496_v24, 273 }
  0xf8   : > { %v1027_v38 = vadd.f32 %v995_v29, %v881_v16  ;;  %v1028_v39 = vadd.f32 %v996_v31, %v882_v17  ;;  %v1025_v40 = vadd.f32 %v993_v32, %v879_v10  ;;  %v1026_v14 = vadd.f32 %v994_v33, %v880_v13 }
  0xf9   : > { %v926_v45 = vpop.permute.xlu1 %925  ;;  %v922_v46 = vpop.permute.xlu0 %921 }
  0xfa   : > { %v1070_v47 = vadd.f32 %v11570_v5, %v1027_v38  ;;  %v1071_v48 = vadd.f32 %v11573_v9, %v1028_v39  ;;  %v1068_v52 = vadd.f32 %v11570_v5, %v1025_v40  ;;  %v1069_v53 = vadd.f32 %v11573_v9, %v1026_v14 }
  0xfb   : > { %v999_v20 = vmul.f32 %v11565_v3, %v926_v45  ;;  %v1000_v54 = vmul.f32 %v11567_v4, %v926_v45  ;;  %v997_v55 = vmul.f32 %v11565_v3, %v922_v46  ;;  %v998_v56 = vmul.f32 %v11567_v4, %v922_v46  ;;  %1406 = vbcast.lane.b32.xlu1 %v11496_v24, 266 }
  0xfc   : > { %v1102_v57 = vmax.f32 %v1070_v47, 0.0  ;;  %v1103_v58 = vmax.f32 %v1071_v48, 0.0  ;;  %v1100_v59 = vmax.f32 %v1068_v52, 0.0  ;;  %v1101_v60 = vmax.f32 %v1069_v53, 0.0  ;;  %1402 = vbcast.lane.b32.xlu0 %v11496_v24, 258 }
  0xfd   : > { %v1031_v6 = vadd.f32 %v999_v20, %v885_v41  ;;  %v1032_v61 = vadd.f32 %v1000_v54, %v886_v42  ;;  %v1029_v62 = vadd.f32 %v997_v55, %v883_v43  ;;  %v1030_v63 = vadd.f32 %v998_v56, %v884_v44  ;;  %v667_v0 = vpop.permute.xlu1 %666  ;;  %v663_v7 = vpop.permute.xlu0 %662 }
  0xfe   : > { %v9963_v10 = vpack.c.bf16 %v1103_v58, %v1102_v57  ;;  %v11604_v13 = vpack.c.bf16 %v1102_v57, %v1100_v59  ;;  %v11606_v16 = vpack.c.bf16 %v1103_v58, %v1101_v60  ;;  %v9962_v25 = vpack.c.bf16 %v1101_v60, %v1100_v59 }
  0xff   : > { %v11609_v17 = vadd.f32 %v11570_v5, %v1031_v6  ;;  %v11612_v18 = vadd.f32 %v11573_v9, %v1032_v61  ;;  %v1072_v21 = vadd.f32 %v11570_v5, %v1029_v62  ;;  %v1073_v2 = vadd.f32 %v11573_v9, %v1030_v63  ;;  %1414 = vbcast.lane.b32.xlu1 %v11496_v24, 282 }
 0x100   : > { %1410 = vbcast.lane.b32.xlu0 %v11496_v24, 274  ;;  %v1596_v23 = vshll.u32 %v11604_v13, 16  ;;  %v1608_v29 = vshll.u32 %v11606_v16, 16  ;;  %v11623_v34 = vrot.slane %v9963_v10, %v11602_v8  ;;  %v1730_v37 = vrot.slane %v11604_v13, 1 }
 0x101   : > { %v788_v11 = vpop.permute.xlu1 %787  ;;  %v784_v26 = vpop.permute.xlu0 %783  ;;  %v1106_v31 = vmax.f32 %v11609_v17, 0.0  ;;  %v1107_v32 = vmax.f32 %v11612_v18, 0.0  ;;  %v1104_v33 = vmax.f32 %v1072_v21, 0.0  ;;  %v1105_v35 = vmax.f32 %v1073_v2, 0.0 }
 0x102   : > { %v11632_v39 = vrot.slane %v1596_v23, 1  ;;  %v1733_v40 = vrot.slane %v11606_v16, 1  ;;  %v11636_v14 = vrot.slane %v9962_v25, %v11602_v8  ;;  %v11640_v44 = vrot.slane %v1608_v29, 1 }
 0x103   : > { %1195 = vbcast.lane.b32.xlu1 %v11515_v50, 264  ;;  %v1134_v38 = vpack.c.bf16 %v1106_v31, %v1104_v33  ;;  %v1135_v41 = vpack.c.bf16 %v1107_v32, %v1105_v35  ;;  %v743_v47 = vmul.f32 %v11546_v51, %v667_v0  ;;  %v857_v56 = vmul.f32 %v11543_v49, %v788_v11 }
 0x104   : > { %1191 = vbcast.lane.b32.xlu0 %v11515_v50, 256  ;;  %v858_v57 = vmul.f32 %v11486_v19, %v788_v11  ;;  %v11667_v63 = vpack.c.bf16 %v1105_v35, %v1104_v33  ;;  %v744_v10 = vmul.f32 %v11475_v12, %v667_v0  ;;  %v741_v21 = vmul.f32 %v11546_v51, %v663_v7 }
 0x105   : > { %v675_v42 = vpop.permute.xlu1 %674  ;;  %v671_v43 = vpop.permute.xlu0 %670  ;;  %v1601_v45 = vshll.u32 %v1134_v38, 16  ;;  %v11642_v46 = vrot.slane %v1134_v38, 1  ;;  %v1613_v48 = vshll.u32 %v1135_v41, 16  ;;  %v1617_v52 = vshrl.u32 %v1134_v38, 16 }
 0x106   : > { %v1620_v53 = vshrl.u32 %v1135_v41, 16  ;;  %v11645_v20 = vrot.slane %v1135_v41, 1  ;;  %v855_v2 = vmul.f32 %v11543_v49, %v784_v26  ;;  %v742_v11 = vmul.f32 %v11475_v12, %v663_v7 }
 0x107   : > { %15123 = vst [vmem:[#allocation18_spill] sm:$0xff] %v11642_v46  ;;  %1294 = vbcast.lane.b32.xlu1 %v11515_v50, 265  ;;  %v11648_v54 = vrot.slane %v1601_v45, 1  ;;  %v11652_v55 = vsel %vm1729_vm0, %v1730_v37, %v11642_v46  ;;  %v11657_v58 = vrot.slane %v1613_v48, 1  ;;  %v856_v29 = vmul.f32 %v11486_v19, %v784_v26 }
 0x108   : > { %15124 = vst [vmem:[#allocation19_spill] sm:$0xff] %v11645_v20  ;;  %1290 = vbcast.lane.b32.xlu0 %v11515_v50, 257  ;;  %v11661_v59 = vsel %vm1729_vm0, %v1733_v40, %v11645_v20  ;;  %v889_v33 = vadd.f32 %v857_v56, %v743_v47  ;;  %v890_v35 = vadd.f32 %v858_v57, %v744_v10  ;;  %v15125_v17 = vshrl.u32 %v11604_v13, 16 }
 0x109   : > { %v796_v61 = vpop.permute.xlu1 %795  ;;  %v792_v62 = vpop.permute.xlu0 %791  ;;  %v11673_v23 = vor.u32 %v1617_v52, %v11648_v54  ;;  %v11676_v25 = vor.u32 %v1620_v53, %v11657_v58  ;;  %v747_v0 = vmul.f32 %v11546_v51, %v675_v42  ;;  %v887_v38 = vadd.f32 %v855_v2, %v741_v21 }
 0x10a   : > { %v861_v37 = vmul.f32 %v11543_v49, %v796_v61  ;;  %v748_v40 = vmul.f32 %v11475_v12, %v675_v42  ;;  %v745_v41 = vmul.f32 %v11546_v51, %v671_v43  ;;  %v862_v45 = vmul.f32 %v11486_v19, %v796_v61 }
 0x10b   : > { %1203 = vbcast.lane.b32.xlu1 %v11515_v50, 280  ;;  %v746_v26 = vmul.f32 %v11475_v12, %v671_v43  ;;  %v859_v47 = vmul.f32 %v11543_v49, %v792_v62  ;;  %v860_v52 = vmul.f32 %v11486_v19, %v792_v62  ;;  %v1874_v56 = vcombine.low %v11673_v23, %v11676_v25 }
 0x10c   : > { %1199 = vbcast.lane.b32.xlu0 %v11515_v50, 272  ;;  %v888_v57 = vadd.f32 %v856_v29, %v742_v11  ;;  %v893_v61 = vadd.f32 %v861_v37, %v747_v0  ;;  %v894_v21 = vadd.f32 %v862_v45, %v748_v40  ;;  %v11727_v18 = vor.u32 %v11632_v39, %v15125_v17 }
 0x10d   : > { %v934_v7 = vpop.permute.xlu1 %933  ;;  %v930_v48 = vpop.permute.xlu0 %929  ;;  %v891_v62 = vadd.f32 %v859_v47, %v745_v41  ;;  %v892_v28 = vadd.f32 %v860_v52, %v746_v26 }
 0x10e   : > { %v1003_v53 = vmul.f32 %v11565_v3, %v934_v7  ;;  %v1004_v42 = vmul.f32 %v11567_v4, %v934_v7  ;;  %v1001_v10 = vmul.f32 %v11565_v3, %v930_v48  ;;  %v1002_v43 = vmul.f32 %v11567_v4, %v930_v48 }
 0x10f   : > { %1302 = vbcast.lane.b32.xlu1 %v11515_v50, 281 }
 0x110   : > { %v1035_v2 = vadd.f32 %v1003_v53, %v889_v33  ;;  %1298 = vbcast.lane.b32.xlu0 %v11515_v50, 273  ;;  %v1036_v27 = vadd.f32 %v1004_v42, %v890_v35  ;;  %v1033_v6 = vadd.f32 %v1001_v10, %v887_v38  ;;  %v1034_v29 = vadd.f32 %v1002_v43, %v888_v57 }
 0x111   : > { %v942_v60 = vpop.permute.xlu1 %941  ;;  %v938_v36 = vpop.permute.xlu0 %937  ;;  %v11719_v57 = vrot.slane %v1874_v56, %v11602_v8 }
 0x112   : > { %v1078_v11 = vadd.f32 %v11570_v5, %v1035_v2  ;;  %v1007_v7 = vmul.f32 %v11565_v3, %v942_v60  ;;  %v1008_v24 = vmul.f32 %v11567_v4, %v942_v60  ;;  %v1079_v0 = vadd.f32 %v11573_v9, %v1036_v27 }
 0x113   : > { %v1076_v33 = vadd.f32 %v11570_v5, %v1033_v6  ;;  %v1005_v37 = vmul.f32 %v11565_v3, %v938_v36  ;;  %v1006_v40 = vmul.f32 %v11567_v4, %v938_v36  ;;  %1422 = vbcast.lane.b32.xlu1 %v11515_v50, 266  ;;  %v1077_v38 = vadd.f32 %v11573_v9, %v1034_v29 }
 0x114   : > { %v1110_v35 = vmax.f32 %v1078_v11, 0.0  ;;  %v1039_v41 = vadd.f32 %v1007_v7, %v893_v61  ;;  %v1040_v45 = vadd.f32 %v1008_v24, %v894_v21  ;;  %1418 = vbcast.lane.b32.xlu0 %v11515_v50, 258  ;;  %v1111_v48 = vmax.f32 %v1079_v0, 0.0 }
 0x115   : > { %v1108_v26 = vmax.f32 %v1076_v33, 0.0  ;;  %v1037_v60 = vadd.f32 %v1005_v37, %v891_v62  ;;  %v1038_v47 = vadd.f32 %v1006_v40, %v892_v28  ;;  %v686_v27 = vpop.permute.xlu1 %685  ;;  %v11708_v52 = vpop.permute.xlu0 %681  ;;  %v11714_v36 = vpack.c.bf16 %v1107_v32, %v1106_v31 }
 0x116   : > { %v1109_v6 = vmax.f32 %v1077_v38, 0.0  ;;  %v1082_v53 = vadd.f32 %v11570_v5, %v1039_v41  ;;  %v1083_v24 = vadd.f32 %v11573_v9, %v1040_v45  ;;  %v15126_v31 = vshrl.u32 %v11606_v16, 16 }
 0x117   : > { %v1136_v42 = vpack.c.bf16 %v1110_v35, %v1108_v26  ;;  %v1080_v28 = vadd.f32 %v11570_v5, %v1037_v60  ;;  %v1081_v10 = vadd.f32 %v11573_v9, %v1038_v47  ;;  %1430 = vbcast.lane.b32.xlu1 %v11515_v50, 282  ;;  %v9967_v61 = vpack.c.bf16 %v1111_v48, %v1110_v35 }
 0x118   : > { %v11732_v32 = vor.u32 %v11640_v44, %v15126_v31  ;;  %v1137_v56 = vpack.c.bf16 %v1111_v48, %v1109_v6  ;;  %1426 = vbcast.lane.b32.xlu0 %v11515_v50, 274  ;;  %v11737_v21 = vrot.slane %v11667_v63, %v11602_v8  ;;  %v1114_v43 = vmax.f32 %v1082_v53, 0.0 }
 0x119   : > { %v1626_v2 = vshll.u32 %v1136_v42, 16  ;;  %v1115_v62 = vmax.f32 %v1083_v24, 0.0  ;;  %v804_v13 = vpop.permute.xlu1 %803  ;;  %v9966_v11 = vpack.c.bf16 %v1109_v6, %v1108_v26  ;;  %v800_v29 = vpop.permute.xlu0 %799  ;;  %v1112_v7 = vmax.f32 %v1080_v28, 0.0 }
 0x11a   : > { %v1638_v44 = vshll.u32 %v1137_v56, 16  ;;  %v1113_v0 = vmax.f32 %v1081_v10, 0.0  ;;  %v11749_v33 = vrot.slane %v9967_v61, %v11602_v8  ;;  %v751_v35 = vmul.f32 %v11546_v51, %v686_v27 }
 0x11b   : > { %1214 = vbcast.lane.b32.xlu1 %v11520_v30, 264  ;;  %v1628_v37 = vrot.slane %v1626_v2, 1  ;;  %v1624_v38 = vshrl.u32 %v1136_v42, 16  ;;  %v1736_v41 = vrot.slane %v1136_v42, 1  ;;  %v1138_v45 = vpack.c.bf16 %v1114_v43, %v1112_v7 }
 0x11c   : > { %v1640_v40 = vrot.slane %v1638_v44, 1  ;;  %1210 = vbcast.lane.b32.xlu0 %v11520_v30, 256  ;;  %v1139_v48 = vpack.c.bf16 %v1115_v62, %v1113_v0  ;;  %v1636_v26 = vshrl.u32 %v1137_v56, 16  ;;  %v1739_v60 = vrot.slane %v1137_v56, 1 }
 0x11d   : > { %v11754_v47 = vrot.slane %v9966_v11, %v11602_v8  ;;  %v11756_v6 = vpack.c.bf16 %v1115_v62, %v1114_v43  ;;  %v694_v53 = vpop.permute.xlu1 %693  ;;  %v1631_v24 = vshll.u32 %v1138_v45, 16  ;;  %v752_v10 = vmul.f32 %v11475_v12, %v686_v27  ;;  %v11766_v2 = vpop.permute.xlu0 %689 }
 0x11e   : > { %v1643_v28 = vshll.u32 %v1139_v48, 16  ;;  %v749_v17 = vmul.f32 %v11546_v51, %v11708_v52  ;;  %v1629_v42 = vor.u32 %v1628_v37, %v1624_v38  ;;  %v1641_v31 = vor.u32 %v1640_v40, %v1636_v26 }
 0x11f   : > { %1310 = vbcast.lane.b32.xlu1 %v11520_v30, 265  ;;  %v11762_v61 = vrot.slane %v1138_v45, 1  ;;  %v11764_v56 = vrot.slane %v1139_v48, 1  ;;  %v1633_v43 = vrot.slane %v1631_v24, 1  ;;  %v1647_v44 = vshrl.u32 %v1138_v45, 16 }
 0x120   : > { %1306 = vbcast.lane.b32.xlu0 %v11520_v30, 257  ;;  %v1645_v62 = vrot.slane %v1643_v28, 1  ;;  %v1650_v11 = vshrl.u32 %v1139_v48, 16  ;;  %v9968_v37 = vpack.c.bf16 %v1113_v0, %v1112_v7  ;;  %v865_v63 = vmul.f32 %v11543_v49, %v804_v13 }
 0x121   : > { %15127 = vst [vmem:[#allocation20_spill] sm:$0xff] %v11762_v61  ;;  %15128 = vst [vmem:[#allocation21_spill] sm:$0xff] %v11764_v56  ;;  %v1738_v27 = vsel %vm1729_vm0, %v1736_v41, %v11762_v61  ;;  %v1741_v39 = vsel %vm1729_vm0, %v1739_v60, %v11764_v56  ;;  %v11775_v38 = vor.u32 %v1647_v44, %v1633_v43  ;;  %v812_v48 = vpop.permute.xlu1 %811  ;;  %v11805_v40 = vpop.permute.xlu0 %807 }
 0x122   : > { %v11777_v26 = vor.u32 %v1650_v11, %v1645_v62  ;;  %v866_v24 = vmul.f32 %v11486_v19, %v804_v13  ;;  %v11785_v45 = vsel %vm1592_vm1, %v1629_v42, %v1633_v43  ;;  %v2093_v7 = vcombine.low %v11762_v61, %v11764_v56  ;;  %v10831_v56 = vld [vmem:[#allocation7 + $0x264] ss:$8 sps:$4 sm:$0xff]  }
 0x123   : > { %1222 = vbcast.lane.b32.xlu1 %v11520_v30, 280  ;;  %v750_v0 = vmul.f32 %v11475_v12, %v11708_v52  ;;  %v11793_v60 = vsel %vm1592_vm1, %v1641_v31, %v1645_v62  ;;  %v1975_v13 = vcombine.low %v1738_v27, %v1741_v39  ;;  %v1976_v28 = vcombine.high %v1738_v27, %v1741_v39 }
 0x124   : > { %1218 = vbcast.lane.b32.xlu0 %v11520_v30, 272  ;;  %v2091_v44 = vcombine.low %v11775_v38, %v11777_v26  ;;  %v11798_v42 = vrot.slane %v9968_v37, %v11602_v8  ;;  %v863_v43 = vmul.f32 %v11543_v49, %v800_v29  ;;  %v864_v11 = vmul.f32 %v11486_v19, %v800_v29 }
 0x125   : > { %v1604_v52 = vsel %vm1592_vm1, %v11727_v18, %v11648_v54  ;;  %v897_v39 = vadd.f32 %v865_v63, %v751_v35  ;;  %v898_v62 = vadd.f32 %v866_v24, %v752_v10  ;;  %v1616_v27 = vsel %vm1592_vm1, %v11732_v32, %v11657_v58 }
 0x126   : > { %v11808_v31 = vrot.slane %v2091_v44, %v11602_v8  ;;  %v1756_v54 = vcombine.low %v1604_v52, %v1616_v27  ;;  %v1757_v18 = vcombine.high %v1604_v52, %v1616_v27  ;;  %v11820_v44 = vrot.slane %v1975_v13, %v11602_v8  ;;  %v950_v27 = vpop.permute.xlu1 %949 }
 0x127   : > { %1318 = vbcast.lane.b32.xlu1 %v11520_v30, 281  ;;  %v11823_v63 = vrot.slane %v1976_v28, %v11602_v8  ;;  %v11828_v32 = vrot.slane %v2093_v7, %v11602_v8  ;;  %v895_v35 = vadd.f32 %v863_v43, %v749_v17  ;;  %v896_v10 = vadd.f32 %v864_v11, %v750_v0 }
 0x128   : > { %1314 = vbcast.lane.b32.xlu0 %v11520_v30, 273  ;;  %v1780_v24 = vrot.slane %v1756_v54, %v11602_v8  ;;  %v1787_v52 = vrot.slane %v1757_v18, %v11602_v8  ;;  %v11835_v41 = vmul.f32 %v11546_v51, %v694_v53  ;;  %v11838_v28 = vmul.f32 %v11475_v12, %v694_v53  ;;  %v946_v54 = vpop.permute.xlu0 %945 }
 0x129   : > { %v11842_v7 = vmul.f32 %v11546_v51, %v11766_v2  ;;  %v869_v18 = vmul.f32 %v11543_v49, %v812_v48  ;;  %v870_v58 = vmul.f32 %v11486_v19, %v812_v48  ;;  %v1011_v37 = vmul.f32 %v11565_v3, %v950_v27 }
 0x12a   : > { %v1802_v17 = vcombine.low %v11636_v14, %v1780_v24  ;;  %v1803_v0 = vcombine.high %v11636_v14, %v1780_v24  ;;  %v1804_v43 = vcombine.low %v11623_v34, %v1787_v52  ;;  %v1805_v11 = vcombine.high %v11623_v34, %v1787_v52  ;;  %v958_v1 = vpop.permute.xlu1 %957 }
 0x12b   : > { %1438 = vbcast.lane.b32.xlu1 %v11520_v30, 266  ;;  %v1012_v52 = vmul.f32 %v11567_v4, %v950_v27  ;;  %v1043_v50 = vadd.f32 %v1011_v37, %v897_v39  ;;  %v1009_v16 = vmul.f32 %v11565_v3, %v946_v54  ;;  %v1010_v53 = vmul.f32 %v11567_v4, %v946_v54 }
 0x12c   : > { %1434 = vbcast.lane.b32.xlu0 %v11520_v30, 258  ;;  %v1814_v29 = vrot.slane %v1802_v17, %v11602_v8  ;;  %v1821_v14 = vrot.slane %v1804_v43, %v11602_v8  ;;  %v1828_v24 = vrot.slane %v1803_v0, %v11602_v8  ;;  %v1835_v34 = vrot.slane %v1805_v11, %v11602_v8 }
 0x12d   : > { %v1044_v17 = vadd.f32 %v1012_v52, %v898_v62  ;;  %v1086_v0 = vadd.f32 %v11570_v5, %v1043_v50  ;;  %v1041_v43 = vadd.f32 %v1009_v16, %v895_v35  ;;  %v1042_v11 = vadd.f32 %v1010_v53, %v896_v10 }
 0x12e   : > { %v9978_v48 = vcombine.low %v1814_v29, %v1828_v24  ;;  %v9980_v13 = vcombine.high %v1814_v29, %v1828_v24  ;;  %v9982_v22 = vcombine.low %v1821_v14, %v1835_v34  ;;  %v9984_v15 = vcombine.high %v1821_v14, %v1835_v34  ;;  %v954_v34 = vpop.permute.xlu0 %953 }
 0x12f   : > { %1446 = vbcast.lane.b32.xlu1 %v11520_v30, 282  ;;  %v1087_v29 = vadd.f32 %v11573_v9, %v1044_v17  ;;  %v1118_v24 = vmax.f32 %v1086_v0, 0.0  ;;  %v1084_v14 = vadd.f32 %v11570_v5, %v1041_v43  ;;  %v867_v10 = vmul.f32 %v11543_v49, %v11805_v40 }
 0x130   : > { %1442 = vbcast.lane.b32.xlu0 %v11520_v30, 274  ;;  %v2636_v27 = vrot.slane %v9978_v48, %v11602_v8  ;;  %v2650_v39 = vrot.slane %v9980_v13, %v11602_v8  ;;  %v2664_v37 = vrot.slane %v9982_v22, %v11602_v8  ;;  %v2678_v54 = vrot.slane %v9984_v15, %v11602_v8 }
 0x131   : > { %v1085_v30 = vadd.f32 %v11573_v9, %v1042_v11  ;;  %v1119_v13 = vmax.f32 %v1087_v29, 0.0  ;;  %v1116_v53 = vmax.f32 %v1084_v14, 0.0  ;;  %v868_v0 = vmul.f32 %v11486_v19, %v11805_v40  ;;  %v705_v14 = vpop.permute.xlu1 %704 }
 0x132   : > { %v2687_v62 = vcombine.high %v2636_v27, %v2650_v39  ;;  %v2691_v50 = vcombine.high %v2664_v37, %v2678_v54  ;;  %v2686_v16 = vcombine.low %v2636_v27, %v2650_v39  ;;  %v2690_v35 = vcombine.low %v2664_v37, %v2678_v54 }
 0x133   : > { %v1117_v22 = vmax.f32 %v1085_v30, 0.0  ;;  %v11880_v43 = vpack.c.bf16 %v1118_v24, %v1116_v53  ;;  %v1015_v27 = vmul.f32 %v11565_v3, %v958_v1  ;;  %v10826_v30 = vld [vmem:[#allocation7 + $0x270] ss:$8 sps:$4 sm:$0xff]   ;;  %v754_v40 = vmul.f32 %v11475_v12, %v11766_v2 }
 0x134   : > { %v2714_v15 = vrot.slane %v2687_v62, %v11602_v8  ;;  %v2742_v52 = vrot.slane %v2691_v50, %v11602_v8  ;;  %v2700_v48 = vrot.slane %v2686_v16, %v11602_v8  ;;  %v2728_v17 = vrot.slane %v2690_v35, %v11602_v8 }
 0x135   : > { %v11882_v11 = vpack.c.bf16 %v1119_v13, %v1117_v22  ;;  %v15129_v62 = vcombine.low %v11798_v42, %v11808_v31  ;;  %v901_v16 = vadd.f32 %v869_v18, %v11835_v41  ;;  %v902_v35 = vadd.f32 %v870_v58, %v11838_v28  ;;  %v701_v41 = vpop.permute.xlu0 %700 }
 0x136   : > { %v2753_v39 = vcombine.low %v2714_v15, %v2742_v52  ;;  %v2754_v37 = vcombine.high %v2714_v15, %v2742_v52  ;;  %v2750_v54 = vcombine.low %v2700_v48, %v2728_v17  ;;  %v2751_v29 = vcombine.high %v2700_v48, %v2728_v17 }
 0x137   : > { %v11889_v50 = vrot.slane %v15129_v62, %v11602_v8  ;;  %v899_v15 = vadd.f32 %v867_v10, %v11842_v7  ;;  %v9971_v52 = vpack.c.bf16 %v1119_v13, %v1118_v24  ;;  %v1656_v48 = vshll.u32 %v11880_v43, 16  ;;  %v10970_v24 = vld [vmem:[#allocation7 + $0x70] ss:$8 sps:$4 sm:$0xff]   ;;  %v10829_v10 = vld [vmem:[#allocation7 + $0x260] ss:$8 sps:$4 sm:$0xff]  }
 0x138   : > { %4046 = vmatprep.mubr.bf16.mxu0 %v2753_v39  ;;  %4147 = vmatprep.mubr.bf16.mxu1 %v2754_v37  ;;  %v1668_v17 = vshll.u32 %v11882_v11, 16  ;;  %v1016_v62 = vmul.f32 %v11567_v4, %v958_v1  ;;  %v1047_v61 = vadd.f32 %v1015_v27, %v901_v16  ;;  %v1013_v2 = vmul.f32 %v11565_v3, %v954_v34  ;;  %v10834_v37 = vld [vmem:[#allocation7 + $0x254] ss:$8 sps:$4 sm:$0xff]  }
 0x139   : > { %15130 = vst [vmem:[#allocation22_spill] sm:$0xff] %v11889_v50  ;;  %4047 = vmatmul.mubr.bf16.vlgmr.msra.gmra.mxu0 %v2750_v54  ;;  %4148 = vmatmul.mubr.bf16.vlgmr.msra.gmra.mxu1 %v2751_v29  ;;  %v15131_v58 = vcombine.high %v11798_v42, %v11808_v31  ;;  %v900_v7 = vadd.f32 %v868_v0, %v754_v40  ;;  %v1658_v31 = vrot.slane %v1656_v48, 1  ;;  %v10971_v29 = vld [vmem:[#allocation7 + $0x64] ss:$8 sps:$4 sm:$0xff]   ;;  %v1742_v40 = vrot.slane %v11880_v43, 1 }
 0x13a   : > { %v1014_v18 = vmul.f32 %v11567_v4, %v954_v34  ;;  %4217 = vmatpush1.bf16.msra.mxu0 %v10826_v30  ;;  %7053 = vmatpush1.bf16.msra.mxu1 %v10970_v24  ;;  %v11907_v13 = vpack.c.bf16 %v1117_v22, %v1116_v53  ;;  %v1048_v1 = vadd.f32 %v1016_v62, %v902_v35  ;;  %v1670_v0 = vrot.slane %v1668_v17, 1  ;;  %v820_v34 = vpop.permute.xlu1 %819 }
 0x13b   : > { %v11904_v28 = vrot.slane %v15131_v58, %v11602_v8  ;;  %v11910_v27 = vadd.f32 %v11570_v5, %v1047_v61  ;;  %v1045_v39 = vadd.f32 %v1013_v2, %v899_v15  ;;  %4218 = vmatprep.subr.bf16.mxu0 %v10831_v56  ;;  %v11913_v42 = vrot.slane %v9971_v52, %v11602_v8  ;;  %v10832_v15 = vld [vmem:[#allocation7 + $0x250] ss:$8 sps:$4 sm:$0xff]   ;;  %v816_v2 = vpop.permute.xlu0 %815  ;;  %v10972_v58 = vld [vmem:[#allocation7 + $0x60] ss:$8 sps:$4 sm:$0xff]  }
 0x13c   : > { %v1046_v54 = vadd.f32 %v1014_v18, %v900_v7  ;;  %7054 = vmatprep.subr.bf16.mxu1 %v10971_v29  ;;  %v1654_v30 = vshrl.u32 %v11880_v43, 16  ;;  %v11917_v53 = vadd.f32 %v11573_v9, %v1048_v1  ;;  %v1666_v56 = vshrl.u32 %v11882_v11, 16  ;;  %v10837_v43 = vld [vmem:[#allocation7 + $0x244] ss:$8 sps:$4 sm:$0xff]  }
 0x13d   : > { %15132 = vst [vmem:[#allocation23_spill] sm:$0xff] %v11904_v28  ;;  %v15027_v61 = vmax.f32 %v11910_v27, 0.0  ;;  %v11921_v22 = vadd.f32 %v11570_v5, %v1045_v39  ;;  %v1745_v16 = vrot.slane %v11882_v11, 1  ;;  %v759_v17 = vmul.f32 %v11546_v51, %v705_v14 }
 0x13e   : > { %v11927_v35 = vadd.f32 %v11573_v9, %v1046_v54  ;;  %4219 = vmatpush1.bf16.msra.mxu0 %v10829_v10  ;;  %v15026_v52 = vmax.f32 %v11917_v53, 0.0  ;;  %v873_v62 = vmul.f32 %v11543_v49, %v820_v34  ;;  %7055 = vmatpush1.bf16.msra.mxu1 %v10972_v58  ;;  %v11933_v7 = vor.u32 %v1658_v31, %v1654_v30  ;;  %v10973_v10 = vld [vmem:[#allocation7 + $0x54] ss:$8 sps:$4 sm:$0xff]  }
 0x13f   : > { %v15025_v48 = vmax.f32 %v11921_v22, 0.0  ;;  %4220 = vmatprep.subr.bf16.mxu0 %v10834_v37  ;;  %v11935_v11 = vor.u32 %v1670_v0, %v1666_v56  ;;  %v760_v24 = vmul.f32 %v11475_v12, %v705_v14  ;;  %7056 = vmatprep.subr.bf16.mxu1 %v10973_v10  ;;  %v757_v39 = vmul.f32 %v11546_v51, %v701_v41  ;;  %v10835_v56 = vld [vmem:[#allocation7 + $0x240] ss:$8 sps:$4 sm:$0xff]  }
 0x140   : > { %v15024_v18 = vmax.f32 %v11927_v35, 0.0  ;;  %v758_v37 = vmul.f32 %v11475_v12, %v701_v41  ;;  %v15133_v31 = vcombine.high %v11673_v23, %v11676_v25  ;;  %v874_v54 = vmul.f32 %v11486_v19, %v820_v34 }
 0x141   : > { %v1142_v1 = vpack.c.bf16 %v15027_v61, %v15025_v48  ;;  %v871_v29 = vmul.f32 %v11543_v49, %v816_v2  ;;  %v872_v30 = vmul.f32 %v11486_v19, %v816_v2  ;;  %v11958_v10 = vadd.f32 %v873_v62, %v759_v17  ;;  %v713_v2 = vpop.permute.xlu1 %712  ;;  %v10975_v17 = vld [vmem:[#allocation7 + $0x44] ss:$8 sps:$4 sm:$0xff]   ;;  %v10840_v62 = vld [vmem:[#allocation7 + $0x234] ss:$8 sps:$4 sm:$0xff]  }
 0x142   : > { %v1905_v0 = vrot.slane %v15133_v31, %v11602_v8  ;;  %v1143_v14 = vpack.c.bf16 %v15026_v52, %v15024_v18  ;;  %4221 = vmatpush1.bf16.msra.mxu0 %v10832_v15  ;;  %v15135_v23 = vcombine.low %v11737_v21, %v11719_v57  ;;  %v10974_v31 = vld [vmem:[#allocation7 + $0x50] ss:$8 sps:$4 sm:$0xff]   ;;  %v15137_v15 = vcombine.high %v11737_v21, %v11719_v57 }
 0x143   : > { %v1661_v58 = vshll.u32 %v1142_v1, 16  ;;  %v11956_v41 = vrot.slane %v1142_v1, 1  ;;  %7057 = vmatpush1.bf16.msra.mxu1 %v10974_v31  ;;  %4222 = vmatprep.subr.bf16.mxu0 %v10837_v43  ;;  %v1677_v18 = vshrl.u32 %v1142_v1, 16  ;;  %v15139_v43 = vrot.slane %v11714_v36, %v11602_v8  ;;  %v10838_v36 = vld [vmem:[#allocation7 + $0x230] ss:$8 sps:$4 sm:$0xff]  }
 0x144   : > { %v1930_v25 = vrot.slane %v15135_v23, %v11602_v8  ;;  %v1673_v34 = vshll.u32 %v1143_v14, 16  ;;  %v11964_v48 = vrot.slane %v1143_v14, 1  ;;  %v1944_v52 = vrot.slane %v15137_v15, %v11602_v8  ;;  %7058 = vmatprep.subr.bf16.mxu1 %v10975_v17  ;;  %v10976_v17 = vld [vmem:[#allocation7 + $0x40] ss:$8 sps:$4 sm:$0xff]  }
 0x145   : > { %15134 = vst [vmem:[#allocation24_spill] sm:$0xff] %v11956_v41  ;;  %v1663_v61 = vrot.slane %v1661_v58, 1  ;;  %v11972_v23 = vsel %vm1729_vm0, %v1742_v40, %v11956_v41  ;;  %v1922_v1 = vcombine.low %v15139_v43, %v1905_v0  ;;  %v15140_v31 = vcombine.low %v11785_v45, %v11793_v60 }
 0x146   : > { %15136 = vst [vmem:[#allocation25_spill] sm:$0xff] %v11964_v48  ;;  %15138 = vst [vmem:[#allocation26_spill] sm:$0xff] %v11972_v23  ;;  %v11981_v46 = vrot.slane %v1673_v34, 1  ;;  %v11985_v57 = vsel %vm1729_vm0, %v1745_v16, %v11964_v48  ;;  %4223 = vmatpush1.bf16.msra.mxu0 %v10835_v56  ;;  %v1680_v0 = vshrl.u32 %v1143_v14, 16  ;;  %v11991_v58 = vadd.f32 %v874_v54, %v760_v24  ;;  %v10843_v56 = vld [vmem:[#allocation7 + $0x224] ss:$8 sps:$4 sm:$0xff]   ;;  %v709_v48 = vpop.permute.xlu0 %708 }
 0x147   : > { %v1997_v20 = vrot.slane %v15140_v31, %v11602_v8  ;;  %15141 = vst [vmem:[#allocation27_spill] sm:$0xff] %v11985_v57  ;;  %v11994_v15 = vmul.f32 %v11546_v51, %v713_v2  ;;  %7059 = vmatpush1.bf16.msra.mxu1 %v10976_v17  ;;  %v11997_v16 = vor.u32 %v1677_v18, %v1663_v61  ;;  %v10977_v18 = vld [vmem:[#allocation7 + $0x34] ss:$8 sps:$4 sm:$0xff]  }
 0x148   : > { %v11999_v43 = vadd.f32 %v871_v29, %v757_v39  ;;  %v1937_v31 = vrot.slane %v1922_v1, %v11602_v8  ;;  %4224 = vmatprep.subr.bf16.mxu0 %v10840_v62  ;;  %v12004_v24 = vor.u32 %v1680_v0, %v11981_v46  ;;  %v12009_v54 = vrot.slane %v11820_v44, %v11602_v8  ;;  %v10841_v0 = vld [vmem:[#allocation7 + $0x220] ss:$8 sps:$4 sm:$0xff]  }
 0x149   : > { %v2019_v34 = vcombine.low %v11754_v47, %v1997_v20  ;;  %v2020_v40 = vcombine.high %v11754_v47, %v1997_v20  ;;  %v9986_v17 = vcombine.low %v1930_v25, %v1944_v52  ;;  %7060 = vmatprep.subr.bf16.mxu1 %v10977_v18  ;;  %v15143_v39 = vmax.f32 %v11910_v27, 0.0 }
 0x14a   : > { %15142 = vst [vmem:[#allocation28_spill] sm:$0xff] %v12009_v54  ;;  %v15144_v29 = vmax.f32 %v11917_v53, 0.0  ;;  %v12017_v20 = vadd.f32 %v872_v30, %v758_v37  ;;  %v12020_v47 = vmul.f32 %v11475_v12, %v713_v2  ;;  %v9988_v62 = vcombine.high %v1930_v25, %v1944_v52  ;;  %4225 = vmatpush1.bf16.msra.mxu0 %v10838_v36  ;;  %v10978_v53 = vld [vmem:[#allocation7 + $0x30] ss:$8 sps:$4 sm:$0xff]  }
 0x14b   : > { %v2031_v14 = vrot.slane %v2019_v34, %v11602_v8  ;;  %v12023_v34 = vrot.slane %v2020_v40, %v11602_v8  ;;  %v2770_v27 = vrot.slane %v9986_v17, %v11602_v8  ;;  %7061 = vmatpush1.bf16.msra.mxu1 %v10978_v53  ;;  %v12029_v37 = vsel %vm1592_vm1, %v11933_v7, %v1663_v61  ;;  %v10979_v7 = vld [vmem:[#allocation7 + $0x24] ss:$8 sps:$4 sm:$0xff]  }
 0x14c   : > { %v12015_v1 = vpack.c.bf16 %v15144_v29, %v15143_v39  ;;  %v15146_v30 = vmax.f32 %v11921_v22, 0.0  ;;  %v15147_v52 = vmax.f32 %v11927_v35, 0.0  ;;  %v2784_v2 = vrot.slane %v9988_v62, %v11602_v8  ;;  %4226 = vmatprep.subr.bf16.mxu0 %v10843_v56  ;;  %7062 = vmatprep.subr.bf16.mxu1 %v10979_v7  ;;  %v828_v56 = vpop.permute.xlu1 %827  ;;  %v10844_v29 = vld [vmem:[#allocation7 + $0x210] ss:$8 sps:$4 sm:$0xff]   ;;  %v10981_v7 = vld [vmem:[#allocation7 + $0x14] ss:$8 sps:$4 sm:$0xff]  }
 0x14d   : > { %15145 = vst [vmem:[#allocation29_spill] sm:$0xff] %v12023_v34  ;;  %v2082_v21 = vcombine.high %v2031_v14, %v12009_v54  ;;  %v9990_v18 = vcombine.low %v1937_v31, %v2031_v14  ;;  %v15148_v40 = vcombine.high %v11785_v45, %v11793_v60  ;;  %v10846_v31 = vld [vmem:[#allocation7 + $0x214] ss:$8 sps:$4 sm:$0xff]   ;;  %v2023_v22 = vcombine.high %v11820_v44, %v11820_v44  ;;  %v10995_v54 = vld [vmem:[#allocation7 + $0xa4] ss:$8 sps:$4 sm:$0xff]  }
 0x14e   : > { %v12035_v25 = vpack.c.bf16 %v15147_v52, %v15146_v30  ;;  %v2024_v35 = vcombine.high %v11823_v63, %v11823_v63  ;;  %v2821_v39 = vcombine.high %v2770_v27, %v2784_v2  ;;  %v12051_v45 = vmul.f32 %v11546_v51, %v709_v48  ;;  %4227 = vmatpush1.bf16.msra.mxu0 %v10841_v0  ;;  %v10980_v30 = vld [vmem:[#allocation7 + $0x20] ss:$8 sps:$4 sm:$0xff]  }
 0x14f   : > { %v2004_v36 = vrot.slane %v15148_v40, %v11602_v8  ;;  %v9992_v61 = vcombine.low %v12023_v34, %v2082_v21  ;;  %v2798_v17 = vrot.slane %v9990_v18, %v11602_v8  ;;  %v2820_v60 = vcombine.low %v2770_v27, %v2784_v2  ;;  %7063 = vmatpush1.bf16.msra.mxu1 %v10980_v30  ;;  %v10849_v2 = vld [vmem:[#allocation7 + $0x204] ss:$8 sps:$4 sm:$0xff]   ;;  %v10982_v30 = vld [vmem:[#allocation7 + $0x10] ss:$8 sps:$4 sm:$0xff]  }
 0x150   : > { %v12058_v53 = vrot.slane %v11823_v63, %v11602_v8  ;;  %v2848_v18 = vrot.slane %v2821_v39, %v11602_v8  ;;  %v12063_v27 = vrot.slane %v2023_v22, %v11602_v8  ;;  %v12066_v0 = vrot.slane %v2024_v35, %v11602_v8  ;;  %4228 = vmatprep.subr.bf16.mxu0 %v10846_v31  ;;  %v10847_v39 = vld [vmem:[#allocation7 + $0x200] ss:$8 sps:$4 sm:$0xff]  }
 0x151   : > { %v2812_v21 = vrot.slane %v9992_v61, %v11602_v8  ;;  %v2021_v62 = vcombine.low %v11749_v33, %v2004_v36  ;;  %v2022_v44 = vcombine.high %v11749_v33, %v2004_v36  ;;  %v2834_v52 = vrot.slane %v2820_v60, %v11602_v8  ;;  %v824_v61 = vpop.permute.xlu0 %823  ;;  %7064 = vmatprep.subr.bf16.mxu1 %v10981_v7 }
 0x152   : > { %15149 = vst [vmem:[#allocation30_spill] sm:$0xff] %v12058_v53  ;;  %15150 = vst [vmem:[#allocation31_spill] sm:$0xff] %v12063_v27  ;;  %v2086_v22 = vcombine.high %v12023_v34, %v12063_v27  ;;  %v12078_v35 = vrot.slane %v11828_v32, %v11602_v8  ;;  %v877_v31 = vmul.f32 %v11543_v49, %v828_v56  ;;  %4229 = vmatpush1.bf16.msra.mxu0 %v10844_v29 }
 0x153   : > { %15151 = vst [vmem:[#allocation32_spill] sm:$0xff] %v12066_v0  ;;  %v2825_v40 = vcombine.high %v2798_v17, %v2812_v21  ;;  %v2824_v33 = vcombine.low %v2798_v17, %v2812_v21  ;;  %v12069_v36 = vrot.slane %v2021_v62, %v11602_v8  ;;  %v12072_v63 = vrot.slane %v2022_v44, %v11602_v8 }
 0x154   : > { %15154 = vst [vmem:[#allocation35_spill] sm:$0xff] %v12078_v35  ;;  %v878_v17 = vmul.f32 %v11486_v19, %v828_v56  ;;  %7065 = vmatpush1.bf16.msra.mxu1 %v10982_v30  ;;  %v12089_v7 = vmul.f32 %v11475_v12, %v709_v48  ;;  %v2184_v56 = vcombine.high %v11889_v50, %v12078_v35 }
 0x155   : > { %15152 = vst [vmem:[#allocation33_spill] sm:$0xff] %v12069_v36  ;;  %15153 = vst [vmem:[#allocation34_spill] sm:$0xff] %v12072_v63  ;;  %v2876_v60 = vrot.slane %v2825_v40, %v11602_v8  ;;  %v2862_v21 = vrot.slane %v2824_v33, %v11602_v8  ;;  %v2084_v62 = vcombine.high %v12069_v36, %v12058_v53  ;;  %v966_v33 = vpop.permute.xlu1 %965  ;;  %4230 = vmatprep.subr.bf16.mxu0 %v10849_v2  ;;  %v10850_v2 = vld [vmem:[#allocation7 + $0x2f0] ss:$8 sps:$4 sm:$0xff]  }
 0x156   : > { %v2088_v44 = vcombine.high %v12072_v63, %v12066_v0  ;;  %v9994_v29 = vcombine.low %v2086_v22, %v12069_v36  ;;  %v12095_v40 = vadd.f32 %v877_v31, %v11994_v15  ;;  %v10983_v0 = vld [vmem:[#allocation7 + $0x4] ss:$8 sps:$4 sm:$0xff]   ;;  %v10000_v53 = vcombine.low %v11904_v28, %v2184_v56  ;;  %4231 = vmatpush1.bf16.msra.mxu0 %v10847_v39  ;;  %v10852_v22 = vld [vmem:[#allocation7 + $0x2f4] ss:$8 sps:$4 sm:$0xff]  }
 0x157   : > { %v2887_v14 = vcombine.low %v2848_v18, %v2876_v60  ;;  %v2888_v41 = vcombine.high %v2848_v18, %v2876_v60  ;;  %v2884_v23 = vcombine.low %v2834_v52, %v2862_v21  ;;  %v2885_v57 = vcombine.high %v2834_v52, %v2862_v21  ;;  %7066 = vmatprep.subr.bf16.mxu1 %v10983_v0  ;;  %v962_v0 = vpop.permute.xlu0 %961  ;;  %v10984_v21 = vld [vmem:[#allocation7] ss:$8 sps:$4 sm:$0xff]  }
 0x158   : > { %v9996_v30 = vcombine.low %v12072_v63, %v2084_v62  ;;  %v9998_v48 = vcombine.low %v2088_v44, %v11889_v50  ;;  %v2904_v35 = vrot.slane %v9994_v29, %v11602_v8  ;;  %v12102_v15 = vadd.f32 %v878_v17, %v12020_v47  ;;  %7067 = vmatpush1.bf16.msra.mxu1 %v10984_v21  ;;  %v10855_v62 = vld [vmem:[#allocation7 + $0x2e4] ss:$8 sps:$4 sm:$0xff]   ;;  %v11001_v50 = vld [vmem:[#allocation7 + $0x80] ss:$8 sps:$4 sm:$0xff]  }
 0x159   : > { %4056 = vmatprep.mubr.bf16.mxu0 %v2887_v14  ;;  %4157 = vmatprep.mubr.bf16.mxu1 %v2888_v41  ;;  %v875_v18 = vmul.f32 %v11543_v49, %v824_v61  ;;  %v1019_v52 = vmul.f32 %v11565_v3, %v966_v33  ;;  %v2946_v39 = vrot.slane %v10000_v53, %v11602_v8  ;;  %v974_v29 = vpop.permute.xlu1 %973 }
 0x15a   : > { %4057 = vmatmul.mubr.bf16.gmra.mxu0 %v2884_v23  ;;  %4158 = vmatmul.mubr.bf16.gmra.mxu1 %v2885_v57  ;;  %v2918_v31 = vrot.slane %v9996_v30, %v11602_v8  ;;  %v2932_v60 = vrot.slane %v9998_v48, %v11602_v8  ;;  %v876_v14 = vmul.f32 %v11486_v19, %v824_v61 }
 0x15b   : > { %v12111_v41 = vadd.f32 %v875_v18, %v12051_v45  ;;  %v1020_v47 = vmul.f32 %v11567_v4, %v966_v33  ;;  %v1051_v17 = vadd.f32 %v1019_v52, %v11958_v10  ;;  %v1017_v44 = vmul.f32 %v11565_v3, %v962_v0  ;;  %4232 = vmatprep.subr.bf16.mxu0 %v10852_v22  ;;  %v10853_v10 = vld [vmem:[#allocation7 + $0x2e0] ss:$8 sps:$4 sm:$0xff]  }
 0x15c   : > { %v2955_v23 = vcombine.high %v2904_v35, %v2918_v31  ;;  %v2959_v57 = vcombine.high %v2932_v60, %v2946_v39  ;;  %v1018_v56 = vmul.f32 %v11567_v4, %v962_v0  ;;  %v2954_v61 = vcombine.low %v2904_v35, %v2918_v31  ;;  %4233 = vmatpush2.bf16.msra.mxu0 %v10850_v2  ;;  %v10985_v0 = vld [vmem:[#allocation7 + $0xf4] ss:$8 sps:$4 sm:$0xff]   ;;  %v970_v2 = vpop.permute.xlu0 %969  ;;  %v10986_v31 = vld [vmem:[#allocation7 + $0xf0] ss:$8 sps:$4 sm:$0xff]  }
 0x15d   : > { %v1052_v53 = vadd.f32 %v1020_v47, %v11991_v58  ;;  %v12119_v45 = vadd.f32 %v11570_v5, %v1051_v17  ;;  %v2958_v33 = vcombine.low %v2932_v60, %v2946_v39  ;;  %v1049_v18 = vadd.f32 %v1017_v44, %v11999_v43  ;;  %7068 = vmatprep.subr.bf16.mxu1 %v10985_v0  ;;  %v10987_v17 = vld [vmem:[#allocation7 + $0xe4] ss:$8 sps:$4 sm:$0xff]  }
 0x15e   : > { %v2982_v30 = vrot.slane %v2955_v23, %v11602_v8  ;;  %v3010_v48 = vrot.slane %v2959_v57, %v11602_v8  ;;  %v1050_v52 = vadd.f32 %v1018_v56, %v12017_v20  ;;  %v2968_v47 = vrot.slane %v2954_v61, %v11602_v8  ;;  %7069 = vmatpush2.bf16.msra.mxu1 %v10986_v31  ;;  %v10858_v56 = vld [vmem:[#allocation7 + $0x2d4] ss:$8 sps:$4 sm:$0xff]  }
 0x15f   : > { %v1095_v22 = vadd.f32 %v11573_v9, %v1052_v53  ;;  %v1126_v58 = vmax.f32 %v12119_v45, 0.0  ;;  %v2996_v35 = vrot.slane %v2958_v33, %v11602_v8  ;;  %4234 = vmatprep.subr.bf16.mxu0 %v10855_v62  ;;  %v1092_v43 = vadd.f32 %v11570_v5, %v1049_v18  ;;  %7070 = vmatprep.subr.bf16.mxu1 %v10987_v17  ;;  %v12134_v33 = vpop.permute.xlu1 %1157 }
 0x160   : > { %v3021_v60 = vcombine.low %v2982_v30, %v3010_v48  ;;  %v3022_v39 = vcombine.high %v2982_v30, %v3010_v48  ;;  %v1093_v20 = vadd.f32 %v11573_v9, %v1050_v52  ;;  %v1023_v44 = vmul.f32 %v11565_v3, %v974_v29  ;;  %4235 = vmatpush2.bf16.msra.mxu0 %v10853_v10  ;;  %v10856_v30 = vld [vmem:[#allocation7 + $0x2d0] ss:$8 sps:$4 sm:$0xff]   ;;  %v10861_v52 = vld [vmem:[#allocation7 + $0x2c4] ss:$8 sps:$4 sm:$0xff]   ;;  %v12155_v31 = vpop.permute.xlu0 %1153 }
 0x161   : > { %v1127_v21 = vmax.f32 %v1095_v22, 0.0  ;;  %v3018_v23 = vcombine.low %v2968_v47, %v2996_v35  ;;  %v3019_v57 = vcombine.high %v2968_v47, %v2996_v35  ;;  %v1124_v53 = vmax.f32 %v1092_v43, 0.0  ;;  %v10988_v35 = vld [vmem:[#allocation7 + $0xe0] ss:$8 sps:$4 sm:$0xff]   ;;  %4236 = vmatprep.subr.bf16.mxu0 %v10858_v56 }
 0x162   : > { %4066 = vmatprep.mubr.bf16.mxu0 %v3021_v60  ;;  %4167 = vmatprep.mubr.bf16.mxu1 %v3022_v39  ;;  %v1125_v45 = vmax.f32 %v1093_v20, 0.0  ;;  %v1024_v62 = vmul.f32 %v11567_v4, %v974_v29  ;;  %v1021_v61 = vmul.f32 %v11565_v3, %v970_v2  ;;  %v908_v48 = vadd.f32 %v876_v14, %v12089_v7  ;;  %v10989_v39 = vld [vmem:[#allocation7 + $0xd4] ss:$8 sps:$4 sm:$0xff]  }
 0x163   : > { %4067 = vmatmul.mubr.bf16.gmra.mxu0 %v3018_v23  ;;  %4168 = vmatmul.mubr.bf16.gmra.mxu1 %v3019_v57  ;;  %v1055_v18 = vadd.f32 %v1023_v44, %v12095_v40  ;;  %v1022_v10 = vmul.f32 %v11567_v4, %v970_v2  ;;  %v12142_v0 = vsel %vm1592_vm1, %v11935_v11, %v11981_v46  ;;  %v10864_v57 = vld [vmem:[#allocation7 + $0x2b4] ss:$8 sps:$4 sm:$0xff]   ;;  %v10994_v44 = vld [vmem:[#allocation7 + $0xb0] ss:$8 sps:$4 sm:$0xff]  }
 0x164   : > { %v12144_v29 = vpack.c.bf16 %v1126_v58, %v1124_v53  ;;  %v12146_v22 = vpack.c.bf16 %v1127_v21, %v1125_v45  ;;  %v1056_v47 = vadd.f32 %v1024_v62, %v12102_v15  ;;  %7071 = vmatpush2.bf16.msra.mxu1 %v10988_v35  ;;  %v12151_v7 = vrot.slane %v11907_v13, %v11602_v8  ;;  %v10862_v35 = vld [vmem:[#allocation7 + $0x2b0] ss:$8 sps:$4 sm:$0xff]  }
 0x165   : > { %v1098_v40 = vadd.f32 %v11570_v5, %v1055_v18  ;;  %v1053_v14 = vadd.f32 %v1021_v61, %v12111_v41  ;;  %v1054_v2 = vadd.f32 %v1022_v10, %v908_v48  ;;  %v15155_v11 = vcombine.low %v11997_v16, %v12004_v24  ;;  %4237 = vmatpush2.bf16.msra.mxu0 %v10856_v30  ;;  %v10859_v41 = vld [vmem:[#allocation7 + $0x2c0] ss:$8 sps:$4 sm:$0xff]   ;;  %v1263_v30 = vpop.permute.xlu1 %1262  ;;  %v10990_v48 = vld [vmem:[#allocation7 + $0xd0] ss:$8 sps:$4 sm:$0xff]  }
 0x166   : > { %v1686_v13 = vshll.u32 %v12144_v29, 16  ;;  %v1698_v60 = vshll.u32 %v12146_v22, 16  ;;  %7072 = vmatprep.subr.bf16.mxu1 %v10989_v39  ;;  %v12171_v20 = vrot.slane %v12035_v25, %v11602_v8  ;;  %v9975_v17 = vpack.c.bf16 %v1127_v21, %v1126_v58  ;;  %4238 = vmatprep.subr.bf16.mxu0 %v10861_v52  ;;  %v10991_v21 = vld [vmem:[#allocation7 + $0xc4] ss:$8 sps:$4 sm:$0xff]  }
 0x167   : > { %v12163_v15 = vrot.slane %v15155_v11, %v11602_v8  ;;  %v1099_v23 = vadd.f32 %v11573_v9, %v1056_v47  ;;  %v9974_v56 = vpack.c.bf16 %v1125_v45, %v1124_v53  ;;  %v1130_v62 = vmax.f32 %v1098_v40, 0.0  ;;  %v10867_v39 = vld [vmem:[#allocation7 + $0x2a4] ss:$8 sps:$4 sm:$0xff]  }
 0x168   : > { %v1096_v61 = vadd.f32 %v11570_v5, %v1053_v14  ;;  %7073 = vmatpush2.bf16.msra.mxu1 %v10990_v48  ;;  %v1688_v25 = vrot.slane %v1686_v13, 1  ;;  %v1097_v58 = vadd.f32 %v11573_v9, %v1054_v2  ;;  %v1700_v45 = vrot.slane %v1698_v60, 1  ;;  %v1259_v13 = vpop.permute.xlu0 %1258 }
 0x169   : > { %v1131_v10 = vmax.f32 %v1099_v23, 0.0  ;;  %7074 = vmatprep.subr.bf16.mxu1 %v10991_v21  ;;  %4239 = vmatpush2.bf16.msra.mxu0 %v10859_v41  ;;  %v12185_v40 = vrot.slane %v9975_v17, %v11602_v8  ;;  %v1684_v14 = vshrl.u32 %v12144_v29, 16  ;;  %v1696_v11 = vshrl.u32 %v12146_v22, 16  ;;  %v12204_v52 = vpop.permute.xlu1 %1165 }
 0x16a   : > { %v1128_v47 = vmax.f32 %v1096_v61, 0.0  ;;  %v1129_v2 = vmax.f32 %v1097_v58, 0.0  ;;  %4240 = vmatprep.subr.bf16.mxu0 %v10864_v57  ;;  %v1748_v23 = vrot.slane %v12144_v29, 1  ;;  %v1751_v48 = vrot.slane %v12146_v22, 1  ;;  %v10992_v61 = vld [vmem:[#allocation7 + $0xc0] ss:$8 sps:$4 sm:$0xff]  }
 0x16b   : > { %v12192_v60 = vrot.slane %v9974_v56, %v11602_v8  ;;  %v1689_v17 = vor.u32 %v1688_v25, %v1684_v14  ;;  %v1226_v53 = vmul.f32 %v12134_v33, %v11546_v51  ;;  %v1227_v58 = vmul.f32 %v12134_v33, %v11475_v12  ;;  %v10993_v57 = vld [vmem:[#allocation7 + $0xb4] ss:$8 sps:$4 sm:$0xff]   ;;  %v10865_v25 = vld [vmem:[#allocation7 + $0x2a0] ss:$8 sps:$4 sm:$0xff]  }
 0x16c   : > { %v1146_v41 = vpack.c.bf16 %v1130_v62, %v1128_v47  ;;  %7075 = vmatpush2.bf16.msra.mxu1 %v10992_v61  ;;  %v1147_v21 = vpack.c.bf16 %v1131_v10, %v1129_v2  ;;  %v12198_v46 = vor.u32 %v1700_v45, %v1696_v11  ;;  %v12200_v29 = vpack.c.bf16 %v1131_v10, %v1130_v62  ;;  %v10870_v45 = vld [vmem:[#allocation7 + $0x294] ss:$8 sps:$4 sm:$0xff]   ;;  %v1162_v36 = vpop.permute.xlu0 %1161 }
 0x16d   : > { %7076 = vmatprep.subr.bf16.mxu1 %v10993_v57  ;;  %4241 = vmatpush2.bf16.msra.mxu0 %v10862_v35  ;;  %v1224_v18 = vmul.f32 %v12155_v31, %v11546_v51  ;;  %v1322_v33 = vmul.f32 %v1263_v30, %v11543_v49  ;;  %v9976_v10 = vpack.c.bf16 %v1129_v2, %v1128_v47  ;;  %v10868_v47 = vld [vmem:[#allocation7 + $0x290] ss:$8 sps:$4 sm:$0xff]  }
 0x16e   : > { %v1691_v22 = vshll.u32 %v1146_v41, 16  ;;  %v12202_v56 = vrot.slane %v1146_v41, 1  ;;  %v1703_v14 = vshll.u32 %v1147_v21, 16  ;;  %v12206_v61 = vrot.slane %v1147_v21, 1  ;;  %4242 = vmatprep.subr.bf16.mxu0 %v10867_v39 }
 0x16f   : > { %v1707_v62 = vshrl.u32 %v1146_v41, 16  ;;  %v1323_v57 = vmul.f32 %v1263_v30, %v11486_v19  ;;  %v1710_v35 = vshrl.u32 %v1147_v21, 16  ;;  %v1320_v63 = vmul.f32 %v1259_v13, %v11543_v49 }
 0x170   : > { %15156 = vst [vmem:[#allocation36_spill] sm:$0xff] %v12202_v56  ;;  %15157 = vst [vmem:[#allocation37_spill] sm:$0xff] %v12206_v61  ;;  %v1693_v11 = vrot.slane %v1691_v22, 1  ;;  %7077 = vmatpush2.bf16.msra.mxu1 %v10994_v44  ;;  %v12212_v43 = vrot.slane %v1703_v14, 1  ;;  %v1225_v30 = vmul.f32 %v12155_v31, %v11475_v12  ;;  %v1321_v44 = vmul.f32 %v1259_v13, %v11486_v19 }
 0x171   : > { %7078 = vmatprep.subr.bf16.mxu1 %v10995_v54  ;;  %4243 = vmatpush2.bf16.msra.mxu0 %v10865_v25  ;;  %v12227_v21 = vadd.f32 %v1322_v33, %v1226_v53  ;;  %v15158_v54 = vcombine.high %v11775_v38, %v11777_v26  ;;  %v2140_v14 = vcombine.high %v11828_v32, %v11828_v32  ;;  %v1271_v38 = vpop.permute.xlu1 %1270  ;;  %v10996_v26 = vld [vmem:[#allocation7 + $0xa0] ss:$8 sps:$4 sm:$0xff]  }
 0x172   : > { %v12219_v41 = vor.u32 %v1707_v62, %v1693_v11  ;;  %v12225_v2 = vor.u32 %v1710_v35, %v12212_v43  ;;  %4244 = vmatprep.subr.bf16.mxu0 %v10870_v45  ;;  %v10873_v62 = vld [vmem:[#allocation7 + $0x284] ss:$8 sps:$4 sm:$0xff]   ;;  %v12237_v31 = vsel %vm1729_vm0, %v1748_v23, %v12202_v56  ;;  %v12241_v13 = vsel %vm1729_vm0, %v1751_v48, %v12206_v61  ;;  %v10997_v35 = vld [vmem:[#allocation7 + $0x94] ss:$8 sps:$4 sm:$0xff]  }
 0x173   : > { %v2122_v22 = vrot.slane %v15158_v54, %v11602_v8  ;;  %v12244_v53 = vrot.slane %v9976_v10, %v11602_v8  ;;  %v12246_v25 = vadd.f32 %v1323_v57, %v1227_v58  ;;  %v12250_v33 = vadd.f32 %v1320_v63, %v1224_v18  ;;  %v10871_v54 = vld [vmem:[#allocation7 + $0x280] ss:$8 sps:$4 sm:$0xff]  }
 0x174   : > { %7079 = vmatpush2.bf16.msra.mxu1 %v10996_v26  ;;  %v2525_v32 = vcombine.low %v12219_v41, %v12225_v2  ;;  %v15159_v23 = vrot.slane %v11756_v6, %v11602_v8  ;;  %v12256_v48 = vrot.slane %v2140_v14, %v11602_v8  ;;  %v12259_v58 = vsel %vm1592_vm1, %v1689_v17, %v1693_v11  ;;  %v10998_v26 = vld [vmem:[#allocation7 + $0x90] ss:$8 sps:$4 sm:$0xff]  }
 0x175   : > { %7080 = vmatprep.subr.bf16.mxu1 %v10997_v35  ;;  %v12261_v10 = vadd.f32 %v1321_v44, %v1225_v30  ;;  %v15161_v57 = vcombine.low %v12029_v37, %v12142_v0  ;;  %v15162_v6 = vcombine.high %v12029_v37, %v12142_v0  ;;  %4245 = vmatpush2.bf16.msra.mxu0 %v10868_v47  ;;  %v1267_v44 = vpop.permute.xlu0 %1266 }
 0x176   : > { %v2139_v45 = vcombine.low %v15159_v23, %v2122_v22  ;;  %15160 = vst [vmem:[#allocation38_spill] sm:$0xff] %v12256_v48  ;;  %v2187_v30 = vcombine.high %v11904_v28, %v12256_v48  ;;  %4246 = vmatprep.subr.bf16.mxu0 %v10873_v62  ;;  %v12285_v23 = vrot.slane %v2525_v32, %v11602_v8  ;;  %v11002_v22 = vld [vmem:[#allocation7 + $0x274] ss:$8 sps:$4 sm:$0xff]  }
 0x177   : > { %v2214_v63 = vrot.slane %v15161_v57, %v11602_v8  ;;  %v2221_v18 = vrot.slane %v15162_v6, %v11602_v8  ;;  %v1230_v35 = vmul.f32 %v12204_v52, %v11546_v51  ;;  %v1231_v62 = vmul.f32 %v12204_v52, %v11475_v12  ;;  %v10999_v57 = vld [vmem:[#allocation7 + $0x84] ss:$8 sps:$4 sm:$0xff]   ;;  %v1391_v6 = vpop.permute.xlu1 %1390 }
 0x178   : > { %v12276_v11 = vrot.slane %v2139_v45, %v11602_v8  ;;  %7081 = vmatpush2.bf16.msra.mxu1 %v10998_v26  ;;  %v1229_v52 = vmul.f32 %v1162_v36, %v11475_v12  ;;  %v1326_v26 = vmul.f32 %v1271_v38, %v11543_v49  ;;  %v1325_v39 = vmul.f32 %v1267_v44, %v11486_v19 }
 0x179   : > { %v2236_v14 = vcombine.low %v12151_v7, %v2214_v63  ;;  %v2237_v37 = vcombine.high %v12151_v7, %v2214_v63  ;;  %v2238_v0 = vcombine.low %v11913_v42, %v2221_v18  ;;  %v2239_v47 = vcombine.high %v11913_v42, %v2221_v18  ;;  %7082 = vmatprep.subr.bf16.mxu1 %v10999_v57  ;;  %v11000_v57 = vld [vmem:[#allocation7 + $0x174] ss:$8 sps:$4 sm:$0xff]   ;;  %v1387_v17 = vpop.permute.xlu0 %1386 }
 0x17a   : > { %15163 = vst [vmem:[#allocation39_spill] sm:$0xff] %v12276_v11  ;;  %v10002_v45 = vcombine.low %v2187_v30, %v12276_v11  ;;  %4247 = vmatpush2.bf16.msra.mxu0 %v10871_v54  ;;  %v1228_v30 = vmul.f32 %v1162_v36, %v11546_v51  ;;  %v1358_v54 = vadd.f32 %v1326_v26, %v1230_v35 }
 0x17b   : > { %v2248_v7 = vrot.slane %v2236_v14, %v11602_v8  ;;  %v12294_v63 = vrot.slane %v2238_v0, %v11602_v8  ;;  %v2262_v42 = vrot.slane %v2237_v37, %v11602_v8  ;;  %v12298_v32 = vrot.slane %v2239_v47, %v11602_v8  ;;  %7153 = vmatprep.subr.bf16.mxu0 %v11000_v57 }
 0x17c   : > { %v3038_v18 = vrot.slane %v10002_v45, %v11602_v8  ;;  %v1327_v47 = vmul.f32 %v1271_v38, %v11486_v19  ;;  %7083 = vmatpush2.bf16.msra.mxu1 %v11001_v50  ;;  %v1324_v45 = vmul.f32 %v1267_v44, %v11543_v49  ;;  %v1450_v36 = vmul.f32 %v1391_v6, %v11565_v3 }
 0x17d   : > { %v10004_v14 = vcombine.low %v2248_v7, %v2262_v42  ;;  %v10006_v0 = vcombine.high %v2248_v7, %v2262_v42  ;;  %v10008_v37 = vcombine.low %v12294_v63, %v12298_v32  ;;  %7254 = vmatprep.subr.bf16.mxu1 %v11002_v22  ;;  %v1357_v28 = vadd.f32 %v1325_v39, %v1229_v52 }
 0x17e   : > { %v1359_v11 = vadd.f32 %v1327_v47, %v1231_v62  ;;  %v1356_v38 = vadd.f32 %v1324_v45, %v1228_v30  ;;  %v1451_v50 = vmul.f32 %v1391_v6, %v11567_v4  ;;  %v1482_v35 = vadd.f32 %v1450_v36, %v12227_v21  ;;  %v1399_v30 = vpop.permute.xlu1 %1398  ;;  %v1395_v47 = vpop.permute.xlu0 %1394 }
 0x17f   : > { %v3052_v57 = vrot.slane %v10004_v14, %v11602_v8  ;;  %v3066_v7 = vrot.slane %v10006_v0, %v11602_v8  ;;  %v3080_v42 = vrot.slane %v10008_v37, %v11602_v8  ;;  %v1448_v14 = vmul.f32 %v1387_v17, %v11565_v3 }
 0x180   : > { %v1483_v27 = vadd.f32 %v1451_v50, %v12246_v25  ;;  %v1514_v22 = vadd.f32 %v1482_v35, %v11570_v5  ;;  %v1449_v0 = vmul.f32 %v1387_v17, %v11567_v4  ;;  %v12335_v50 = vsel %vm1592_vm1, %v12198_v46, %v12212_v43 }
 0x181   : > { %v3089_v26 = vcombine.high %v3038_v18, %v3052_v57  ;;  %v3093_v44 = vcombine.high %v3066_v7, %v3080_v42  ;;  %v3088_v48 = vcombine.low %v3038_v18, %v3052_v57  ;;  %v3092_v34 = vcombine.low %v3066_v7, %v3080_v42 }
 0x182   : > { %v1515_v18 = vadd.f32 %v1483_v27, %v11573_v9  ;;  %v1546_v52 = vmax.f32 %v1514_v22, 0.0  ;;  %v1480_v25 = vadd.f32 %v1448_v14, %v12250_v33  ;;  %v1481_v37 = vadd.f32 %v1449_v0, %v12261_v10 }
 0x183   : > { %v3116_v62 = vrot.slane %v3089_v26, %v11602_v8  ;;  %v3144_v39 = vrot.slane %v3093_v44, %v11602_v8  ;;  %v3102_v6 = vrot.slane %v3088_v48, %v11602_v8  ;;  %v3130_v21 = vrot.slane %v3092_v34, %v11602_v8 }
 0x184   : > { %v1547_v7 = vmax.f32 %v1515_v18, 0.0  ;;  %v1512_v42 = vadd.f32 %v1480_v25, %v11570_v5  ;;  %v1513_v48 = vadd.f32 %v1481_v37, %v11573_v9  ;;  %v1454_v34 = vmul.f32 %v1399_v30, %v11565_v3  ;;  %v1177_v25 = vpop.permute.xlu1 %1176 }
 0x185   : > { %v3155_v45 = vcombine.low %v3116_v62, %v3144_v39  ;;  %v3156_v36 = vcombine.high %v3116_v62, %v3144_v39  ;;  %v3152_v17 = vcombine.low %v3102_v6, %v3130_v21  ;;  %v3153_v57 = vcombine.high %v3102_v6, %v3130_v21 }
 0x186   : > { %v1455_v27 = vmul.f32 %v1399_v30, %v11567_v4  ;;  %v1452_v33 = vmul.f32 %v1395_v47, %v11565_v3  ;;  %v1453_v10 = vmul.f32 %v1395_v47, %v11567_v4  ;;  %v1544_v35 = vmax.f32 %v1512_v42, 0.0 }
 0x187   : > { %4076 = vmatprep.mubr.bf16.mxu0 %v3155_v45  ;;  %4177 = vmatprep.mubr.bf16.mxu1 %v3156_v36  ;;  %v1545_v26 = vmax.f32 %v1513_v48, 0.0  ;;  %v1486_v44 = vadd.f32 %v1454_v34, %v1358_v54  ;;  %v2571_v22 = vcombine.low %v12244_v53, %v12285_v23  ;;  %v2572_v6 = vcombine.high %v12244_v53, %v12285_v23 }
 0x188   : > { %4077 = vmatmul.mubr.bf16.gmra.mxu0 %v3152_v17  ;;  %4178 = vmatmul.mubr.bf16.gmra.mxu1 %v3153_v57  ;;  %v1487_v14 = vadd.f32 %v1455_v27, %v1359_v11  ;;  %v1484_v0 = vadd.f32 %v1452_v33, %v1356_v38  ;;  %v1485_v62 = vadd.f32 %v1453_v10, %v1357_v28 }
 0x189   : > { %v1576_v21 = vpack.c.bf16 %v1546_v52, %v1544_v35  ;;  %v1577_v46 = vpack.c.bf16 %v1547_v7, %v1545_v26  ;;  %v1518_v43 = vadd.f32 %v1486_v44, %v11570_v5  ;;  %v2407_v28 = vcombine.low %v12259_v58, %v12335_v50 }
 0x18a   : > { %v1519_v30 = vadd.f32 %v1487_v14, %v11573_v9  ;;  %v1516_v54 = vadd.f32 %v1484_v0, %v11570_v5  ;;  %v1517_v18 = vadd.f32 %v1485_v62, %v11573_v9  ;;  %v15164_v53 = vcombine.low %v12237_v31, %v12241_v13 }
 0x18b   : > { %v10127_v38 = vpack.c.bf16 %v1547_v7, %v1546_v52  ;;  %v15165_v37 = vcombine.high %v12237_v31, %v12241_v13  ;;  %v12366_v36 = vrot.slane %v2571_v22, %v11602_v8  ;;  %v1550_v17 = vmax.f32 %v1518_v43, 0.0  ;;  %v1173_v52 = vpop.permute.xlu0 %1172 }
 0x18c   : > { %v12355_v23 = vrot.slane %v15164_v53, %v11602_v8  ;;  %v12369_v57 = vrot.slane %v2572_v6, %v11602_v8  ;;  %v10126_v42 = vpack.c.bf16 %v1545_v26, %v1544_v35  ;;  %v1551_v48 = vmax.f32 %v1519_v30, 0.0  ;;  %v1279_v35 = vpop.permute.xlu1 %1278 }
 0x18d   : > { %v12361_v47 = vrot.slane %v15165_v37, %v11602_v8  ;;  %15166 = vst [vmem:[#allocation40_spill] sm:$0xff] %v12366_v36  ;;  %v1548_v34 = vmax.f32 %v1516_v54, 0.0  ;;  %v5115_v7 = vshll.u32 %v1576_v21, 16  ;;  %v5127_v27 = vshll.u32 %v1577_v46, 16 }
 0x18e   : > { %15167 = vst [vmem:[#allocation41_spill] sm:$0xff] %v12369_v57  ;;  %v1549_v33 = vmax.f32 %v1517_v18, 0.0  ;;  %v1234_v31 = vmul.f32 %v1177_v25, %v11546_v51  ;;  %v12373_v13 = vrot.slane %v10127_v38, %v11602_v8  ;;  %v5113_v10 = vshrl.u32 %v1576_v21, 16 }
 0x18f   : > { %v12375_v44 = vpack.c.bf16 %v1551_v48, %v1550_v17  ;;  %v1578_v22 = vpack.c.bf16 %v1550_v17, %v1548_v34  ;;  %v5125_v14 = vshrl.u32 %v1577_v46, 16  ;;  %v5248_v0 = vrot.slane %v1576_v21, 1 }
 0x190   : > { %v1579_v62 = vpack.c.bf16 %v1551_v48, %v1549_v33  ;;  %v12377_v6 = vpack.c.bf16 %v1549_v33, %v1548_v34  ;;  %v5251_v26 = vrot.slane %v1577_v46, 1  ;;  %v12380_v43 = vrot.slane %v10126_v42, %v11602_v8  ;;  %v1275_v48 = vpop.permute.xlu0 %1274 }
 0x191   : > { %v5120_v30 = vshll.u32 %v1578_v22, 16  ;;  %v12382_v54 = vrot.slane %v1578_v22, 1  ;;  %v5117_v18 = vrot.slane %v5115_v7, 1  ;;  %v5129_v53 = vrot.slane %v5127_v27, 1 }
 0x192   : > { %v5132_v38 = vshll.u32 %v1579_v62, 16  ;;  %v12384_v37 = vrot.slane %v1579_v62, 1  ;;  %v1235_v17 = vmul.f32 %v1177_v25, %v11475_v12  ;;  %v1330_v46 = vmul.f32 %v1279_v35, %v11543_v49 }
 0x193   : > { %15168 = vst [vmem:[#allocation42_spill] sm:$0xff] %v12382_v54  ;;  %v5122_v39 = vrot.slane %v5120_v30, 1  ;;  %v12388_v21 = vsel %vm1729_vm0, %v5248_v0, %v12382_v54  ;;  %v5136_v33 = vshrl.u32 %v1578_v22, 16  ;;  %v5139_v30 = vshrl.u32 %v1579_v62, 16 }
 0x194   : > { %15169 = vst [vmem:[#allocation43_spill] sm:$0xff] %v12384_v37  ;;  %15170 = vst [vmem:[#allocation44_spill] sm:$0xff] %v12388_v21  ;;  %v5134_v42 = vrot.slane %v5132_v38, 1  ;;  %v12394_v34 = vsel %vm1729_vm0, %v5251_v26, %v12384_v37  ;;  %v1232_v0 = vmul.f32 %v1173_v52, %v11546_v51  ;;  %v1331_v25 = vmul.f32 %v1279_v35, %v11486_v19 }
 0x195   : > { %15171 = vst [vmem:[#allocation45_spill] sm:$0xff] %v12394_v34  ;;  %v1328_v45 = vmul.f32 %v1275_v48, %v11543_v49  ;;  %v1329_v38 = vmul.f32 %v1275_v48, %v11486_v19  ;;  %v15172_v26 = vcombine.high %v11997_v16, %v12004_v24  ;;  %v15173_v7 = vcombine.low %v12171_v20, %v12163_v15 }
 0x196   : > { %v5118_v22 = vor.u32 %v5117_v18, %v5113_v10  ;;  %v5130_v62 = vor.u32 %v5129_v53, %v5125_v14  ;;  %v1233_v37 = vmul.f32 %v1173_v52, %v11475_v12  ;;  %v12413_v54 = vadd.f32 %v1330_v46, %v1234_v31 }
 0x197   : > { %v2339_v11 = vrot.slane %v15172_v26, %v11602_v8  ;;  %v2364_v27 = vrot.slane %v15173_v7, %v11602_v8  ;;  %v12415_v35 = vor.u32 %v5136_v33, %v5122_v39  ;;  %v12417_v21 = vor.u32 %v5139_v30, %v5134_v42 }
 0x198   : > { %v15174_v48 = vrot.slane %v12015_v1, %v11602_v8  ;;  %v15175_v24 = vcombine.high %v12171_v20, %v12163_v15  ;;  %v12427_v10 = vsel %vm1592_vm1, %v5118_v22, %v5122_v39  ;;  %v12429_v14 = vadd.f32 %v1331_v25, %v1235_v17  ;;  %v1185_v15 = vpop.permute.xlu1 %1184 }
 0x199   : > { %v2431_v52 = vrot.slane %v2407_v28, %v11602_v8  ;;  %v10010_v31 = vcombine.high %v12294_v63, %v12298_v32  ;;  %v12435_v18 = vsel %vm1592_vm1, %v5130_v62, %v5134_v42  ;;  %v12437_v1 = vadd.f32 %v1328_v45, %v1232_v0 }
 0x19a   : > { %v2356_v16 = vcombine.low %v15174_v48, %v2339_v11  ;;  %v2378_v26 = vrot.slane %v15175_v24, %v11602_v8  ;;  %v12439_v11 = vadd.f32 %v1329_v38, %v1233_v37  ;;  %v15176_v28 = vcombine.high %v12259_v58, %v12335_v50 }
 0x19b   : > { %v2453_v20 = vcombine.low %v12192_v60, %v2431_v52  ;;  %v3172_v39 = vrot.slane %v10010_v31, %v11602_v8  ;;  %v2454_v63 = vcombine.high %v12192_v60, %v2431_v52  ;;  %v5392_v32 = vcombine.low %v12415_v35, %v12417_v21 }
 0x19c   : > { %v10012_v53 = vcombine.low %v2364_v27, %v2378_v26  ;;  %v2438_v17 = vrot.slane %v15176_v28, %v11602_v8  ;;  %v2371_v45 = vrot.slane %v2356_v16, %v11602_v8  ;;  %v10014_v37 = vcombine.high %v2364_v27, %v2378_v26  ;;  %v1181_v27 = vpop.permute.xlu0 %1180  ;;  %v1287_v26 = vpop.permute.xlu1 %1286 }
 0x19d   : > { %v2465_v42 = vrot.slane %v2453_v20, %v11602_v8  ;;  %v2457_v58 = vcombine.high %v12355_v23, %v12355_v23  ;;  %v1238_v60 = vmul.f32 %v1185_v15, %v11546_v51  ;;  %v2458_v30 = vcombine.high %v12361_v47, %v12361_v47 }
 0x19e   : > { %v3186_v46 = vrot.slane %v10012_v53, %v11602_v8  ;;  %v2455_v7 = vcombine.low %v12185_v40, %v2438_v17  ;;  %v2456_v33 = vcombine.high %v12185_v40, %v2438_v17  ;;  %v12461_v0 = vrot.slane %v2454_v63, %v11602_v8 }
 0x19f   : > { %v10016_v25 = vcombine.low %v2371_v45, %v2465_v42  ;;  %v12471_v40 = vrot.slane %v12355_v23, %v11602_v8  ;;  %v1239_v48 = vmul.f32 %v1185_v15, %v11475_v12  ;;  %v12476_v16 = vrot.slane %v12361_v47, %v11602_v8 }
 0x1a0   : > { %v3223_v50 = vcombine.high %v3172_v39, %v3186_v46  ;;  %15177 = vst [vmem:[#allocation46_spill] sm:$0xff] %v12461_v0  ;;  %v12464_v38 = vrot.slane %v2455_v7, %v11602_v8  ;;  %v12467_v22 = vrot.slane %v2456_v33, %v11602_v8  ;;  %v3222_v62 = vcombine.low %v3172_v39, %v3186_v46  ;;  %v1283_v7 = vpop.permute.xlu0 %1282 }
 0x1a1   : > { %v12479_v24 = vrot.slane %v2457_v58, %v11602_v8  ;;  %v3200_v52 = vrot.slane %v10014_v37, %v11602_v8  ;;  %v3214_v31 = vrot.slane %v10016_v25, %v11602_v8  ;;  %v12484_v53 = vrot.slane %v2458_v30, %v11602_v8 }
 0x1a2   : > { %15178 = vst [vmem:[#allocation47_spill] sm:$0xff] %v12467_v22  ;;  %v2516_v23 = vcombine.high %v2465_v42, %v12471_v40  ;;  %v12488_v20 = vrot.slane %v5392_v32, %v11602_v8  ;;  %v3250_v15 = vrot.slane %v3223_v50, %v11602_v8  ;;  %v2518_v47 = vcombine.high %v12464_v38, %v12476_v16 }
 0x1a3   : > { %15179 = vst [vmem:[#allocation48_spill] sm:$0xff] %v12484_v53  ;;  %v2520_v39 = vcombine.high %v12461_v0, %v12479_v24  ;;  %v3227_v28 = vcombine.high %v3200_v52, %v3214_v31  ;;  %v3226_v17 = vcombine.low %v3200_v52, %v3214_v31  ;;  %v2522_v63 = vcombine.high %v12467_v22, %v12484_v53 }
 0x1a4   : > { %v10018_v45 = vcombine.low %v12461_v0, %v2516_v23  ;;  %v3236_v37 = vrot.slane %v3222_v62, %v11602_v8  ;;  %v10022_v46 = vcombine.low %v12467_v22, %v2518_v47  ;;  %v1334_v42 = vmul.f32 %v1287_v26, %v11543_v49  ;;  %v1407_v23 = vpop.permute.xlu1 %1406  ;;  %v15209_v0 = vld [vmem:[#allocation23_spill] sm:$0xff] }
 0x1a5   : > { %v10020_v32 = vcombine.low %v2520_v39, %v12464_v38  ;;  %v3278_v33 = vrot.slane %v3227_v28, %v11602_v8  ;;  %v3264_v58 = vrot.slane %v3226_v17, %v11602_v8  ;;  %v10024_v50 = vcombine.low %v2522_v63, %v12366_v36 }
 0x1a6   : > { %v3306_v30 = vrot.slane %v10018_v45, %v11602_v8  ;;  %v3334_v52 = vrot.slane %v10022_v46, %v11602_v8  ;;  %v1236_v62 = vmul.f32 %v1181_v27, %v11546_v51  ;;  %v12510_v31 = vmul.f32 %v1181_v27, %v11475_v12 }
 0x1a7   : > { %v3320_v25 = vrot.slane %v10020_v32, %v11602_v8  ;;  %v3289_v47 = vcombine.low %v3250_v15, %v3278_v33  ;;  %v3290_v39 = vcombine.high %v3250_v15, %v3278_v33  ;;  %v3286_v34 = vcombine.low %v3236_v37, %v3264_v58  ;;  %v1403_v33 = vpop.permute.xlu0 %1402 }
 0x1a8   : > { %v3287_v28 = vcombine.high %v3236_v37, %v3264_v58  ;;  %v3348_v17 = vrot.slane %v10024_v50, %v11602_v8  ;;  %v1335_v63 = vmul.f32 %v1287_v26, %v11486_v19  ;;  %v1366_v45 = vadd.f32 %v1334_v42, %v1238_v60 }
 0x1a9   : > { %v3357_v22 = vcombine.high %v3306_v30, %v3320_v25  ;;  %4086 = vmatprep.mubr.bf16.mxu0 %v3289_v47  ;;  %4187 = vmatprep.mubr.bf16.mxu1 %v3290_v39  ;;  %v3356_v32 = vcombine.low %v3306_v30, %v3320_v25  ;;  %v1458_v46 = vmul.f32 %v1407_v23, %v11565_v3 }
 0x1aa   : > { %v1459_v53 = vmul.f32 %v1407_v23, %v11567_v4  ;;  %4087 = vmatmul.mubr.bf16.gmra.mxu0 %v3286_v34  ;;  %4188 = vmatmul.mubr.bf16.gmra.mxu1 %v3287_v28  ;;  %v3361_v27 = vcombine.high %v3334_v52, %v3348_v17  ;;  %v1332_v37 = vmul.f32 %v1283_v7, %v11543_v49  ;;  %v1415_v28 = vpop.permute.xlu1 %1414 }
 0x1ab   : > { %v3384_v15 = vrot.slane %v3357_v22, %v11602_v8  ;;  %v3360_v58 = vcombine.low %v3334_v52, %v3348_v17  ;;  %v3370_v50 = vrot.slane %v3356_v32, %v11602_v8  ;;  %v1490_v60 = vadd.f32 %v1458_v46, %v12413_v54 }
 0x1ac   : > { %v1491_v26 = vadd.f32 %v1459_v53, %v12429_v14  ;;  %v3412_v42 = vrot.slane %v3361_v27, %v11602_v8  ;;  %v1367_v30 = vadd.f32 %v1335_v63, %v1239_v48  ;;  %v15180_v34 = vcombine.high %v12219_v41, %v12225_v2 }
 0x1ad   : > { %v15181_v22 = vcombine.low %v12202_v56, %v12206_v61  ;;  %v3398_v52 = vrot.slane %v3360_v58, %v11602_v8  ;;  %v1522_v47 = vadd.f32 %v1490_v60, %v11570_v5  ;;  %v1456_v54 = vmul.f32 %v1403_v33, %v11565_v3  ;;  %v15203_v56 = vld [vmem:[#allocation33_spill] sm:$0xff] }
 0x1ae   : > { %v2556_v25 = vrot.slane %v15180_v34, %v11602_v8  ;;  %v1457_v14 = vmul.f32 %v1403_v33, %v11567_v4  ;;  %v3423_v53 = vcombine.low %v3384_v15, %v3412_v42  ;;  %v3424_v48 = vcombine.high %v3384_v15, %v3412_v42 }
 0x1af   : > { %v2563_v23 = vrot.slane %v15181_v22, %v11602_v8  ;;  %v15182_v39 = vrot.slane %v12200_v29, %v11602_v8  ;;  %v1333_v17 = vmul.f32 %v1283_v7, %v11486_v19  ;;  %v1364_v63 = vadd.f32 %v1332_v37, %v1236_v62  ;;  %v1411_v37 = vpop.permute.xlu0 %1410 }
 0x1b0   : > { %v3420_v32 = vcombine.low %v3370_v50, %v3398_v52  ;;  %v1523_v46 = vadd.f32 %v1491_v26, %v11573_v9  ;;  %4096 = vmatprep.mubr.bf16.mxu0 %v3423_v53  ;;  %4197 = vmatprep.mubr.bf16.mxu1 %v3424_v48  ;;  %v3421_v27 = vcombine.high %v3370_v50, %v3398_v52  ;;  %v1554_v60 = vmax.f32 %v1522_v47, 0.0 }
 0x1b1   : > { %v2573_v41 = vcombine.low %v15182_v39, %v2556_v25  ;;  %v2574_v2 = vcombine.high %v2563_v23, %v2563_v23  ;;  %v12540_v58 = vrot.slane %v2563_v23, %v11602_v8  ;;  %v1488_v33 = vadd.f32 %v1456_v54, %v12437_v1 }
 0x1b2   : > { %v1489_v7 = vadd.f32 %v1457_v14, %v12439_v11  ;;  %v1462_v62 = vmul.f32 %v1415_v28, %v11565_v3  ;;  %4097 = vmatmul.mubr.bf16.gmra.mxu0 %v3420_v32  ;;  %4198 = vmatmul.mubr.bf16.gmra.mxu1 %v3421_v27  ;;  %v1463_v42 = vmul.f32 %v1415_v28, %v11567_v4  ;;  %v1555_v34 = vmax.f32 %v1523_v46, 0.0 }
 0x1b3   : > { %15183 = vst [vmem:[#allocation49_spill] sm:$0xff] %v12540_v58  ;;  %v12543_v15 = vrot.slane %v2574_v2, %v11602_v8  ;;  %v12546_v29 = vrot.slane %v2573_v41, %v11602_v8  ;;  %v2618_v50 = vcombine.high %v12366_v36, %v12540_v58  ;;  %v1520_v25 = vadd.f32 %v1488_v33, %v11570_v5  ;;  %v15208_v58 = vld [vmem:[#allocation38_spill] sm:$0xff] }
 0x1b4   : > { %v1521_v1 = vadd.f32 %v1489_v7, %v11573_v9  ;;  %v1494_v11 = vadd.f32 %v1462_v62, %v1366_v45  ;;  %v1495_v52 = vadd.f32 %v1463_v42, %v1367_v30  ;;  %v1460_v47 = vmul.f32 %v1411_v37, %v11565_v3 }
 0x1b5   : > { %15184 = vst [vmem:[#allocation50_spill] sm:$0xff] %v12543_v15  ;;  %15185 = vst [vmem:[#allocation51_spill] sm:$0xff] %v12546_v29  ;;  %v2621_v26 = vcombine.high %v12369_v57, %v12543_v15  ;;  %v10026_v22 = vcombine.low %v12369_v57, %v2618_v50  ;;  %v1365_v54 = vadd.f32 %v1333_v17, %v12510_v31  ;;  %v1552_v14 = vmax.f32 %v1520_v25, 0.0 }
 0x1b6   : > { %v1553_v53 = vmax.f32 %v1521_v1, 0.0  ;;  %v1461_v48 = vmul.f32 %v1411_v37, %v11567_v4  ;;  %v1526_v2 = vadd.f32 %v1494_v11, %v11570_v5  ;;  %v1492_v45 = vadd.f32 %v1460_v47, %v1364_v63 }
 0x1b7   : > { %v10028_v23 = vcombine.low %v2621_v26, %v12546_v29  ;;  %v3436_v39 = vrot.slane %v10026_v22, %v11602_v8  ;;  %v12570_v30 = vrot.slane %v12377_v6, %v11602_v8  ;;  %v10131_v32 = vpack.c.bf16 %v1555_v34, %v1554_v60 }
 0x1b8   : > { %v1527_v31 = vadd.f32 %v1495_v52, %v11573_v9  ;;  %v1580_v46 = vpack.c.bf16 %v1554_v60, %v1552_v14  ;;  %v1493_v27 = vadd.f32 %v1461_v48, %v1365_v54  ;;  %v1524_v33 = vadd.f32 %v1492_v45, %v11570_v5 }
 0x1b9   : > { %v3450_v41 = vrot.slane %v10028_v23, %v11602_v8  ;;  %v1581_v37 = vpack.c.bf16 %v1555_v34, %v1553_v53  ;;  %v1558_v26 = vmax.f32 %v1526_v2, 0.0  ;;  %v12586_v42 = vrot.slane %v10131_v32, %v11602_v8 }
 0x1ba   : > { %v10130_v25 = vpack.c.bf16 %v1553_v53, %v1552_v14  ;;  %v1559_v1 = vmax.f32 %v1527_v31, 0.0  ;;  %v1525_v11 = vadd.f32 %v1493_v27, %v11573_v9  ;;  %v5145_v23 = vshll.u32 %v1580_v46, 16 }
 0x1bb   : > { %v3459_v17 = vcombine.high %v3436_v39, %v3450_v41  ;;  %v1556_v34 = vmax.f32 %v1524_v33, 0.0  ;;  %v3458_v52 = vcombine.low %v3436_v39, %v3450_v41  ;;  %v5143_v47 = vshrl.u32 %v1580_v46, 16 }
 0x1bc   : > { %v5155_v54 = vshrl.u32 %v1581_v37, 16  ;;  %v5157_v48 = vshll.u32 %v1581_v37, 16  ;;  %v1557_v45 = vmax.f32 %v1525_v11, 0.0  ;;  %v5254_v28 = vrot.slane %v1580_v46, 1 }
 0x1bd   : > { %v3482_v60 = vrot.slane %v3459_v17, %v11602_v8  ;;  %v1582_v17 = vpack.c.bf16 %v1558_v26, %v1556_v34  ;;  %v3468_v2 = vrot.slane %v3458_v52, %v11602_v8  ;;  %v1758_v14 = vcombine.low %v11652_v55, %v11661_v59 }
 0x1be   : > { %v5257_v53 = vrot.slane %v1581_v37, 1  ;;  %v12593_v32 = vrot.slane %v10130_v25, %v11602_v8  ;;  %v1583_v31 = vpack.c.bf16 %v1559_v1, %v1557_v45  ;;  %v1759_v39 = vcombine.high %v11652_v55, %v11661_v59  ;;  %v1192_v55 = vpop.permute.xlu0 %1191 }
 0x1bf   : > { %4106 = vmatprep.mubr.bf16.mxu0 %v3482_v60  ;;  %v3491_v22 = vcombine.high %v3482_v60, %v3482_v60  ;;  %v5147_v41 = vrot.slane %v5145_v23, 1  ;;  %v5150_v27 = vshll.u32 %v1582_v17, 16  ;;  %v12597_v33 = vrot.slane %v1582_v17, 1  ;;  %v1196_v60 = vpop.permute.xlu1 %1195 }
 0x1c0   : > { %4107 = vmatmul.mubr.bf16.gmra.mxu0 %v3468_v2  ;;  %v3490_v46 = vcombine.high %v3468_v2, %v3468_v2  ;;  %v5159_v11 = vrot.slane %v5157_v48, 1  ;;  %v5162_v52 = vshll.u32 %v1583_v31, 16  ;;  %v12601_v50 = vrot.slane %v1583_v31, 1 }
 0x1c1   : > { %4207 = vmatprep.mubr.bf16.mxu1 %v3491_v22  ;;  %15186 = vst [vmem:[#allocation52_spill] sm:$0xff] %v12597_v33  ;;  %v12599_v22 = vpack.c.bf16 %v1559_v1, %v1558_v26  ;;  %v5152_v37 = vrot.slane %v5150_v27, 1  ;;  %v5166_v25 = vshrl.u32 %v1582_v17, 16  ;;  %v10132_v6 = vpack.c.bf16 %v1557_v45, %v1556_v34 }
 0x1c2   : > { %15188 = vst [vmem:[#allocation54_spill] sm:$0xff] %v12601_v50  ;;  %4208 = vmatmul.mubr.bf16.gmra.mxu1 %v3490_v46  ;;  %v1794_v62 = vrot.slane %v1758_v14, %v11602_v8  ;;  %v5164_v59 = vrot.slane %v5162_v52, 1  ;;  %v5169_v23 = vshrl.u32 %v1583_v31, 16  ;;  %v1801_v2 = vrot.slane %v1759_v39, %v11602_v8  ;;  %v1291_v63 = vpop.permute.xlu0 %1290 }
 0x1c3   : > { %15187 = vst [vmem:[#allocation53_spill] sm:$0xff] %v12599_v22  ;;  %v12607_v48 = vor.u32 %v5166_v25, %v5152_v37  ;;  %v12611_v26 = vsel %vm1729_vm0, %v5254_v28, %v12597_v33  ;;  %v12615_v1 = vsel %vm1729_vm0, %v5257_v53, %v12601_v50  ;;  %v1242_v34 = vmul.f32 %v1196_v60, %v11546_v51  ;;  %v1295_v52 = vpop.permute.xlu1 %1294 }
 0x1c4   : > { %v5148_v45 = vor.u32 %v5147_v41, %v5143_v47  ;;  %v5160_v17 = vor.u32 %v5159_v11, %v5155_v54  ;;  %v12618_v14 = vor.u32 %v5169_v23, %v5164_v59  ;;  %v1806_v31 = vcombine.high %v1794_v62, %v1794_v62 }
 0x1c5   : > { %v5611_v27 = vcombine.low %v12597_v33, %v12601_v50  ;;  %v1243_v28 = vmul.f32 %v1196_v60, %v11475_v12  ;;  %v1240_v46 = vmul.f32 %v1192_v55, %v11546_v51  ;;  %v12632_v54 = vrot.slane %v10132_v6, %v11602_v8 }
 0x1c6   : > { %v12627_v53 = vsel %vm1592_vm1, %v5148_v45, %v5152_v37  ;;  %v1807_v41 = vcombine.high %v1801_v2, %v1801_v2  ;;  %v12635_v11 = vsel %vm1592_vm1, %v5160_v17, %v5164_v59  ;;  %v5609_v25 = vcombine.low %v12607_v48, %v12618_v14 }
 0x1c7   : > { %v1842_v60 = vrot.slane %v1794_v62, %v11602_v8  ;;  %v1856_v23 = vrot.slane %v1806_v31, %v11602_v8  ;;  %v1849_v45 = vrot.slane %v1801_v2, %v11602_v8  ;;  %v1338_v39 = vmul.f32 %v1295_v52, %v11543_v49 }
 0x1c8   : > { %v1863_v6 = vrot.slane %v1807_v41, %v11602_v8  ;;  %v12647_v59 = vrot.slane %v5611_v27, %v11602_v8  ;;  %v1339_v7 = vmul.f32 %v1295_v52, %v11486_v19  ;;  %v1336_v37 = vmul.f32 %v1291_v63, %v11543_v49 }
 0x1c9   : > { %v9979_v17 = vcombine.low %v1842_v60, %v1856_v23  ;;  %v9981_v47 = vcombine.high %v1842_v60, %v1856_v23  ;;  %v12654_v2 = vrot.slane %v5609_v25, %v11602_v8  ;;  %v1241_v27 = vmul.f32 %v1192_v55, %v11475_v12 }
 0x1ca   : > { %v9983_v31 = vcombine.low %v1849_v45, %v1863_v6  ;;  %v9985_v50 = vcombine.high %v1849_v45, %v1863_v6  ;;  %v12661_v23 = vadd.f32 %v1338_v39, %v1242_v34  ;;  %v1337_v62 = vmul.f32 %v1291_v63, %v11486_v19 }
 0x1cb   : > { %v2643_v41 = vrot.slane %v9979_v17, %v11602_v8  ;;  %v2657_v33 = vrot.slane %v9981_v47, %v11602_v8  ;;  %v12664_v22 = vadd.f32 %v1339_v7, %v1243_v28  ;;  %v15189_v25 = vcombine.low %v12427_v10, %v12435_v18 }
 0x1cc   : > { %v2671_v60 = vrot.slane %v9983_v31, %v11602_v8  ;;  %v2685_v52 = vrot.slane %v9985_v50, %v11602_v8  ;;  %v12670_v55 = vadd.f32 %v1336_v37, %v1240_v46  ;;  %v15190_v50 = vcombine.high %v12427_v10, %v12435_v18 }
 0x1cd   : > { %v2688_v45 = vcombine.low %v2643_v41, %v2657_v33  ;;  %v2689_v6 = vcombine.high %v2643_v41, %v2657_v33  ;;  %v5298_v17 = vrot.slane %v15189_v25, %v11602_v8  ;;  %v1204_v41 = vpop.permute.xlu1 %1203 }
 0x1ce   : > { %v2692_v47 = vcombine.low %v2671_v60, %v2685_v52  ;;  %v2693_v29 = vcombine.high %v2671_v60, %v2685_v52  ;;  %v5305_v34 = vrot.slane %v15190_v50, %v11602_v8  ;;  %v12684_v60 = vadd.f32 %v1337_v62, %v1241_v27  ;;  %v15191_v52 = vld [vmem:[#allocation18_spill] sm:$0xff]  ;;  %v1200_v50 = vpop.permute.xlu0 %1199 }
 0x1cf   : > { %v2721_v63 = vrot.slane %v2689_v6, %v11602_v8  ;;  %v5320_v33 = vcombine.low %v12380_v43, %v5298_v17  ;;  %v5321_v7 = vcombine.high %v12380_v43, %v5298_v17  ;;  %v2707_v39 = vrot.slane %v2688_v45, %v11602_v8  ;;  %v15192_v43 = vld [vmem:[#allocation19_spill] sm:$0xff] }
 0x1d0   : > { %v2749_v28 = vrot.slane %v2693_v29, %v11602_v8  ;;  %v5322_v31 = vcombine.low %v12373_v13, %v5305_v34  ;;  %v5323_v46 = vcombine.high %v12373_v13, %v5305_v34  ;;  %v2735_v37 = vrot.slane %v2692_v47, %v11602_v8 }
 0x1d1   : > { %v5332_v10 = vrot.slane %v5320_v33, %v11602_v8  ;;  %v5346_v18 = vrot.slane %v5321_v7, %v11602_v8  ;;  %v15193_v6 = vcombine.low %v15191_v52, %v15192_v43  ;;  %v15194_v62 = vcombine.high %v15191_v52, %v15192_v43  ;;  %v11003_v43 = vld [vmem:[#allocation7 + $0x170] ss:$8 sps:$4 sm:$0xff]  }
 0x1d2   : > { %v2755_v25 = vcombine.low %v2721_v63, %v2749_v28  ;;  %v5339_v29 = vrot.slane %v5322_v31, %v11602_v8  ;;  %v5353_v17 = vrot.slane %v5323_v46, %v11602_v8  ;;  %v2752_v13 = vcombine.low %v2707_v39, %v2735_v37  ;;  %v15195_v63 = vld [vmem:[#allocation31_spill] sm:$0xff]  ;;  %v15196_v28 = vld [vmem:[#allocation29_spill] sm:$0xff] }
 0x1d3   : > { %v1912_v45 = vrot.slane %v15193_v6, %v11602_v8  ;;  %v10142_v47 = vcombine.low %v5332_v10, %v5346_v18  ;;  %v10144_v34 = vcombine.high %v5332_v10, %v5346_v18  ;;  %v1919_v27 = vrot.slane %v15194_v62, %v11602_v8  ;;  %v1303_v62 = vpop.permute.xlu1 %1302 }
 0x1d4   : > { %4248 = vmatprep.mubr.bf16.mxu0 %v2755_v25  ;;  %v10146_v7 = vcombine.low %v5339_v29, %v5353_v17  ;;  %v10148_v57 = vcombine.high %v5339_v29, %v5353_v17  ;;  %v1246_v6 = vmul.f32 %v1204_v41, %v11546_v51  ;;  %v2085_v31 = vcombine.low %v15196_v28, %v15195_v63  ;;  %v15197_v29 = vld [vmem:[#allocation28_spill] sm:$0xff] }
 0x1d5   : > { %v1923_v33 = vcombine.high %v1912_v45, %v1912_v45  ;;  %v6154_v46 = vrot.slane %v10142_v47, %v11602_v8  ;;  %v6168_v39 = vrot.slane %v10144_v34, %v11602_v8  ;;  %4249 = vmatmul.mubr.bf16.vlgmr.msra.gmra.mxu0 %v2752_v13  ;;  %v1951_v37 = vrot.slane %v1912_v45, %v11602_v8  ;;  %v11004_v13 = vld [vmem:[#allocation7 + $0x164] ss:$8 sps:$4 sm:$0xff]  }
 0x1d6   : > { %v6182_v18 = vrot.slane %v10146_v7, %v11602_v8  ;;  %v6196_v52 = vrot.slane %v10148_v57, %v11602_v8  ;;  %7154 = vmatpush1.bf16.msra.mxu0 %v11003_v43  ;;  %v1958_v25 = vrot.slane %v1919_v27, %v11602_v8  ;;  %v9993_v17 = vcombine.high %v2085_v31, %v15197_v29  ;;  %v1299_v57 = vpop.permute.xlu0 %1298 }
 0x1d7   : > { %v1965_v10 = vrot.slane %v1923_v33, %v11602_v8  ;;  %v6204_v28 = vcombine.low %v6154_v46, %v6168_v39  ;;  %v6205_v47 = vcombine.high %v6154_v46, %v6168_v39  ;;  %7155 = vmatprep.subr.bf16.mxu0 %v11004_v13  ;;  %v1423_v13 = vpop.permute.xlu1 %1422 }
 0x1d8   : > { %v6208_v45 = vcombine.low %v6182_v18, %v6196_v52  ;;  %v6209_v61 = vcombine.high %v6182_v18, %v6196_v52  ;;  %v9991_v33 = vcombine.low %v1958_v25, %v15197_v29  ;;  %v2819_v7 = vrot.slane %v9993_v17, %v11602_v8  ;;  %v11005_v52 = vld [vmem:[#allocation7 + $0x160] ss:$8 sps:$4 sm:$0xff]  }
 0x1d9   : > { %v9987_v15 = vcombine.low %v1951_v37, %v1965_v10  ;;  %v9989_v34 = vcombine.high %v1951_v37, %v1965_v10  ;;  %v12712_v43 = vrot.slane %v6205_v47, %v11602_v8  ;;  %v12715_v27 = vrot.slane %v6204_v28, %v11602_v8  ;;  %v11006_v28 = vld [vmem:[#allocation7 + $0x154] ss:$8 sps:$4 sm:$0xff]  }
 0x1da   : > { %v12720_v39 = vrot.slane %v6209_v61, %v11602_v8  ;;  %v12723_v37 = vrot.slane %v6208_v45, %v11602_v8  ;;  %v1247_v10 = vmul.f32 %v1204_v41, %v11475_v12  ;;  %v2805_v18 = vrot.slane %v9991_v33, %v11602_v8  ;;  %7156 = vmatpush1.bf16.msra.mxu0 %v11005_v52 }
 0x1db   : > { %15198 = vst [vmem:[#allocation18_spill] sm:$0xff] %v12712_v43  ;;  %15199 = vst [vmem:[#allocation19_spill] sm:$0xff] %v12715_v27  ;;  %v2777_v31 = vrot.slane %v9987_v15, %v11602_v8  ;;  %v2791_v46 = vrot.slane %v9989_v34, %v11602_v8  ;;  %v1244_v29 = vmul.f32 %v1200_v50, %v11546_v51  ;;  %7157 = vmatprep.subr.bf16.mxu0 %v11006_v28 }
 0x1dc   : > { %15200 = vst [vmem:[#allocation31_spill] sm:$0xff] %v12720_v39  ;;  %15201 = vst [vmem:[#allocation29_spill] sm:$0xff] %v12723_v37  ;;  %v1342_v17 = vmul.f32 %v1303_v62, %v11543_v49  ;;  %v1343_v15 = vmul.f32 %v1303_v62, %v11486_v19  ;;  %v6271_v61 = vcombine.low %v12712_v43, %v12720_v39  ;;  %v1419_v39 = vpop.permute.xlu0 %1418 }
 0x1dd   : > { %v2823_v25 = vcombine.high %v2777_v31, %v2791_v46  ;;  %v6268_v47 = vcombine.low %v12715_v27, %v12723_v37  ;;  %v2827_v41 = vcombine.high %v2805_v18, %v2819_v7  ;;  %v12735_v34 = vmul.f32 %v1200_v50, %v11475_v12  ;;  %v11007_v50 = vld [vmem:[#allocation7 + $0x150] ss:$8 sps:$4 sm:$0xff]  }
 0x1de   : > { %v12738_v33 = vadd.f32 %v1342_v17, %v1246_v6  ;;  %v1340_v52 = vmul.f32 %v1299_v57, %v11543_v49  ;;  %v12742_v62 = vmul.f32 %v1299_v57, %v11486_v19  ;;  %7084 = vmatprep.mubr.bf16.mxu1 %v6271_v61  ;;  %v12745_v43 = vadd.f32 %v1343_v15, %v1247_v10  ;;  %v15202_v17 = vld [vmem:[#allocation30_spill] sm:$0xff]  ;;  %v15204_v10 = vld [vmem:[#allocation32_spill] sm:$0xff] }
 0x1df   : > { %v2855_v45 = vrot.slane %v2823_v25, %v11602_v8  ;;  %v2883_v28 = vrot.slane %v2827_v41, %v11602_v8  ;;  %v2822_v27 = vcombine.low %v2777_v31, %v2791_v46  ;;  %v2826_v37 = vcombine.low %v2805_v18, %v2819_v7  ;;  %7085 = vmatmul.mubr.bf16.vlgmr.msra.gmra.mxu1 %v6268_v47  ;;  %v15205_v15 = vld [vmem:[#allocation34_spill] sm:$0xff]  ;;  %v11008_v7 = vld [vmem:[#allocation7 + $0x144] ss:$8 sps:$4 sm:$0xff]  }
 0x1e0   : > { %7158 = vmatpush1.bf16.msra.mxu0 %v11007_v50  ;;  %v1466_v25 = vmul.f32 %v1423_v13, %v11565_v3  ;;  %v1467_v6 = vmul.f32 %v1423_v13, %v11567_v4  ;;  %v2083_v36 = vcombine.low %v15203_v56, %v15202_v17  ;;  %v2087_v31 = vcombine.low %v15205_v15, %v15204_v10  ;;  %v15206_v47 = vld [vmem:[#allocation35_spill] sm:$0xff]  ;;  %v15207_v50 = vld [vmem:[#allocation22_spill] sm:$0xff] }
 0x1e1   : > { %v2889_v57 = vcombine.low %v2855_v45, %v2883_v28  ;;  %v2841_v61 = vrot.slane %v2822_v27, %v11602_v8  ;;  %v2869_v41 = vrot.slane %v2826_v37, %v11602_v8  ;;  %7159 = vmatprep.subr.bf16.mxu0 %v11008_v7  ;;  %v2183_v13 = vcombine.low %v15207_v50, %v15206_v47  ;;  %v11009_v45 = vld [vmem:[#allocation7 + $0x270] ss:$8 sps:$4 sm:$0xff]  }
 0x1e2   : > { %v1498_v46 = vadd.f32 %v1466_v25, %v12661_v23  ;;  %v1499_v18 = vadd.f32 %v1467_v6, %v12664_v22  ;;  %v2186_v56 = vcombine.low %v15209_v0, %v15208_v58  ;;  %7255 = vmatpush1.bf16.msra.mxu1 %v11009_v45  ;;  %v9995_v37 = vcombine.high %v15195_v63, %v2083_v36  ;;  %v11010_v6 = vld [vmem:[#allocation7 + $0x140] ss:$8 sps:$4 sm:$0xff]  }
 0x1e3   : > { %4258 = vmatprep.mubr.bf16.mxu0 %v2889_v57  ;;  %v2886_v27 = vcombine.low %v2841_v61, %v2869_v41  ;;  %v9997_v28 = vcombine.high %v2087_v31, %v15202_v17  ;;  %v1464_v15 = vmul.f32 %v1419_v39, %v11565_v3  ;;  %v9999_v25 = vcombine.high %v15204_v10, %v2183_v13  ;;  %v1431_v57 = vpop.permute.xlu1 %1430  ;;  %v1427_v41 = vpop.permute.xlu0 %1426 }
 0x1e4   : > { %v12765_v23 = vadd.f32 %v1498_v46, %v11570_v5  ;;  %v12768_v22 = vadd.f32 %v1499_v18, %v11573_v9  ;;  %v10001_v0 = vcombine.high %v2186_v56, %v15206_v47  ;;  %7160 = vmatpush1.bf16.msra.mxu0 %v11010_v6  ;;  %v12773_v36 = vrot.slane %v9995_v37, %v11602_v8  ;;  %v11011_v18 = vld [vmem:[#allocation7 + $0x134] ss:$8 sps:$4 sm:$0xff]   ;;  %v11012_v47 = vld [vmem:[#allocation7 + $0x264] ss:$8 sps:$4 sm:$0xff]   ;;  %v11014_v37 = vld [vmem:[#allocation7 + $0x130] ss:$8 sps:$4 sm:$0xff]  }
 0x1e5   : > { %4259 = vmatmul.mubr.bf16.gmra.mxu0 %v2886_v27  ;;  %v12776_v63 = vrot.slane %v9997_v28, %v11602_v8  ;;  %v1465_v17 = vmul.f32 %v1419_v39, %v11567_v4  ;;  %v1496_v61 = vadd.f32 %v1464_v15, %v12670_v55  ;;  %v1372_v31 = vadd.f32 %v1340_v52, %v1244_v29  ;;  %v11013_v52 = vld [vmem:[#allocation7 + $0x260] ss:$8 sps:$4 sm:$0xff]  }
 0x1e6   : > { %v1562_v10 = vmax.f32 %v12765_v23, 0.0  ;;  %v12782_v7 = vrot.slane %v9999_v25, %v11602_v8  ;;  %v12785_v46 = vrot.slane %v10001_v0, %v11602_v8  ;;  %7161 = vmatprep.subr.bf16.mxu0 %v11011_v18  ;;  %7256 = vmatprep.subr.bf16.mxu1 %v11012_v47  ;;  %v1470_v29 = vmul.f32 %v1431_v57, %v11565_v3  ;;  %v11015_v25 = vld [vmem:[#allocation7 + $0x124] ss:$8 sps:$4 sm:$0xff]  }
 0x1e7   : > { %v2957_v50 = vcombine.high %v12773_v36, %v12776_v63  ;;  %v1497_v39 = vadd.f32 %v1465_v17, %v12684_v60  ;;  %v12791_v55 = vadd.f32 %v1496_v61, %v11570_v5  ;;  %7257 = vmatpush1.bf16.msra.mxu1 %v11013_v52  ;;  %v1563_v13 = vmax.f32 %v12768_v22, 0.0  ;;  %v11016_v22 = vld [vmem:[#allocation7 + $0x254] ss:$8 sps:$4 sm:$0xff]  }
 0x1e8   : > { %v2961_v56 = vcombine.high %v12782_v7, %v12785_v46  ;;  %v1471_v45 = vmul.f32 %v1431_v57, %v11567_v4  ;;  %v1468_v27 = vmul.f32 %v1427_v41, %v11565_v3  ;;  %7162 = vmatpush1.bf16.msra.mxu0 %v11014_v37  ;;  %v1502_v23 = vadd.f32 %v1470_v29, %v12738_v33  ;;  %v11017_v33 = vld [vmem:[#allocation7 + $0x250] ss:$8 sps:$4 sm:$0xff]   ;;  %v11018_v29 = vld [vmem:[#allocation7 + $0x120] ss:$8 sps:$4 sm:$0xff]  }
 0x1e9   : > { %v2989_v60 = vrot.slane %v2957_v50, %v11602_v8  ;;  %v1529_v28 = vadd.f32 %v1497_v39, %v11573_v9  ;;  %v1560_v15 = vmax.f32 %v12791_v55, 0.0  ;;  %7163 = vmatprep.subr.bf16.mxu0 %v11015_v25  ;;  %7258 = vmatprep.subr.bf16.mxu1 %v11016_v22  ;;  %v1373_v0 = vadd.f32 %v12742_v62, %v12735_v34 }
 0x1ea   : > { %v3017_v6 = vrot.slane %v2961_v56, %v11602_v8  ;;  %v1503_v57 = vadd.f32 %v1471_v45, %v12745_v43  ;;  %v1469_v17 = vmul.f32 %v1427_v41, %v11567_v4  ;;  %v1534_v47 = vadd.f32 %v1502_v23, %v11570_v5  ;;  %v11019_v56 = vld [vmem:[#allocation7 + $0x114] ss:$8 sps:$4 sm:$0xff]   ;;  %v11020_v45 = vld [vmem:[#allocation7 + $0x244] ss:$8 sps:$4 sm:$0xff]  }
 0x1eb   : > { %v1561_v61 = vmax.f32 %v1529_v28, 0.0  ;;  %v12808_v18 = vpack.c.bf16 %v1562_v10, %v1560_v15  ;;  %v1500_v50 = vadd.f32 %v1468_v27, %v1372_v31  ;;  %7259 = vmatpush1.bf16.msra.mxu1 %v11017_v33  ;;  %v5655_v39 = vcombine.low %v12632_v54, %v12654_v2  ;;  %v11024_v33 = vld [vmem:[#allocation7 + $0x104] ss:$8 sps:$4 sm:$0xff]  }
 0x1ec   : > { %v3023_v55 = vcombine.low %v2989_v60, %v3017_v6  ;;  %v1535_v34 = vadd.f32 %v1503_v57, %v11573_v9  ;;  %v1501_v62 = vadd.f32 %v1469_v17, %v1373_v0  ;;  %7164 = vmatpush1.bf16.msra.mxu0 %v11018_v29  ;;  %v5656_v43 = vcombine.high %v12632_v54, %v12654_v2  ;;  %v11022_v57 = vld [vmem:[#allocation7 + $0x110] ss:$8 sps:$4 sm:$0xff]   ;;  %v11023_v17 = vld [vmem:[#allocation7 + $0x234] ss:$8 sps:$4 sm:$0xff]  }
 0x1ed   : > { %15210 = vst [vmem:[#allocation28_spill] sm:$0xff] %v12808_v18  ;;  %v12816_v41 = vpack.c.bf16 %v1563_v13, %v1561_v61  ;;  %v5175_v52 = vshll.u32 %v12808_v18, 16  ;;  %v2956_v31 = vcombine.low %v12773_v36, %v12776_v63  ;;  %7165 = vmatprep.subr.bf16.mxu0 %v11019_v56  ;;  %7260 = vmatprep.subr.bf16.mxu1 %v11020_v45  ;;  %v1566_v60 = vmax.f32 %v1534_v47, 0.0  ;;  %v15216_v45 = vld [vmem:[#allocation20_spill] sm:$0xff] }
 0x1ee   : > { %v10135_v37 = vpack.c.bf16 %v1563_v13, %v1562_v10  ;;  %4268 = vmatprep.mubr.bf16.mxu0 %v3023_v55  ;;  %v1532_v28 = vadd.f32 %v1500_v50, %v11570_v5  ;;  %v15212_v54 = vcombine.low %v12611_v26, %v12615_v1  ;;  %v15213_v36 = vcombine.high %v12611_v26, %v12615_v1  ;;  %v11021_v13 = vld [vmem:[#allocation7 + $0x240] ss:$8 sps:$4 sm:$0xff]  }
 0x1ef   : > { %15211 = vst [vmem:[#allocation30_spill] sm:$0xff] %v12816_v41  ;;  %v5187_v10 = vshll.u32 %v12816_v41, 16  ;;  %7261 = vmatpush1.bf16.msra.mxu1 %v11021_v13  ;;  %v12840_v25 = vrot.slane %v5655_v39, %v11602_v8  ;;  %v1567_v22 = vmax.f32 %v1535_v34, 0.0  ;;  %v1533_v0 = vadd.f32 %v1501_v62, %v11573_v9  ;;  %v11026_v13 = vld [vmem:[#allocation7 + $0x100] ss:$8 sps:$4 sm:$0xff]  }
 0x1f0   : > { %v12828_v2 = vrot.slane %v15212_v54, %v11602_v8  ;;  %v12834_v63 = vrot.slane %v15213_v36, %v11602_v8  ;;  %v1564_v6 = vmax.f32 %v1532_v28, 0.0  ;;  %7166 = vmatpush1.bf16.msra.mxu0 %v11022_v57  ;;  %7262 = vmatprep.subr.bf16.mxu1 %v11023_v17  ;;  %v12844_v26 = vrot.slane %v5656_v43, %v11602_v8  ;;  %v11025_v28 = vld [vmem:[#allocation7 + $0x230] ss:$8 sps:$4 sm:$0xff]   ;;  %v15221_v17 = vld [vmem:[#allocation27_spill] sm:$0xff] }
 0x1f1   : > { %15214 = vst [vmem:[#allocation33_spill] sm:$0xff] %v12840_v25  ;;  %v5177_v1 = vrot.slane %v5175_v52, 1  ;;  %v2960_v47 = vcombine.low %v12782_v7, %v12785_v46  ;;  %v2975_v50 = vrot.slane %v2956_v31, %v11602_v8  ;;  %7167 = vmatprep.subr.bf16.mxu0 %v11024_v33  ;;  %v12850_v39 = vrot.slane %v10135_v37, %v11602_v8  ;;  %v1215_v52 = vpop.permute.xlu1 %1214  ;;  %v15217_v7 = vld [vmem:[#allocation21_spill] sm:$0xff] }
 0x1f2   : > { %v5189_v55 = vrot.slane %v5187_v10, 1  ;;  %v1565_v34 = vmax.f32 %v1533_v0, 0.0  ;;  %v12852_v62 = vpack.c.bf16 %v1566_v60, %v1564_v6  ;;  %v5173_v29 = vshrl.u32 %v12808_v18, 16 }
 0x1f3   : > { %v10134_v56 = vpack.c.bf16 %v1561_v61, %v1560_v15  ;;  %v3003_v43 = vrot.slane %v2960_v47, %v11602_v8  ;;  %v15218_v46 = vcombine.high %v15216_v45, %v15217_v7  ;;  %7263 = vmatpush1.bf16.msra.mxu1 %v11025_v28  ;;  %v5185_v37 = vshrl.u32 %v12816_v41, 16  ;;  %v11027_v15 = vld [vmem:[#allocation7 + $0x224] ss:$8 sps:$4 sm:$0xff]   ;;  %v15222_v47 = vld [vmem:[#allocation26_spill] sm:$0xff]  ;;  %v1211_v28 = vpop.permute.xlu0 %1210 }
 0x1f4   : > { %15215 = vst [vmem:[#allocation32_spill] sm:$0xff] %v12852_v62  ;;  %v12861_v54 = vpack.c.bf16 %v1567_v22, %v1566_v60  ;;  %v12863_v36 = vpack.c.bf16 %v1567_v22, %v1565_v34  ;;  %v5180_v10 = vshll.u32 %v12852_v62, 16  ;;  %7168 = vmatpush1.bf16.msra.mxu0 %v11026_v13  ;;  %7264 = vmatprep.subr.bf16.mxu1 %v11027_v15  ;;  %v11028_v45 = vld [vmem:[#allocation7 + $0x1f4] ss:$8 sps:$4 sm:$0xff]   ;;  %v11030_v15 = vld [vmem:[#allocation7 + $0x1f0] ss:$8 sps:$4 sm:$0xff]  }
 0x1f5   : > { %v2136_v31 = vrot.slane %v15218_v46, %v11602_v8  ;;  %v5178_v61 = vor.u32 %v5177_v1, %v5173_v29  ;;  %v3020_v0 = vcombine.low %v2975_v50, %v3003_v43  ;;  %v2192_v33 = vcombine.low %v15222_v47, %v15221_v17  ;;  %7169 = vmatprep.subr.bf16.mxu0 %v11028_v45  ;;  %v15223_v1 = vld [vmem:[#allocation39_spill] sm:$0xff]  ;;  %v11031_v45 = vld [vmem:[#allocation7 + $0x214] ss:$8 sps:$4 sm:$0xff]  }
 0x1f6   : > { %15219 = vst [vmem:[#allocation34_spill] sm:$0xff] %v12861_v54  ;;  %15220 = vst [vmem:[#allocation35_spill] sm:$0xff] %v12863_v36  ;;  %v5190_v7 = vor.u32 %v5189_v55, %v5185_v37  ;;  %v5182_v60 = vrot.slane %v5180_v10, 1  ;;  %v5192_v22 = vshll.u32 %v12863_v36, 16  ;;  %v5196_v46 = vshrl.u32 %v12852_v62, 16 }
 0x1f7   : > { %v2175_v57 = vrot.slane %v2136_v31, %v11602_v8  ;;  %v5199_v13 = vshrl.u32 %v12863_v36, 16  ;;  %v10136_v23 = vpack.c.bf16 %v1565_v34, %v1564_v6  ;;  %4269 = vmatmul.mubr.bf16.gmra.mxu0 %v3020_v0  ;;  %v2193_v29 = vcombine.high %v15222_v47, %v15221_v17  ;;  %v11029_v43 = vld [vmem:[#allocation7 + $0x220] ss:$8 sps:$4 sm:$0xff]   ;;  %v11032_v17 = vld [vmem:[#allocation7 + $0x1e4] ss:$8 sps:$4 sm:$0xff]  }
 0x1f8   : > { %7265 = vmatpush1.bf16.msra.mxu1 %v11029_v43  ;;  %v12876_v31 = vsel %vm1592_vm1, %v5178_v61, %v5182_v60  ;;  %v5194_v55 = vrot.slane %v5192_v22, 1  ;;  %v12878_v37 = vor.u32 %v5196_v46, %v5182_v60  ;;  %v2228_v10 = vrot.slane %v2192_v33, %v11602_v8  ;;  %7170 = vmatpush2.bf16.msra.mxu0 %v11030_v15  ;;  %v11033_v43 = vld [vmem:[#allocation7 + $0x210] ss:$8 sps:$4 sm:$0xff]   ;;  %v1307_v15 = vpop.permute.xlu0 %1306  ;;  %v11035_v34 = vld [vmem:[#allocation7 + $0x1d4] ss:$8 sps:$4 sm:$0xff]  }
 0x1f9   : > { %v2185_v50 = vcombine.low %v15223_v1, %v2175_v57  ;;  %7266 = vmatprep.subr.bf16.mxu1 %v11031_v45  ;;  %v12882_v6 = vrot.slane %v10134_v56, %v11602_v8  ;;  %v1250_v0 = vmul.f32 %v1215_v52, %v11546_v51  ;;  %v2235_v61 = vrot.slane %v2193_v29, %v11602_v8  ;;  %v1311_v57 = vpop.permute.xlu1 %1310  ;;  %v11034_v45 = vld [vmem:[#allocation7 + $0x1e0] ss:$8 sps:$4 sm:$0xff]  }
 0x1fa   : > { %7171 = vmatprep.subr.bf16.mxu0 %v11032_v17  ;;  %v12889_v47 = vsel %vm1592_vm1, %v5190_v7, %v5194_v55  ;;  %v12891_v33 = vor.u32 %v5199_v13, %v5194_v55  ;;  %v1251_v60 = vmul.f32 %v1215_v52, %v11475_v12  ;;  %v2240_v22 = vcombine.high %v2228_v10, %v2228_v10  ;;  %v11036_v7 = vld [vmem:[#allocation7 + $0x204] ss:$8 sps:$4 sm:$0xff]  }
 0x1fb   : > { %v12897_v46 = vrot.slane %v10136_v23, %v11602_v8  ;;  %v2241_v1 = vcombine.high %v2235_v61, %v2235_v61  ;;  %v2276_v29 = vrot.slane %v2228_v10, %v11602_v8  ;;  %v10003_v55 = vcombine.high %v15208_v58, %v2185_v50 }
 0x1fc   : > { %7267 = vmatpush1.bf16.msra.mxu1 %v11033_v43  ;;  %v5826_v13 = vcombine.low %v12878_v37, %v12891_v33  ;;  %v2290_v52 = vrot.slane %v2240_v22, %v11602_v8  ;;  %7172 = vmatpush2.bf16.msra.mxu0 %v11034_v45  ;;  %v12909_v10 = vrot.slane %v2235_v61, %v11602_v8 }
 0x1fd   : > { %v12912_v17 = vrot.slane %v2241_v1, %v11602_v8  ;;  %v1346_v43 = vmul.f32 %v1311_v57, %v11543_v49  ;;  %7173 = vmatprep.subr.bf16.mxu0 %v11035_v34  ;;  %v1248_v45 = vmul.f32 %v1211_v28, %v11546_v51  ;;  %7268 = vmatprep.subr.bf16.mxu1 %v11036_v7  ;;  %v1223_v27 = vpop.permute.xlu1 %1222  ;;  %v11037_v34 = vld [vmem:[#allocation7 + $0x200] ss:$8 sps:$4 sm:$0xff]   ;;  %v11038_v7 = vld [vmem:[#allocation7 + $0x1d0] ss:$8 sps:$4 sm:$0xff]  }
 0x1fe   : > { %v12916_v22 = vrot.slane %v5826_v13, %v11602_v8  ;;  %v10005_v58 = vcombine.low %v2276_v29, %v2290_v52  ;;  %v10007_v50 = vcombine.high %v2276_v29, %v2290_v52  ;;  %v1249_v23 = vmul.f32 %v1211_v28, %v11475_v12 }
 0x1ff   : > { %v10009_v61 = vcombine.low %v12909_v10, %v12912_v17  ;;  %v1347_v1 = vmul.f32 %v1311_v57, %v11486_v19  ;;  %v1344_v56 = vmul.f32 %v1307_v15, %v11543_v49  ;;  %v3045_v13 = vrot.slane %v10003_v55, %v11602_v8 }
 0x200   : > { %7269 = vmatpush1.bf16.msra.mxu1 %v11037_v34  ;;  %v3059_v29 = vrot.slane %v10005_v58, %v11602_v8  ;;  %v3073_v52 = vrot.slane %v10007_v50, %v11602_v8  ;;  %v12927_v36 = vadd.f32 %v1346_v43, %v1250_v0  ;;  %7174 = vmatpush2.bf16.msra.mxu0 %v11038_v7  ;;  %v11039_v34 = vld [vmem:[#allocation7 + $0x1c4] ss:$8 sps:$4 sm:$0xff]   ;;  %v11040_v43 = vld [vmem:[#allocation7 + $0x2f4] ss:$8 sps:$4 sm:$0xff]  }
 0x201   : > { %v3087_v57 = vrot.slane %v10009_v61, %v11602_v8  ;;  %v12932_v62 = vadd.f32 %v1347_v1, %v1251_v60  ;;  %v1345_v41 = vmul.f32 %v1307_v15, %v11486_v19  ;;  %7175 = vmatprep.subr.bf16.mxu0 %v11039_v34  ;;  %v12935_v18 = vadd.f32 %v1344_v56, %v1248_v45  ;;  %v15224_v60 = vld [vmem:[#allocation24_spill] sm:$0xff]  ;;  %v15225_v61 = vld [vmem:[#allocation25_spill] sm:$0xff] }
 0x202   : > { %v3091_v55 = vcombine.high %v3045_v13, %v3059_v29  ;;  %v3090_v58 = vcombine.low %v3045_v13, %v3059_v29  ;;  %v12938_v0 = vmul.f32 %v1223_v27, %v11546_v51  ;;  %7270 = vmatprep.subr.bf16.mxu1 %v11040_v43  ;;  %v12941_v28 = vmul.f32 %v1223_v27, %v11475_v12  ;;  %v11041_v34 = vld [vmem:[#allocation7 + $0x2f0] ss:$8 sps:$4 sm:$0xff]  }
 0x203   : > { %v3095_v50 = vcombine.high %v3073_v52, %v3087_v57  ;;  %v3094_v7 = vcombine.low %v3073_v52, %v3087_v57  ;;  %v15226_v15 = vcombine.low %v15224_v60, %v15225_v61  ;;  %v15227_v13 = vcombine.high %v15224_v60, %v15225_v61  ;;  %v11042_v52 = vld [vmem:[#allocation7 + $0x1c0] ss:$8 sps:$4 sm:$0xff]  }
 0x204   : > { %7271 = vmatpush2.bf16.msra.mxu1 %v11041_v34  ;;  %v3123_v56 = vrot.slane %v3091_v55, %v11602_v8  ;;  %v3109_v45 = vrot.slane %v3090_v58, %v11602_v8  ;;  %v10011_v27 = vcombine.high %v12909_v10, %v12912_v17  ;;  %7176 = vmatpush2.bf16.msra.mxu0 %v11042_v52  ;;  %v11043_v55 = vld [vmem:[#allocation7 + $0x1b4] ss:$8 sps:$4 sm:$0xff]  }
 0x205   : > { %v2346_v1 = vrot.slane %v15226_v15, %v11602_v8  ;;  %v2353_v29 = vrot.slane %v15227_v13, %v11602_v8  ;;  %v3151_v57 = vrot.slane %v3095_v50, %v11602_v8  ;;  %v12956_v43 = vadd.f32 %v1345_v41, %v1249_v23  ;;  %7177 = vmatprep.subr.bf16.mxu0 %v11043_v55  ;;  %v11044_v23 = vld [vmem:[#allocation7 + $0x2e4] ss:$8 sps:$4 sm:$0xff]  }
 0x206   : > { %v3137_v15 = vrot.slane %v3094_v7, %v11602_v8  ;;  %v15228_v60 = vcombine.high %v12415_v35, %v12417_v21  ;;  %v15229_v17 = vcombine.low %v12570_v30, %v12488_v20  ;;  %7272 = vmatprep.subr.bf16.mxu1 %v11044_v23  ;;  %v12976_v35 = vrot.slane %v10011_v27, %v11602_v8 }
 0x207   : > { %v2357_v34 = vcombine.high %v2346_v1, %v2346_v1  ;;  %v2385_v58 = vrot.slane %v2346_v1, %v11602_v8  ;;  %v2392_v54 = vrot.slane %v2353_v29, %v11602_v8  ;;  %v3157_v50 = vcombine.low %v3123_v56, %v3151_v57  ;;  %v11045_v29 = vld [vmem:[#allocation7 + $0x2e0] ss:$8 sps:$4 sm:$0xff]   ;;  %v11046_v57 = vld [vmem:[#allocation7 + $0x1b0] ss:$8 sps:$4 sm:$0xff]  }
 0x208   : > { %v5423_v10 = vrot.slane %v15228_v60, %v11602_v8  ;;  %v5448_v41 = vrot.slane %v15229_v17, %v11602_v8  ;;  %v3154_v7 = vcombine.low %v3109_v45, %v3137_v15  ;;  %v15230_v1 = vcombine.high %v12570_v30, %v12488_v20  ;;  %7273 = vmatpush2.bf16.msra.mxu1 %v11045_v29 }
 0x209   : > { %v2399_v61 = vrot.slane %v2357_v34, %v11602_v8  ;;  %v10017_v21 = vcombine.low %v2392_v54, %v12471_v40  ;;  %v15231_v52 = vrot.slane %v12375_v44, %v11602_v8  ;;  %v15232_v56 = vcombine.low %v12627_v53, %v12635_v11  ;;  %7178 = vmatpush2.bf16.msra.mxu0 %v11046_v57  ;;  %v1219_v54 = vpop.permute.xlu0 %1218 }
 0x20a   : > { %v5462_v13 = vrot.slane %v15230_v1, %v11602_v8  ;;  %4278 = vmatprep.mubr.bf16.mxu0 %v3157_v50  ;;  %v11047_v50 = vld [vmem:[#allocation7 + $0x1a4] ss:$8 sps:$4 sm:$0xff]   ;;  %v13008_v1 = vmul.f32 %v1219_v54, %v11546_v51  ;;  %v15233_v51 = vcombine.high %v12627_v53, %v12635_v11 }
 0x20b   : > { %v5440_v55 = vcombine.low %v15231_v52, %v5423_v10  ;;  %v5515_v45 = vrot.slane %v15232_v56, %v11602_v8  ;;  %v10013_v20 = vcombine.low %v2385_v58, %v2399_v61  ;;  %v10015_v30 = vcombine.high %v2385_v58, %v2399_v61  ;;  %4279 = vmatmul.mubr.bf16.gmra.mxu0 %v3154_v7 }
 0x20c   : > { %v10150_v15 = vcombine.low %v5448_v41, %v5462_v13  ;;  %v10152_v34 = vcombine.high %v5448_v41, %v5462_v13  ;;  %v12986_v27 = vrot.slane %v10017_v21, %v11602_v8  ;;  %v12992_v10 = vrot.slane %v12828_v2, %v11602_v8  ;;  %7179 = vmatprep.subr.bf16.mxu0 %v11047_v50  ;;  %v11048_v13 = vld [vmem:[#allocation7 + $0x1a0] ss:$8 sps:$4 sm:$0xff]  }
 0x20d   : > { %v5537_v44 = vcombine.low %v12593_v32, %v5515_v45  ;;  %v5538_v60 = vcombine.high %v12593_v32, %v5515_v45  ;;  %v12995_v17 = vrot.slane %v10013_v20, %v11602_v8  ;;  %v12998_v58 = vrot.slane %v10015_v30, %v11602_v8  ;;  %7180 = vmatpush2.bf16.msra.mxu0 %v11048_v13 }
 0x20e   : > { %v6288_v41 = vrot.slane %v10150_v15, %v11602_v8  ;;  %v6302_v23 = vrot.slane %v10152_v34, %v11602_v8  ;;  %v5455_v7 = vrot.slane %v5440_v55, %v11602_v8  ;;  %v13015_v56 = vmul.f32 %v1219_v54, %v11475_v12  ;;  %v11049_v55 = vld [vmem:[#allocation7 + $0x194] ss:$8 sps:$4 sm:$0xff]  }
 0x20f   : > { %v5549_v32 = vrot.slane %v5537_v44, %v11602_v8  ;;  %v13005_v61 = vrot.slane %v5538_v60, %v11602_v8  ;;  %v3225_v29 = vcombine.high %v12976_v35, %v12995_v17  ;;  %v3229_v21 = vcombine.high %v12998_v58, %v12986_v27  ;;  %7181 = vmatprep.subr.bf16.mxu0 %v11049_v55  ;;  %v11050_v15 = vld [vmem:[#allocation7 + $0x2d4] ss:$8 sps:$4 sm:$0xff]   ;;  %v11051_v60 = vld [vmem:[#allocation7 + $0x2d0] ss:$8 sps:$4 sm:$0xff]  }
 0x210   : > { %v6339_v52 = vcombine.high %v6288_v41, %v6302_v23  ;;  %v5522_v20 = vrot.slane %v15233_v51, %v11602_v8  ;;  %v5541_v30 = vcombine.high %v12828_v2, %v12828_v2  ;;  %7274 = vmatprep.subr.bf16.mxu1 %v11050_v15  ;;  %v6338_v44 = vcombine.low %v6288_v41, %v6302_v23 }
 0x211   : > { %v5600_v45 = vcombine.high %v5549_v32, %v12992_v10  ;;  %v10154_v57 = vcombine.low %v5455_v7, %v5549_v32  ;;  %v3257_v34 = vrot.slane %v3225_v29, %v11602_v8  ;;  %v3285_v12 = vrot.slane %v3229_v21, %v11602_v8  ;;  %7275 = vmatpush2.bf16.msra.mxu1 %v11051_v60  ;;  %v1319_v7 = vpop.permute.xlu1 %1318  ;;  %v11052_v32 = vld [vmem:[#allocation7 + $0x190] ss:$8 sps:$4 sm:$0xff]   ;;  %v11053_v21 = vld [vmem:[#allocation7 + $0x184] ss:$8 sps:$4 sm:$0xff]  }
 0x212   : > { %v13027_v54 = vrot.slane %v6339_v52, %v11602_v8  ;;  %v5539_v11 = vcombine.low %v12586_v42, %v5522_v20  ;;  %v5540_v2 = vcombine.high %v12586_v42, %v5522_v20  ;;  %7182 = vmatpush2.bf16.msra.mxu0 %v11052_v32  ;;  %v5542_v29 = vcombine.high %v12834_v63, %v12834_v63 }
 0x213   : > { %v10156_v50 = vcombine.low %v13005_v61, %v5600_v45  ;;  %v6316_v53 = vrot.slane %v10154_v57, %v11602_v8  ;;  %v3291_v13 = vcombine.low %v3257_v34, %v3285_v12  ;;  %v13037_v41 = vrot.slane %v12834_v63, %v11602_v8  ;;  %7183 = vmatprep.subr.bf16.mxu0 %v11053_v21  ;;  %v11054_v57 = vld [vmem:[#allocation7 + $0x2c4] ss:$8 sps:$4 sm:$0xff]  }
 0x214   : > { %v13040_v23 = vrot.slane %v5541_v30, %v11602_v8  ;;  %v13044_v42 = vrot.slane %v5539_v11, %v11602_v8  ;;  %v13047_v55 = vrot.slane %v5540_v2, %v11602_v8  ;;  %v13051_v45 = vrot.slane %v12647_v59, %v11602_v8  ;;  %7276 = vmatprep.subr.bf16.mxu1 %v11054_v57  ;;  %v11055_v11 = vld [vmem:[#allocation7 + $0x180] ss:$8 sps:$4 sm:$0xff]   ;;  %v11057_v57 = vld [vmem:[#allocation7 + $0x2b4] ss:$8 sps:$4 sm:$0xff]  }
 0x215   : > { %v6330_v52 = vrot.slane %v10156_v50, %v11602_v8  ;;  %4288 = vmatprep.mubr.bf16.mxu0 %v3291_v13  ;;  %v13054_v63 = vrot.slane %v5542_v29, %v11602_v8  ;;  %v1350_v20 = vmul.f32 %v1319_v7, %v11543_v49  ;;  %v1351_v30 = vmul.f32 %v1319_v7, %v11486_v19  ;;  %v1315_v50 = vpop.permute.xlu0 %1314 }
 0x216   : > { %15234 = vst [vmem:[#allocation22_spill] sm:$0xff] %v13047_v55  ;;  %15235 = vst [vmem:[#allocation38_spill] sm:$0xff] %v13051_v45  ;;  %v5604_v51 = vcombine.high %v13005_v61, %v13040_v23  ;;  %v5602_v12 = vcombine.high %v13044_v42, %v13037_v41  ;;  %v5702_v60 = vcombine.high %v12840_v25, %v13051_v45  ;;  %7184 = vmatpush2.bf16.msra.mxu0 %v11055_v11  ;;  %v15240_v45 = vld [vmem:[#allocation49_spill] sm:$0xff] }
 0x217   : > { %15236 = vst [vmem:[#allocation23_spill] sm:$0xff] %v13054_v63  ;;  %v6343_v15 = vcombine.high %v6316_v53, %v6330_v52  ;;  %v6342_v34 = vcombine.low %v6316_v53, %v6330_v52  ;;  %v13065_v2 = vrot.slane %v6338_v44, %v11602_v8  ;;  %v5606_v32 = vcombine.high %v13047_v55, %v13054_v63  ;;  %v11056_v53 = vld [vmem:[#allocation7 + $0x2c0] ss:$8 sps:$4 sm:$0xff]  }
 0x218   : > { %v10158_v13 = vcombine.low %v5604_v51, %v13044_v42  ;;  %v13071_v7 = vadd.f32 %v1350_v20, %v12938_v0  ;;  %7277 = vmatpush2.bf16.msra.mxu1 %v11056_v53  ;;  %v10160_v52 = vcombine.low %v13047_v55, %v5602_v12  ;;  %v10164_v44 = vcombine.low %v12844_v26, %v5702_v60  ;;  %v11058_v53 = vld [vmem:[#allocation7 + $0x2b0] ss:$8 sps:$4 sm:$0xff]  }
 0x219   : > { %v13074_v29 = vrot.slane %v6343_v15, %v11602_v8  ;;  %v13077_v21 = vrot.slane %v6342_v34, %v11602_v8  ;;  %7278 = vmatprep.subr.bf16.mxu1 %v11057_v57  ;;  %v10162_v11 = vcombine.low %v5606_v32, %v12840_v25  ;;  %v13086_v0 = vadd.f32 %v1351_v30, %v12941_v28  ;;  %v1439_v15 = vpop.permute.xlu1 %1438  ;;  %v1435_v63 = vpop.permute.xlu0 %1434 }
 0x21a   : > { %v13083_v51 = vrot.slane %v10158_v13, %v11602_v8  ;;  %v1348_v20 = vmul.f32 %v1315_v50, %v11543_v49  ;;  %v13094_v60 = vrot.slane %v10160_v52, %v11602_v8  ;;  %v13097_v32 = vrot.slane %v10164_v44, %v11602_v8 }
 0x21b   : > { %v6405_v34 = vcombine.low %v13027_v54, %v13074_v29  ;;  %v6402_v12 = vcombine.low %v13065_v2, %v13077_v21  ;;  %v13100_v13 = vrot.slane %v10162_v11, %v11602_v8  ;;  %v1349_v28 = vmul.f32 %v1315_v50, %v11486_v19 }
 0x21c   : > { %v13104_v49 = vadd.f32 %v1348_v20, %v13008_v1  ;;  %v3224_v30 = vcombine.low %v12976_v35, %v12995_v17  ;;  %7279 = vmatpush2.bf16.msra.mxu1 %v11058_v53  ;;  %v6473_v52 = vcombine.high %v13083_v51, %v13094_v60  ;;  %v3228_v44 = vcombine.low %v12998_v58, %v12986_v27  ;;  %v15237_v17 = vld [vmem:[#allocation46_spill] sm:$0xff]  ;;  %v15238_v53 = vld [vmem:[#allocation48_spill] sm:$0xff] }
 0x21d   : > { %7094 = vmatprep.mubr.bf16.mxu1 %v6405_v34  ;;  %v1474_v57 = vmul.f32 %v1439_v15, %v11565_v3  ;;  %v1475_v11 = vmul.f32 %v1439_v15, %v11567_v4  ;;  %v6477_v19 = vcombine.high %v13100_v13, %v13097_v32  ;;  %v2517_v35 = vcombine.low %v12464_v38, %v12476_v16  ;;  %v11059_v34 = vld [vmem:[#allocation7 + $0x2a4] ss:$8 sps:$4 sm:$0xff]  }
 0x21e   : > { %7095 = vmatmul.mubr.bf16.gmra.mxu1 %v6402_v12  ;;  %v3243_v1 = vrot.slane %v3224_v30, %v11602_v8  ;;  %v2519_v50 = vcombine.low %v15237_v17, %v12479_v24  ;;  %v13122_v20 = vrot.slane %v6473_v52, %v11602_v8  ;;  %v3271_v27 = vrot.slane %v3228_v44, %v11602_v8  ;;  %v10874_v12 = vld [vmem:[#allocation8 + $0x78] sm:$0xff]   ;;  %v15239_v38 = vld [vmem:[#allocation47_spill] sm:$0xff]  ;;  %v15241_v17 = vld [vmem:[#allocation40_spill] sm:$0xff] }
 0x21f   : > { %v1506_v58 = vadd.f32 %v1474_v57, %v12927_v36  ;;  %v1507_v15 = vadd.f32 %v1475_v11, %v12932_v62  ;;  %7280 = vmatprep.subr.bf16.mxu1 %v11059_v34  ;;  %v13128_v30 = vrot.slane %v6477_v19, %v11602_v8  ;;  %v2521_v25 = vcombine.low %v15239_v38, %v15238_v53  ;;  %v11060_v44 = vld [vmem:[#allocation7 + $0x2a0] ss:$8 sps:$4 sm:$0xff]   ;;  %v11061_v19 = vld [vmem:[#allocation7 + $0x294] ss:$8 sps:$4 sm:$0xff]  }
 0x220   : > { %v2617_v55 = vcombine.low %v15241_v17, %v15240_v45  ;;  %v10019_v52 = vcombine.high %v2519_v50, %v12471_v40  ;;  %7281 = vmatpush2.bf16.msra.mxu1 %v11060_v44  ;;  %v3288_v36 = vcombine.low %v3243_v1, %v3271_v27  ;;  %v10021_v11 = vcombine.high %v12479_v24, %v2517_v35  ;;  %v1447_v35 = vpop.permute.xlu1 %1446  ;;  %v11062_v44 = vld [vmem:[#allocation7 + $0x290] ss:$8 sps:$4 sm:$0xff]  }
 0x221   : > { %v1538_v62 = vadd.f32 %v1506_v58, %v11570_v5  ;;  %v1539_v57 = vadd.f32 %v1507_v15, %v11573_v9  ;;  %7282 = vmatprep.subr.bf16.mxu1 %v11061_v19  ;;  %v6539_v34 = vcombine.low %v13122_v20, %v13128_v30  ;;  %v10023_v38 = vcombine.high %v2521_v25, %v12476_v16 }
 0x222   : > { %v10025_v17 = vcombine.high %v15238_v53, %v2617_v55  ;;  %v13143_v40 = vrot.slane %v10019_v52, %v11602_v8  ;;  %10329 = vmatprep.subr.bf16.mxu0 %v10874_v12  ;;  %4289 = vmatmul.mubr.bf16.gmra.mxu0 %v3288_v36  ;;  %v13146_v27 = vrot.slane %v10021_v11, %v11602_v8 }
 0x223   : > { %v1570_v1 = vmax.f32 %v1538_v62, 0.0  ;;  %v1571_v50 = vmax.f32 %v1539_v57, 0.0  ;;  %v1472_v24 = vmul.f32 %v1435_v63, %v11565_v3  ;;  %7104 = vmatprep.mubr.bf16.mxu1 %v6539_v34  ;;  %v13150_v58 = vrot.slane %v10023_v38, %v11602_v8 }
 0x224   : > { %v13153_v16 = vrot.slane %v10025_v17, %v11602_v8  ;;  %v1473_v25 = vmul.f32 %v1435_v63, %v11567_v4  ;;  %v6472_v55 = vcombine.low %v13083_v51, %v13094_v60  ;;  %v1381_v15 = vadd.f32 %v1349_v28, %v13015_v56  ;;  %7283 = vmatpush2.bf16.msra.mxu1 %v11062_v44  ;;  %v1443_v51 = vpop.permute.xlu0 %1442  ;;  %v11063_v60 = vld [vmem:[#allocation7 + $0x284] ss:$8 sps:$4 sm:$0xff]  }
 0x225   : > { %v3359_v12 = vcombine.high %v13143_v40, %v13146_v27  ;;  %v1504_v53 = vadd.f32 %v1472_v24, %v12935_v18  ;;  %v6476_v52 = vcombine.low %v13100_v13, %v13097_v32  ;;  %v1478_v56 = vmul.f32 %v1447_v35, %v11565_v3  ;;  %7284 = vmatprep.subr.bf16.mxu1 %v11063_v60 }
 0x226   : > { %v3363_v36 = vcombine.high %v13150_v58, %v13153_v16  ;;  %v1505_v63 = vadd.f32 %v1473_v25, %v12956_v43  ;;  %v13168_v62 = vrot.slane %v6472_v55, %v11602_v8  ;;  %v10139_v28 = vpack.c.bf16 %v1571_v50, %v1570_v1  ;;  %v11064_v25 = vld [vmem:[#allocation7 + $0x280] ss:$8 sps:$4 sm:$0xff]  }
 0x227   : > { %v3391_v18 = vrot.slane %v3359_v12, %v11602_v8  ;;  %v1536_v32 = vadd.f32 %v1504_v53, %v11570_v5  ;;  %v13174_v13 = vrot.slane %v6476_v52, %v11602_v8  ;;  %v1479_v11 = vmul.f32 %v1447_v35, %v11567_v4 }
 0x228   : > { %v3419_v57 = vrot.slane %v3363_v36, %v11602_v8  ;;  %v1537_v43 = vadd.f32 %v1505_v63, %v11573_v9  ;;  %v1510_v19 = vadd.f32 %v1478_v56, %v13071_v7  ;;  %v1476_v17 = vmul.f32 %v1443_v51, %v11565_v3  ;;  %7285 = vmatpush2.bf16.msra.mxu1 %v11064_v25  ;;  %v10880_v56 = vld [vmem:[#allocation8 + $0xf8] sm:$0xff]  }
 0x229   : > { %v1568_v34 = vmax.f32 %v1536_v32, 0.0  ;;  %v6536_v38 = vcombine.low %v13168_v62, %v13174_v13  ;;  %v1477_v24 = vmul.f32 %v1443_v51, %v11567_v4  ;;  %v1511_v53 = vadd.f32 %v1479_v11, %v13086_v0  ;;  %10381 = vmatprep.subr.bf16.mxu1 %v10880_v56  ;;  %v13213_v56 = vpop.f32.mrf.mxu0 }
 0x22a   : > { %v3425_v55 = vcombine.low %v3391_v18, %v3419_v57  ;;  %v1569_v12 = vmax.f32 %v1537_v43, 0.0  ;;  %v1542_v52 = vadd.f32 %v1510_v19, %v11570_v5  ;;  %v1508_v44 = vadd.f32 %v1476_v17, %v13104_v49 }
 0x22b   : > { %v1588_v7 = vpack.c.bf16 %v1570_v1, %v1568_v34  ;;  %7105 = vmatmul.mubr.bf16.gmra.mxu1 %v6536_v38  ;;  %v1509_v36 = vadd.f32 %v1477_v24, %v1381_v15  ;;  %v13190_v3 = vrot.slane %v10139_v28, %v11602_v8  ;;  %v1543_v63 = vadd.f32 %v1511_v53, %v11573_v9  ;;  %v15243_v38 = vld [vmem:[#allocation37_spill] sm:$0xff] }
 0x22c   : > { %4298 = vmatprep.mubr.bf16.mxu0 %v3425_v55  ;;  %v1589_v4 = vpack.c.bf16 %v1571_v50, %v1569_v12  ;;  %v3358_v0 = vcombine.low %v13143_v40, %v13146_v27  ;;  %v10138_v60 = vpack.c.bf16 %v1569_v12, %v1568_v34  ;;  %v1574_v18 = vmax.f32 %v1542_v52, 0.0  ;;  %v15242_v34 = vld [vmem:[#allocation36_spill] sm:$0xff] }
 0x22d   : > { %v5205_v51 = vshll.u32 %v1588_v7, 16  ;;  %v1540_v1 = vadd.f32 %v1508_v44, %v11570_v5  ;;  %v5203_v32 = vshrl.u32 %v1588_v7, 16  ;;  %v5266_v15 = vrot.slane %v1588_v7, 1  ;;  %v15245_v7 = vld [vmem:[#allocation50_spill] sm:$0xff] }
 0x22e   : > { %v5215_v57 = vshrl.u32 %v1589_v4, 16  ;;  %v5217_v49 = vshll.u32 %v1589_v4, 16  ;;  %v1575_v43 = vmax.f32 %v1543_v63, 0.0  ;;  %v1541_v50 = vadd.f32 %v1509_v36, %v11573_v9 }
 0x22f   : > { %v5207_v28 = vrot.slane %v5205_v51, 1  ;;  %v1572_v11 = vmax.f32 %v1540_v1, 0.0  ;;  %v3362_v40 = vcombine.low %v13150_v58, %v13153_v16  ;;  %v3377_v27 = vrot.slane %v3358_v0, %v11602_v8  ;;  %v15246_v58 = vld [vmem:[#allocation41_spill] sm:$0xff] }
 0x230   : > { %v5219_v19 = vrot.slane %v5217_v49, 1  ;;  %v15244_v5 = vcombine.high %v15242_v34, %v15243_v38  ;;  %v5269_v24 = vrot.slane %v1589_v4, 1  ;;  %v13205_v25 = vrot.slane %v10138_v60, %v11602_v8  ;;  %v13215_v4 = vpop.f32.mrf.mxu1 }
 0x231   : > { %v1573_v55 = vmax.f32 %v1541_v50, 0.0  ;;  %v1590_v12 = vpack.c.bf16 %v1574_v18, %v1572_v11  ;;  %v5208_v53 = vor.u32 %v5207_v28, %v5203_v32  ;;  %v3405_v9 = vrot.slane %v3362_v40, %v11602_v8  ;;  %v15247_v32 = vld [vmem:[#allocation51_spill] sm:$0xff] }
 0x232   : > { %v2570_v17 = vrot.slane %v15244_v5, %v11602_v8  ;;  %v2620_v16 = vcombine.low %v15246_v58, %v15245_v7  ;;  %v5220_v44 = vor.u32 %v5219_v19, %v5215_v57  ;;  %v13211_v36 = vpack.c.bf16 %v1575_v43, %v1574_v18 }
 0x233   : > { %v1591_v63 = vpack.c.bf16 %v1575_v43, %v1573_v55  ;;  %v5210_v0 = vshll.u32 %v1590_v12, 16  ;;  %v5226_v51 = vshrl.u32 %v1590_v12, 16  ;;  %v13217_v60 = vrot.slane %v1590_v12, 1  ;;  %v13233_v12 = vpop.f32.mrf.mxu0 }
 0x234   : > { %v2609_v52 = vrot.slane %v2570_v17, %v11602_v8  ;;  %v3422_v1 = vcombine.low %v3377_v27, %v3405_v9  ;;  %v10140_v34 = vpack.c.bf16 %v1573_v55, %v1572_v11  ;;  %v10027_v43 = vcombine.high %v2620_v16, %v15240_v45  ;;  %15248 = vst [vmem:[#allocation20_spill] sm:$0xff] %v13233_v12  ;;  %v13235_v11 = vpop.f32.mrf.mxu1 }
 0x235   : > { %v5212_v28 = vrot.slane %v5210_v0, 1  ;;  %v5222_v50 = vshll.u32 %v1591_v63, 16  ;;  %v13220_v40 = vrot.slane %v1591_v63, 1  ;;  %v5229_v57 = vshrl.u32 %v1591_v63, 16  ;;  %15249 = vst [vmem:[#allocation21_spill] sm:$0xff] %v13235_v11 }
 0x236   : > { %v2619_v49 = vcombine.low %v15247_v32, %v2609_v52  ;;  %v5268_v18 = vsel %vm1729_vm0, %v5266_v15, %v13217_v60  ;;  %4299 = vmatmul.mubr.bf16.gmra.mxu0 %v3422_v1  ;;  %v13251_v0 = vrot.slane %v10140_v34, %v11602_v8  ;;  %v15252_v34 = vcombine.high %v12607_v48, %v12618_v14  ;;  %v15255_v14 = vld [vmem:[#allocation53_spill] sm:$0xff]  ;;  %v15261_v15 = vld [vmem:[#allocation31_spill] sm:$0xff] }
 0x237   : > { %v13227_v38 = vsel %vm1592_vm1, %v5208_v53, %v5212_v28  ;;  %v5224_v27 = vrot.slane %v5222_v50, 1  ;;  %v13229_v5 = vor.u32 %v5226_v51, %v5212_v28  ;;  %v5271_v17 = vsel %vm1729_vm0, %v5269_v24, %v13220_v40  ;;  %v13263_v28 = vpop.f32.mrf.mxu1  ;;  %v15262_v50 = vld [vmem:[#allocation18_spill] sm:$0xff] }
 0x238   : > { %v10029_v19 = vcombine.high %v15245_v7, %v2619_v49  ;;  %v5927_v55 = vcombine.low %v5268_v18, %v5271_v17  ;;  %v5928_v45 = vcombine.high %v5268_v18, %v5271_v17  ;;  %v3443_v7 = vrot.slane %v10027_v43, %v11602_v8  ;;  %v13261_v49 = vpop.f32.mrf.mxu0  ;;  %15251 = vst [vmem:[#allocation26_spill] sm:$0xff] %v13263_v28 }
 0x239   : > { %v5225_v53 = vsel %vm1592_vm1, %v5220_v44, %v5224_v27  ;;  %v13242_v52 = vor.u32 %v5229_v57, %v5224_v27  ;;  %v6045_v63 = vcombine.low %v13217_v60, %v13220_v40  ;;  %15250 = vst [vmem:[#allocation27_spill] sm:$0xff] %v13261_v49  ;;  %v5640_v57 = vrot.slane %v15252_v34, %v11602_v8 }
 0x23a   : > { %v3457_v24 = vrot.slane %v10029_v19, %v11602_v8  ;;  %v5925_v58 = vcombine.low %v13227_v38, %v5225_v53  ;;  %v5926_v16 = vcombine.high %v13227_v38, %v5225_v53  ;;  %v13254_v51 = vrot.slane %v5927_v55, %v11602_v8 }
 0x23b   : > { %v13257_v44 = vrot.slane %v5928_v45, %v11602_v8  ;;  %v6043_v1 = vcombine.low %v13229_v5, %v13242_v52  ;;  %v5658_v18 = vcombine.high %v12647_v59, %v12647_v59  ;;  %v15253_v43 = vcombine.low %v12876_v31, %v12889_v47 }
 0x23c   : > { %v3461_v32 = vcombine.high %v3443_v7, %v3457_v24  ;;  %v15254_v17 = vcombine.high %v12876_v31, %v12889_v47  ;;  %v3460_v48 = vcombine.low %v3443_v7, %v3457_v24  ;;  %v15256_v45 = vrot.slane %v15255_v14, %v11602_v8  ;;  %v13300_v7 = vpop.f32.mrf.mxu0  ;;  %v13302_v24 = vpop.f32.mrf.mxu1 }
 0x23d   : > { %v5732_v19 = vrot.slane %v15253_v43, %v11602_v8  ;;  %v13278_v38 = vrot.slane %v6043_v1, %v11602_v8  ;;  %v13289_v53 = vrot.slane %v5658_v18, %v11602_v8  ;;  %v13294_v43 = vrot.slane %v6045_v63, %v11602_v8  ;;  %15257 = vst [vmem:[#allocation39_spill] sm:$0xff] %v13300_v7 }
 0x23e   : > { %v3489_v27 = vrot.slane %v3461_v32, %v11602_v8  ;;  %v5739_v55 = vrot.slane %v15254_v17, %v11602_v8  ;;  %v5657_v59 = vcombine.low %v15256_v45, %v5640_v57  ;;  %15258 = vst [vmem:[#allocation24_spill] sm:$0xff] %v13302_v24  ;;  %v13320_v14 = vpop.f32.mrf.mxu1 }
 0x23f   : > { %v5754_v34 = vcombine.low %v12882_v6, %v5732_v19  ;;  %v5755_v1 = vcombine.high %v12882_v6, %v5732_v19  ;;  %v6089_v32 = vcombine.low %v13251_v0, %v13278_v38  ;;  %v5705_v6 = vcombine.high %v12844_v26, %v13289_v53  ;;  %15260 = vst [vmem:[#allocation46_spill] sm:$0xff] %v13320_v14 }
 0x240   : > { %4308 = vmatprep.mubr.bf16.mxu0 %v3489_v27  ;;  %v5756_v31 = vcombine.low %v12850_v39, %v5739_v55  ;;  %v5757_v47 = vcombine.high %v12850_v39, %v5739_v55  ;;  %v13305_v57 = vrot.slane %v5657_v59, %v11602_v8  ;;  %v13312_v19 = vrot.slane %v5926_v16, %v11602_v8  ;;  %v13318_v55 = vpop.f32.mrf.mxu0 }
 0x241   : > { %v5766_v63 = vrot.slane %v5754_v34, %v11602_v8  ;;  %v5780_v18 = vrot.slane %v5755_v1, %v11602_v8  ;;  %15259 = vst [vmem:[#allocation25_spill] sm:$0xff] %v13318_v55  ;;  %v3475_v1 = vrot.slane %v3460_v48, %v11602_v8  ;;  %v13325_v16 = vrot.slane %v6089_v32, %v11602_v8 }
 0x242   : > { %v5773_v27 = vrot.slane %v5756_v31, %v11602_v8  ;;  %v5787_v17 = vrot.slane %v5757_v47, %v11602_v8  ;;  %v10166_v45 = vcombine.low %v5705_v6, %v13305_v57  ;;  %v6272_v39 = vcombine.high %v15262_v50, %v15261_v15 }
 0x243   : > { %v10168_v59 = vcombine.low %v5766_v63, %v5780_v18  ;;  %v10170_v34 = vcombine.high %v5766_v63, %v5780_v18  ;;  %v6406_v31 = vcombine.high %v13027_v54, %v13074_v29  ;;  %4309 = vmatmul.mubr.bf16.gmra.mxu0 %v3475_v1  ;;  %v15263_v48 = vcombine.high %v12878_v37, %v12891_v33 }
 0x244   : > { %v10172_v9 = vcombine.low %v5773_v27, %v5787_v17  ;;  %v6556_v47 = vrot.slane %v10166_v45, %v11602_v8  ;;  %7185 = vmatprep.mubr.bf16.mxu0 %v6272_v39  ;;  %v15264_v15 = vcombine.low %v12897_v46, %v12916_v22  ;;  %v15265_v29 = vcombine.high %v12897_v46, %v12916_v22  ;;  %v13348_v45 = vpop.f32.mrf.mxu0 }
 0x245   : > { %v6570_v35 = vrot.slane %v10168_v59, %v11602_v8  ;;  %v6584_v6 = vrot.slane %v10170_v34, %v11602_v8  ;;  %v5857_v32 = vrot.slane %v15263_v48, %v11602_v8  ;;  %v5949_v18 = vrot.slane %v5925_v58, %v11602_v8  ;;  %15266 = vst [vmem:[#allocation48_spill] sm:$0xff] %v13348_v45  ;;  %v13350_v59 = vpop.f32.mrf.mxu1 }
 0x246   : > { %v6598_v63 = vrot.slane %v10172_v9, %v11602_v8  ;;  %v5882_v54 = vrot.slane %v15264_v15, %v11602_v8  ;;  %v5896_v50 = vrot.slane %v15265_v29, %v11602_v8  ;;  %15267 = vst [vmem:[#allocation47_spill] sm:$0xff] %v13350_v59  ;;  %v15268_v9 = vld [vmem:[#allocation34_spill] sm:$0xff]  ;;  %v10174_v1 = vcombine.high %v5773_v27, %v5787_v17 }
 0x247   : > { %v6607_v37 = vcombine.high %v6556_v47, %v6570_v35  ;;  %v6606_v33 = vcombine.low %v6556_v47, %v6570_v35  ;;  %v15269_v39 = vrot.slane %v15268_v9, %v11602_v8  ;;  %v5971_v14 = vcombine.low %v13205_v25, %v5949_v18  ;;  %v15293_v59 = vld [vmem:[#allocation42_spill] sm:$0xff] }
 0x248   : > { %v6611_v48 = vcombine.high %v6584_v6, %v6598_v63  ;;  %v6610_v15 = vcombine.low %v6584_v6, %v6598_v63  ;;  %v10176_v55 = vcombine.low %v5882_v54, %v5896_v50  ;;  %v10178_v29 = vcombine.high %v5882_v54, %v5896_v50  ;;  %v13371_v6 = vpop.f32.mrf.mxu0  ;;  %v15272_v63 = vld [vmem:[#allocation29_spill] sm:$0xff] }
 0x249   : > { %v5874_v34 = vcombine.low %v15269_v39, %v5857_v32  ;;  %v13357_v46 = vrot.slane %v6607_v37, %v11602_v8  ;;  %v13360_v22 = vrot.slane %v6606_v33, %v11602_v8  ;;  %v5983_v27 = vrot.slane %v5971_v14, %v11602_v8  ;;  %15270 = vst [vmem:[#allocation49_spill] sm:$0xff] %v13371_v6  ;;  %v13373_v32 = vpop.f32.mrf.mxu1  ;;  %v15273_v37 = vld [vmem:[#allocation19_spill] sm:$0xff]  ;;  %v10879_v6 = vld [vmem:[#allocation8 + $0x28] sm:$0xff]  }
 0x24a   : > { %v13364_v35 = vrot.slane %v6611_v48, %v11602_v8  ;;  %v13367_v47 = vrot.slane %v6610_v15, %v11602_v8  ;;  %v6690_v17 = vrot.slane %v10174_v1, %v11602_v8  ;;  %15271 = vst [vmem:[#allocation40_spill] sm:$0xff] %v13373_v32  ;;  %v6269_v33 = vcombine.high %v15273_v37, %v15272_v63  ;;  %v10875_v48 = vld [vmem:[#allocation8 + $0x38] sm:$0xff]  }
 0x24b   : > { %v5889_v58 = vrot.slane %v5874_v34, %v11602_v8  ;;  %v6704_v9 = vrot.slane %v10176_v55, %v11602_v8  ;;  %v6718_v54 = vrot.slane %v10178_v29, %v11602_v8  ;;  %v6403_v50 = vcombine.high %v13065_v2, %v13077_v21  ;;  %v10876_v2 = vld [vmem:[#allocation8 + $0x70] sm:$0xff]   ;;  %v15274_v21 = vld [vmem:[#allocation28_spill] sm:$0xff] }
 0x24c   : > { %v6673_v39 = vcombine.low %v13357_v46, %v13364_v35  ;;  %v6670_v14 = vcombine.low %v13360_v22, %v13367_v47  ;;  %v5972_v1 = vcombine.high %v13205_v25, %v5949_v18  ;;  %7186 = vmatmul.mubr.bf16.vlgmr.msra.gmra.mxu0 %v6269_v33  ;;  %v5973_v55 = vcombine.low %v13190_v3, %v13312_v19 }
 0x24d   : > { %v10180_v34 = vcombine.low %v5889_v58, %v5983_v27  ;;  %v6741_v15 = vcombine.high %v6690_v17, %v6704_v9  ;;  %v6740_v63 = vcombine.low %v6690_v17, %v6704_v9  ;;  %v5974_v29 = vcombine.high %v13190_v3, %v13312_v19  ;;  %7195 = vmatprep.mubr.bf16.mxu0 %v6406_v31  ;;  %v13396_v58 = vpop.f32.mrf.mxu0  ;;  %v13398_v17 = vpop.f32.mrf.mxu1 }
 0x24e   : > { %7114 = vmatprep.mubr.bf16.mxu1 %v6673_v39  ;;  %v5975_v25 = vcombine.high %v13254_v51, %v13254_v51  ;;  %v5976_v18 = vcombine.high %v13257_v44, %v13257_v44  ;;  %15275 = vst [vmem:[#allocation36_spill] sm:$0xff] %v13396_v58  ;;  %15276 = vst [vmem:[#allocation37_spill] sm:$0xff] %v13398_v17  ;;  %v15277_v3 = vcombine.high %v13251_v0, %v13278_v38  ;;  %v10877_v38 = vld [vmem:[#allocation8 + $0x30] sm:$0xff]   ;;  %v15282_v17 = vld [vmem:[#allocation30_spill] sm:$0xff] }
 0x24f   : > { %v6732_v32 = vrot.slane %v10180_v34, %v11602_v8  ;;  %7115 = vmatmul.mubr.bf16.gmra.mxu1 %v6670_v14  ;;  %v6540_v31 = vcombine.high %v13122_v20, %v13128_v30  ;;  %v13409_v33 = vrot.slane %v5973_v55, %v11602_v8  ;;  %v13412_v9 = vrot.slane %v5972_v1, %v11602_v8 }
 0x250   : > { %v13404_v19 = vrot.slane %v15277_v3, %v11602_v8  ;;  %v13415_v37 = vrot.slane %v5974_v29, %v11602_v8  ;;  %v13419_v0 = vrot.slane %v13254_v51, %v11602_v8  ;;  %10330 = vmatpush3.bf16.msra.mxu0 %v10875_v48  ;;  %v13422_v14 = vrot.slane %v6741_v15, %v11602_v8  ;;  %v13446_v15 = vpop.f32.mrf.mxu1 }
 0x251   : > { %v6745_v39 = vcombine.high %v6718_v54, %v6732_v32  ;;  %v6744_v34 = vcombine.low %v6718_v54, %v6732_v32  ;;  %v13426_v20 = vrot.slane %v13257_v44, %v11602_v8  ;;  %v13429_v30 = vrot.slane %v5975_v25, %v11602_v8  ;;  %10331 = vmatprep.subr.bf16.mxu0 %v10876_v2  ;;  %v13444_v44 = vpop.f32.mrf.mxu0 }
 0x252   : > { %v13432_v32 = vrot.slane %v5976_v18, %v11602_v8  ;;  %v13438_v51 = vrot.slane %v6740_v63, %v11602_v8  ;;  %v6034_v48 = vcombine.high %v5983_v27, %v13419_v0  ;;  %15278 = vst [vmem:[#allocation50_spill] sm:$0xff] %v13444_v44  ;;  %15279 = vst [vmem:[#allocation41_spill] sm:$0xff] %v13446_v15 }
 0x253   : > { %v13435_v54 = vrot.slane %v6745_v39, %v11602_v8  ;;  %v13441_v1 = vrot.slane %v6744_v34, %v11602_v8  ;;  %v6036_v55 = vcombine.high %v13409_v33, %v13426_v20  ;;  %v6038_v29 = vcombine.high %v13412_v9, %v13429_v30  ;;  %v10878_v34 = vld [vmem:[#allocation8 + $0x68] sm:$0xff]  }
 0x254   : > { %v6040_v2 = vcombine.high %v13415_v37, %v13432_v32  ;;  %v15280_v63 = vcombine.high %v13229_v5, %v13242_v52  ;;  %v10182_v3 = vcombine.low %v13412_v9, %v6034_v48  ;;  %v6092_v39 = vcombine.high %v13294_v43, %v13294_v43  ;;  %10332 = vmatpush3.bf16.msra.mxu0 %v10877_v38 }
 0x255   : > { %v6807_v27 = vcombine.low %v13422_v14, %v13435_v54  ;;  %v6804_v18 = vcombine.low %v13438_v51, %v13441_v1  ;;  %7196 = vmatmul.mubr.bf16.gmra.mxu0 %v6403_v50  ;;  %v10184_v15 = vcombine.low %v6038_v29, %v13409_v33  ;;  %v10186_v44 = vcombine.low %v13415_v37, %v6036_v55  ;;  %v13480_v55 = vpop.f32.mrf.mxu0  ;;  %v13482_v29 = vpop.f32.mrf.mxu1 }
 0x256   : > { %v6074_v25 = vrot.slane %v15280_v63, %v11602_v8  ;;  %v10188_v5 = vcombine.low %v6040_v2, %v13325_v16  ;;  %v15281_v52 = vrot.slane %v13211_v36, %v11602_v8  ;;  %7205 = vmatprep.mubr.bf16.mxu0 %v6540_v31  ;;  %v6824_v48 = vrot.slane %v10182_v3, %v11602_v8  ;;  %v10882_v36 = vld [vmem:[#allocation8 + $0x60] sm:$0xff]  }
 0x257   : > { %7124 = vmatprep.mubr.bf16.mxu1 %v6807_v27  ;;  %v13475_v50 = vrot.slane %v13294_v43, %v11602_v8  ;;  %v13478_v38 = vrot.slane %v6092_v39, %v11602_v8  ;;  %15283 = vst [vmem:[#allocation51_spill] sm:$0xff] %v13480_v55  ;;  %15284 = vst [vmem:[#allocation53_spill] sm:$0xff] %v13482_v29  ;;  %v6838_v2 = vrot.slane %v10184_v15, %v11602_v8  ;;  %v13504_v29 = vpop.f32.mrf.mxu0  ;;  %v13506_v55 = vpop.f32.mrf.mxu1 }
 0x258   : > { %v6091_v63 = vcombine.low %v15281_v52, %v6074_v25  ;;  %7125 = vmatmul.mubr.bf16.gmra.mxu1 %v6804_v18  ;;  %v6852_v25 = vrot.slane %v10186_v44, %v11602_v8  ;;  %v6866_v31 = vrot.slane %v10188_v5, %v11602_v8  ;;  %v6537_v27 = vcombine.high %v13168_v62, %v13174_v13 }
 0x259   : > { %v6674_v43 = vcombine.high %v13357_v46, %v13364_v35  ;;  %v6136_v39 = vcombine.high %v13325_v16, %v13475_v50  ;;  %v6139_v18 = vcombine.high %v13404_v19, %v13478_v38  ;;  %10333 = vmatprep.subr.bf16.mxu0 %v10878_v34  ;;  %v6875_v15 = vcombine.high %v6824_v48, %v6838_v2  ;;  %v15285_v46 = vld [vmem:[#allocation45_spill] sm:$0xff]  ;;  %v15286_v35 = vld [vmem:[#allocation44_spill] sm:$0xff] }
 0x25a   : > { %v13492_v3 = vrot.slane %v6091_v63, %v11602_v8  ;;  %v6879_v44 = vcombine.high %v6852_v25, %v6866_v31  ;;  %v6874_v52 = vcombine.low %v6824_v48, %v6838_v2  ;;  %v6878_v5 = vcombine.low %v6852_v25, %v6866_v31  ;;  %10334 = vmatpush3.bf16.msra.mxu0 %v10879_v6 }
 0x25b   : > { %v10190_v62 = vcombine.low %v13404_v19, %v6136_v39  ;;  %v5276_v63 = vcombine.low %v15286_v35, %v15285_v46  ;;  %v5277_v58 = vcombine.high %v15286_v35, %v15285_v46  ;;  %15287 = vst [vmem:[#allocation31_spill] sm:$0xff] %v13504_v29  ;;  %15288 = vst [vmem:[#allocation18_spill] sm:$0xff] %v13506_v55  ;;  %10335 = vmatprep.subr.bf16.mxu0 %v10882_v36  ;;  %v15290_v46 = vld [vmem:[#allocation35_spill] sm:$0xff] }
 0x25c   : > { %v10192_v13 = vcombine.low %v6139_v18, %v13492_v3  ;;  %v13509_v34 = vrot.slane %v6875_v15, %v11602_v8  ;;  %v13512_v6 = vrot.slane %v6879_v44, %v11602_v8  ;;  %v13515_v48 = vrot.slane %v6874_v52, %v11602_v8  ;;  %v15289_v18 = vld [vmem:[#allocation32_spill] sm:$0xff] }
 0x25d   : > { %v13518_v2 = vrot.slane %v6878_v5, %v11602_v8  ;;  %v6954_v25 = vrot.slane %v10190_v62, %v11602_v8  ;;  %v5312_v39 = vrot.slane %v5276_v63, %v11602_v8  ;;  %v5319_v36 = vrot.slane %v5277_v58, %v11602_v8  ;;  %7206 = vmatmul.mubr.bf16.gmra.mxu0 %v6537_v27  ;;  %v10883_v62 = vld [vmem:[#allocation8 + $0x20] sm:$0xff]   ;;  %v13534_v58 = vpop.f32.mrf.mxu0 }
 0x25e   : > { %v6968_v31 = vrot.slane %v10192_v13, %v11602_v8  ;;  %v13525_v15 = vrot.slane %v15289_v18, 1  ;;  %v13528_v44 = vrot.slane %v15290_v46, 1  ;;  %v6941_v52 = vcombine.low %v13509_v34, %v13512_v6  ;;  %7215 = vmatprep.mubr.bf16.mxu0 %v6674_v43  ;;  %15291 = vst [vmem:[#allocation34_spill] sm:$0xff] %v13534_v58  ;;  %v13536_v18 = vpop.f32.mrf.mxu1  ;;  %v15294_v43 = vld [vmem:[#allocation43_spill] sm:$0xff]  ;;  %10336 = vmatpush3.bf16.msra.mxu0 %v10883_v62 }
 0x25f   : > { %v6938_v5 = vcombine.low %v13515_v48, %v13518_v2  ;;  %v5324_v63 = vcombine.high %v5312_v39, %v5312_v39  ;;  %v5325_v55 = vcombine.high %v5319_v36, %v5319_v36  ;;  %15292 = vst [vmem:[#allocation29_spill] sm:$0xff] %v13536_v18  ;;  %v6671_v46 = vcombine.high %v13360_v22, %v13367_v47  ;;  %v13553_v47 = vpop.f32.mrf.mxu0 }
 0x260   : > { %v6977_v13 = vcombine.high %v6954_v25, %v6968_v31  ;;  %v6976_v35 = vcombine.low %v6954_v25, %v6968_v31  ;;  %7134 = vmatprep.mubr.bf16.mxu1 %v6941_v52  ;;  %v6808_v27 = vcombine.high %v13422_v14, %v13435_v54  ;;  %v5360_v29 = vrot.slane %v5312_v39, %v11602_v8  ;;  %v10886_v31 = vld [vmem:[#allocation8 + $0x58] sm:$0xff]   ;;  %v13555_v14 = vpop.f32.mrf.mxu1 }
 0x261   : > { %v15295_v45 = vcombine.low %v15293_v59, %v15294_v43  ;;  %7135 = vmatmul.mubr.bf16.gmra.mxu1 %v6938_v5  ;;  %v5367_v52 = vrot.slane %v5319_v36, %v11602_v8  ;;  %v5374_v18 = vrot.slane %v5324_v63, %v11602_v8  ;;  %v5381_v22 = vrot.slane %v5325_v55, %v11602_v8 }
 0x262   : > { %v13548_v58 = vrot.slane %v6977_v13, %v11602_v8  ;;  %v13558_v54 = vrot.slane %v6976_v35, %v11602_v8  ;;  %v5603_v36 = vcombine.low %v13005_v61, %v13040_v23  ;;  %10337 = vmatprep.subr.bf16.mxu0 %v10886_v31 }
 0x263   : > { %v5430_v25 = vrot.slane %v15295_v45, %v11602_v8  ;;  %v15296_v45 = vcombine.high %v15293_v59, %v15294_v43  ;;  %v10143_v55 = vcombine.low %v5360_v29, %v5374_v18  ;;  %v10145_v13 = vcombine.high %v5360_v29, %v5374_v18  ;;  %v10887_v43 = vld [vmem:[#allocation8 + $0x18] sm:$0xff]   ;;  %v13575_v18 = vpop.f32.mrf.mxu0 }
 0x264   : > { %7144 = vmatprep.mubr.bf16.mxu1 %v13548_v58  ;;  %v10147_v63 = vcombine.low %v5367_v52, %v5381_v22  ;;  %v10149_v28 = vcombine.high %v5367_v52, %v5381_v22  ;;  %v10157_v59 = vcombine.high %v5603_v36, %v12992_v10  ;;  %v13577_v52 = vpop.f32.mrf.mxu1  ;;  %10338 = vmatpush3.bf16.msra.mxu0 %v10887_v43 }
 0x265   : > { %v5437_v39 = vrot.slane %v15296_v45, %v11602_v8  ;;  %v5441_v5 = vcombine.high %v5430_v25, %v5430_v25  ;;  %v5469_v49 = vrot.slane %v5430_v25, %v11602_v8  ;;  %v6161_v45 = vrot.slane %v10143_v55, %v11602_v8  ;;  %7216 = vmatmul.mubr.bf16.gmra.mxu0 %v6671_v46 }
 0x266   : > { %v6175_v61 = vrot.slane %v10145_v13, %v11602_v8  ;;  %v6189_v62 = vrot.slane %v10147_v63, %v11602_v8  ;;  %v6203_v29 = vrot.slane %v10149_v28, %v11602_v8  ;;  %v6337_v31 = vrot.slane %v10157_v59, %v11602_v8  ;;  %7225 = vmatprep.mubr.bf16.mxu0 %v6808_v27 }
 0x267   : > { %v5476_v35 = vrot.slane %v5437_v39, %v11602_v8  ;;  %v5483_v24 = vrot.slane %v5441_v5, %v11602_v8  ;;  %v10890_v5 = vld [vmem:[#allocation8 + $0x50] sm:$0xff]   ;;  %v15297_v28 = vrot.slane %v15274_v21, 1 }
 0x268   : > { %v6206_v36 = vcombine.low %v6161_v45, %v6175_v61  ;;  %v6207_v55 = vcombine.high %v6161_v45, %v6175_v61  ;;  %v6210_v13 = vcombine.low %v6189_v62, %v6203_v29  ;;  %v6211_v7 = vcombine.high %v6189_v62, %v6203_v29  ;;  %v13595_v45 = vpop.f32.mrf.mxu0  ;;  %v13597_v61 = vpop.f32.mrf.mxu1  ;;  %10339 = vmatprep.subr.bf16.mxu0 %v10890_v5 }
 0x269   : > { %v10151_v25 = vcombine.low %v5469_v49, %v5483_v24  ;;  %v10153_v22 = vcombine.high %v5469_v49, %v5483_v24  ;;  %v10155_v39 = vcombine.low %v5476_v35, %v12992_v10  ;;  %v13585_v63 = vsel %vm1729_vm0, %v15297_v28, %v13525_v15  ;;  %v10891_v24 = vld [vmem:[#allocation8 + $0x10] sm:$0xff]   ;;  %7145 = vmatmul.mubr.bf16.gmra.mxu1 %v13558_v54 }
 0x26a   : > { %v6239_v27 = vrot.slane %v6207_v55, %v11602_v8  ;;  %v6267_v35 = vrot.slane %v6211_v7, %v11602_v8  ;;  %v6225_v59 = vrot.slane %v6206_v36, %v11602_v8  ;;  %v6253_v21 = vrot.slane %v6210_v13, %v11602_v8  ;;  %10340 = vmatpush3.bf16.msra.mxu0 %v10891_v24 }
 0x26b   : > { %v6295_v46 = vrot.slane %v10151_v25, %v11602_v8  ;;  %v6309_v49 = vrot.slane %v10153_v22, %v11602_v8  ;;  %v6323_v10 = vrot.slane %v10155_v39, %v11602_v8  ;;  %v15298_v62 = vrot.slane %v15282_v17, 1 }
 0x26c   : > { %v5828_v29 = vcombine.low %v13525_v15, %v13528_v44  ;;  %v6273_v7 = vcombine.low %v6239_v27, %v6267_v35  ;;  %v6805_v39 = vcombine.high %v13438_v51, %v13441_v1  ;;  %v6270_v36 = vcombine.low %v6225_v59, %v6253_v21  ;;  %v15299_v27 = vld [vmem:[#allocation23_spill] sm:$0xff]  ;;  %v15300_v35 = vld [vmem:[#allocation22_spill] sm:$0xff]  ;;  %v15302_v1 = vld [vmem:[#allocation33_spill] sm:$0xff]  ;;  %v13619_v59 = vpop.f32.mrf.mxu0 }
 0x26d   : > { %v5265_v43 = vsel %vm1729_vm0, %v15298_v62, %v13528_v44  ;;  %v6341_v25 = vcombine.high %v6295_v46, %v6309_v49  ;;  %v6345_v22 = vcombine.high %v6323_v10, %v6337_v31  ;;  %v6340_v55 = vcombine.low %v6295_v46, %v6309_v49  ;;  %v10894_v62 = vld [vmem:[#allocation8 + $0x48] sm:$0xff]   ;;  %v15301_v51 = vld [vmem:[#allocation38_spill] sm:$0xff] }
 0x26e   : > { %v6344_v11 = vcombine.low %v6323_v10, %v6337_v31  ;;  %v5601_v17 = vcombine.low %v13044_v42, %v13037_v41  ;;  %7286 = vmatprep.mubr.bf16.mxu1 %v6273_v7  ;;  %v6942_v5 = vcombine.high %v13509_v34, %v13512_v6  ;;  %v5605_v12 = vcombine.low %v15300_v35, %v15299_v27  ;;  %v13621_v31 = vpop.f32.mrf.mxu1 }
 0x26f   : > { %v6373_v13 = vrot.slane %v6341_v25, %v11602_v8  ;;  %v6401_v28 = vrot.slane %v6345_v22, %v11602_v8  ;;  %v5701_v46 = vcombine.low %v15302_v1, %v15301_v51  ;;  %v5704_v49 = vcombine.low %v12844_v26, %v13289_v53  ;;  %7226 = vmatmul.mubr.bf16.gmra.mxu0 %v6805_v39  ;;  %v15303_v25 = vld [vmem:[#allocation52_spill] sm:$0xff]  ;;  %v15304_v22 = vld [vmem:[#allocation54_spill] sm:$0xff] }
 0x270   : > { %v13624_v10 = vrot.slane %v6340_v55, %v11602_v8  ;;  %v13627_v34 = vrot.slane %v6344_v11, %v11602_v8  ;;  %v10159_v6 = vcombine.high %v13040_v23, %v5601_v17  ;;  %7235 = vmatprep.mubr.bf16.mxu0 %v6942_v5  ;;  %v10161_v24 = vcombine.high %v5605_v12, %v13037_v41  ;;  %v13639_v55 = vpop.f32.mrf.mxu1  ;;  %v10881_v11 = vld [vmem:[#allocation8 + $0xb8] sm:$0xff]   ;;  %v10884_v17 = vld [vmem:[#allocation8 + $0xf0] sm:$0xff]  }
 0x271   : > { %v6407_v42 = vcombine.low %v6373_v13, %v6401_v28  ;;  %v10163_v21 = vcombine.high %v15299_v27, %v5701_v46  ;;  %v10165_v26 = vcombine.high %v5704_v49, %v15301_v51  ;;  %v15305_v7 = vcombine.high %v15303_v25, %v15304_v22  ;;  %v13637_v13 = vpop.f32.mrf.mxu0  ;;  %10341 = vmatprep.subr.bf16.mxu0 %v10894_v62  ;;  %v10895_v49 = vld [vmem:[#allocation8 + $0x8] sm:$0xff]  }
 0x272   : > { %v6404_v23 = vcombine.low %v13624_v10, %v13627_v34  ;;  %v6429_v28 = vrot.slane %v10159_v6, %v11602_v8  ;;  %v5710_v41 = vcombine.low %v13585_v63, %v5265_v43  ;;  %v5711_v12 = vcombine.high %v13585_v63, %v5265_v43  ;;  %7287 = vmatmul.mubr.bf16.vlgmr.msra.gmra.mxu1 %v6270_v36  ;;  %v13653_v46 = vpop.f32.mrf.mxu1 }
 0x273   : > { %v5654_v39 = vrot.slane %v15305_v7, %v11602_v8  ;;  %v5829_v5 = vcombine.high %v13525_v15, %v13528_v44  ;;  %v6443_v27 = vrot.slane %v10161_v24, %v11602_v8  ;;  %v6457_v35 = vrot.slane %v10163_v21, %v11602_v8  ;;  %v13651_v1 = vpop.f32.mrf.mxu0  ;;  %7296 = vmatprep.mubr.bf16.mxu1 %v6407_v42 }
 0x274   : > { %v6471_v51 = vrot.slane %v10165_v26, %v11602_v8  ;;  %v6939_v63 = vcombine.high %v13515_v48, %v13518_v2  ;;  %v5746_v15 = vrot.slane %v5710_v41, %v11602_v8  ;;  %v5753_v44 = vrot.slane %v5711_v12, %v11602_v8  ;;  %v13663_v24 = vpop.f32.mrf.mxu1  ;;  %10382 = vmatpush3.bf16.msra.mxu1 %v10881_v11  ;;  %v10885_v26 = vld [vmem:[#allocation8 + $0xb0] sm:$0xff]  }
 0x275   : > { %v5693_v43 = vrot.slane %v5654_v39, %v11602_v8  ;;  %v6475_v36 = vcombine.high %v6429_v28, %v6443_v27  ;;  %v6474_v10 = vcombine.low %v6429_v28, %v6443_v27  ;;  %v5864_v34 = vrot.slane %v5828_v29, %v11602_v8  ;;  %v13661_v6 = vpop.f32.mrf.mxu0  ;;  %10383 = vmatprep.subr.bf16.mxu1 %v10884_v17 }
 0x276   : > { %v6479_v62 = vcombine.high %v6457_v35, %v6471_v51  ;;  %v7009_v42 = vcombine.high %v13548_v58, %v13548_v58  ;;  %v5758_v2 = vcombine.high %v5746_v15, %v5746_v15  ;;  %v5759_v21 = vcombine.high %v5753_v44, %v5753_v44  ;;  %v13674_v11 = vpop.f32.mrf.mxu1  ;;  %10342 = vmatpush3.bf16.msra.mxu0 %v10895_v49 }
 0x277   : > { %v5703_v48 = vcombine.low %v13305_v57, %v5693_v43  ;;  %v6507_v25 = vrot.slane %v6475_v36, %v11602_v8  ;;  %v5794_v29 = vrot.slane %v5746_v15, %v11602_v8  ;;  %v5871_v7 = vrot.slane %v5829_v5, %v11602_v8  ;;  %v13672_v39 = vpop.f32.mrf.mxu0  ;;  %7236 = vmatmul.mubr.bf16.gmra.mxu0 %v6939_v63  ;;  %v10888_v15 = vld [vmem:[#allocation8 + $0xe8] sm:$0xff]  }
 0x278   : > { %v6535_v22 = vrot.slane %v6479_v62, %v11602_v8  ;;  %v5801_v57 = vrot.slane %v5753_v44, %v11602_v8  ;;  %v5808_v58 = vrot.slane %v5758_v2, %v11602_v8  ;;  %v5815_v28 = vrot.slane %v5759_v21, %v11602_v8  ;;  %7245 = vmatprep.mubr.bf16.mxu0 %v7009_v42  ;;  %v13683_v43 = vpop.f32.mrf.mxu1  ;;  %v10889_v62 = vld [vmem:[#allocation8 + $0xa8] sm:$0xff]   ;;  %v10892_v42 = vld [vmem:[#allocation8 + $0xe0] sm:$0xff]  }
 0x279   : > { %v10167_v41 = vcombine.high %v13289_v53, %v5703_v48  ;;  %v6478_v12 = vcombine.low %v6457_v35, %v6471_v51  ;;  %v6493_v17 = vrot.slane %v6474_v10, %v11602_v8  ;;  %v5875_v27 = vcombine.high %v5864_v34, %v5864_v34  ;;  %v13681_v5 = vpop.f32.mrf.mxu0  ;;  %10384 = vmatpush3.bf16.msra.mxu1 %v10885_v26 }
 0x27a   : > { %v6541_v49 = vcombine.low %v6507_v25, %v6535_v22  ;;  %v10169_v63 = vcombine.low %v5794_v29, %v5808_v58  ;;  %v10171_v36 = vcombine.high %v5794_v29, %v5808_v58  ;;  %v10173_v44 = vcombine.low %v5801_v57, %v5815_v28  ;;  %7297 = vmatmul.mubr.bf16.gmra.mxu1 %v6404_v23 }
 0x27b   : > { %v5903_v2 = vrot.slane %v5864_v34, %v11602_v8  ;;  %v5910_v53 = vrot.slane %v5871_v7, %v11602_v8  ;;  %v5917_v35 = vrot.slane %v5875_v27, %v11602_v8  ;;  %v10175_v51 = vcombine.high %v5801_v57, %v5815_v28  ;;  %v13688_v10 = vpop.f32.mrf.mxu0  ;;  %v13696_v7 = vpop.f32.mrf.mxu1  ;;  %10385 = vmatprep.subr.bf16.mxu1 %v10888_v15  ;;  %v10898_v57 = vld [vmem:[#allocation8 + $0x40] sm:$0xff]  }
 0x27c   : > { %7306 = vmatprep.mubr.bf16.mxu1 %v6541_v49  ;;  %v6563_v48 = vrot.slane %v10167_v41, %v11602_v8  ;;  %v6577_v21 = vrot.slane %v10169_v63, %v11602_v8  ;;  %v6591_v25 = vrot.slane %v10171_v36, %v11602_v8  ;;  %v6605_v26 = vrot.slane %v10173_v44, %v11602_v8  ;;  %v10893_v27 = vld [vmem:[#allocation8 + $0xa0] sm:$0xff]  }
 0x27d   : > { %v6521_v23 = vrot.slane %v6478_v12, %v11602_v8  ;;  %v10177_v34 = vcombine.low %v5903_v2, %v5917_v35  ;;  %v10179_v22 = vcombine.high %v5903_v2, %v5917_v35  ;;  %v10181_v29 = vcombine.low %v5910_v53, %v13419_v0  ;;  %10386 = vmatpush3.bf16.msra.mxu1 %v10889_v62  ;;  %v13706_v44 = vpop.f32.mrf.mxu0  ;;  %v13714_v35 = vpop.f32.mrf.mxu1 }
 0x27e   : > { %v7008_v58 = vcombine.high %v13558_v54, %v13558_v54  ;;  %v6609_v28 = vcombine.high %v6563_v48, %v6577_v21  ;;  %v6613_v41 = vcombine.high %v6591_v25, %v6605_v26  ;;  %v6608_v49 = vcombine.low %v6563_v48, %v6577_v21  ;;  %10387 = vmatprep.subr.bf16.mxu1 %v10892_v42 }
 0x27f   : > { %v6612_v63 = vcombine.low %v6591_v25, %v6605_v26  ;;  %v13701_v36 = vrot.slane %v10175_v51, %v11602_v8  ;;  %v13704_v12 = vrot.slane %v10181_v29, %v11602_v8  ;;  %v13711_v2 = vrot.slane %v10177_v34, %v11602_v8  ;;  %v10896_v51 = vld [vmem:[#allocation8 + $0xd8] sm:$0xff]   ;;  %10343 = vmatprep.subr.bf16.mxu0 %v10898_v57 }
 0x280   : > { %7246 = vmatmul.mubr.bf16.gmra.mxu0 %v7008_v58  ;;  %v6641_v15 = vrot.slane %v6609_v28, %v11602_v8  ;;  %v6669_v54 = vrot.slane %v6613_v41, %v11602_v8  ;;  %v6725_v62 = vrot.slane %v10179_v22, %v11602_v8  ;;  %v6538_v53 = vcombine.low %v6493_v17, %v6521_v23  ;;  %v10897_v25 = vld [vmem:[#allocation8 + $0x98] sm:$0xff]   ;;  %v13723_v23 = vpop.f32.mrf.mxu0  ;;  %v10899_v22 = vld [vmem:[#allocation8] sm:$0xff]   ;;  %v10900_v28 = vld [vmem:[#allocation8 + $0xd0] sm:$0xff]  }
 0x281   : > { %v6035_v42 = vcombine.low %v13409_v33, %v13426_v20  ;;  %10388 = vmatpush3.bf16.msra.mxu1 %v10893_v27  ;;  %v6627_v26 = vrot.slane %v6608_v49, %v11602_v8  ;;  %v6655_v34 = vrot.slane %v6612_v63, %v11602_v8  ;;  %v6037_v17 = vcombine.low %v13412_v9, %v13429_v30  ;;  %v13733_v27 = vpop.f32.mrf.mxu1 }
 0x282   : > { %v6675_v48 = vcombine.low %v6641_v15, %v6669_v54  ;;  %v6747_v21 = vcombine.high %v6725_v62, %v13704_v12  ;;  %7307 = vmatmul.mubr.bf16.gmra.mxu1 %v6538_v53  ;;  %v6743_v29 = vcombine.high %v13701_v36, %v13711_v2  ;;  %v6039_v33 = vcombine.low %v13415_v37, %v13432_v32  ;;  %v10901_v37 = vld [vmem:[#allocation8 + $0x90] sm:$0xff]  }
 0x283   : > { %v6135_v57 = vcombine.low %v13325_v16, %v13475_v50  ;;  %v10185_v58 = vcombine.high %v13429_v30, %v6035_v42  ;;  %v10183_v41 = vcombine.high %v6037_v17, %v13419_v0  ;;  %10389 = vmatprep.subr.bf16.mxu1 %v10896_v51  ;;  %v6672_v16 = vcombine.low %v6627_v26, %v6655_v34  ;;  %v4108_v51 = vpop.f32.mrf.mxu0  ;;  %v4209_v42 = vpop.f32.mrf.mxu1  ;;  %v10902_v26 = vld [vmem:[#allocation8 + $0xc8] sm:$0xff]  }
 0x284   : > { %7316 = vmatprep.mubr.bf16.mxu1 %v6675_v48  ;;  %v6803_v9 = vrot.slane %v6747_v21, %v11602_v8  ;;  %v10187_v49 = vcombine.high %v6039_v33, %v13426_v20  ;;  %v6746_v30 = vcombine.low %v6725_v62, %v13704_v12  ;;  %v15306_v0 = vcombine.high %v13217_v60, %v13220_v40 }
 0x285   : > { %v10189_v63 = vcombine.high %v13432_v32, %v6135_v57  ;;  %v13739_v15 = vrot.slane %v10185_v58, %v11602_v8  ;;  %10390 = vmatpush3.bf16.msra.mxu1 %v10897_v25  ;;  %v6831_v54 = vrot.slane %v10183_v41, %v11602_v8  ;;  %10344 = vmatpush3.bf16.msra.mxu0 %v10899_v22  ;;  %v4110_v25 = vpop.f32.mrf.mxu0 }
 0x286   : > { %v6088_v53 = vrot.slane %v15306_v0, %v11602_v8  ;;  %v6775_v20 = vrot.slane %v6743_v29, %v11602_v8  ;;  %v6859_v32 = vrot.slane %v10187_v49, %v11602_v8  ;;  %v13752_v21 = vadd.f32 %v13555_v14, %v13553_v47  ;;  %10391 = vmatprep.subr.bf16.mxu1 %v10900_v28  ;;  %v10903_v14 = vld [vmem:[#allocation8 + $0x88] sm:$0xff]   ;;  %v4211_v29 = vpop.f32.mrf.mxu1 }
 0x287   : > { %v6873_v48 = vrot.slane %v10189_v63, %v11602_v8  ;;  %v6877_v12 = vcombine.high %v6831_v54, %v13739_v15  ;;  %v6138_v60 = vcombine.low %v13404_v19, %v13478_v38  ;;  %v13760_v40 = vadd.f32 %v13577_v52, %v13575_v18  ;;  %v4112_v18 = vpop.f32.mrf.mxu0  ;;  %v10904_v52 = vld [vmem:[#allocation8 + $0xc0] sm:$0xff]  }
 0x288   : > { %v6127_v62 = vrot.slane %v6088_v53, %v11602_v8  ;;  %v6809_v34 = vcombine.low %v6775_v20, %v6803_v9  ;;  %v13764_v47 = vadd.f32 %v13597_v61, %v13595_v45  ;;  %v6742_v22 = vcombine.low %v13701_v36, %v13711_v2  ;;  %v4213_v36 = vpop.f32.mrf.mxu1  ;;  %v15316_v18 = vld [vmem:[#allocation39_spill] sm:$0xff] }
 0x289   : > { %v6881_v17 = vcombine.high %v6859_v32, %v6873_v48  ;;  %10392 = vmatpush3.bf16.msra.mxu1 %v10901_v37  ;;  %v6789_v33 = vrot.slane %v6746_v30, %v11602_v8  ;;  %v13772_v57 = vadd.f32 %v13639_v55, %v13637_v13  ;;  %v6909_v45 = vrot.slane %v6877_v12, %v11602_v8  ;;  %v4113_v2 = vpop.f32.mrf.mxu0  ;;  %v15308_v12 = vld [vmem:[#allocation20_spill] sm:$0xff]  ;;  %v15318_v36 = vld [vmem:[#allocation27_spill] sm:$0xff] }
 0x28a   : > { %7317 = vmatmul.mubr.bf16.gmra.mxu1 %v6672_v16  ;;  %v6137_v19 = vcombine.low %v13492_v3, %v6127_v62  ;;  %v10191_v61 = vcombine.high %v6138_v60, %v13475_v50  ;;  %v13778_v58 = vadd.f32 %v13653_v46, %v13651_v1  ;;  %v13782_v3 = vadd.f32 %v13663_v24, %v13661_v6  ;;  %v10905_v1 = vld [vmem:[#allocation8 + $0x80] sm:$0xff]   ;;  %v4214_v41 = vpop.f32.mrf.mxu1  ;;  %v15309_v62 = vld [vmem:[#allocation21_spill] sm:$0xff]  ;;  %v15319_v2 = vld [vmem:[#allocation26_spill] sm:$0xff] }
 0x28b   : > { %7326 = vmatprep.mubr.bf16.mxu1 %v6809_v34  ;;  %10393 = vmatprep.subr.bf16.mxu1 %v10902_v26  ;;  %v6937_v28 = vrot.slane %v6881_v17, %v11602_v8  ;;  %v13788_v55 = vadd.f32 %v13683_v43, %v13681_v5  ;;  %v13792_v50 = vadd.f32 %v13696_v7, %v13688_v10  ;;  %v11256_v63 = vmov 1983009808  }
 0x28c   : > { %v10193_v13 = vcombine.high %v13478_v38, %v6137_v19  ;;  %v6761_v46 = vrot.slane %v6742_v22, %v11602_v8  ;;  %v13797_v6 = vadd.f32 %v13714_v35, %v13706_v44  ;;  %v13799_v24 = vadd.f32 %v4209_v42, %v4108_v51  ;;  %v15310_v42 = vld [vmem:[#allocation16_spill] sm:$0xff] }
 0x28d   : > { %10394 = vmatpush3.bf16.msra.mxu1 %v10903_v14  ;;  %v13801_v38 = vadd.f32 %v4211_v29, %v4110_v25  ;;  %v6876_v43 = vcombine.low %v6831_v54, %v13739_v15  ;;  %v6880_v9 = vcombine.low %v6859_v32, %v6873_v48  ;;  %v6943_v10 = vcombine.low %v6909_v45, %v6937_v28  ;;  %v15307_v54 = vld [vmem:[#allocation15_spill] sm:$0xff]  ;;  %v10906_v32 = vld [vmem:[#allocation8 + $0x178] sm:$0xff]   ;;  %v15311_v25 = vld [vmem:[#allocation17_spill] sm:$0xff] }
 0x28e   : > { %10395 = vmatprep.subr.bf16.mxu1 %v10904_v52  ;;  %v6806_v5 = vcombine.low %v6761_v46, %v6789_v33  ;;  %v6961_v7 = vrot.slane %v10191_v61, %v11602_v8  ;;  %v6975_v49 = vrot.slane %v10193_v13, %v11602_v8  ;;  %v4346_v37 = vunpack.c.l.s4 %v11256_v63  ;;  %10433 = vmatprep.subr.bf16.mxu0 %v10906_v32  ;;  %v15317_v52 = vld [vmem:[#allocation24_spill] sm:$0xff] }
 0x28f   : > { %v6895_v44 = vrot.slane %v6876_v43, %v11602_v8  ;;  %v6923_v35 = vrot.slane %v6880_v9, %v11602_v8  ;;  %v4150_v48 = vadd.f32 %v13215_v4, %v13213_v56  ;;  %v4152_v60 = vadd.f32 %v15309_v62, %v15308_v12 }
 0x290   : > { %v6979_v16 = vcombine.high %v6961_v7, %v6975_v49  ;;  %v4347_v30 = vunpack.c.0.s8 %v4346_v37  ;;  %v6978_v51 = vcombine.low %v6961_v7, %v6975_v49  ;;  %v15312_v26 = vcombine.low %v15310_v42, %v15311_v25 }
 0x291   : > { %10396 = vmatpush3.bf16.msra.mxu1 %v10905_v1  ;;  %v6940_v0 = vcombine.low %v6895_v44, %v6923_v35  ;;  %v15314_v14 = vcombine.high %v15310_v42, %v15311_v25  ;;  %v4156_v33 = vadd.f32 %v15317_v52, %v15316_v18  ;;  %v4154_v28 = vadd.f32 %v15319_v2, %v15318_v36 }
 0x292   : > { %7327 = vmatmul.mubr.bf16.gmra.mxu1 %v6806_v5  ;;  %v7007_v15 = vrot.slane %v6979_v16, %v11602_v8  ;;  %v13810_v53 = vsub.s32 %v4347_v30, %v15307_v54  ;;  %v6993_v56 = vrot.slane %v6978_v51, %v11602_v8 }
 0x293   : > { %7336 = vmatprep.mubr.bf16.mxu1 %v6943_v10 }
 0x294   : > { %v13820_v34 = vrot.slane %v15312_v26, %v13810_v53  ;;  %v13826_v22 = vrot.slane %v15314_v14, %v13810_v53  ;;  %v15322_v26 = vld [vmem:[#allocation25_spill] sm:$0xff] }
 0x295   : > { %v4250_v20 = vpop.f32.mrf.mxu0 }
 0x296   : > { %15313 = vst [vmem:[#allocation19_spill] sm:$0xff] %v13820_v34  ;;  %15315 = vst [vmem:[#allocation28_spill] sm:$0xff] %v13826_v22  ;;  %v4251_v19 = vadd.f32 %v4250_v20, %v4150_v48  ;;  %v13835_v13 = vcombine.high %v13820_v34, %v13820_v34  ;;  %v13841_v8 = vcombine.high %v13826_v22, %v13826_v22 }
 0x297   : > { %v4252_v17 = vpop.f32.mrf.mxu0 }
 0x298   : > { %v4253_v29 = vadd.f32 %v4252_v17, %v4152_v60  ;;  %15320 = vst [vmem:[#allocation30_spill] sm:$0xff] %v13835_v13  ;;  %15321 = vst [vmem:[#allocation45_spill] sm:$0xff] %v13841_v8  ;;  %v15323_v17 = vld [vmem:[#allocation46_spill] sm:$0xff] }
 0x299   : > { %v4254_v4 = vpop.f32.mrf.mxu0  ;;  %v4160_v14 = vadd.f32 %v15323_v17, %v15322_v26 }
 0x29a   : > { %7337 = vmatmul.mubr.bf16.gmra.mxu1 %v6940_v0  ;;  %v4343_v45 = vcombine.low %v4251_v19, %v4253_v29  ;;  %v4344_v61 = vcombine.high %v4251_v19, %v4253_v29  ;;  %v4255_v43 = vadd.f32 %v4254_v4, %v4154_v28  ;;  %v10922_v0 = vld [vmem:[#allocation8 + $0x1f8] sm:$0xff]   ;;  %v15324_v19 = vld [vmem:[#allocation48_spill] sm:$0xff]  ;;  %v15325_v29 = vld [vmem:[#allocation47_spill] sm:$0xff] }
 0x29b   : > { %7346 = vmatprep.mubr.bf16.mxu1 %v7007_v15  ;;  %v4256_v1 = vpop.f32.mrf.mxu0  ;;  %10485 = vmatprep.subr.bf16.mxu1 %v10922_v0 }
 0x29c   : > { %v4351_v46 = vrot.slane %v4343_v45, %v13810_v53  ;;  %v4358_v41 = vrot.slane %v4344_v61, %v13810_v53  ;;  %v4257_v5 = vadd.f32 %v4256_v1, %v4156_v33  ;;  %v15326_v1 = vld [vmem:[#allocation36_spill] sm:$0xff] }
 0x29e   : > { %v4359_v9 = vcombine.high %v4351_v46, %v4351_v46  ;;  %v4360_v10 = vcombine.high %v4358_v41, %v4358_v41  ;;  %v4660_v7 = vadd.f32 %v13820_v34, %v4351_v46  ;;  %v4662_v49 = vadd.f32 %v13826_v22, %v4358_v41  ;;  %v15327_v46 = vld [vmem:[#allocation37_spill] sm:$0xff] }
 0x29f   : > { %v4361_v63 = vcombine.low %v4255_v43, %v4257_v5  ;;  %v4362_v37 = vcombine.high %v4255_v43, %v4257_v5  ;;  %v4166_v41 = vadd.f32 %v15327_v46, %v15326_v1 }
 0x2a0   : > { %v4661_v44 = vadd.f32 %v13835_v13, %v4359_v9  ;;  %v4663_v35 = vadd.f32 %v13841_v8, %v4360_v10  ;;  %v4712_v15 = vmax.f32 %v4660_v7, 0.0  ;;  %v4714_v51 = vmax.f32 %v4662_v49, 0.0 }
 0x2a1   : > { %v4369_v16 = vrot.slane %v4361_v63, %v13810_v53  ;;  %v4376_v30 = vrot.slane %v4362_v37, %v13810_v53  ;;  %v15328_v37 = vld [vmem:[#allocation49_spill] sm:$0xff] }
 0x2a2   : > { %7347 = vmatmul.mubr.bf16.gmra.mxu1 %v6993_v56  ;;  %v4713_v54 = vmax.f32 %v4661_v44, 0.0  ;;  %v4715_v20 = vmax.f32 %v4663_v35, 0.0  ;;  %v4162_v56 = vadd.f32 %v15325_v29, %v15324_v19  ;;  %v15329_v44 = vld [vmem:[#allocation40_spill] sm:$0xff] }
 0x2a3   : > { %v4377_v32 = vcombine.high %v4369_v16, %v4369_v16  ;;  %v4378_v48 = vcombine.high %v4376_v30, %v4376_v30  ;;  %v4664_v12 = vadd.f32 %v13820_v34, %v4369_v16  ;;  %v4666_v62 = vadd.f32 %v13826_v22, %v4376_v30 }
 0x2a4   : > { %v4816_v60 = vcombine.low %v4712_v15, %v4713_v54  ;;  %v4817_v42 = vcombine.low %v4714_v51, %v4715_v20  ;;  %v4164_v35 = vadd.f32 %v15329_v44, %v15328_v37 }
 0x2a5   : > { %v4260_v25 = vpop.f32.mrf.mxu0  ;;  %v4665_v4 = vadd.f32 %v13835_v13, %v4377_v32  ;;  %v4667_v18 = vadd.f32 %v13841_v8, %v4378_v48  ;;  %v4716_v52 = vmax.f32 %v4664_v12, 0.0  ;;  %v4718_v33 = vmax.f32 %v4666_v62, 0.0 }
 0x2a6   : > { %v4261_v2 = vadd.f32 %v4260_v25, %v4160_v14  ;;  %v4824_v5 = vrot.slane %v4816_v60, %v13810_v53  ;;  %v4831_v43 = vrot.slane %v4817_v42, %v13810_v53 }
 0x2a7   : > { %v4262_v45 = vpop.f32.mrf.mxu0  ;;  %v4717_v61 = vmax.f32 %v4665_v4, 0.0  ;;  %v4719_v36 = vmax.f32 %v4667_v18, 0.0 }
 0x2a8   : > { %v4263_v28 = vadd.f32 %v4262_v45, %v4162_v56  ;;  %v4832_v51 = vcombine.low %v4824_v5, %v4831_v43  ;;  %v4833_v32 = vcombine.high %v4824_v5, %v4831_v43 }
 0x2a9   : > { %v4264_v9 = vpop.f32.mrf.mxu0  ;;  %v4834_v10 = vcombine.low %v4716_v52, %v4717_v61  ;;  %v4835_v7 = vcombine.low %v4718_v33, %v4719_v36  ;;  %v10907_v33 = vld [vmem:[#allocation8 + $0x138] sm:$0xff]  }
 0x2aa   : > { %v4379_v49 = vcombine.low %v4261_v2, %v4263_v28  ;;  %v4380_v63 = vcombine.high %v4261_v2, %v4263_v28  ;;  %v4265_v20 = vadd.f32 %v4264_v9, %v4164_v35  ;;  %v10908_v28 = vld [vmem:[#allocation8 + $0x170] sm:$0xff]  }
 0x2ab   : > { %v4266_v16 = vpop.f32.mrf.mxu0  ;;  %v4842_v54 = vrot.slane %v4834_v10, %v13810_v53  ;;  %v4849_v48 = vrot.slane %v4835_v7, %v13810_v53  ;;  %v10909_v7 = vld [vmem:[#allocation8 + $0x130] sm:$0xff]  }
 0x2ac   : > { %v4387_v30 = vrot.slane %v4379_v49, %v13810_v53  ;;  %v4394_v0 = vrot.slane %v4380_v63, %v13810_v53  ;;  %v4267_v15 = vadd.f32 %v4266_v16, %v4166_v41  ;;  %v15330_v49 = vld [vmem:[#allocation50_spill] sm:$0xff]  ;;  %v15331_v63 = vld [vmem:[#allocation41_spill] sm:$0xff] }
 0x2ad   : > { %v4850_v17 = vcombine.low %v4842_v54, %v4849_v48  ;;  %v4851_v14 = vcombine.high %v4842_v54, %v4849_v48  ;;  %v4170_v37 = vadd.f32 %v15331_v63, %v15330_v49 }
 0x2ae   : > { %v4395_v12 = vcombine.high %v4387_v30, %v4387_v30  ;;  %v4396_v62 = vcombine.high %v4394_v0, %v4394_v0  ;;  %v4668_v60 = vadd.f32 %v13820_v34, %v4387_v30  ;;  %v4670_v42 = vadd.f32 %v13826_v22, %v4394_v0  ;;  %v10910_v30 = vld [vmem:[#allocation8 + $0x168] sm:$0xff]   ;;  %v15332_v0 = vld [vmem:[#allocation51_spill] sm:$0xff] }
 0x2af   : > { %v4397_v25 = vcombine.low %v4265_v20, %v4267_v15  ;;  %v4398_v26 = vcombine.high %v4265_v20, %v4267_v15  ;;  %v13873_v18 = vpack.c.bf16 %v4851_v14, %v4833_v32  ;;  %v13875_v52 = vpack.c.bf16 %v4850_v17, %v4832_v51  ;;  %v15333_v15 = vld [vmem:[#allocation53_spill] sm:$0xff]  ;;  %v15336_v17 = vld [vmem:[#allocation34_spill] sm:$0xff] }
 0x2b0   : > { %v4669_v19 = vadd.f32 %v13835_v13, %v4395_v12  ;;  %v4671_v29 = vadd.f32 %v13841_v8, %v4396_v62  ;;  %v4720_v45 = vmax.f32 %v4668_v60, 0.0  ;;  %v4722_v36 = vmax.f32 %v4670_v42, 0.0  ;;  %v15334_v12 = vld [vmem:[#allocation31_spill] sm:$0xff]  ;;  %v15335_v62 = vld [vmem:[#allocation18_spill] sm:$0xff]  ;;  %v15337_v14 = vld [vmem:[#allocation29_spill] sm:$0xff] }
 0x2b1   : > { %v4405_v56 = vrot.slane %v4397_v25, %v13810_v53  ;;  %v4412_v4 = vrot.slane %v4398_v26, %v13810_v53  ;;  %9335 = vmatprep.mubr.bf16.mxu0 %v13873_v18  ;;  %v8134_v10 = vshll.u32 %v13873_v18, 16  ;;  %v4172_v54 = vadd.f32 %v15333_v15, %v15332_v0 }
 0x2b2   : > { %v4721_v61 = vmax.f32 %v4669_v19, 0.0  ;;  %v4723_v2 = vmax.f32 %v4671_v29, 0.0  ;;  %9336 = vmatmul.mubr.bf16.vlgmr.msra.gmra.mxu0 %v13875_v52  ;;  %v8122_v48 = vshll.u32 %v13875_v52, 16  ;;  %v4174_v60 = vadd.f32 %v15335_v62, %v15334_v12 }
 0x2b3   : > { %v4413_v1 = vcombine.high %v4405_v56, %v4405_v56  ;;  %v4672_v46 = vadd.f32 %v13820_v34, %v4405_v56  ;;  %v4414_v43 = vcombine.high %v4412_v4, %v4412_v4  ;;  %10434 = vmatpush3.bf16.msra.mxu0 %v10907_v33  ;;  %v13886_v16 = vadd.f32 %v13835_v13, %v4412_v4 }
 0x2b4   : > { %v4852_v41 = vcombine.low %v4720_v45, %v4721_v61  ;;  %v4853_v5 = vcombine.low %v4722_v36, %v4723_v2  ;;  %10435 = vmatprep.subr.bf16.mxu0 %v10908_v28  ;;  %v4176_v19 = vadd.f32 %v15337_v14, %v15336_v17  ;;  %v8132_v4 = vshrl.u32 %v13873_v18, 16  ;;  %v10911_v45 = vld [vmem:[#allocation8 + $0x128] sm:$0xff]  }
 0x2b5   : > { %v4724_v9 = vmax.f32 %v4672_v46, 0.0  ;;  %v4673_v51 = vadd.f32 %v13820_v34, %v4413_v1  ;;  %v13900_v26 = vadd.f32 %v13826_v22, %v4414_v43  ;;  %v8136_v33 = vrot.slane %v8134_v10, 1  ;;  %v10912_v1 = vld [vmem:[#allocation8 + $0x160] sm:$0xff]  }
 0x2b6   : > { %v4860_v44 = vrot.slane %v4852_v41, %v13810_v53  ;;  %v4867_v35 = vrot.slane %v4853_v5, %v13810_v53  ;;  %v4726_v61 = vmax.f32 %v13886_v16, 0.0  ;;  %v8120_v43 = vshrl.u32 %v13875_v52, 16  ;;  %v10913_v16 = vld [vmem:[#allocation8 + $0x120] sm:$0xff]  }
 0x2b7   : > { %v4876_v20 = vrot.slane %v4724_v9, %v13810_v53  ;;  %v4270_v32 = vpop.f32.mrf.mxu0  ;;  %10436 = vmatpush3.bf16.msra.mxu0 %v10909_v7  ;;  %v4725_v46 = vmax.f32 %v4673_v51, 0.0  ;;  %v8124_v9 = vrot.slane %v8122_v48, 1  ;;  %v4727_v10 = vmax.f32 %v13900_v26, 0.0 }
 0x2b8   : > { %v13895_v42 = vcombine.low %v4860_v44, %v4867_v35  ;;  %v13897_v25 = vcombine.high %v4860_v44, %v4867_v35  ;;  %v4271_v2 = vadd.f32 %v4270_v32, %v4170_v37  ;;  %10437 = vmatprep.subr.bf16.mxu0 %v10910_v30  ;;  %v8137_v35 = vor.u32 %v8136_v33, %v8132_v4  ;;  %v10914_v32 = vld [vmem:[#allocation8 + $0x158] sm:$0xff]  }
 0x2b9   : > { %v4877_v29 = vcombine.high %v4876_v20, %v4876_v20  ;;  %v4272_v56 = vpop.f32.mrf.mxu0  ;;  %v8258_v30 = vrot.slane %v13873_v18, 1  ;;  %v8125_v62 = vor.u32 %v8124_v9, %v8120_v43  ;;  %v8255_v43 = vrot.slane %v13875_v52, 1  ;;  %v10924_v9 = vld [vmem:[#allocation8 + $0x1f0] sm:$0xff]  }
 0x2ba   : > { %v13907_v36 = vpack.c.bf16 %v4876_v20, %v13895_v42  ;;  %v4273_v28 = vadd.f32 %v4272_v56, %v4172_v54  ;;  %v10917_v52 = vld [vmem:[#allocation8 + $0x110] sm:$0xff]  }
 0x2bb   : > { %v4274_v41 = vpop.f32.mrf.mxu0  ;;  %v13910_v5 = vpack.c.bf16 %v4877_v29, %v13897_v25  ;;  %10438 = vmatpush3.bf16.msra.mxu0 %v10911_v45  ;;  %v10915_v45 = vld [vmem:[#allocation8 + $0x118] sm:$0xff]  }
 0x2bc   : > { %v4415_v7 = vcombine.low %v4271_v2, %v4273_v28  ;;  %v4416_v49 = vcombine.high %v4271_v2, %v4273_v28  ;;  %v8127_v63 = vshll.u32 %v13907_v36, 16  ;;  %10439 = vmatprep.subr.bf16.mxu0 %v10912_v1  ;;  %v4275_v48 = vadd.f32 %v4274_v41, %v4174_v60  ;;  %v10916_v41 = vld [vmem:[#allocation8 + $0x150] sm:$0xff]  }
 0x2bd   : > { %v4276_v44 = vpop.f32.mrf.mxu0  ;;  %v8139_v37 = vshll.u32 %v13910_v5, 16  ;;  %v8259_v0 = vrot.slane %v13910_v5, 1  ;;  %v8256_v29 = vrot.slane %v13907_v36, 1  ;;  %v4878_v1 = vcombine.low %v4725_v46, %v4726_v61  ;;  %v10925_v61 = vld [vmem:[#allocation8 + $0x1b0] sm:$0xff]  }
 0x2be   : > { %v4423_v15 = vrot.slane %v4415_v7, %v13810_v53  ;;  %v4430_v54 = vrot.slane %v4416_v49, %v13810_v53  ;;  %v4277_v51 = vadd.f32 %v4276_v44, %v4176_v19  ;;  %v13920_v20 = vrot.slane %v8127_v63, 1  ;;  %v10923_v19 = vld [vmem:[#allocation8 + $0x1b8] sm:$0xff]  }
 0x2bf   : > { %v13922_v12 = vrot.slane %v8139_v37, 1  ;;  %v13927_v26 = vsel %vm1729_vm0, %v8258_v30, %v8259_v0  ;;  %10440 = vmatpush3.bf16.msra.mxu0 %v10913_v16  ;;  %v13943_v37 = vsel %vm1729_vm0, %v8255_v43, %v8256_v29  ;;  %v10926_v30 = vld [vmem:[#allocation8 + $0x1e8] sm:$0xff]   ;;  %v10920_v43 = vld [vmem:[#allocation8 + $0x140] sm:$0xff]  }
 0x2c0   : > { %v4431_v18 = vcombine.high %v4423_v15, %v4423_v15  ;;  %v4432_v17 = vcombine.high %v4430_v54, %v4430_v54  ;;  %v4676_v14 = vadd.f32 %v13841_v8, %v4423_v15  ;;  %v4678_v56 = vadd.f32 %v13835_v13, %v4430_v54  ;;  %10441 = vmatprep.subr.bf16.mxu0 %v10914_v32 }
 0x2c1   : > { %v4433_v4 = vcombine.low %v4275_v48, %v4277_v51  ;;  %v8142_v60 = vsel %vm1592_vm1, %v8137_v35, %v13922_v12  ;;  %v8130_v33 = vsel %vm1592_vm1, %v8125_v62, %v13920_v20  ;;  %v4434_v35 = vcombine.high %v4275_v48, %v4277_v51 }
 0x2c2   : > { %v4677_v2 = vadd.f32 %v13820_v34, %v4431_v18  ;;  %v4728_v28 = vmax.f32 %v4676_v14, 0.0  ;;  %9416 = vmatprep.mubr.bf16.mxu1 %v8142_v60  ;;  %v4679_v7 = vadd.f32 %v13826_v22, %v4432_v17  ;;  %v4730_v46 = vmax.f32 %v4678_v56, 0.0 }
 0x2c3   : > { %v4441_v49 = vrot.slane %v4433_v4, %v13810_v53  ;;  %9417 = vmatmul.mubr.bf16.vlgmr.msra.gmra.mxu1 %v8130_v33  ;;  %10442 = vmatpush3.bf16.msra.mxu0 %v10915_v45  ;;  %v4886_v15 = vrot.slane %v4878_v1, %v13810_v53  ;;  %v4448_v18 = vrot.slane %v4434_v35, %v13810_v53  ;;  %v10919_v45 = vld [vmem:[#allocation8 + $0x108] sm:$0xff]   ;;  %v10934_v35 = vld [vmem:[#allocation8 + $0x1d8] sm:$0xff]  }
 0x2c4   : > { %v4729_v63 = vmax.f32 %v4677_v2, 0.0  ;;  %v4879_v44 = vcombine.low %v4727_v10, %v4728_v28  ;;  %10486 = vmatpush3.bf16.msra.mxu1 %v10923_v19  ;;  %10443 = vmatprep.subr.bf16.mxu0 %v10916_v41  ;;  %v10918_v10 = vld [vmem:[#allocation8 + $0x148] sm:$0xff]   ;;  %v4731_v51 = vmax.f32 %v4679_v7, 0.0  ;;  %v10928_v2 = vld [vmem:[#allocation8 + $0x1e0] sm:$0xff]  }
 0x2c5   : > { %v4680_v16 = vadd.f32 %v13841_v8, %v4441_v49  ;;  %10487 = vmatprep.subr.bf16.mxu1 %v10924_v9  ;;  %v4449_v48 = vcombine.high %v4441_v49, %v4441_v49  ;;  %v10927_v19 = vld [vmem:[#allocation8 + $0x1a8] sm:$0xff]   ;;  %v4450_v9 = vcombine.high %v4448_v18, %v4448_v18  ;;  %v4682_v7 = vadd.f32 %v13835_v13, %v4448_v18 }
 0x2c6   : > { %v4893_v54 = vrot.slane %v4879_v44, %v13810_v53  ;;  %v4896_v32 = vcombine.low %v4729_v63, %v4730_v46  ;;  %v10930_v63 = vld [vmem:[#allocation8 + $0x1a0] sm:$0xff]  }
 0x2c7   : > { %v4732_v62 = vmax.f32 %v4680_v16, 0.0  ;;  %10444 = vmatpush3.bf16.msra.mxu0 %v10917_v52  ;;  %v4681_v1 = vadd.f32 %v13820_v34, %v4449_v48  ;;  %v10921_v16 = vld [vmem:[#allocation8 + $0x100] sm:$0xff]   ;;  %v4186_v52 = vadd.f32 %v13621_v31, %v13619_v59  ;;  %v8146_v48 = vshrl.u32 %v13910_v5, 16 }
 0x2c8   : > { %v4895_v17 = vcombine.high %v4886_v15, %v4893_v54  ;;  %v4894_v14 = vcombine.low %v4886_v15, %v4893_v54  ;;  %10488 = vmatpush3.bf16.msra.mxu1 %v10925_v61  ;;  %10445 = vmatprep.subr.bf16.mxu0 %v10918_v10  ;;  %v4904_v28 = vrot.slane %v4896_v32, %v13810_v53  ;;  %v10929_v10 = vld [vmem:[#allocation8 + $0x278] sm:$0xff]  }
 0x2c9   : > { %v4897_v56 = vcombine.low %v4731_v51, %v4732_v62  ;;  %10489 = vmatprep.subr.bf16.mxu1 %v10926_v30  ;;  %v4733_v30 = vmax.f32 %v4681_v1, 0.0  ;;  %v4734_v51 = vmax.f32 %v4682_v7, 0.0  ;;  %v10935_v62 = vld [vmem:[#allocation8 + $0x198] sm:$0xff]  }
 0x2ca   : > { %v10322_v60 = vpack.c.bf16 %v4895_v17, %v13897_v25  ;;  %v10321_v33 = vpack.c.bf16 %v4894_v14, %v13895_v42 }
 0x2cb   : > { %v4280_v4 = vpop.f32.mrf.mxu0  ;;  %v4911_v41 = vrot.slane %v4897_v56, %v13810_v53  ;;  %10446 = vmatpush3.bf16.msra.mxu0 %v10919_v45  ;;  %v10938_v56 = vld [vmem:[#allocation8 + $0x1d0] sm:$0xff]  }
 0x2cc   : > { %9343 = vmatprep.mubr.bf16.mxu0 %v10322_v60  ;;  %10490 = vmatpush3.bf16.msra.mxu1 %v10927_v19  ;;  %v4281_v25 = vadd.f32 %v4280_v4, %v13752_v21  ;;  %v13961_v21 = vadd.f32 %v13674_v11, %v13672_v39  ;;  %v13973_v4 = vor.u32 %v8146_v48, %v13922_v12  ;;  %v8143_v60 = vshrl.u32 %v13907_v36, 16  ;;  %v10946_v48 = vld [vmem:[#allocation8 + $0x1c0] sm:$0xff]  }
 0x2cd   : > { %v4282_v49 = vpop.f32.mrf.mxu0  ;;  %v4913_v44 = vcombine.high %v4904_v28, %v4911_v41  ;;  %9344 = vmatmul.mubr.bf16.gmra.mxu0 %v10321_v33  ;;  %v4912_v46 = vcombine.low %v4904_v28, %v4911_v41  ;;  %10491 = vmatprep.subr.bf16.mxu1 %v10928_v2  ;;  %v4914_v33 = vcombine.low %v4733_v30, %v4734_v51 }
 0x2ce   : > { %v4283_v42 = vadd.f32 %v4282_v49, %v13760_v40  ;;  %10447 = vmatprep.subr.bf16.mxu0 %v10920_v43  ;;  %v4683_v40 = vadd.f32 %v13826_v22, %v4450_v9  ;;  %v13978_v43 = vor.u32 %v8143_v60, %v13920_v20  ;;  %v10942_v49 = vld [vmem:[#allocation8 + $0x1c8] sm:$0xff]  }
 0x2cf   : > { %v4284_v61 = vpop.f32.mrf.mxu0  ;;  %v13967_v19 = vpack.c.bf16 %v4913_v44, %v4895_v17  ;;  %v13970_v11 = vpack.c.bf16 %v4912_v46, %v4894_v14  ;;  %10448 = vmatpush3.bf16.msra.mxu0 %v10921_v16  ;;  %v4922_v44 = vrot.slane %v4914_v33, %v13810_v53 }
 0x2d0   : > { %v4451_v15 = vcombine.low %v4281_v25, %v4283_v42  ;;  %v4452_v54 = vcombine.high %v4281_v25, %v4283_v42  ;;  %10492 = vmatpush3.bf16.msra.mxu1 %v10930_v63  ;;  %v4285_v39 = vadd.f32 %v4284_v61, %v13764_v47  ;;  %10537 = vmatprep.subr.bf16.mxu0 %v10929_v10  ;;  %v4735_v17 = vmax.f32 %v4683_v40, 0.0  ;;  %v10939_v47 = vld [vmem:[#allocation8 + $0x190] sm:$0xff]  }
 0x2d1   : > { %v4286_v32 = vpop.f32.mrf.mxu0  ;;  %10493 = vmatprep.subr.bf16.mxu1 %v10934_v35  ;;  %v8164_v7 = vshll.u32 %v13967_v19, 16  ;;  %v8152_v20 = vshll.u32 %v13970_v11, 16  ;;  %v8488_v46 = vunpack.c.h.b16 %v13967_v19  ;;  %v8162_v51 = vshrl.u32 %v13967_v19, 16 }
 0x2d2   : > { %v4459_v18 = vrot.slane %v4451_v15, %v13810_v53  ;;  %v4466_v59 = vrot.slane %v4452_v54, %v13810_v53  ;;  %v4287_v31 = vadd.f32 %v4286_v32, %v4186_v52  ;;  %v10943_v54 = vld [vmem:[#allocation8 + $0x188] sm:$0xff]   ;;  %v8150_v33 = vshrl.u32 %v13970_v11, 16 }
 0x2d3   : > { %v8166_v32 = vrot.slane %v8164_v7, 1 }
 0x2d4   : > { %v4467_v45 = vcombine.high %v4459_v18, %v4459_v18  ;;  %v4468_v2 = vcombine.high %v4466_v59, %v4466_v59  ;;  %v4684_v28 = vadd.f32 %v13841_v8, %v4459_v18  ;;  %v4469_v1 = vcombine.low %v4285_v39, %v4287_v31  ;;  %10494 = vmatpush3.bf16.msra.mxu1 %v10935_v62 }
 0x2d5   : > { %v4470_v41 = vcombine.high %v4285_v39, %v4287_v31  ;;  %10495 = vmatprep.subr.bf16.mxu1 %v10938_v56  ;;  %v4686_v63 = vadd.f32 %v13820_v34, %v4466_v59  ;;  %v8154_v31 = vrot.slane %v8152_v20, 1 }
 0x2d6   : > { %v4685_v12 = vadd.f32 %v13820_v34, %v4467_v45  ;;  %v4687_v14 = vadd.f32 %v13835_v13, %v4468_v2  ;;  %v4736_v9 = vmax.f32 %v4684_v28, 0.0  ;;  %v4477_v25 = vrot.slane %v4469_v1, %v13810_v53  ;;  %v10947_v1 = vld [vmem:[#allocation8 + $0x180] sm:$0xff]  }
 0x2d7   : > { %v4484_v42 = vrot.slane %v4470_v41, %v13810_v53  ;;  %v4738_v62 = vmax.f32 %v4686_v63, 0.0  ;;  %v8264_v63 = vrot.slane %v13967_v19, 1 }
 0x2d8   : > { %v4737_v35 = vmax.f32 %v4685_v12, 0.0  ;;  %v4915_v61 = vcombine.low %v4735_v17, %v4736_v9  ;;  %v4739_v16 = vmax.f32 %v4687_v14, 0.0  ;;  %v4485_v52 = vcombine.high %v4477_v25, %v4477_v25  ;;  %10496 = vmatpush3.bf16.msra.mxu1 %v10939_v47 }
 0x2d9   : > { %v4486_v30 = vcombine.high %v4484_v42, %v4484_v42  ;;  %v4688_v15 = vadd.f32 %v13826_v22, %v4477_v25  ;;  %10497 = vmatprep.subr.bf16.mxu1 %v10942_v49  ;;  %v13995_v59 = vadd.f32 %v13820_v34, %v4484_v42  ;;  %v8487_v12 = vunpack.c.h.b16 %v13970_v11  ;;  %v14008_v25 = vpop.f32.mrf.mxu1 }
 0x2da   : > { %v4929_v10 = vrot.slane %v4915_v61, %v13810_v53  ;;  %v4938_v40 = vrot.slane %v4737_v35, %v13810_v53  ;;  %v4689_v18 = vadd.f32 %v13841_v8, %v4485_v52  ;;  %v4940_v45 = vcombine.low %v4738_v62, %v4739_v16 }
 0x2db   : > { %v13999_v2 = vadd.f32 %v13835_v13, %v4486_v30  ;;  %v4740_v28 = vmax.f32 %v4688_v15, 0.0  ;;  %v8167_v14 = vor.u32 %v8166_v32, %v8162_v51  ;;  %v4742_v9 = vmax.f32 %v13995_v59, 0.0 }
 0x2dc   : > { %v4930_v56 = vcombine.low %v4922_v44, %v4929_v10  ;;  %v4931_v39 = vcombine.high %v4922_v44, %v4929_v10  ;;  %v4939_v60 = vcombine.high %v4938_v40, %v4938_v40  ;;  %v4741_v17 = vmax.f32 %v4689_v18, 0.0  ;;  %10498 = vmatpush3.bf16.msra.mxu1 %v10943_v54 }
 0x2dd   : > { %10499 = vmatprep.subr.bf16.mxu1 %v10946_v48  ;;  %v8155_v49 = vor.u32 %v8154_v31, %v8150_v33  ;;  %v14015_v61 = vrot.slane %v4940_v45, %v13810_v53  ;;  %v4743_v16 = vmax.f32 %v13999_v2, 0.0  ;;  %v14028_v31 = vpop.f32.mrf.mxu1 }
 0x2de   : > { %v14001_v41 = vpack.c.bf16 %v4938_v40, %v4930_v56  ;;  %v14003_v47 = vpack.c.bf16 %v4939_v60, %v4931_v39  ;;  %v4941_v7 = vcombine.low %v4740_v28, %v4741_v17 }
 0x2e0   : > { %v8500_v42 = vunpack.c.l.b16 %v14003_v47  ;;  %v8499_v20 = vunpack.c.l.b16 %v14001_v41  ;;  %v8169_v44 = vshll.u32 %v14003_v47, 16  ;;  %v8157_v35 = vshll.u32 %v14001_v41, 16  ;;  %10500 = vmatpush3.bf16.msra.mxu1 %v10947_v1 }
 0x2e1   : > { %v14019_v30 = vrot.slane %v4941_v7, %v13810_v53  ;;  %v8176_v19 = vshrl.u32 %v14003_v47, 16  ;;  %v8173_v40 = vshrl.u32 %v14001_v41, 16  ;;  %v8265_v18 = vrot.slane %v14003_v47, 1 }
 0x2e2   : > { %v4290_v52 = vpop.f32.mrf.mxu0  ;;  %v8608_v15 = vpack.c.b16 %v8500_v42, %v8488_v46  ;;  %v8607_v54 = vpack.c.b16 %v8499_v20, %v8487_v12  ;;  %v8171_v10 = vrot.slane %v8169_v44, 1  ;;  %v8159_v32 = vrot.slane %v8157_v35, 1 }
 0x2e3   : > { %v4957_v48 = vcombine.high %v14015_v61, %v14019_v30  ;;  %v4956_v62 = vcombine.low %v14015_v61, %v14019_v30  ;;  %v4291_v56 = vadd.f32 %v4290_v52, %v13772_v57  ;;  %v8262_v17 = vrot.slane %v14001_v41, 1 }
 0x2e4   : > { %v4292_v51 = vpop.f32.mrf.mxu0  ;;  %9351 = vmatprep.mubr.bf16.mxu0 %v8608_v15  ;;  %v8172_v39 = vsel %vm1592_vm1, %v8167_v14, %v8171_v10  ;;  %v8178_v60 = vor.u32 %v8176_v19, %v8171_v10  ;;  %v8160_v2 = vsel %vm1592_vm1, %v8155_v49, %v8159_v32  ;;  %v8175_v57 = vor.u32 %v8173_v40, %v8159_v32  ;;  %v10954_v19 = vld [vmem:[#allocation8 + $0x2f8] sm:$0xff]  }
 0x2e5   : > { %v4293_v46 = vadd.f32 %v4292_v51, %v13778_v58  ;;  %9352 = vmatmul.mubr.bf16.gmra.mxu0 %v8607_v54  ;;  %v10197_v45 = vcombine.low %v13973_v4, %v8172_v39  ;;  %v8490_v28 = vunpack.c.h.b16 %v8172_v39  ;;  %v10196_v12 = vcombine.low %v13978_v43, %v8160_v2  ;;  %v14040_v4 = vpop.f32.mrf.mxu1  ;;  %10589 = vmatprep.subr.bf16.mxu1 %v10954_v19 }
 0x2e6   : > { %v4294_v33 = vpop.f32.mrf.mxu0  ;;  %v8502_v14 = vunpack.c.l.b16 %v8178_v60  ;;  %v8266_v42 = vsel %vm1729_vm0, %v8264_v63, %v8265_v18  ;;  %v8261_v20 = vrot.slane %v13970_v11, 1  ;;  %v8489_v35 = vunpack.c.h.b16 %v8160_v2 }
 0x2e7   : > { %v4487_v1 = vcombine.low %v4291_v56, %v4293_v46  ;;  %v4488_v47 = vcombine.high %v4291_v56, %v4293_v46  ;;  %v4295_v58 = vadd.f32 %v4294_v33, %v13782_v3  ;;  %9424 = vmatprep.mubr.bf16.mxu1 %v10197_v45  ;;  %v14047_v43 = vcombine.low %v8259_v0, %v8266_v42  ;;  %v14055_v0 = vpop.f32.mrf.mxu1 }
 0x2e8   : > { %v4296_v7 = vpop.f32.mrf.mxu0  ;;  %9425 = vmatmul.mubr.bf16.gmra.mxu1 %v10196_v12  ;;  %v8610_v3 = vpack.c.b16 %v8502_v14, %v8490_v28  ;;  %v8263_v52 = vsel %vm1729_vm0, %v8261_v20, %v8262_v17  ;;  %v8492_v63 = vunpack.c.h.b16 %v8266_v42  ;;  %v8501_v10 = vunpack.c.l.b16 %v8175_v57 }
 0x2e9   : > { %v4495_v49 = vrot.slane %v4487_v1, %v13810_v53  ;;  %v4502_v41 = vrot.slane %v4488_v47, %v13810_v53  ;;  %v4297_v44 = vadd.f32 %v4296_v7, %v13961_v21  ;;  %v14053_v21 = vcombine.low %v8256_v29, %v8263_v52 }
 0x2ea   : > { %9432 = vmatprep.mubr.bf16.mxu1 %v8610_v3  ;;  %v8504_v5 = vunpack.c.l.b16 %v8265_v18  ;;  %v4958_v32 = vcombine.low %v4742_v9, %v4743_v16  ;;  %v8491_v29 = vunpack.c.h.b16 %v8263_v52  ;;  %v14066_v18 = vpop.f32.mrf.mxu1  ;;  %v8609_v28 = vpack.c.b16 %v8501_v10, %v8489_v35 }
 0x2eb   : > { %v4503_v11 = vcombine.high %v4495_v49, %v4495_v49  ;;  %v4504_v15 = vcombine.high %v4502_v41, %v4502_v41  ;;  %v4692_v54 = vadd.f32 %v13826_v22, %v4495_v49  ;;  %v4505_v40 = vcombine.low %v4295_v58, %v4297_v44 }
 0x2ec   : > { %v4506_v51 = vcombine.high %v4295_v58, %v4297_v44  ;;  %v4694_v46 = vadd.f32 %v13820_v34, %v4502_v41  ;;  %v14064_v36 = vpack.c.b16 %v8504_v5, %v8492_v63  ;;  %v8503_v59 = vunpack.c.l.b16 %v8262_v17  ;;  %v14073_v42 = vpop.f32.mrf.mxu1 }
 0x2ed   : > { %v4693_v56 = vadd.f32 %v13841_v8, %v4503_v11  ;;  %v4695_v39 = vadd.f32 %v13835_v13, %v4504_v15  ;;  %v4513_v60 = vrot.slane %v4505_v40, %v13810_v53  ;;  %v4744_v45 = vmax.f32 %v4692_v54, 0.0 }
 0x2ee   : > { %v4520_v33 = vrot.slane %v4506_v51, %v13810_v53  ;;  %v14070_v57 = vpack.c.b16 %v8503_v59, %v8491_v29  ;;  %v4746_v58 = vmax.f32 %v4694_v46, 0.0  ;;  %v4966_v17 = vrot.slane %v4958_v32, %v13810_v53  ;;  %v14078_v15 = vpop.f32.mrf.mxu1 }
 0x2ef   : > { %v4745_v2 = vmax.f32 %v4693_v56, 0.0  ;;  %v4747_v9 = vmax.f32 %v4695_v39, 0.0  ;;  %v4521_v16 = vcombine.high %v4513_v60, %v4513_v60  ;;  %v4696_v1 = vadd.f32 %v13826_v22, %v4513_v60 }
 0x2f0   : > { %v4698_v47 = vadd.f32 %v13820_v34, %v4520_v33  ;;  %9433 = vmatmul.mubr.bf16.gmra.mxu1 %v8609_v28  ;;  %15338 = vst [vmem:[#allocation44_spill] sm:$0xff] %v14070_v57  ;;  %v4522_v49 = vcombine.high %v4520_v33, %v4520_v33  ;;  %v4206_v39 = vadd.f32 %v13733_v27, %v13723_v23 }
 0x2f1   : > { %v4959_v12 = vcombine.low %v4744_v45, %v4745_v2  ;;  %v4697_v7 = vadd.f32 %v13841_v8, %v4521_v16  ;;  %v4976_v41 = vcombine.low %v4746_v58, %v4747_v9  ;;  %v4748_v44 = vmax.f32 %v4696_v1, 0.0 }
 0x2f2   : > { %v4750_v14 = vmax.f32 %v4698_v47, 0.0  ;;  %v4699_v54 = vadd.f32 %v13820_v34, %v4522_v49 }
 0x2f3   : > { %v4973_v20 = vrot.slane %v4959_v12, %v13810_v53  ;;  %v4749_v3 = vmax.f32 %v4697_v7, 0.0  ;;  %v4984_v56 = vrot.slane %v4976_v41, %v13810_v53 }
 0x2f4   : > { %v5000_v11 = vrot.slane %v4750_v14, %v13810_v53 }
 0x2f5   : > { %v4975_v52 = vcombine.high %v4966_v17, %v4973_v20  ;;  %v4974_v63 = vcombine.low %v4966_v17, %v4973_v20  ;;  %v4977_v19 = vcombine.low %v4748_v44, %v4749_v3 }
 0x2f6   : > { %v4300_v35 = vpop.f32.mrf.mxu0 }
 0x2f7   : > { %v14084_v40 = vpack.c.bf16 %v4975_v52, %v4957_v48  ;;  %v14089_v51 = vpack.c.bf16 %v4974_v63, %v4956_v62  ;;  %v4301_v5 = vadd.f32 %v4300_v35, %v13788_v55  ;;  %v4991_v46 = vrot.slane %v4977_v19, %v13810_v53 }
 0x2f8   : > { %v4302_v10 = vpop.f32.mrf.mxu0  ;;  %v5001_v55 = vcombine.high %v5000_v11, %v5000_v11  ;;  %v4751_v62 = vmax.f32 %v4699_v54, 0.0 }
 0x2f9   : > { %v4303_v32 = vadd.f32 %v4302_v10, %v13792_v50  ;;  %9359 = vmatprep.mubr.bf16.mxu0 %v14084_v40  ;;  %v8194_v48 = vshll.u32 %v14084_v40, 16  ;;  %v14100_v30 = vcombine.high %v4984_v56, %v4991_v46  ;;  %v14102_v50 = vpop.f32.mrf.mxu1  ;;  %v8192_v45 = vshrl.u32 %v14084_v40, 16 }
 0x2fa   : > { %v4304_v60 = vpop.f32.mrf.mxu0  ;;  %9360 = vmatmul.mubr.bf16.gmra.mxu0 %v14089_v51  ;;  %v14105_v2 = vcombine.low %v4984_v56, %v4991_v46  ;;  %v8182_v23 = vshll.u32 %v14089_v51, 16  ;;  %v8180_v12 = vshrl.u32 %v14089_v51, 16 }
 0x2fb   : > { %v4523_v33 = vcombine.low %v4301_v5, %v4303_v32  ;;  %v4524_v61 = vcombine.high %v4301_v5, %v4303_v32  ;;  %v14111_v9 = vpack.c.bf16 %v5001_v55, %v14100_v30  ;;  %v4305_v16 = vadd.f32 %v4304_v60, %v13797_v6  ;;  %v14120_v49 = vpop.f32.mrf.mxu1 }
 0x2fc   : > { %v4306_v29 = vpop.f32.mrf.mxu0  ;;  %v8196_v1 = vrot.slane %v8194_v48, 1  ;;  %v14115_v47 = vpack.c.bf16 %v5000_v11, %v14105_v2  ;;  %v8184_v63 = vrot.slane %v8182_v23, 1 }
 0x2fd   : > { %v4531_v27 = vrot.slane %v4523_v33, %v13810_v53  ;;  %v4538_v28 = vrot.slane %v4524_v61, %v13810_v53  ;;  %v4307_v59 = vadd.f32 %v4306_v29, %v4206_v39  ;;  %v8199_v44 = vshll.u32 %v14111_v9, 16  ;;  %v14132_v39 = vpop.f32.mrf.mxu1 }
 0x2fe   : > { %v8187_v6 = vshll.u32 %v14115_v47, 16  ;;  %v8197_v54 = vor.u32 %v8196_v1, %v8192_v45  ;;  %v8185_v23 = vor.u32 %v8184_v63, %v8180_v12 }
 0x2ff   : > { %v4539_v58 = vcombine.high %v4531_v27, %v4531_v27  ;;  %v4540_v7 = vcombine.high %v4538_v28, %v4538_v28  ;;  %v4700_v14 = vadd.f32 %v13835_v13, %v4531_v27  ;;  %v4702_v20 = vadd.f32 %v13841_v8, %v4538_v28 }
 0x300   : > { %v4541_v17 = vcombine.low %v4305_v16, %v4307_v59  ;;  %v4542_v41 = vcombine.high %v4305_v16, %v4307_v59  ;;  %v14128_v10 = vrot.slane %v8199_v44, 1  ;;  %v14130_v46 = vrot.slane %v8187_v6, 1 }
 0x301   : > { %v4701_v3 = vadd.f32 %v13826_v22, %v4539_v58  ;;  %v4703_v35 = vadd.f32 %v13820_v34, %v4540_v7  ;;  %v4752_v52 = vmax.f32 %v4700_v14, 0.0  ;;  %v4754_v32 = vmax.f32 %v4702_v20, 0.0  ;;  %v14145_v20 = vpop.f32.mrf.mxu1 }
 0x302   : > { %v4549_v19 = vrot.slane %v4541_v17, %v13810_v53  ;;  %v4556_v11 = vrot.slane %v4542_v41, %v13810_v53  ;;  %v8202_v45 = vsel %vm1592_vm1, %v8197_v54, %v14128_v10  ;;  %v8190_v14 = vsel %vm1592_vm1, %v8185_v23, %v14130_v46 }
 0x303   : > { %v4753_v5 = vmax.f32 %v4701_v3, 0.0  ;;  %v5002_v56 = vcombine.low %v4751_v62, %v4752_v52  ;;  %v4310_v61 = vpop.f32.mrf.mxu0  ;;  %v4755_v55 = vmax.f32 %v4703_v35, 0.0  ;;  %9440 = vmatprep.mubr.bf16.mxu1 %v8202_v45  ;;  %v8267_v54 = vrot.slane %v14089_v51, 1 }
 0x304   : > { %v4557_v60 = vcombine.high %v4549_v19, %v4549_v19  ;;  %v4704_v48 = vadd.f32 %v13835_v13, %v4549_v19  ;;  %v4706_v33 = vadd.f32 %v13841_v8, %v4556_v11  ;;  %v4558_v27 = vcombine.high %v4556_v11, %v4556_v11  ;;  %9441 = vmatmul.mubr.bf16.gmra.mxu1 %v8190_v14 }
 0x305   : > { %v5003_v29 = vcombine.low %v4753_v5, %v4754_v32  ;;  %v4311_v59 = vadd.f32 %v4310_v61, %v13799_v24  ;;  %v4312_v16 = vpop.f32.mrf.mxu0  ;;  %v5010_v58 = vrot.slane %v5002_v56, %v13810_v53  ;;  %v8270_v24 = vrot.slane %v14084_v40, 1 }
 0x306   : > { %v4705_v28 = vadd.f32 %v13826_v22, %v4557_v60  ;;  %v4756_v62 = vmax.f32 %v4704_v48, 0.0  ;;  %v4313_v1 = vadd.f32 %v4312_v16, %v13801_v38  ;;  %v4758_v17 = vmax.f32 %v4706_v33, 0.0  ;;  %v14155_v60 = vpop.f32.mrf.mxu1 }
 0x307   : > { %v5017_v7 = vrot.slane %v5003_v29, %v13810_v53  ;;  %v4314_v44 = vpop.f32.mrf.mxu0  ;;  %v4707_v52 = vadd.f32 %v13820_v34, %v4558_v27  ;;  %v15096_v11 = vrot.slane %v14111_v9, 1  ;;  %15339 = vst [vmem:[#allocation32_spill] sm:$0xff] %v14155_v60 }
 0x308   : > { %v4757_v12 = vmax.f32 %v4705_v28, 0.0  ;;  %v5020_v41 = vcombine.low %v4755_v55, %v4756_v62  ;;  %v4559_v6 = vcombine.low %v4311_v59, %v4313_v1  ;;  %v4560_v3 = vcombine.high %v4311_v59, %v4313_v1 }
 0x309   : > { %v5019_v35 = vcombine.high %v5010_v58, %v5017_v7  ;;  %v5018_v38 = vcombine.low %v5010_v58, %v5017_v7  ;;  %v4315_v19 = vpop.f32.mrf.mxu0  ;;  %v14164_v51 = vsel %vm1729_vm0, %v8270_v24, %v15096_v11  ;;  %v15095_v55 = vrot.slane %v14115_v47, 1 }
 0x30a   : > { %v5021_v63 = vcombine.low %v4757_v12, %v4758_v17  ;;  %v4567_v5 = vrot.slane %v4559_v6, %v13810_v53  ;;  %v4574_v32 = vrot.slane %v4560_v3, %v13810_v53  ;;  %v5028_v48 = vrot.slane %v5020_v41, %v13810_v53  ;;  %15340 = vst [vmem:[#allocation35_spill] sm:$0xff] %v14164_v51 }
 0x30b   : > { %v10326_v56 = vpack.c.bf16 %v5019_v35, %v14100_v30  ;;  %v10325_v40 = vpack.c.bf16 %v5018_v38, %v14105_v2  ;;  %v14176_v59 = vsel %vm1729_vm0, %v8267_v54, %v15095_v55  ;;  %v4759_v16 = vmax.f32 %v4707_v52, 0.0 }
 0x30c   : > { %v5035_v33 = vrot.slane %v5021_v63, %v13810_v53  ;;  %v14159_v61 = vpop.f32.mrf.mxu0  ;;  %v4575_v29 = vcombine.high %v4567_v5, %v4567_v5  ;;  %v4576_v45 = vcombine.high %v4574_v32, %v4574_v32  ;;  %v4708_v30 = vadd.f32 %v13835_v13, %v4567_v5  ;;  %15341 = vst [vmem:[#allocation42_spill] sm:$0xff] %v14176_v59 }
 0x30d   : > { %v4710_v2 = vadd.f32 %v13841_v8, %v4574_v32  ;;  %9367 = vmatprep.mubr.bf16.mxu0 %v10326_v56 }
 0x30e   : > { %v5037_v27 = vcombine.high %v5028_v48, %v5035_v33  ;;  %v14171_v28 = vpop.f32.mrf.mxu0  ;;  %v5036_v62 = vcombine.low %v5028_v48, %v5035_v33  ;;  %9368 = vmatmul.mubr.bf16.gmra.mxu0 %v10325_v40  ;;  %v4709_v1 = vadd.f32 %v13826_v22, %v4575_v29  ;;  %v4711_v58 = vadd.f32 %v13820_v34, %v4576_v45 }
 0x30f   : > { %v14169_v23 = vpop.f32.mrf.mxu1  ;;  %v4760_v7 = vmax.f32 %v4708_v30, 0.0  ;;  %v4762_v24 = vmax.f32 %v4710_v2, 0.0  ;;  %v8206_v29 = vshrl.u32 %v14111_v9, 16 }
 0x310   : > { %v5109_v12 = vpack.c.bf16 %v5037_v27, %v5019_v35  ;;  %v14182_v17 = vpack.c.bf16 %v5036_v62, %v5018_v38  ;;  %v14184_v41 = vpop.f32.mrf.mxu0  ;;  %v4761_v44 = vmax.f32 %v4709_v1, 0.0  ;;  %v4763_v6 = vmax.f32 %v4711_v58, 0.0 }
 0x311   : > { %v14180_v14 = vpop.f32.mrf.mxu1  ;;  %v5038_v3 = vcombine.low %v4759_v16, %v4760_v7  ;;  %v8203_v27 = vshrl.u32 %v14115_v47, 16  ;;  %v8208_v1 = vor.u32 %v8206_v29, %v14128_v10 }
 0x312   : > { %v14188_v19 = vpop.f32.mrf.mxu0  ;;  %v5039_v52 = vcombine.low %v4761_v44, %v4762_v24  ;;  %v5062_v54 = vrot.slane %v4763_v6, %v13810_v53  ;;  %v8224_v35 = vshll.u32 %v5109_v12, 16  ;;  %v8212_v38 = vshll.u32 %v14182_v17, 16 }
 0x313   : > { %v14186_v63 = vpop.f32.mrf.mxu1  ;;  %v5046_v56 = vrot.slane %v5038_v3, %v13810_v53  ;;  %v8560_v6 = vunpack.c.h.b16 %v5109_v12  ;;  %v8205_v3 = vor.u32 %v8203_v27, %v14130_v46  ;;  %v8222_v55 = vshrl.u32 %v5109_v12, 16 }
 0x314   : > { %v5053_v40 = vrot.slane %v5039_v52, %v13810_v53  ;;  %v5063_v2 = vcombine.high %v5062_v54, %v5062_v54  ;;  %v8226_v58 = vrot.slane %v8224_v35, 1  ;;  %v8214_v7 = vrot.slane %v8212_v38, 1 }
 0x315   : > { %v14191_v5 = vpop.f32.mrf.mxu1  ;;  %v14193_v32 = vpop.f32.mrf.mxu0  ;;  %v8210_v11 = vshrl.u32 %v14182_v17, 16  ;;  %v8276_v59 = vrot.slane %v5109_v12, 1  ;;  %v8273_v35 = vrot.slane %v14182_v17, 1 }
 0x316   : > { %15342 = vst [vmem:[#allocation43_spill] sm:$0xff] %v14191_v5  ;;  %v5054_v45 = vcombine.low %v5046_v56, %v5053_v40  ;;  %v5055_v30 = vcombine.high %v5046_v56, %v5053_v40  ;;  %v8559_v56 = vunpack.c.h.b16 %v14182_v17  ;;  %v8227_v38 = vor.u32 %v8226_v58, %v8222_v55 }
 0x317   : > { %v14200_v33 = vpop.f32.mrf.mxu0  ;;  %v8215_v46 = vor.u32 %v8214_v7, %v8210_v11  ;;  %v15343_v11 = vrot.slane %v14111_v9, 1 }
 0x318   : > { %v14198_v48 = vpop.f32.mrf.mxu1  ;;  %v5110_v44 = vpack.c.bf16 %v5062_v54, %v5054_v45  ;;  %v5111_v24 = vpack.c.bf16 %v5063_v2, %v5055_v30 }
 0x319   : > { %v14206_v16 = vpop.f32.mrf.mxu0 }
 0x31a   : > { %v14204_v62 = vpop.f32.mrf.mxu1  ;;  %v8572_v8 = vunpack.c.l.b16 %v5111_v24  ;;  %v8571_v13 = vunpack.c.l.b16 %v5110_v44  ;;  %v8229_v10 = vshll.u32 %v5111_v24, 16  ;;  %v8217_v45 = vshll.u32 %v5110_v44, 16 }
 0x31b   : > { %v14213_v40 = vpop.f32.mrf.mxu0  ;;  %v8277_v30 = vrot.slane %v5111_v24, 1  ;;  %v8236_v5 = vshrl.u32 %v5111_v24, 16  ;;  %v8233_v12 = vshrl.u32 %v5110_v44, 16  ;;  %v8274_v60 = vrot.slane %v5110_v44, 1 }
 0x31c   : > { %v14210_v52 = vpop.f32.mrf.mxu1  ;;  %v8644_v2 = vpack.c.b16 %v8572_v8, %v8560_v6  ;;  %v8643_v27 = vpack.c.b16 %v8571_v13, %v8559_v56  ;;  %v8231_v51 = vrot.slane %v8229_v10, 1  ;;  %v8219_v57 = vrot.slane %v8217_v45, 1 }
 0x31d   : > { %v14219_v29 = vpop.f32.mrf.mxu0  ;;  %v8278_v34 = vsel %vm1729_vm0, %v8276_v59, %v8277_v30  ;;  %v8576_v13 = vunpack.c.l.b16 %v8277_v30  ;;  %v8575_v30 = vunpack.c.l.b16 %v8274_v60 }
 0x31e   : > { %v14217_v54 = vpop.f32.mrf.mxu1  ;;  %9375 = vmatprep.mubr.bf16.mxu0 %v8644_v2  ;;  %v8232_v17 = vsel %vm1592_vm1, %v8227_v38, %v8231_v51  ;;  %v8238_v58 = vor.u32 %v8236_v5, %v8231_v51  ;;  %v14229_v7 = vcombine.low %v15343_v11, %v8278_v34  ;;  %v8220_v24 = vsel %vm1592_vm1, %v8215_v46, %v8219_v57 }
 0x31f   : > { %v14221_v22 = vpop.f32.mrf.mxu0  ;;  %9376 = vmatmul.mubr.bf16.gmra.mxu0 %v8643_v27  ;;  %v10209_v8 = vcombine.low %v8208_v1, %v8232_v17  ;;  %v8562_v6 = vunpack.c.h.b16 %v8232_v17  ;;  %v8235_v10 = vor.u32 %v8233_v12, %v8219_v57  ;;  %v10208_v59 = vcombine.low %v8205_v3, %v8220_v24 }
 0x320   : > { %9497 = vmatprep.mubr.bf16.mxu0 %v13927_v26  ;;  %v8574_v44 = vunpack.c.l.b16 %v8238_v58  ;;  %v8561_v9 = vunpack.c.h.b16 %v8220_v24  ;;  %v8275_v1 = vsel %vm1729_vm0, %v8273_v35, %v8274_v60  ;;  %v8564_v46 = vunpack.c.h.b16 %v8278_v34  ;;  %v10931_v34 = vld [vmem:[#allocation8 + $0x238] sm:$0xff]  }
 0x321   : > { %v14225_v55 = vpop.f32.mrf.mxu1  ;;  %v7211_v56 = vpop.f32.mrf.mxu0  ;;  %9448 = vmatprep.mubr.bf16.mxu1 %v10209_v8  ;;  %v8573_v45 = vunpack.c.l.b16 %v8235_v10  ;;  %v15344_v26 = vrot.slane %v14115_v47, 1  ;;  %v8563_v27 = vunpack.c.h.b16 %v8275_v1  ;;  %v10932_v8 = vld [vmem:[#allocation8 + $0x270] sm:$0xff]  }
 0x322   : > { %v14236_v51 = vadd.f32 %v7211_v56, %v14145_v20  ;;  %9449 = vmatmul.mubr.bf16.gmra.mxu1 %v10208_v59  ;;  %v8646_v57 = vpack.c.b16 %v8574_v44, %v8562_v6  ;;  %v14247_v17 = vpack.c.b16 %v8576_v13, %v8564_v46  ;;  %v10933_v56 = vld [vmem:[#allocation8 + $0x230] sm:$0xff]   ;;  %v10936_v59 = vld [vmem:[#allocation8 + $0x268] sm:$0xff]  }
 0x323   : > { %v14233_v38 = vpop.f32.mrf.mxu1  ;;  %v14238_v5 = vpop.f32.mrf.mxu0  ;;  %v14245_v3 = vcombine.low %v15344_v26, %v8275_v1  ;;  %v8645_v12 = vpack.c.b16 %v8573_v45, %v8561_v9  ;;  %v14254_v60 = vpack.c.b16 %v8575_v30, %v8563_v27  ;;  %v10940_v1 = vld [vmem:[#allocation8 + $0x260] sm:$0xff]   ;;  %v7188_v30 = vadd.f32 %v14159_v61, %v14008_v25 }
 0x324   : > { %9456 = vmatprep.mubr.bf16.mxu1 %v8646_v57  ;;  %v7190_v57 = vadd.f32 %v14171_v28, %v14028_v31  ;;  %v7192_v25 = vadd.f32 %v14184_v41, %v14040_v4  ;;  %v7198_v61 = vadd.f32 %v14193_v32, %v14066_v18  ;;  %v14298_v4 = vadd.f32 %v14213_v40, %v14102_v50 }
 0x325   : > { %v14241_v2 = vpop.f32.mrf.mxu1  ;;  %v7217_v20 = vpop.f32.mrf.mxu0  ;;  %v14311_v50 = vadd.f32 %v14221_v22, %v14132_v39  ;;  %v15349_v39 = vld [vmem:[#allocation43_spill] sm:$0xff] }
 0x326   : > { %v14252_v35 = vadd.f32 %v7217_v20, %v14169_v23  ;;  %v10941_v20 = vld [vmem:[#allocation8 + $0x220] sm:$0xff]  }
 0x327   : > { %v14249_v58 = vpop.f32.mrf.mxu1  ;;  %v7219_v11 = vpop.f32.mrf.mxu0  ;;  %9498 = vmatmul.mubr.bf16.vlgmr.msra.gmra.mxu0 %v13943_v37  ;;  %v10937_v37 = vld [vmem:[#allocation8 + $0x228] sm:$0xff]  }
 0x328   : > { %v14259_v47 = vadd.f32 %v7219_v11, %v14180_v14  ;;  %9505 = vmatprep.mubr.bf16.mxu0 %v14047_v43  ;;  %10538 = vmatpush3.bf16.msra.mxu0 %v10931_v34  ;;  %v10944_v11 = vld [vmem:[#allocation8 + $0x258] sm:$0xff]  }
 0x329   : > { %v14256_v24 = vpop.f32.mrf.mxu1  ;;  %v7221_v13 = vpop.f32.mrf.mxu0  ;;  %10539 = vmatprep.subr.bf16.mxu0 %v10932_v8 }
 0x32a   : > { %v14266_v23 = vadd.f32 %v7221_v13, %v14186_v63  ;;  %9457 = vmatmul.mubr.bf16.gmra.mxu1 %v8645_v12  ;;  %v7200_v13 = vadd.f32 %v14200_v33, %v14073_v42  ;;  %v15345_v33 = vld [vmem:[#allocation32_spill] sm:$0xff] }
 0x32b   : > { %v14263_v6 = vpop.f32.mrf.mxu1  ;;  %v7223_v10 = vpop.f32.mrf.mxu0 }
 0x32c   : > { %10540 = vmatpush3.bf16.msra.mxu0 %v10933_v56  ;;  %v7202_v56 = vadd.f32 %v14206_v16, %v14078_v15  ;;  %v10945_v15 = vld [vmem:[#allocation8 + $0x218] sm:$0xff]   ;;  %v14315_v16 = vadd.f32 %v14238_v5, %v15345_v33  ;;  %v15350_v5 = vld [vmem:[#allocation35_spill] sm:$0xff] }
 0x32d   : > { %v7150_v44 = vpop.f32.mrf.mxu1  ;;  %10541 = vmatprep.subr.bf16.mxu0 %v10936_v59 }
 0x32f   : > { %v7227_v9 = vpop.f32.mrf.mxu0  ;;  %v7151_v14 = vpop.f32.mrf.mxu1  ;;  %9506 = vmatmul.mubr.bf16.gmra.mxu0 %v14053_v21 }
 0x330   : > { %v14269_v45 = vadd.f32 %v7227_v9, %v14198_v48  ;;  %9513 = vmatprep.mubr.bf16.mxu0 %v14064_v36  ;;  %10542 = vmatpush3.bf16.msra.mxu0 %v10937_v37  ;;  %v7194_v36 = vadd.f32 %v14188_v19, %v14055_v0  ;;  %v14305_v0 = vadd.f32 %v14219_v29, %v14120_v49  ;;  %v10948_v29 = vld [vmem:[#allocation8 + $0x250] sm:$0xff]   ;;  %v15346_v9 = vld [vmem:[#allocation19_spill] sm:$0xff]  ;;  %v15347_v37 = vld [vmem:[#allocation28_spill] sm:$0xff] }
 0x331   : > { %v7229_v43 = vpop.f32.mrf.mxu0  ;;  %10543 = vmatprep.subr.bf16.mxu0 %v10940_v1  ;;  %v15348_v1 = vld [vmem:[#allocation44_spill] sm:$0xff] }
 0x332   : > { %v7288_v46 = vpop.f32.mrf.mxu1  ;;  %v14272_v63 = vadd.f32 %v7229_v43, %v14204_v62 }
 0x333   : > { %v7231_v26 = vpop.f32.mrf.mxu0  ;;  %v7289_v12 = vadd.f32 %v7288_v46, %v7188_v30  ;;  %v14324_v46 = vadd.f32 %v7223_v10, %v15349_v39 }
 0x334   : > { %v7290_v48 = vpop.f32.mrf.mxu1  ;;  %v14281_v27 = vadd.f32 %v7231_v26, %v14210_v52  ;;  %10544 = vmatpush3.bf16.msra.mxu0 %v10941_v20 }
 0x335   : > { %v7291_v62 = vadd.f32 %v7290_v48, %v7190_v57  ;;  %v7233_v34 = vpop.f32.mrf.mxu0  ;;  %10545 = vmatprep.subr.bf16.mxu0 %v10944_v11  ;;  %v15351_v48 = vld [vmem:[#allocation30_spill] sm:$0xff] }
 0x336   : > { %v7292_v31 = vpop.f32.mrf.mxu1  ;;  %v14286_v21 = vadd.f32 %v7233_v34, %v14217_v54 }
 0x337   : > { %v7381_v28 = vcombine.low %v7289_v12, %v7291_v62  ;;  %v7382_v52 = vcombine.high %v7289_v12, %v7291_v62  ;;  %v7237_v8 = vpop.f32.mrf.mxu0  ;;  %v7293_v40 = vadd.f32 %v7292_v31, %v7192_v25  ;;  %9514 = vmatmul.mubr.bf16.gmra.mxu0 %v15348_v1  ;;  %v15352_v12 = vld [vmem:[#allocation45_spill] sm:$0xff] }
 0x338   : > { %v7294_v41 = vpop.f32.mrf.mxu1  ;;  %v14301_v54 = vadd.f32 %v7237_v8, %v14225_v55  ;;  %9521 = vmatprep.mubr.bf16.mxu0 %v15350_v5  ;;  %10546 = vmatpush3.bf16.msra.mxu0 %v10945_v15  ;;  %v10949_v31 = vld [vmem:[#allocation8 + $0x210] sm:$0xff]   ;;  %v10952_v5 = vld [vmem:[#allocation8 + $0x240] sm:$0xff]  }
 0x339   : > { %v7389_v18 = vrot.slane %v7381_v28, %v13810_v53  ;;  %v7396_v42 = vrot.slane %v7382_v52, %v13810_v53  ;;  %v7295_v19 = vadd.f32 %v7294_v41, %v7194_v36  ;;  %v7239_v32 = vpop.f32.mrf.mxu0  ;;  %10547 = vmatprep.subr.bf16.mxu0 %v10948_v29  ;;  %v10951_v29 = vld [vmem:[#allocation8 + $0x208] sm:$0xff]  }
 0x33a   : > { %v7298_v55 = vpop.f32.mrf.mxu1  ;;  %v14318_v49 = vadd.f32 %v7239_v32, %v14233_v38 }
 0x33b   : > { %v7397_v59 = vcombine.high %v7389_v18, %v7389_v18  ;;  %v7398_v44 = vcombine.high %v7396_v42, %v7396_v42  ;;  %v7667_v14 = vadd.f32 %v7389_v18, %v15346_v9  ;;  %v7669_v43 = vadd.f32 %v7396_v42, %v15347_v37  ;;  %v7241_v22 = vpop.f32.mrf.mxu0 }
 0x33c   : > { %v7399_v30 = vcombine.low %v7293_v40, %v7295_v19  ;;  %v7400_v57 = vcombine.high %v7293_v40, %v7295_v19  ;;  %v7300_v26 = vpop.f32.mrf.mxu1  ;;  %v14328_v38 = vadd.f32 %v7241_v22, %v14241_v2  ;;  %v7299_v11 = vadd.f32 %v7298_v55, %v7198_v61  ;;  %v10950_v2 = vld [vmem:[#allocation8 + $0x248] sm:$0xff]   ;;  %10548 = vmatpush3.bf16.msra.mxu0 %v10949_v31 }
 0x33d   : > { %v7668_v20 = vadd.f32 %v7397_v59, %v15351_v48  ;;  %v7670_v62 = vadd.f32 %v7398_v44, %v15352_v12  ;;  %v7719_v34 = vmax.f32 %v7667_v14, 0.0  ;;  %v7243_v25 = vpop.f32.mrf.mxu0  ;;  %v7301_v28 = vadd.f32 %v7300_v26, %v7200_v13  ;;  %10549 = vmatprep.subr.bf16.mxu0 %v10950_v2 }
 0x33e   : > { %v7407_v10 = vrot.slane %v7399_v30, %v13810_v53  ;;  %v7414_v36 = vrot.slane %v7400_v57, %v13810_v53  ;;  %v7302_v52 = vpop.f32.mrf.mxu1  ;;  %v14335_v8 = vadd.f32 %v7243_v25, %v14249_v58  ;;  %v7721_v18 = vmax.f32 %v7669_v43, 0.0 }
 0x33f   : > { %v7720_v41 = vmax.f32 %v7668_v20, 0.0  ;;  %v7722_v42 = vmax.f32 %v7670_v62, 0.0  ;;  %v7303_v19 = vadd.f32 %v7302_v52, %v7202_v56  ;;  %v7417_v44 = vcombine.low %v7299_v11, %v7301_v28  ;;  %v15353_v62 = vld [vmem:[#allocation42_spill] sm:$0xff] }
 0x340   : > { %v7247_v32 = vpop.f32.mrf.mxu0  ;;  %v7415_v61 = vcombine.high %v7407_v10, %v7407_v10  ;;  %v7416_v33 = vcombine.high %v7414_v36, %v7414_v36  ;;  %v7671_v15 = vadd.f32 %v7407_v10, %v15346_v9  ;;  %v7673_v40 = vadd.f32 %v7414_v36, %v15347_v37  ;;  %v7304_v55 = vpop.f32.mrf.mxu1  ;;  %9522 = vmatmul.mubr.bf16.gmra.mxu0 %v15353_v62 }
 0x341   : > { %v7823_v59 = vcombine.low %v7719_v34, %v7720_v41  ;;  %v7824_v13 = vcombine.low %v7721_v18, %v7722_v42  ;;  %v7418_v14 = vcombine.high %v7299_v11, %v7301_v28  ;;  %v7425_v26 = vrot.slane %v7417_v44, %v13810_v53  ;;  %9529 = vmatprep.mubr.bf16.mxu0 %v14229_v7  ;;  %v10953_v42 = vld [vmem:[#allocation8 + $0x200] sm:$0xff]  }
 0x342   : > { %v7249_v58 = vpop.f32.mrf.mxu0  ;;  %v7672_v1 = vadd.f32 %v7415_v61, %v15351_v48  ;;  %v7674_v43 = vadd.f32 %v7416_v33, %v15352_v12  ;;  %v7723_v56 = vmax.f32 %v7671_v15, 0.0  ;;  %v7725_v22 = vmax.f32 %v7673_v40, 0.0  ;;  %v7308_v39 = vpop.f32.mrf.mxu1  ;;  %10550 = vmatpush3.bf16.msra.mxu0 %v10951_v29 }
 0x343   : > { %v14342_v30 = vrot.slane %v7823_v59, %v13810_v53  ;;  %v14345_v57 = vrot.slane %v7824_v13, %v13810_v53  ;;  %v7432_v20 = vrot.slane %v7418_v14, %v13810_v53  ;;  %v7305_v31 = vadd.f32 %v7304_v55, %v14298_v4  ;;  %10551 = vmatprep.subr.bf16.mxu0 %v10952_v5 }
 0x344   : > { %v7251_v34 = vpop.f32.mrf.mxu0  ;;  %v7724_v11 = vmax.f32 %v7672_v1, 0.0  ;;  %v7726_v25 = vmax.f32 %v7674_v43, 0.0  ;;  %v14353_v10 = vadd.f32 %v7247_v32, %v14256_v24  ;;  %v7310_v36 = vpop.f32.mrf.mxu1  ;;  %v7433_v52 = vcombine.high %v7425_v26, %v7425_v26 }
 0x345   : > { %v7839_v28 = vcombine.low %v14342_v30, %v14345_v57  ;;  %v7434_v2 = vcombine.high %v7432_v20, %v7432_v20  ;;  %v7675_v41 = vadd.f32 %v7425_v26, %v15346_v9  ;;  %v7677_v7 = vadd.f32 %v7432_v20, %v15347_v37 }
 0x346   : > { %v7252_v18 = vpop.f32.mrf.mxu0  ;;  %v7841_v61 = vcombine.low %v7723_v56, %v7724_v11  ;;  %v7842_v33 = vcombine.low %v7725_v22, %v7726_v25  ;;  %v7435_v15 = vcombine.low %v7303_v19, %v7305_v31  ;;  %v7312_v4 = vpop.f32.mrf.mxu1  ;;  %v7676_v24 = vadd.f32 %v7433_v52, %v15351_v48  ;;  %10552 = vmatpush3.bf16.msra.mxu0 %v10953_v42 }
 0x347   : > { %v7678_v32 = vadd.f32 %v7434_v2, %v15352_v12  ;;  %v7727_v40 = vmax.f32 %v7675_v41, 0.0  ;;  %v7436_v55 = vcombine.high %v7303_v19, %v7305_v31  ;;  %v7729_v44 = vmax.f32 %v7677_v7, 0.0 }
 0x348   : > { %v14362_v59 = vrot.slane %v7841_v61, %v13810_v53  ;;  %v14365_v13 = vrot.slane %v7842_v33, %v13810_v53  ;;  %v7443_v14 = vrot.slane %v7435_v15, %v13810_v53  ;;  %v7314_v29 = vpop.f32.mrf.mxu1  ;;  %v7728_v1 = vmax.f32 %v7676_v24, 0.0  ;;  %9530 = vmatmul.mubr.bf16.gmra.mxu0 %v14245_v3 }
 0x349   : > { %v7730_v43 = vmax.f32 %v7678_v32, 0.0  ;;  %v7450_v56 = vrot.slane %v7436_v55, %v13810_v53  ;;  %v7309_v22 = vadd.f32 %v7308_v39, %v14305_v0  ;;  %v14374_v20 = vadd.f32 %v7249_v58, %v14263_v6  ;;  %9537 = vmatprep.mubr.bf16.mxu0 %v14247_v17 }
 0x34a   : > { %v7857_v19 = vcombine.low %v14362_v59, %v14365_v13  ;;  %v7451_v5 = vcombine.high %v7443_v14, %v7443_v14  ;;  %v7679_v26 = vadd.f32 %v7443_v14, %v15346_v9  ;;  %v7318_v62 = vpop.f32.mrf.mxu1  ;;  %v7859_v34 = vcombine.low %v7727_v40, %v7728_v1 }
 0x34b   : > { %v7860_v11 = vcombine.low %v7729_v44, %v7730_v43  ;;  %v7452_v25 = vcombine.high %v7450_v56, %v7450_v56  ;;  %v7681_v31 = vadd.f32 %v7450_v56, %v15351_v48  ;;  %v7311_v52 = vadd.f32 %v7310_v36, %v14311_v50 }
 0x34c   : > { %v7680_v0 = vadd.f32 %v7451_v5, %v15346_v9  ;;  %v7731_v39 = vmax.f32 %v7679_v26, 0.0  ;;  %v7313_v2 = vadd.f32 %v7312_v4, %v14236_v51  ;;  %v7320_v41 = vpop.f32.mrf.mxu1  ;;  %v7867_v6 = vrot.slane %v7859_v34, %v13810_v53 }
 0x34d   : > { %v7874_v58 = vrot.slane %v7860_v11, %v13810_v53  ;;  %v7682_v18 = vadd.f32 %v7452_v25, %v15347_v37  ;;  %v7733_v42 = vmax.f32 %v7681_v31, 0.0  ;;  %v7453_v33 = vcombine.low %v7309_v22, %v7311_v52 }
 0x34e   : > { %v7732_v61 = vmax.f32 %v7680_v0, 0.0  ;;  %v14386_v3 = vrot.slane %v7731_v39, %v13810_v53  ;;  %v7454_v7 = vcombine.high %v7309_v22, %v7311_v52  ;;  %v7322_v15 = vpop.f32.mrf.mxu1  ;;  %v7315_v17 = vadd.f32 %v7314_v29, %v14315_v16 }
 0x34f   : > { %v14388_v50 = vcombine.high %v7867_v6, %v7874_v58  ;;  %v7734_v51 = vmax.f32 %v7682_v18, 0.0  ;;  %v14390_v36 = vcombine.low %v7867_v6, %v7874_v58  ;;  %v7461_v32 = vrot.slane %v7453_v33, %v13810_v53 }
 0x350   : > { %v7884_v4 = vcombine.high %v14386_v3, %v14386_v3  ;;  %v14395_v24 = vcombine.low %v7732_v61, %v7733_v42  ;;  %v7468_v40 = vrot.slane %v7454_v7, %v13810_v53  ;;  %v7324_v55 = vpop.f32.mrf.mxu1  ;;  %v7471_v14 = vcombine.low %v7313_v2, %v7315_v17  ;;  %9538 = vmatmul.mubr.bf16.gmra.mxu0 %v14254_v60 }
 0x351   : > { %v14401_v44 = vpack.c.bf16 %v14386_v3, %v14390_v36  ;;  %v7472_v1 = vcombine.high %v7313_v2, %v7315_v17  ;;  %v7319_v43 = vadd.f32 %v7318_v62, %v14252_v35  ;;  %v7469_v56 = vcombine.high %v7461_v32, %v7461_v32 }
 0x352   : > { %v7470_v16 = vcombine.high %v7468_v40, %v7468_v40  ;;  %v7683_v29 = vadd.f32 %v7461_v32, %v15352_v12  ;;  %v7685_v22 = vadd.f32 %v7468_v40, %v15351_v48  ;;  %v7328_v5 = vpop.f32.mrf.mxu1  ;;  %v7479_v26 = vrot.slane %v7471_v14, %v13810_v53 }
 0x353   : > { %v7486_v34 = vrot.slane %v7472_v1, %v13810_v53  ;;  %v7321_v11 = vadd.f32 %v7320_v41, %v14259_v47  ;;  %v7840_v25 = vcombine.high %v14342_v30, %v14345_v57  ;;  %v7684_v35 = vadd.f32 %v7469_v56, %v15346_v9 }
 0x354   : > { %v7686_v62 = vadd.f32 %v7470_v16, %v15347_v37  ;;  %v7735_v31 = vmax.f32 %v7683_v29, 0.0  ;;  %v7737_v0 = vmax.f32 %v7685_v22, 0.0  ;;  %v7330_v39 = vpop.f32.mrf.mxu1  ;;  %v7487_v52 = vcombine.high %v7479_v26, %v7479_v26 }
 0x355   : > { %v7488_v2 = vcombine.high %v7486_v34, %v7486_v34  ;;  %v7687_v6 = vadd.f32 %v7479_v26, %v15352_v12  ;;  %v7689_v58 = vadd.f32 %v7486_v34, %v15351_v48  ;;  %v7736_v18 = vmax.f32 %v7684_v35, 0.0 }
 0x356   : > { %v7738_v47 = vmax.f32 %v7686_v62, 0.0  ;;  %v14416_v41 = vcombine.low %v7734_v51, %v7735_v31  ;;  %v7489_v42 = vcombine.low %v7319_v43, %v7321_v11  ;;  %v7332_v61 = vpop.f32.mrf.mxu1  ;;  %v7688_v60 = vadd.f32 %v7487_v52, %v15346_v9 }
 0x357   : > { %v7690_v33 = vadd.f32 %v7488_v2, %v15347_v37  ;;  %v7739_v7 = vmax.f32 %v7687_v6, 0.0  ;;  %v7741_v17 = vmax.f32 %v7689_v58, 0.0  ;;  %v7903_v32 = vcombine.low %v7736_v18, %v7737_v0  ;;  %v10956_v18 = vld [vmem:[#allocation8 + $0x2f0] sm:$0xff]  }
 0x358   : > { %v7490_v40 = vcombine.high %v7319_v43, %v7321_v11  ;;  %v7497_v14 = vrot.slane %v7489_v42, %v13810_v53  ;;  %v7858_v1 = vcombine.high %v14362_v59, %v14365_v13  ;;  %v14423_v56 = vpop.f32.mrf.mxu1  ;;  %v7740_v16 = vmax.f32 %v7688_v60, 0.0 }
 0x359   : > { %v7742_v51 = vmax.f32 %v7690_v33, 0.0  ;;  %v7904_v29 = vcombine.low %v7738_v47, %v7739_v7  ;;  %v7323_v22 = vadd.f32 %v7322_v15, %v14266_v23  ;;  %v14427_v26 = vrot.slane %v7903_v32, %v13810_v53  ;;  %v10955_v15 = vld [vmem:[#allocation8 + $0x2b8] sm:$0xff]  }
 0x35a   : > { %v7504_v34 = vrot.slane %v7490_v40, %v13810_v53  ;;  %v7505_v35 = vcombine.high %v7497_v14, %v7497_v14  ;;  %v7691_v43 = vadd.f32 %v7497_v14, %v15352_v12  ;;  %v14431_v11 = vpop.f32.mrf.mxu1  ;;  %v7921_v31 = vcombine.low %v7740_v16, %v7741_v17 }
 0x35b   : > { %v14434_v62 = vrot.slane %v7904_v29, %v13810_v53  ;;  %v14436_v0 = vpack.c.bf16 %v7858_v1, %v7840_v25  ;;  %v14444_v23 = vpack.c.bf16 %v7857_v19, %v7839_v28  ;;  %v7325_v57 = vadd.f32 %v7324_v55, %v14324_v46  ;;  %v10957_v46 = vld [vmem:[#allocation8 + $0x2b0] sm:$0xff]  }
 0x35c   : > { %v7506_v52 = vcombine.high %v7504_v34, %v7504_v34  ;;  %v7692_v2 = vadd.f32 %v7505_v35, %v15346_v9  ;;  %v7693_v6 = vadd.f32 %v7504_v34, %v15346_v9  ;;  %v7743_v58 = vmax.f32 %v7691_v43, 0.0  ;;  %v14448_v47 = vpop.f32.mrf.mxu1 }
 0x35d   : > { %v7919_v25 = vcombine.low %v14427_v26, %v14434_v62  ;;  %v14453_v30 = vrot.slane %v7921_v31, %v13810_v53  ;;  %9578 = vmatprep.mubr.bf16.mxu1 %v14436_v0  ;;  %v7329_v28 = vadd.f32 %v7328_v5, %v14269_v45  ;;  %v7507_v33 = vcombine.low %v7323_v22, %v7325_v57  ;;  %v10959_v31 = vld [vmem:[#allocation8 + $0x2a8] sm:$0xff]  }
 0x35e   : > { %v7694_v59 = vadd.f32 %v7506_v52, %v15351_v48  ;;  %v7744_v13 = vmax.f32 %v7692_v2, 0.0  ;;  %v7745_v19 = vmax.f32 %v7693_v6, 0.0  ;;  %v7922_v42 = vcombine.low %v7742_v51, %v7743_v58  ;;  %9579 = vmatmul.mubr.bf16.vlgmr.msra.gmra.mxu1 %v14444_v23  ;;  %v14460_v60 = vpop.f32.mrf.mxu1 }
 0x35f   : > { %v7508_v7 = vcombine.high %v7323_v22, %v7325_v57  ;;  %v7331_v17 = vadd.f32 %v7330_v39, %v14272_v63  ;;  %v14464_v32 = vadd.f32 %v7332_v61, %v14281_v27  ;;  %10590 = vmatpush3.bf16.msra.mxu1 %v10955_v15  ;;  %v14476_v40 = vpack.c.bf16 %v7884_v4, %v14388_v50  ;;  %v10958_v27 = vld [vmem:[#allocation8 + $0x2e8] sm:$0xff]  }
 0x360   : > { %v7746_v55 = vmax.f32 %v7694_v59, 0.0  ;;  %v14467_v45 = vrot.slane %v7922_v42, %v13810_v53  ;;  %v14470_v5 = vrot.slane %v7744_v13, %v13810_v53  ;;  %10591 = vmatprep.subr.bf16.mxu1 %v10956_v18  ;;  %v14478_v63 = vpop.f32.mrf.mxu1  ;;  %v7515_v39 = vrot.slane %v7507_v33, %v13810_v53  ;;  %v10960_v18 = vld [vmem:[#allocation8 + $0x2e0] sm:$0xff]  }
 0x361   : > { %v7522_v61 = vrot.slane %v7508_v7, %v13810_v53  ;;  %v7525_v14 = vcombine.low %v7329_v28, %v7331_v17  ;;  %v7526_v1 = vcombine.high %v7329_v28, %v7331_v17 }
 0x362   : > { %v7937_v16 = vcombine.low %v14453_v30, %v14467_v45  ;;  %v7938_v51 = vcombine.high %v14453_v30, %v14467_v45  ;;  %v7946_v3 = vcombine.high %v14470_v5, %v14470_v5  ;;  %v7947_v4 = vcombine.low %v7745_v19, %v7746_v55  ;;  %v14488_v29 = vpop.f32.mrf.mxu1 }
 0x363   : > { %v7523_v22 = vcombine.high %v7515_v39, %v7515_v39  ;;  %v7524_v34 = vcombine.high %v7522_v61, %v7522_v61  ;;  %v7695_v35 = vadd.f32 %v7515_v39, %v15347_v37  ;;  %v7697_v43 = vadd.f32 %v7522_v61, %v15346_v9  ;;  %10592 = vmatpush3.bf16.msra.mxu1 %v10957_v46  ;;  %v10961_v61 = vld [vmem:[#allocation8 + $0x2a0] sm:$0xff]  }
 0x364   : > { %v14493_v15 = vrot.slane %v7947_v4, %v13810_v53  ;;  %v14496_v52 = vpack.c.bf16 %v14470_v5, %v7937_v16  ;;  %v7533_v2 = vrot.slane %v7525_v14, %v13810_v53  ;;  %v7540_v6 = vrot.slane %v7526_v1, %v13810_v53  ;;  %10593 = vmatprep.subr.bf16.mxu1 %v10958_v27  ;;  %v14500_v58 = vpop.f32.mrf.mxu1 }
 0x365   : > { %v7696_v57 = vadd.f32 %v7523_v22, %v15352_v12  ;;  %v7698_v28 = vadd.f32 %v7524_v34, %v15351_v48  ;;  %v7747_v59 = vmax.f32 %v7695_v35, 0.0  ;;  %v7749_v13 = vmax.f32 %v7697_v43, 0.0  ;;  %v10962_v34 = vld [vmem:[#allocation8 + $0x2d8] sm:$0xff]  }
 0x366   : > { %v7541_v19 = vcombine.high %v7533_v2, %v7533_v2  ;;  %v7542_v42 = vcombine.high %v7540_v6, %v7540_v6  ;;  %v7699_v33 = vadd.f32 %v7533_v2, %v15347_v37  ;;  %v7701_v7 = vadd.f32 %v7540_v6, %v15346_v9  ;;  %v7352_v17 = vpop.f32.mrf.mxu1 }
 0x367   : > { %v7748_v46 = vmax.f32 %v7696_v57, 0.0  ;;  %v7750_v55 = vmax.f32 %v7698_v28, 0.0  ;;  %v8292_v27 = vshrl.u32 %v14436_v0, 16  ;;  %v8294_v39 = vshll.u32 %v14436_v0, 16  ;;  %10594 = vmatpush3.bf16.msra.mxu1 %v10959_v31 }
 0x368   : > { %v7700_v14 = vadd.f32 %v7541_v19, %v15352_v12  ;;  %v7702_v1 = vadd.f32 %v7542_v42, %v15351_v48  ;;  %v7751_v16 = vmax.f32 %v7699_v33, 0.0  ;;  %v7753_v4 = vmax.f32 %v7701_v7, 0.0  ;;  %10595 = vmatprep.subr.bf16.mxu1 %v10960_v18  ;;  %v7353_v22 = vpop.f32.mrf.mxu1 }
 0x369   : > { %v7948_v35 = vcombine.low %v7747_v59, %v7748_v46  ;;  %v7965_v43 = vcombine.low %v7749_v13, %v7750_v55  ;;  %v8296_v2 = vrot.slane %v8294_v39, 1  ;;  %v8299_v6 = vshll.u32 %v14476_v40, 16  ;;  %v10963_v13 = vld [vmem:[#allocation8 + $0x298] sm:$0xff]  }
 0x36a   : > { %v7752_v57 = vmax.f32 %v7700_v14, 0.0  ;;  %v7754_v28 = vmax.f32 %v7702_v1, 0.0  ;;  %v7893_v31 = vrot.slane %v14395_v24, %v13810_v53  ;;  %v7900_v19 = vrot.slane %v14416_v41, %v13810_v53  ;;  %v10964_v14 = vld [vmem:[#allocation8 + $0x2d0] sm:$0xff]  }
 0x36b   : > { %v14516_v42 = vrot.slane %v7948_v35, %v13810_v53  ;;  %v14519_v18 = vrot.slane %v7965_v43, %v13810_v53  ;;  %v8297_v33 = vor.u32 %v8296_v2, %v8292_v27  ;;  %v14521_v59 = vrot.slane %v8299_v6, 1  ;;  %10596 = vmatpush3.bf16.msra.mxu1 %v10961_v61 }
 0x36c   : > { %v7966_v7 = vcombine.low %v7751_v16, %v7752_v57  ;;  %v14523_v17 = vcombine.low %v7753_v4, %v7754_v28  ;;  %v7902_v46 = vcombine.high %v7893_v31, %v7900_v19  ;;  %v7920_v24 = vcombine.high %v14427_v26, %v14434_v62  ;;  %10597 = vmatprep.subr.bf16.mxu1 %v10962_v34  ;;  %v10965_v28 = vld [vmem:[#allocation8 + $0x290] sm:$0xff]  }
 0x36d   : > { %v8302_v41 = vsel %vm1592_vm1, %v8297_v33, %v14521_v59  ;;  %v8280_v55 = vshrl.u32 %v14444_v23, 16  ;;  %v8282_v39 = vshll.u32 %v14444_v23, 16  ;;  %v8287_v27 = vshll.u32 %v14401_v44, 16 }
 0x36e   : > { %v14533_v61 = vrot.slane %v7966_v7, %v13810_v53  ;;  %9659 = vmatprep.mubr.bf16.mxu0 %v8302_v41  ;;  %v14535_v1 = vpack.c.bf16 %v7920_v24, %v7902_v46  ;;  %v10324_v16 = vpack.c.bf16 %v7902_v46, %v14388_v50  ;;  %v7335_v4 = vadd.f32 %v14423_v56, %v14286_v21  ;;  %v10967_v24 = vld [vmem:[#allocation8 + $0x288] sm:$0xff]  }
 0x36f   : > { %v8284_v22 = vrot.slane %v8282_v39, 1  ;;  %v14540_v34 = vrot.slane %v8287_v27, 1  ;;  %v7901_v35 = vcombine.low %v7893_v31, %v7900_v19  ;;  %v7339_v43 = vadd.f32 %v14431_v11, %v14301_v54  ;;  %10598 = vmatpush3.bf16.msra.mxu1 %v10963_v13  ;;  %v10968_v39 = vld [vmem:[#allocation8 + $0x2c0] sm:$0xff]  }
 0x370   : > { %9586 = vmatprep.mubr.bf16.mxu1 %v10324_v16  ;;  %v7543_v2 = vcombine.low %v14464_v32, %v7335_v4  ;;  %v7544_v6 = vcombine.high %v14464_v32, %v7335_v4  ;;  %v7341_v57 = vadd.f32 %v14448_v47, %v14318_v49  ;;  %v7343_v50 = vadd.f32 %v14460_v60, %v14328_v38  ;;  %v10966_v38 = vld [vmem:[#allocation8 + $0x2c8] sm:$0xff]  }
 0x371   : > { %v8285_v21 = vor.u32 %v8284_v22, %v8280_v55  ;;  %v14553_v56 = vpack.c.bf16 %v7919_v25, %v7901_v35  ;;  %v10323_v54 = vpack.c.bf16 %v7901_v35, %v14390_v36  ;;  %v7345_v11 = vadd.f32 %v14478_v63, %v14335_v8  ;;  %10599 = vmatprep.subr.bf16.mxu1 %v10964_v14 }
 0x372   : > { %v7551_v32 = vrot.slane %v7543_v2, %v13810_v53  ;;  %v7558_v49 = vrot.slane %v7544_v6, %v13810_v53  ;;  %v7561_v47 = vcombine.low %v7339_v43, %v7341_v57  ;;  %v7562_v31 = vcombine.high %v7339_v43, %v7341_v57 }
 0x373   : > { %v8290_v60 = vsel %vm1592_vm1, %v8285_v21, %v14540_v34  ;;  %9587 = vmatmul.mubr.bf16.gmra.mxu1 %v10323_v54  ;;  %v7579_v26 = vcombine.low %v7343_v50, %v7345_v11  ;;  %v7580_v62 = vcombine.high %v7343_v50, %v7345_v11  ;;  %v14564_v36 = vadd.f32 %v14488_v29, %v14353_v10  ;;  %v10969_v54 = vld [vmem:[#allocation8 + $0x280] sm:$0xff]  }
 0x374   : > { %9660 = vmatmul.mubr.bf16.vlgmr.msra.gmra.mxu0 %v8290_v60  ;;  %v7559_v8 = vcombine.high %v7551_v32, %v7551_v32  ;;  %v7560_v25 = vcombine.high %v7558_v49, %v7558_v49  ;;  %v7703_v63 = vadd.f32 %v7551_v32, %v15347_v37  ;;  %v7705_v19 = vadd.f32 %v7558_v49, %v15346_v9 }
 0x375   : > { %v7569_v33 = vrot.slane %v7561_v47, %v13810_v53  ;;  %v7576_v13 = vrot.slane %v7562_v31, %v13810_v53  ;;  %v7587_v7 = vrot.slane %v7579_v26, %v13810_v53  ;;  %v7594_v46 = vrot.slane %v7580_v62, %v13810_v53  ;;  %10600 = vmatpush3.bf16.msra.mxu1 %v10965_v28 }
 0x376   : > { %v7704_v10 = vadd.f32 %v7559_v8, %v15352_v12  ;;  %v7706_v29 = vadd.f32 %v7560_v25, %v15346_v9  ;;  %v7755_v41 = vmax.f32 %v7703_v63, 0.0  ;;  %v7757_v55 = vmax.f32 %v7705_v19, 0.0  ;;  %10601 = vmatprep.subr.bf16.mxu1 %v10966_v38 }
 0x377   : > { %v7577_v27 = vcombine.high %v7569_v33, %v7569_v33  ;;  %v7578_v14 = vcombine.high %v7576_v13, %v7576_v13  ;;  %v7707_v16 = vadd.f32 %v7569_v33, %v15351_v48  ;;  %v7709_v4 = vadd.f32 %v7576_v13, %v15352_v12 }
 0x378   : > { %v7756_v22 = vmax.f32 %v7704_v10, 0.0  ;;  %v7758_v35 = vmax.f32 %v7706_v29, 0.0  ;;  %v14577_v43 = vrot.slane %v7757_v55, %v13810_v53  ;;  %v7595_v2 = vcombine.high %v7587_v7, %v7587_v7 }
 0x379   : > { %v7708_v6 = vadd.f32 %v7577_v27, %v15347_v37  ;;  %v7710_v57 = vadd.f32 %v7578_v14, %v15346_v9  ;;  %v7759_v50 = vmax.f32 %v7707_v16, 0.0  ;;  %v7761_v21 = vmax.f32 %v7709_v4, 0.0  ;;  %10602 = vmatpush3.bf16.msra.mxu1 %v10967_v24 }
 0x37a   : > { %v14581_v11 = vcombine.low %v7755_v41, %v7756_v22  ;;  %v7596_v28 = vcombine.high %v7594_v46, %v7594_v46  ;;  %v7711_v32 = vadd.f32 %v7587_v7, %v15351_v48  ;;  %v7712_v49 = vadd.f32 %v7595_v2, %v15347_v37  ;;  %10603 = vmatprep.subr.bf16.mxu1 %v10968_v39 }
 0x37b   : > { %v7760_v47 = vmax.f32 %v7708_v6, 0.0  ;;  %v7762_v31 = vmax.f32 %v7710_v57, 0.0  ;;  %v14585_v38 = vcombine.low %v7758_v35, %v7759_v50  ;;  %v7713_v60 = vadd.f32 %v7594_v46, %v15352_v12 }
 0x37c   : > { %v7714_v26 = vadd.f32 %v7596_v28, %v15346_v9  ;;  %v7763_v62 = vmax.f32 %v7711_v32, 0.0  ;;  %v7764_v8 = vmax.f32 %v7712_v49, 0.0  ;;  %v14595_v25 = vpack.c.bf16 %v7946_v3, %v7938_v51 }
 0x37d   : > { %v14597_v63 = vcombine.low %v7760_v47, %v7761_v21  ;;  %v7765_v19 = vmax.f32 %v7713_v60, 0.0  ;;  %v8494_v33 = vunpack.c.h.b16 %v14535_v1  ;;  %v7351_v13 = vadd.f32 %v14500_v58, %v14374_v20  ;;  %10604 = vmatpush3.bf16.msra.mxu1 %v10969_v54 }
 0x37e   : > { %v7766_v7 = vmax.f32 %v7714_v26, 0.0  ;;  %v8027_v46 = vcombine.low %v7762_v31, %v7763_v62  ;;  %v8506_v24 = vunpack.c.l.b16 %v14595_v25  ;;  %v8493_v30 = vunpack.c.h.b16 %v14553_v56 }
 0x37f   : > { %v8028_v45 = vcombine.low %v7764_v8, %v7765_v19  ;;  %v7597_v5 = vcombine.low %v14564_v36, %v7351_v13  ;;  %v7598_v51 = vcombine.high %v14564_v36, %v7351_v13  ;;  %v8505_v3 = vunpack.c.l.b16 %v14496_v52 }
 0x380   : > { %v14608_v10 = vrot.slane %v8027_v46, %v13810_v53  ;;  %v8614_v29 = vpack.c.b16 %v8506_v24, %v8494_v33  ;;  %v8306_v20 = vshrl.u32 %v14476_v40, 16  ;;  %v8322_v58 = vshrl.u32 %v14535_v1, 16 }
 0x381   : > { %v14613_v41 = vrot.slane %v8028_v45, %v13810_v53  ;;  %v7605_v55 = vrot.slane %v7597_v5, %v13810_v53  ;;  %v7612_v39 = vrot.slane %v7598_v51, %v13810_v53  ;;  %v8613_v27 = vpack.c.b16 %v8505_v3, %v8493_v30 }
 0x382   : > { %9594 = vmatprep.mubr.bf16.mxu1 %v8614_v29  ;;  %v8308_v36 = vor.u32 %v8306_v20, %v14521_v59  ;;  %v8324_v14 = vshll.u32 %v14535_v1, 16  ;;  %v8329_v16 = vshll.u32 %v14595_v25, 16  ;;  %v8303_v4 = vshrl.u32 %v14401_v44, 16 }
 0x383   : > { %v8043_v22 = vcombine.low %v14608_v10, %v14613_v41  ;;  %v7613_v35 = vcombine.high %v7605_v55, %v7605_v55  ;;  %v7614_v2 = vcombine.high %v7612_v39, %v7612_v39  ;;  %v7715_v6 = vadd.f32 %v7605_v55, %v15351_v48  ;;  %9595 = vmatmul.mubr.bf16.gmra.mxu1 %v8613_v27 }
 0x384   : > { %v7717_v57 = vadd.f32 %v7612_v39, %v15352_v12  ;;  %v8326_v50 = vrot.slane %v8324_v14, 1  ;;  %v8331_v21 = vrot.slane %v8329_v16, 1  ;;  %v8305_v59 = vor.u32 %v8303_v4, %v14540_v34 }
 0x385   : > { %v7716_v54 = vadd.f32 %v7613_v35, %v15347_v37  ;;  %v7718_v28 = vadd.f32 %v7614_v2, %v15346_v9  ;;  %v7767_v32 = vmax.f32 %v7715_v6, 0.0  ;;  %v8310_v49 = vshrl.u32 %v14553_v56, 16 }
 0x386   : > { %v7769_v47 = vmax.f32 %v7717_v57, 0.0  ;;  %v8327_v31 = vor.u32 %v8326_v50, %v8322_v58  ;;  %v8312_v60 = vshll.u32 %v14553_v56, 16  ;;  %v8317_v48 = vshll.u32 %v14496_v52, 16 }
 0x387   : > { %v7768_v26 = vmax.f32 %v7716_v54, 0.0  ;;  %v7770_v62 = vmax.f32 %v7718_v28, 0.0  ;;  %v8045_v12 = vcombine.low %v7766_v7, %v7767_v32  ;;  %v7964_v8 = vcombine.high %v14493_v15, %v14516_v42 }
 0x388   : > { %v8332_v34 = vsel %vm1592_vm1, %v8327_v31, %v8331_v21  ;;  %v8314_v37 = vrot.slane %v8312_v60, 1  ;;  %v8319_v19 = vrot.slane %v8317_v48, 1  ;;  %v7982_v9 = vcombine.high %v14519_v18, %v14533_v61 }
 0x389   : > { %v8046_v33 = vcombine.low %v7768_v26, %v7769_v47  ;;  %v8053_v13 = vrot.slane %v8045_v12, %v13810_v53  ;;  %v8069_v46 = vrot.slane %v7770_v62, %v13810_v53  ;;  %v10203_v24 = vcombine.low %v8308_v36, %v8332_v34 }
 0x38a   : > { %v8315_v30 = vor.u32 %v8314_v37, %v8310_v49  ;;  %v14638_v45 = vpack.c.bf16 %v7982_v9, %v7964_v8  ;;  %v8336_v7 = vshrl.u32 %v14595_v25, 16  ;;  %v8496_v5 = vunpack.c.h.b16 %v8332_v34 }
 0x38b   : > { %v8060_v51 = vrot.slane %v8046_v33, %v13810_v53  ;;  %v8070_v3 = vcombine.high %v8069_v46, %v8069_v46  ;;  %9667 = vmatprep.mubr.bf16.mxu0 %v10203_v24  ;;  %v7963_v29 = vcombine.low %v14493_v15, %v14516_v42  ;;  %v7981_v20 = vcombine.low %v14519_v18, %v14533_v61  ;;  %v14655_v61 = vpop.f32.mrf.mxu0 }
 0x38c   : > { %v8320_v58 = vsel %vm1592_vm1, %v8315_v30, %v8319_v19  ;;  %9602 = vmatprep.mubr.bf16.mxu1 %v14638_v45  ;;  %v8338_v55 = vor.u32 %v8336_v7, %v8331_v21  ;;  %v8333_v39 = vshrl.u32 %v14496_v52, 16  ;;  %v7991_v27 = vrot.slane %v14523_v17, %v13810_v53 }
 0x38d   : > { %v8061_v36 = vcombine.low %v8053_v13, %v8060_v51  ;;  %v8062_v14 = vcombine.high %v8053_v13, %v8060_v51  ;;  %v10202_v16 = vcombine.low %v8305_v59, %v8320_v58  ;;  %v14651_v4 = vpack.c.bf16 %v7981_v20, %v7963_v29  ;;  %v14673_v48 = vpop.f32.mrf.mxu0 }
 0x38e   : > { %v8508_v35 = vunpack.c.l.b16 %v8338_v55  ;;  %v8335_v15 = vor.u32 %v8333_v39, %v8319_v19  ;;  %v8495_v42 = vunpack.c.h.b16 %v8320_v58  ;;  %v7998_v18 = vrot.slane %v14581_v11, %v13810_v53 }
 0x38f   : > { %v14657_v2 = vpack.c.bf16 %v8069_v46, %v8061_v36  ;;  %9668 = vmatmul.mubr.bf16.gmra.mxu0 %v10202_v16  ;;  %9603 = vmatmul.mubr.bf16.gmra.mxu1 %v14651_v4  ;;  %v8008_v17 = vcombine.high %v14577_v43, %v14577_v43  ;;  %v8017_v6 = vrot.slane %v14585_v38, %v13810_v53  ;;  %v8352_v57 = vshrl.u32 %v14638_v45, 16  ;;  %v14693_v7 = vpop.f32.mrf.mxu0 }
 0x390   : > { %v8616_v50 = vpack.c.b16 %v8508_v35, %v8496_v5  ;;  %v8507_v21 = vunpack.c.l.b16 %v8335_v15  ;;  %v8000_v59 = vcombine.high %v7991_v27, %v7998_v18  ;;  %v8024_v11 = vrot.slane %v14597_v63, %v13810_v53 }
 0x391   : > { %v8044_v54 = vcombine.high %v14608_v10, %v14613_v41  ;;  %v8354_v28 = vshll.u32 %v14638_v45, 16  ;;  %v7999_v32 = vcombine.low %v7991_v27, %v7998_v18  ;;  %v8340_v49 = vshrl.u32 %v14651_v4, 16  ;;  %v14706_v35 = vpop.f32.mrf.mxu0 }
 0x392   : > { %9675 = vmatprep.mubr.bf16.mxu0 %v8616_v50  ;;  %v8615_v47 = vpack.c.b16 %v8507_v21, %v8495_v42  ;;  %v8026_v31 = vcombine.high %v8017_v6, %v8024_v11  ;;  %v14671_v38 = vpack.c.bf16 %v8008_v17, %v8000_v59  ;;  %v8025_v60 = vcombine.low %v8017_v6, %v8024_v11  ;;  %v10397_v21 = vpop.f32.mrf.mxu1 }
 0x393   : > { %v8356_v26 = vrot.slane %v8354_v28, 1  ;;  %v14676_v62 = vpack.c.bf16 %v14577_v43, %v7999_v32  ;;  %v8342_v53 = vshll.u32 %v14651_v4, 16  ;;  %v14679_v63 = vpack.c.bf16 %v8070_v3, %v8062_v14 }
 0x394   : > { %v14681_v12 = vpack.c.bf16 %v8044_v54, %v8026_v31  ;;  %v10328_v8 = vpack.c.bf16 %v8026_v31, %v8000_v59  ;;  %v8359_v34 = vshll.u32 %v14671_v38, 16  ;;  %v14687_v37 = vpack.c.bf16 %v8043_v22, %v8025_v60  ;;  %v14713_v59 = vpop.f32.mrf.mxu0 }
 0x395   : > { %v8357_v19 = vor.u32 %v8356_v26, %v8352_v57  ;;  %v10327_v9 = vpack.c.bf16 %v8025_v60, %v7999_v32  ;;  %v8344_v33 = vrot.slane %v8342_v53, 1  ;;  %v8347_v43 = vshll.u32 %v14676_v62, 16 }
 0x396   : > { %9610 = vmatprep.mubr.bf16.mxu1 %v10328_v8  ;;  %v8361_v13 = vrot.slane %v8359_v34, 1  ;;  %v8566_v46 = vunpack.c.h.b16 %v14681_v12  ;;  %v8578_v24 = vunpack.c.l.b16 %v14679_v63  ;;  %v8565_v30 = vunpack.c.h.b16 %v14687_v37 }
 0x397   : > { %9676 = vmatmul.mubr.bf16.gmra.mxu0 %v8615_v47  ;;  %9611 = vmatmul.mubr.bf16.gmra.mxu1 %v10327_v9  ;;  %v8345_v10 = vor.u32 %v8344_v33, %v8340_v49  ;;  %v8349_v41 = vrot.slane %v8347_v43, 1  ;;  %v8577_v22 = vunpack.c.l.b16 %v14657_v2  ;;  %v8418_v5 = vrot.slane %v14436_v0, 1  ;;  %v10352_v33 = vpop.f32.mrf.mxu0 }
 0x398   : > { %v8362_v51 = vsel %vm1592_vm1, %v8357_v19, %v8361_v13  ;;  %v8650_v3 = vpack.c.b16 %v8578_v24, %v8566_v46  ;;  %v8419_v29 = vrot.slane %v14476_v40, 1  ;;  %v8366_v20 = vshrl.u32 %v14671_v38, 16 }
 0x399   : > { %9683 = vmatprep.mubr.bf16.mxu0 %v8362_v51  ;;  %v8350_v58 = vsel %vm1592_vm1, %v8345_v10, %v8349_v41  ;;  %v8649_v55 = vpack.c.b16 %v8577_v22, %v8565_v30  ;;  %v8382_v39 = vshrl.u32 %v14681_v12, 16  ;;  %v8384_v27 = vshll.u32 %v14681_v12, 16 }
 0x39a   : > { %9618 = vmatprep.mubr.bf16.mxu1 %v8650_v3  ;;  %v8420_v36 = vsel %vm1729_vm0, %v8418_v5, %v8419_v29  ;;  %v8368_v14 = vor.u32 %v8366_v20, %v8361_v13  ;;  %v8389_v0 = vshll.u32 %v14679_v63, 16  ;;  %v8363_v16 = vshrl.u32 %v14676_v62, 16 }
 0x39b   : > { %v8386_v40 = vrot.slane %v8384_v27, 1  ;;  %v8370_v15 = vshrl.u32 %v14687_v37, 16  ;;  %v8372_v42 = vshll.u32 %v14687_v37, 16  ;;  %v8377_v18 = vshll.u32 %v14657_v2, 16 }
 0x39c   : > { %v8391_v17 = vrot.slane %v8389_v0, 1  ;;  %v8365_v6 = vor.u32 %v8363_v16, %v8349_v41  ;;  %v8396_v57 = vshrl.u32 %v14679_v63, 16  ;;  %v8415_v50 = vrot.slane %v14444_v23, 1 }
 0x39d   : > { %v8387_v11 = vor.u32 %v8386_v40, %v8382_v39  ;;  %v8374_v54 = vrot.slane %v8372_v42, 1  ;;  %v8379_v28 = vrot.slane %v8377_v18, 1  ;;  %v8416_v32 = vrot.slane %v14401_v44, 1  ;;  %v10354_v39 = vpop.f32.mrf.mxu0 }
 0x39e   : > { %v8398_v49 = vor.u32 %v8396_v57, %v8391_v17  ;;  %v8424_v47 = vrot.slane %v14535_v1, 1  ;;  %v8425_v31 = vrot.slane %v14595_v25, 1  ;;  %v8393_v60 = vshrl.u32 %v14657_v2, 16  ;;  %v10398_v1 = vpop.f32.mrf.mxu1 }
 0x39f   : > { %9684 = vmatmul.mubr.bf16.gmra.mxu0 %v8350_v58  ;;  %9619 = vmatmul.mubr.bf16.gmra.mxu1 %v8649_v55  ;;  %v8392_v26 = vsel %vm1592_vm1, %v8387_v11, %v8391_v17  ;;  %v8375_v23 = vor.u32 %v8374_v54, %v8370_v15  ;;  %v8417_v53 = vsel %vm1729_vm0, %v8415_v50, %v8416_v32  ;;  %v8421_v8 = vrot.slane %v14553_v56, 1 }
 0x3a0   : > { %9740 = vmatprep.mubr.bf16.mxu1 %v8420_v36  ;;  %v10215_v34 = vcombine.low %v8368_v14, %v8392_v26  ;;  %v8568_v19 = vunpack.c.h.b16 %v8392_v26  ;;  %v8580_v44 = vunpack.c.l.b16 %v8398_v49  ;;  %v8426_v9 = vsel %vm1729_vm0, %v8424_v47, %v8425_v31 }
 0x3a1   : > { %v8380_v25 = vsel %vm1592_vm1, %v8375_v23, %v8379_v28  ;;  %v10205_v43 = vcombine.low %v8419_v29, %v8426_v9  ;;  %v8395_v13 = vor.u32 %v8393_v60, %v8379_v28  ;;  %v8422_v46 = vrot.slane %v14496_v52, 1  ;;  %v10400_v29 = vpop.f32.mrf.mxu1 }
 0x3a2   : > { %9691 = vmatprep.mubr.bf16.mxu0 %v10215_v34  ;;  %v10214_v24 = vcombine.low %v8365_v6, %v8380_v25  ;;  %v8652_v30 = vpack.c.b16 %v8580_v44, %v8568_v19  ;;  %v8567_v10 = vunpack.c.h.b16 %v8380_v25  ;;  %v8498_v41 = vunpack.c.h.b16 %v8426_v9  ;;  %v10355_v6 = vpop.f32.mrf.mxu0 }
 0x3a3   : > { %v8579_v56 = vunpack.c.l.b16 %v8395_v13  ;;  %v8423_v22 = vsel %vm1729_vm0, %v8421_v8, %v8422_v46  ;;  %v8510_v5 = vunpack.c.l.b16 %v8425_v31  ;;  %v8509_v51 = vunpack.c.l.b16 %v8422_v46  ;;  %v10401_v17 = vpop.f32.mrf.mxu1 }
 0x3a4   : > { %v10204_v3 = vcombine.low %v8416_v32, %v8423_v22  ;;  %v8497_v20 = vunpack.c.h.b16 %v8423_v22  ;;  %v8430_v58 = vrot.slane %v14638_v45, 1  ;;  %v8431_v55 = vrot.slane %v14671_v38, 1 }
 0x3a5   : > { %v8651_v27 = vpack.c.b16 %v8579_v56, %v8567_v10  ;;  %v8618_v52 = vpack.c.b16 %v8510_v5, %v8498_v41  ;;  %v8427_v36 = vrot.slane %v14651_v4, 1  ;;  %v8428_v14 = vrot.slane %v14676_v62, 1 }
 0x3a6   : > { %v8617_v0 = vpack.c.b16 %v8509_v51, %v8497_v20  ;;  %v8432_v16 = vsel %vm1729_vm0, %v8430_v58, %v8431_v55  ;;  %v8436_v40 = vrot.slane %v14681_v12, 1  ;;  %v8437_v15 = vrot.slane %v14679_v63, 1 }
 0x3a7   : > { %9692 = vmatmul.mubr.bf16.gmra.mxu0 %v10214_v24  ;;  %9741 = vmatmul.mubr.bf16.vlgmr.msra.gmra.mxu1 %v8417_v53  ;;  %v8429_v45 = vsel %vm1729_vm0, %v8427_v36, %v8428_v14  ;;  %v8433_v38 = vrot.slane %v14687_v37, 1  ;;  %v8434_v42 = vrot.slane %v14657_v2, 1  ;;  %v10347_v4 = vadd.f32 %v14673_v48, %v14655_v61  ;;  %v10357_v48 = vpop.f32.mrf.mxu0 }
 0x3a8   : > { %9699 = vmatprep.mubr.bf16.mxu0 %v8652_v30  ;;  %9748 = vmatprep.mubr.bf16.mxu1 %v10205_v43  ;;  %v8438_v62 = vsel %vm1729_vm0, %v8436_v40, %v8437_v15  ;;  %v8582_v18 = vunpack.c.l.b16 %v8437_v15  ;;  %v10350_v12 = vadd.f32 %v14706_v35, %v14693_v7  ;;  %v10399_v63 = vadd.f32 %v10398_v1, %v10397_v21  ;;  %v10403_v60 = vpop.f32.mrf.mxu1 }
 0x3a9   : > { %v10217_v57 = vcombine.low %v8431_v55, %v8438_v62  ;;  %v8435_v50 = vsel %vm1729_vm0, %v8433_v38, %v8434_v42  ;;  %v8570_v37 = vunpack.c.h.b16 %v8438_v62  ;;  %v8581_v11 = vunpack.c.l.b16 %v8434_v42  ;;  %v10358_v7 = vpop.f32.mrf.mxu0 }
 0x3aa   : > { %v10216_v2 = vcombine.low %v8428_v14, %v8435_v50  ;;  %v8569_v54 = vunpack.c.h.b16 %v8435_v50  ;;  %v14742_v28 = vadd.f32 %v10399_v63, %v10347_v4  ;;  %v10353_v61 = vadd.f32 %v10352_v33, %v14713_v59  ;;  %v10404_v23 = vpop.f32.mrf.mxu1 }
 0x3ab   : > { %v8654_v32 = vpack.c.b16 %v8582_v18, %v8570_v37  ;;  %v10402_v49 = vadd.f32 %v10401_v17, %v10400_v29  ;;  %v10356_v47 = vadd.f32 %v10355_v6, %v10354_v39  ;;  %v10359_v21 = vadd.f32 %v10358_v7, %v10357_v48  ;;  %v10360_v26 = vpop.f32.mrf.mxu0 }
 0x3ac   : > { %v8653_v31 = vpack.c.b16 %v8581_v11, %v8569_v54  ;;  %v10405_v53 = vadd.f32 %v10404_v23, %v10403_v60  ;;  %v10406_v19 = vpop.f32.mrf.mxu1 }
 0x3ad   : > { %v14745_v35 = vadd.f32 %v10402_v49, %v10350_v12  ;;  %v10361_v8 = vpop.f32.mrf.mxu0 }
 0x3ae   : > { %v10362_v34 = vadd.f32 %v10361_v8, %v10360_v26  ;;  %v14747_v59 = vadd.f32 %v10405_v53, %v10353_v61  ;;  %v10407_v44 = vpop.f32.mrf.mxu1 }
 0x3af   : > { %9700 = vmatmul.mubr.bf16.gmra.mxu0 %v8651_v27  ;;  %9749 = vmatmul.mubr.bf16.gmra.mxu1 %v10204_v3  ;;  %v10408_v9 = vadd.f32 %v10407_v44, %v10406_v19 }
 0x3b0   : > { %9756 = vmatprep.mubr.bf16.mxu1 %v8618_v52  ;;  %v10409_v1 = vpop.f32.mrf.mxu1 }
 0x3b1   : > { %v14749_v33 = vadd.f32 %v10408_v9, %v10356_v47 }
 0x3b2   : > { %v10410_v25 = vpop.f32.mrf.mxu1 }
 0x3b3   : > { %v10411_v43 = vadd.f32 %v10410_v25, %v10409_v1 }
 0x3b4   : > { %v10412_v13 = vpop.f32.mrf.mxu1 }
 0x3b5   : > { %v14751_v46 = vadd.f32 %v10411_v43, %v10359_v21 }
 0x3b6   : > { %v10413_v24 = vpop.f32.mrf.mxu1 }
 0x3b7   : > { %9757 = vmatmul.mubr.bf16.gmra.mxu1 %v8617_v0  ;;  %v10414_v30 = vadd.f32 %v10413_v24, %v10412_v13 }
 0x3b8   : > { %9764 = vmatprep.mubr.bf16.mxu1 %v8432_v16 }
 0x3b9   : > { %v14753_v41 = vadd.f32 %v10414_v30, %v10362_v34 }
 0x3ba   : > { %v10363_v10 = vpop.f32.mrf.mxu0 }
 0x3bc   : > { %v10364_v56 = vpop.f32.mrf.mxu0 }
 0x3bd   : > { %v10365_v22 = vadd.f32 %v10364_v56, %v10363_v10 }
 0x3be   : > { %v10366_v5 = vpop.f32.mrf.mxu0 }
 0x3bf   : > { %9765 = vmatmul.mubr.bf16.gmra.mxu1 %v8429_v45 }
 0x3c0   : > { %9772 = vmatprep.mubr.bf16.mxu1 %v10217_v57  ;;  %v10367_v51 = vpop.f32.mrf.mxu0 }
 0x3c1   : > { %v10368_v3 = vadd.f32 %v10367_v51, %v10366_v5 }
 0x3c4   : > { %v10415_v20 = vpop.f32.mrf.mxu1 }
 0x3c6   : > { %v10416_v58 = vpop.f32.mrf.mxu1 }
 0x3c7   : > { %9773 = vmatmul.mubr.bf16.gmra.mxu1 %v10216_v2  ;;  %v10417_v55 = vadd.f32 %v10416_v58, %v10415_v20 }
 0x3c8   : > { %9780 = vmatprep.mubr.bf16.mxu1 %v8654_v32  ;;  %v10418_v29 = vpop.f32.mrf.mxu1 }
 0x3c9   : > { %v14755_v39 = vadd.f32 %v10417_v55, %v10365_v22 }
 0x3ca   : > { %v10419_v52 = vpop.f32.mrf.mxu1 }
 0x3cb   : > { %v10420_v36 = vadd.f32 %v10419_v52, %v10418_v29 }
 0x3cd   : > { %v14757_v16 = vadd.f32 %v10420_v36, %v10368_v3 }
 0x3ce   : > { %v10369_v27 = vpop.f32.mrf.mxu0 }
 0x3cf   : > { %9781 = vmatmul.mubr.bf16.gmra.mxu1 %v8653_v31 }
 0x3d0   : > { %v10370_v14 = vpop.f32.mrf.mxu0 }
 0x3d1   : > { %v10371_v0 = vadd.f32 %v10370_v14, %v10369_v27 }
 0x3d2   : > { %v10372_v40 = vpop.f32.mrf.mxu0 }
 0x3d4   : > { %v10373_v15 = vpop.f32.mrf.mxu0 }
 0x3d5   : > { %v10374_v45 = vadd.f32 %v10373_v15, %v10372_v40 }
 0x3df   : > { %v10375_v38 = vpop.f32.mrf.mxu0 }
 0x3e1   : > { %v10376_v42 = vpop.f32.mrf.mxu0 }
 0x3e2   : > { %v10377_v4 = vadd.f32 %v10376_v42, %v10375_v38  ;;  %v10421_v62 = vpop.f32.mrf.mxu1 }
 0x3e3   : > { %v10378_v18 = vpop.f32.mrf.mxu0 }
 0x3e4   : > { %v10422_v12 = vpop.f32.mrf.mxu1 }
 0x3e5   : > { %v10423_v63 = vadd.f32 %v10422_v12, %v10421_v62  ;;  %v10379_v17 = vpop.f32.mrf.mxu0 }
 0x3e6   : > { %v10380_v6 = vadd.f32 %v10379_v17, %v10378_v18  ;;  %v10424_v57 = vpop.f32.mrf.mxu1 }
 0x3e7   : > { %v14759_v50 = vadd.f32 %v10423_v63, %v10371_v0  ;;  %v14761_v37 = vpop.f32.mrf.mxu0 }
 0x3e8   : > { %v10425_v11 = vpop.f32.mrf.mxu1 }
 0x3e9   : > { %15354 = vst [vmem:[#allocation23_spill] sm:$0xff] %v14759_v50  ;;  %v10426_v2 = vadd.f32 %v10425_v11, %v10424_v57  ;;  %v14763_v54 = vpop.f32.mrf.mxu0 }
 0x3ea   : > { %v10427_v61 = vpop.f32.mrf.mxu1 }
 0x3eb   : > { %v14765_v48 = vadd.f32 %v10426_v2, %v10374_v45  ;;  %v14767_v32 = vpop.f32.mrf.mxu0 }
 0x3ec   : > { %v10428_v49 = vpop.f32.mrf.mxu1 }
 0x3ed   : > { %15355 = vst [vmem:[#allocation22_spill] sm:$0xff] %v14765_v48  ;;  %v10429_v47 = vadd.f32 %v10428_v49, %v10427_v61  ;;  %v14769_v31 = vpop.f32.mrf.mxu0  ;;  %v10451_v48 = vadd.f32 %v14763_v54, %v14761_v37 }
 0x3ee   : > { %v10430_v7 = vpop.f32.mrf.mxu1 }
 0x3ef   : > { %v14771_v21 = vadd.f32 %v10429_v47, %v10377_v4  ;;  %v14773_v60 = vpop.f32.mrf.mxu0 }
 0x3f0   : > { %v10431_v26 = vpop.f32.mrf.mxu1 }
 0x3f1   : > { %15356 = vst [vmem:[#allocation38_spill] sm:$0xff] %v14771_v21  ;;  %v10432_v23 = vadd.f32 %v10431_v26, %v10430_v7  ;;  %v14775_v53 = vpop.f32.mrf.mxu0 }
 0x3f2   : > { %v10457_v37 = vadd.f32 %v14775_v53, %v14773_v60 }
 0x3f3   : > { %v14777_v8 = vadd.f32 %v10432_v23, %v10380_v6  ;;  %v14779_v34 = vpop.f32.mrf.mxu0 }
 0x3f4   : > { %v9508_v60 = vadd.f32 %v10457_v37, %v14747_v59 }
 0x3f5   : > { %15357 = vst [vmem:[#allocation33_spill] sm:$0xff] %v14777_v8  ;;  %v14781_v19 = vpop.f32.mrf.mxu0 }
 0x3f6   : > { %v10460_v53 = vadd.f32 %v14781_v19, %v14779_v34 }
 0x3f7   : > { %v14783_v44 = vpop.f32.mrf.mxu0 }
 0x3f9   : > { %v14785_v9 = vpop.f32.mrf.mxu0 }
 0x3fa   : > { %v10463_v59 = vadd.f32 %v14785_v9, %v14783_v44 }
 0x3fb   : > { %v14787_v1 = vpop.f32.mrf.mxu0 }
 0x3fd   : > { %v14789_v25 = vpop.f32.mrf.mxu0 }
 0x400   : > { %v14791_v43 = vpop.f32.mrf.mxu0 }
 0x402   : > { %v14793_v13 = vpop.f32.mrf.mxu0 }
 0x404   : > { %v14795_v24 = vpop.f32.mrf.mxu0 }
 0x406   : > { %v14797_v30 = vpop.f32.mrf.mxu0 }
 0x408   : > { %v14799_v10 = vpop.f32.mrf.mxu0 }
 0x409   : > { %15358 = vst [vmem:[#allocation52_spill] sm:$0xff] %v14799_v10 }
 0x40a   : > { %v14801_v56 = vpop.f32.mrf.mxu0 }
 0x40b   : > { %15359 = vst [vmem:[#allocation54_spill] sm:$0xff] %v14801_v56 }
 0x40c   : > { %v14803_v5 = vpop.f32.mrf.mxu0 }
 0x40d   : > { %15360 = vst [vmem:[#allocation15_spill] sm:$0xff] %v14803_v5 }
 0x40e   : > { %v14805_v3 = vpop.f32.mrf.mxu0 }
 0x40f   : > { %15361 = vst [vmem:[#allocation20_spill] sm:$0xff] %v14805_v3 }
 0x410   : > { %v14807_v58 = vpop.f32.mrf.mxu0 }
 0x411   : > { %15362 = vst [vmem:[#allocation21_spill] sm:$0xff] %v14807_v58 }
 0x412   : > { %v14809_v29 = vpop.f32.mrf.mxu0 }
 0x413   : > { %15363 = vst [vmem:[#allocation16_spill] sm:$0xff] %v14809_v29 }
 0x414   : > { %v14811_v52 = vpop.f32.mrf.mxu0 }
 0x415   : > { %15364 = vst [vmem:[#allocation17_spill] sm:$0xff] %v14811_v52 }
 0x416   : > { %v14813_v14 = vpop.f32.mrf.mxu0 }
 0x417   : > { %15365 = vst [vmem:[#allocation39_spill] sm:$0xff] %v14813_v14 }
 0x41e   : > { %v10501_v22 = vpop.f32.mrf.mxu1 }
 0x420   : > { %v10502_v51 = vpop.f32.mrf.mxu1 }
 0x421   : > { %v10503_v5 = vadd.f32 %v10502_v51, %v10501_v22 }
 0x422   : > { %v10504_v20 = vpop.f32.mrf.mxu1 }
 0x424   : > { %v10505_v55 = vpop.f32.mrf.mxu1 }
 0x433   : > { %v10507_v27 = vpop.f32.mrf.mxu1 }
 0x434   : > { %v10553_v40 = vpop.f32.mrf.mxu0 }
 0x435   : > { %v10508_v36 = vpop.f32.mrf.mxu1 }
 0x436   : > { %v10554_v38 = vpop.f32.mrf.mxu0 }
 0x437   : > { %v10510_v0 = vpop.f32.mrf.mxu1 }
 0x438   : > { %v10556_v62 = vpop.f32.mrf.mxu0 }
 0x439   : > { %v10511_v15 = vpop.f32.mrf.mxu1 }
 0x43a   : > { %v10557_v12 = vpop.f32.mrf.mxu0 }
 0x43b   : > { %v10558_v10 = vadd.f32 %v10557_v12, %v10556_v62  ;;  %v10512_v62 = vadd.f32 %v10511_v15, %v10510_v0 }
 0x443   : > { %v14815_v45 = vpop.f32.mrf.mxu1 }
 0x445   : > { %v14817_v42 = vpop.f32.mrf.mxu1 }
 0x447   : > { %v14819_v4 = vpop.f32.mrf.mxu1 }
 0x449   : > { %v14821_v18 = vpop.f32.mrf.mxu1 }
 0x44f   : > { %v10559_v63 = vpop.f32.mrf.mxu0  ;;  %v14823_v17 = vpop.f32.mrf.mxu1 }
 0x451   : > { %v10560_v6 = vpop.f32.mrf.mxu0  ;;  %v14825_v57 = vpop.f32.mrf.mxu1 }
 0x453   : > { %v10562_v11 = vpop.f32.mrf.mxu0  ;;  %v14827_v2 = vpop.f32.mrf.mxu1 }
 0x455   : > { %v10563_v61 = vpop.f32.mrf.mxu0  ;;  %v14829_v49 = vpop.f32.mrf.mxu1 }
 0x457   : > { %v14831_v47 = vpop.f32.mrf.mxu0  ;;  %v14833_v7 = vpop.f32.mrf.mxu1 }
 0x458   : > { %15366 = vst [vmem:[#allocation24_spill] sm:$0xff] %v14833_v7 }
 0x459   : > { %v14835_v26 = vpop.f32.mrf.mxu0  ;;  %v14837_v23 = vpop.f32.mrf.mxu1 }
 0x45a   : > { %15367 = vst [vmem:[#allocation27_spill] sm:$0xff] %v14837_v23  ;;  %v9500_v23 = vadd.f32 %v10451_v48, %v14742_v28  ;;  %v14871_v28 = vld [vmem:[%s15011_s6] ss:$0 sm:$0xff] }
 0x45b   : > { %v14839_v8 = vpop.f32.mrf.mxu1  ;;  %v14841_v14 = vpop.f32.mrf.mxu0 }
 0x45c   : > { %15368 = vst [vmem:[#allocation26_spill] sm:$0xff] %v14839_v8  ;;  %v9581_v56 = vadd.f32 %v10503_v5, %v9500_v23  ;;  %v10567_v23 = vadd.f32 %v14835_v26, %v14831_v47 }
 0x45d   : > { %v14843_v52 = vpop.f32.mrf.mxu1  ;;  %v14847_v29 = vpop.f32.mrf.mxu0 }
 0x45e   : > { %15369 = vst [vmem:[#allocation25_spill] sm:$0xff] %v14843_v52  ;;  %v10555_v52 = vadd.f32 %v10554_v38, %v10553_v40  ;;  %v10570_v47 = vadd.f32 %v14847_v29, %v14841_v14 }
 0x45f   : > { %v14845_v21 = vpop.f32.mrf.mxu1  ;;  %v14855_v50 = vpop.f32.mrf.mxu0 }
 0x460   : > { %15370 = vst [vmem:[#allocation46_spill] sm:$0xff] %v14845_v21  ;;  %v10454_v21 = vadd.f32 %v14769_v31, %v14767_v32  ;;  %v10509_v31 = vadd.f32 %v10508_v36, %v10507_v27  ;;  %v10564_v27 = vadd.f32 %v10563_v61, %v10562_v11  ;;  %v10466_v11 = vadd.f32 %v14789_v25, %v14787_v1 }
 0x461   : > { %v14849_v58 = vpop.f32.mrf.mxu1  ;;  %v14864_v54 = vpop.f32.mrf.mxu0  ;;  %v10469_v25 = vadd.f32 %v14793_v13, %v14791_v43  ;;  %v10472_v13 = vadd.f32 %v14797_v30, %v14795_v24  ;;  %v15374_v30 = vld [vmem:[#allocation52_spill] sm:$0xff] }
 0x462   : > { %15371 = vst [vmem:[#allocation48_spill] sm:$0xff] %v14849_v58  ;;  %v10506_v58 = vadd.f32 %v10505_v55, %v10504_v20  ;;  %v9503_v51 = vadd.f32 %v10454_v21, %v14745_v35  ;;  %v9589_v38 = vadd.f32 %v10509_v31, %v9508_v60  ;;  %v9519_v1 = vadd.f32 %v10466_v11, %v14753_v41 }
 0x463   : > { %v14853_v3 = vpop.f32.mrf.mxu1  ;;  %v14876_v20 = vpop.f32.mrf.mxu0  ;;  %v9524_v43 = vadd.f32 %v10469_v25, %v14755_v39  ;;  %v10573_v29 = vadd.f32 %v14864_v54, %v14855_v50  ;;  %v9527_v24 = vadd.f32 %v10472_v13, %v14757_v16 }
 0x464   : > { %15372 = vst [vmem:[#allocation47_spill] sm:$0xff] %v14853_v3  ;;  %v9662_v3 = vadd.f32 %v10555_v52, %v9581_v56  ;;  %v9584_v32 = vadd.f32 %v10506_v58, %v9503_v51  ;;  %v10561_v56 = vadd.f32 %v10560_v6, %v10559_v63  ;;  %v9516_v6 = vadd.f32 %v10463_v59, %v14751_v46 }
 0x465   : > { %v14857_v8 = vpop.f32.mrf.mxu1 }
 0x466   : > { %15373 = vst [vmem:[#allocation36_spill] sm:$0xff] %v14857_v8  ;;  %v9665_v21 = vadd.f32 %v10558_v10, %v9584_v32  ;;  %v9670_v19 = vadd.f32 %v10561_v56, %v9589_v38 }
 0x467   : > { %v10605_v7 = vpop.f32.mrf.mxu1 }
 0x469   : > { %v10606_v22 = vpop.f32.mrf.mxu1 }
 0x46a   : > { %v10607_v8 = vadd.f32 %v10606_v22, %v10605_v7 }
 0x46b   : > { %v10608_v48 = vpop.f32.mrf.mxu1 }
 0x46c   : > { %v9743_v5 = vadd.f32 %v10607_v8, %v9662_v3  ;;  %v9511_v8 = vadd.f32 %v10460_v53, %v14749_v33  ;;  %v10575_v3 = vpop.f32.mrf.mxu0  ;;  %v10515_v33 = vadd.f32 %v14817_v42, %v14815_v45  ;;  %v10518_v42 = vadd.f32 %v14821_v18, %v14819_v4 }
 0x46d   : > { %v10609_v35 = vpop.f32.mrf.mxu1  ;;  %v10521_v18 = vadd.f32 %v14825_v57, %v14823_v17  ;;  %v10524_v57 = vadd.f32 %v14829_v49, %v14827_v2  ;;  %v10576_v50 = vadd.f32 %v10575_v3, %v14876_v20  ;;  %v15376_v2 = vld [vmem:[#allocation24_spill] sm:$0xff]  ;;  %v15377_v49 = vld [vmem:[#allocation27_spill] sm:$0xff] }
 0x46e   : > { %v9795_v55 = vadd.f32 %v14871_v28, %v9743_v5  ;;  %v10610_v52 = vadd.f32 %v10609_v35, %v10608_v48  ;;  %v14886_v0 = vpop.f32.mrf.mxu0  ;;  %v9592_v63 = vadd.f32 %v10512_v62, %v9511_v8  ;;  %v9597_v45 = vadd.f32 %v10515_v33, %v9516_v6 }
 0x46f   : > { %v10611_v40 = vpop.f32.mrf.mxu1  ;;  %v9600_v4 = vadd.f32 %v10518_v42, %v9519_v1  ;;  %v9605_v17 = vadd.f32 %v10521_v18, %v9524_v43  ;;  %v15383_v1 = vld [vmem:[#allocation22_spill] sm:$0xff]  ;;  %v15387_v43 = vld [vmem:[#allocation48_spill] sm:$0xff] }
 0x470   : > { %v9807_v12 = vmax.f32 %v9795_v55, 0.0  ;;  %v9746_v58 = vadd.f32 %v10610_v52, %v9665_v21  ;;  %v9673_v7 = vadd.f32 %v10564_v27, %v9592_v63  ;;  %v10578_v51 = vpop.f32.mrf.mxu0  ;;  %v9678_v5 = vadd.f32 %v10567_v23, %v9597_v45  ;;  %v15378_v63 = vld [vmem:[#allocation23_spill] sm:$0xff]  ;;  %v15382_v45 = vld [vmem:[#allocation25_spill] sm:$0xff] }
 0x471   : > { %v10612_v34 = vpop.f32.mrf.mxu1  ;;  %v9681_v55 = vadd.f32 %v10570_v47, %v9600_v4  ;;  %v9686_v59 = vadd.f32 %v10573_v29, %v9605_v17  ;;  %v10579_v20 = vadd.f32 %v10578_v51, %v14886_v0  ;;  %v15388_v29 = vld [vmem:[#allocation38_spill] sm:$0xff] }
 0x472   : > { %9819 = vst [vmem:[%s14882_s11] sm:$0xff] %v9807_v12  ;;  %v9796_v10 = vadd.f32 %v14871_v28, %v9746_v58  ;;  %v10613_v36 = vadd.f32 %v10612_v34, %v10611_v40  ;;  %v10580_v53 = vpop.f32.mrf.mxu0  ;;  %v15375_v12 = vld [vmem:[#allocation54_spill] sm:$0xff] }
 0x473   : > { %v10614_v15 = vpop.f32.mrf.mxu1  ;;  %v10475_v58 = vadd.f32 %v15375_v12, %v15374_v30 }
 0x474   : > { %v9808_v44 = vmax.f32 %v9796_v10, 0.0  ;;  %v9751_v9 = vadd.f32 %v10613_v36, %v9670_v19  ;;  %v10581_v40 = vpop.f32.mrf.mxu0  ;;  %v9608_v10 = vadd.f32 %v10524_v57, %v9527_v24  ;;  %v10527_v36 = vadd.f32 %v15377_v49, %v15376_v2 }
 0x475   : > { %v10615_v61 = vpop.f32.mrf.mxu1  ;;  %v9532_v33 = vadd.f32 %v10475_v58, %v15378_v63  ;;  %v10582_v0 = vadd.f32 %v10581_v40, %v10580_v53  ;;  %v15391_v58 = vld [vmem:[#allocation47_spill] sm:$0xff] }
 0x476   : > { %9820 = vst [vmem:[%s14882_s11 + $0x8] sm:$0xff] %v9808_v44  ;;  %v9797_v37 = vadd.f32 %v14871_v28, %v9751_v9  ;;  %v10616_v22 = vadd.f32 %v10615_v61, %v10614_v15  ;;  %v10583_v19 = vpop.f32.mrf.mxu0  ;;  %v15379_v44 = vld [vmem:[#allocation15_spill] sm:$0xff]  ;;  %v15380_v9 = vld [vmem:[#allocation20_spill] sm:$0xff]  ;;  %v9689_v61 = vadd.f32 %v10576_v50, %v9608_v10 }
 0x477   : > { %v10617_v48 = vpop.f32.mrf.mxu1  ;;  %v10478_v6 = vadd.f32 %v15380_v9, %v15379_v44 }
 0x478   : > { %v9809_v46 = vmax.f32 %v9797_v37, 0.0  ;;  %v9754_v32 = vadd.f32 %v10616_v22, %v9673_v7  ;;  %v10584_v23 = vpop.f32.mrf.mxu0  ;;  %v9613_v22 = vadd.f32 %v10527_v36, %v9532_v33 }
 0x479   : > { %v10618_v31 = vpop.f32.mrf.mxu1  ;;  %v9535_v25 = vadd.f32 %v10478_v6, %v15383_v1  ;;  %v10585_v40 = vadd.f32 %v10584_v23, %v10583_v19 }
 0x47a   : > { %9821 = vst [vmem:[%s14882_s11 + $0x10] sm:$0xff] %v9809_v46  ;;  %v9798_v26 = vadd.f32 %v14871_v28, %v9754_v32  ;;  %v10619_v60 = vadd.f32 %v10618_v31, %v10617_v48  ;;  %v15381_v48 = vld [vmem:[#allocation26_spill] sm:$0xff]  ;;  %v15384_v31 = vld [vmem:[#allocation21_spill] sm:$0xff]  ;;  %v10586_v4 = vpop.f32.mrf.mxu0 }
 0x47b   : > { %v10620_v35 = vpop.f32.mrf.mxu1  ;;  %v10530_v42 = vadd.f32 %v15382_v45, %v15381_v48 }
 0x47c   : > { %v9810_v41 = vmax.f32 %v9798_v26, 0.0  ;;  %v9759_v21 = vadd.f32 %v10619_v60, %v9678_v5  ;;  %v15385_v5 = vld [vmem:[#allocation16_spill] sm:$0xff]  ;;  %v9694_v60 = vadd.f32 %v10579_v20, %v9613_v22  ;;  %v10587_v24 = vpop.f32.mrf.mxu0 }
 0x47d   : > { %v10621_v56 = vpop.f32.mrf.mxu1  ;;  %v10481_v47 = vadd.f32 %v15385_v5, %v15384_v31  ;;  %v10588_v49 = vadd.f32 %v10587_v24, %v10586_v4 }
 0x47e   : > { %9822 = vst [vmem:[%s14882_s11 + $0x18] sm:$0xff] %v9810_v41  ;;  %v9799_v14 = vadd.f32 %v14871_v28, %v9759_v21  ;;  %v10622_v52 = vadd.f32 %v10621_v56, %v10620_v35  ;;  %v9616_v41 = vadd.f32 %v10530_v42, %v9535_v25  ;;  %v15386_v21 = vld [vmem:[#allocation46_spill] sm:$0xff] }
 0x47f   : > { %v10623_v38 = vpop.f32.mrf.mxu1  ;;  %v10533_v13 = vadd.f32 %v15387_v43, %v15386_v21 }
 0x480   : > { %v9811_v39 = vmax.f32 %v9799_v14, 0.0  ;;  %v9762_v62 = vadd.f32 %v10622_v52, %v9681_v55  ;;  %v9540_v14 = vadd.f32 %v10481_v47, %v15388_v29  ;;  %v15389_v52 = vld [vmem:[#allocation17_spill] sm:$0xff]  ;;  %v9697_v53 = vadd.f32 %v10582_v0, %v9616_v41 }
 0x481   : > { %v10624_v8 = vpop.f32.mrf.mxu1 }
 0x482   : > { %9823 = vst [vmem:[%s14882_s11 + $0x20] sm:$0xff] %v9811_v39  ;;  %v9800_v54 = vadd.f32 %v14871_v28, %v9762_v62  ;;  %v10625_v34 = vadd.f32 %v10624_v8, %v10623_v38  ;;  %v15390_v38 = vld [vmem:[#allocation39_spill] sm:$0xff]  ;;  %v9621_v12 = vadd.f32 %v10533_v13, %v9540_v14  ;;  %v15392_v8 = vld [vmem:[#allocation36_spill] sm:$0xff] }
 0x483   : > { %v10626_v27 = vpop.f32.mrf.mxu1  ;;  %v10484_v17 = vadd.f32 %v15390_v38, %v15389_v52 }
 0x484   : > { %v9812_v15 = vmax.f32 %v9800_v54, 0.0  ;;  %v9767_v16 = vadd.f32 %v10625_v34, %v9686_v59  ;;  %v10536_v59 = vadd.f32 %v15392_v8, %v15391_v58  ;;  %v15393_v34 = vld [vmem:[#allocation33_spill] sm:$0xff]  ;;  %v9702_v2 = vadd.f32 %v10585_v40, %v9621_v12 }
 0x485   : > { %v10627_v11 = vpop.f32.mrf.mxu1 }
 0x486   : > { %9824 = vst [vmem:[%s14882_s11 + $0x28] sm:$0xff] %v9812_v15  ;;  %v9801_v3 = vadd.f32 %v14871_v28, %v9767_v16  ;;  %v10628_v7 = vadd.f32 %v10627_v11, %v10626_v27  ;;  %v9543_v27 = vadd.f32 %v10484_v17, %v15393_v34 }
 0x487   : > { %v10629_v37 = vpop.f32.mrf.mxu1 }
 0x488   : > { %v9813_v46 = vmax.f32 %v9801_v3, 0.0  ;;  %v9770_v32 = vadd.f32 %v10628_v7, %v9689_v61  ;;  %v9624_v16 = vadd.f32 %v10536_v59, %v9543_v27 }
 0x489   : > { %v10630_v26 = vpop.f32.mrf.mxu1 }
 0x48a   : > { %9825 = vst [vmem:[%s14882_s11 + $0x30] sm:$0xff] %v9813_v46  ;;  %v9802_v51 = vadd.f32 %v14871_v28, %v9770_v32  ;;  %v10631_v35 = vadd.f32 %v10630_v26, %v10629_v37  ;;  %v9705_v9 = vadd.f32 %v10588_v49, %v9624_v16 }
 0x48b   : > { %v10632_v18 = vpop.f32.mrf.mxu1 }
 0x48c   : > { %v9814_v56 = vmax.f32 %v9802_v51, 0.0  ;;  %v9775_v55 = vadd.f32 %v10631_v35, %v9694_v60 }
 0x48d   : > { %v10633_v57 = vpop.f32.mrf.mxu1 }
 0x48e   : > { %9826 = vst [vmem:[%s14882_s11 + $0x38] sm:$0xff] %v9814_v56  ;;  %v9803_v39 = vadd.f32 %v14871_v28, %v9775_v55  ;;  %v10634_v62 = vadd.f32 %v10633_v57, %v10632_v18 }
 0x48f   : > { %v10635_v30 = vpop.f32.mrf.mxu1 }
 0x490   : > { %v9815_v50 = vmax.f32 %v9803_v39, 0.0  ;;  %v9778_v54 = vadd.f32 %v10634_v62, %v9697_v53 }
 0x491   : > { %v10636_v10 = vpop.f32.mrf.mxu1 }
 0x492   : > { %9827 = vst [vmem:[%s14882_s11 + $0x40] sm:$0xff] %v9815_v50  ;;  %v9804_v19 = vadd.f32 %v14871_v28, %v9778_v54  ;;  %v10637_v36 = vadd.f32 %v10636_v10, %v10635_v30 }
 0x493   : > { %v10638_v15 = vpop.f32.mrf.mxu1 }
 0x494   : > { %v9816_v63 = vmax.f32 %v9804_v19, 0.0  ;;  %v9783_v33 = vadd.f32 %v10637_v36, %v9702_v2 }
 0x495   : > { %v10639_v44 = vpop.f32.mrf.mxu1 }
 0x496   : > { %9828 = vst [vmem:[%s14882_s11 + $0x48] sm:$0xff] %v9816_v63  ;;  %v9805_v6 = vadd.f32 %v14871_v28, %v9783_v33  ;;  %v10640_v11 = vadd.f32 %v10639_v44, %v10638_v15 }
 0x498   : > { %v9817_v61 = vmax.f32 %v9805_v6, 0.0  ;;  %v9786_v20 = vadd.f32 %v10640_v11, %v9705_v9 }
 0x49a   : > { %9829 = vst [vmem:[%s14882_s11 + $0x50] sm:$0xff] %v9817_v61  ;;  %v9806_v3 = vadd.f32 %v14871_v28, %v9786_v20 }
 0x49c   : > { %v9818_v7 = vmax.f32 %v9806_v3, 0.0 }
 0x49e   : > { %9830 = vst [vmem:[%s14882_s11 + $0x58] sm:$0xff] %v9818_v7 }
 0x49f   : > { %11184 = shalt.err (!%p11181_p3)
}
 0x4a0   : > { %s11185_s12 = scalar_lea.hbm %s14959_s23, 1536  ;;  %s11189_s14 = scalar_lea.hbm %s15012_s7, 3072 }
 0x4a1   : > { %p11186_p2 = scmp.ne.s32.totalorder %s14959_s23, %s11185_s12  ;;  %p11190_p5 = scmp.lt.s32.totalorder %s14959_s23, %s15012_s7 }
 0x4a2   : > { %p11191_p4 = scmp.lt.s32.totalorder %s11189_s14, %s11185_s12 }
 0x4a3   : > { %p11187_p9 = pnand %p11186_p2, %p15394_p12 }
 0x4a4   : > { %p11192_p6 = por %p11191_p4, %p11190_p5 }
 0x4a5   : > { %p11188_p11 = pneg %p11187_p9 }
 0x4a7   : > { %p11193_p8 = pnand %p11192_p6, %p11188_p11 }
 0x4a9   : > { %11196 = shalt.err (!%p11193_p8)
}
 0x4aa   : > { %s11258_s22 = smov 128   ;;  %s11259_s1 = smov 8  }
 0x4ab   : > { %10657 = dma.vmem_to_hbm [thread:$0]  (%p15394_p12), %s14961_s18, 1536, %s14959_s23, %s9832_s29, %s11258_s22, %s11258_s22, %s11259_s1  }
 0x4ac PF: > { %s9861_s28 = sand.u32 1, %s11231_s24   ;;  %p15395_p7 = scmp.ne.s32.totalorder %s15107_s8, 0 }
 0x4ad   : > { %p15396_p10 = scmp.ge.s32.totalorder %s11243_s27, 2  ;;  %s9862_s30 = scalar_lea.sflag [#allocation4], %s9861_s28 }
 0x4af   : > { %p10674_p13 = pnand %p15396_p10, %p15395_p7 }
 0x4b1   : > { %p10675_p0 = pneg %p10674_p13 }
 0x4b3   : > { %11226 = dma.done.wait (%p10675_p0), %s9862_s30, 1536  }
 0x4b4   : > { %11228 = vsyncadd (%p10675_p0), %s9862_s30, 4294965760  ;;  %p22_p1 = scmp.ge.s32.totalorder %s11380_s17, 4   ;;  %s15397_s24 = smov %s11235_s25 }
 0x4b5   : > { %s15398_s25 = smov %s11239_s26  ;;  %s15399_s26 = smov %s11390_s20 }
 0x4b6   : > { %s15400_s27 = smov %s11380_s17  ;;  %24 = sbr.rel (!%p22_p1) target bundleno = 9 (0x9), region = 105 }
 0x4bb   :  { %9867 = vsyncpa [#allocation3], 1 }
 0x4bc   :  { %9869 = vsyncpa [#allocation3 + $0x1], 1 }
 0x4bd   :  { %9870 = vsyncpa [#allocation6], 1 }
 0x4be   :  { %9871 = vsyncpa [#allocation9], 1 }
 0x4bf   :  { %9872 = vsyncpa [#allocation4], 1 }
 0x4c0   :  { %9874 = vsyncpa [#allocation4 + $0x1], 1 }

</bundles_post_ra>
